<compile_context>
chip_gen: v7x
topology: tpu7x:2x2x1
jax: 0.10.0
libtpu: 0.0.40
codegen_flags: <defaults>
</compile_context>

<pallas_src>
import jax
import jax.numpy as jnp
from jax import lax
from jax.experimental import pallas as pl
from jax.experimental.pallas import tpu as pltpu

# Problem size consistent with the module (input_channels=4, small 3-D volume).
N, C, D, H, W = 2, 4, 8, 8, 8
CP = 8                                   # channels padded to a full sublane tile
Q = (D + 2) * (H + 2) * (W + 2)          # 1000 flattened zero-padded positions
M0 = (H + 2) * (W + 2) + (W + 2) + 1     # 111 = max |tap offset| -> slab margin
QP = Q + 2 * M0                          # 1222 columns in the margined slab
EPS = 1e-5                               # nn.BatchNorm3d default eps


# ------------------------------ Pallas kernel --------------------------------

def _resblock_kernel(xf_ref, w1_ref, w2_ref, w3_ref, b_ref, sp_ref, mask_ref,
                     o_ref, hbuf_ref):
    """Fused conv-bn-relu x2, conv-bn, + relu(bn(x)) skip for ONE batch element.

    xf_ref   : (CP, QP)      zero-margined, zero-halo flattened padded input
    w{1,2,3} : (27, CP, CP)  BN-scale-folded weights, [tap, c_out, c_in]
    b_ref    : (3, CP, 1)    folded conv-bias + BN bias per stage
    sp_ref   : (2, CP, 1)    skip-path BN scale / bias
    mask_ref : (1, Q)        1.0 at interior flat positions, 0.0 at the halo
    o_ref    : (CP, Q)       lane-dense output slab
    hbuf_ref : (CP, QP)      VMEM scratch holding the padded intermediate act
    """

    def conv27(src_ref, w_ref):
        # 3x3x3 conv = 27 static lane-shifted slices of the padded slab, each
        # contracted with an (CP, CP) weight on the MXU, accumulated in f32.
        # (At CP=8 the MXU is barely used; a VPU broadcast-MAC variant would
        #  also work, but the dot form is the simplest correct lowering.)
        acc = jnp.zeros((CP, Q), jnp.float32)
        t = 0
        for kd in range(3):
            for kh in range(3):
                for kw in range(3):
                    off = ((kd - 1) * (H + 2) * (W + 2)
                           + (kh - 1) * (W + 2) + (kw - 1))
                    tap = src_ref[:, M0 + off:M0 + off + Q]          # (CP, Q)
                    acc = acc + jnp.dot(w_ref[t], tap,
                                        preferred_element_type=jnp.float32)
                    t += 1
        return acc

    mask = mask_ref[...]                                             # (1, Q)
    hbuf_ref[...] = jnp.zeros_like(hbuf_ref)     # margins + spatial halo stay 0

    # stage 1: conv1 + bn1 + relu   (activation kept in VMEM scratch)
    a = jnp.maximum(conv27(xf_ref, w1_ref) + b_ref[0], 0.0)
    hbuf_ref[:, M0:M0 + Q] = a * mask
    # stage 2: conv2 + bn2 + relu
    a = jnp.maximum(conv27(hbuf_ref, w2_ref) + b_ref[1], 0.0)
    hbuf_ref[:, M0:M0 + Q] = a * mask
    # stage 3: conv3 + bn3 (no relu)  +  skip = relu(bn0(x))
    y = conv27(hbuf_ref, w3_ref) + b_ref[2]
    skip = jnp.maximum(xf_ref[:, M0:M0 + Q] * sp_ref[0] + sp_ref[1], 0.0)
    o_ref[...] = y + skip


def _fused_call(xf, w1, w2, w3, b, sp, mask):
    return pl.pallas_call(
        _resblock_kernel,
        out_shape=jax.ShapeDtypeStruct((N, CP, Q), jnp.float32),
        grid=(N,),
        in_specs=[
            pl.BlockSpec((None, CP, QP), lambda n: (n, 0, 0)),   # x slab
            pl.BlockSpec((27, CP, CP), lambda n: (0, 0, 0)),     # w1 (folded)
            pl.BlockSpec((27, CP, CP), lambda n: (0, 0, 0)),     # w2 (folded)
            pl.BlockSpec((27, CP, CP), lambda n: (0, 0, 0)),     # w3 (folded)
            pl.BlockSpec((3, CP, 1), lambda n: (0, 0, 0)),       # biases
            pl.BlockSpec((2, CP, 1), lambda n: (0, 0, 0)),       # skip scale/bias
            pl.BlockSpec((1, Q), lambda n: (0, 0)),              # interior mask
        ],
        out_specs=pl.BlockSpec((None, CP, Q), lambda n: (n, 0, 0)),
        scratch_shapes=[pltpu.VMEM((CP, QP), jnp.float32)],
        compiler_params=pltpu.CompilerParams(
            dimension_semantics=("parallel",)),
    )(xf, w1, w2, w3, b, sp, mask)


# ------------------------------ JAX glue --------------------------------------

def _fold_conv_bn(w, cb, gamma, beta, mean, var):
    """Fold eval-mode BN into the conv weights (scale) and one bias vector."""
    s = gamma / jnp.sqrt(var + EPS)                              # (C,)
    bias = (cb - mean) * s + beta                                # (C,)
    wt = jnp.transpose(w, (2, 3, 4, 0, 1)).reshape(27, C, C)     # [t, co, ci]
    wt = wt * s[None, :, None]                                   # scale per c_out
    wp = jnp.zeros((27, CP, CP), jnp.float32).at[:, :C, :C].set(wt)
    bp = jnp.zeros((CP,), jnp.float32).at[:C].set(bias)
    return wp, bp


def _interior_mask():
    m = jnp.zeros((D + 2, H + 2, W + 2), jnp.float32)
    m = m.at[1:1 + D, 1:1 + H, 1:1 + W].set(1.0)
    return m.reshape(1, Q)


@jax.jit
def residual_block(x_ncdhw, p):
    """Pallas forward.  x_ncdhw: (N, C, D, H, W) float32 (PyTorch layout)."""
    w1, b1 = _fold_conv_bn(p["w1"], p["cb1"], p["g1"], p["be1"], p["m1"], p["v1"])
    w2, b2 = _fold_conv_bn(p["w2"], p["cb2"], p["g2"], p["be2"], p["m2"], p["v2"])
    w3, b3 = _fold_conv_bn(p["w3"], p["cb3"], p["g3"], p["be3"], p["m3"], p["v3"])
    b = jnp.stack([b1, b2, b3]).reshape(3, CP, 1)

    s0 = p["g0"] / jnp.sqrt(p["v0"] + EPS)
    b0 = p["be0"] - p["m0"] * s0
    sp = jnp.zeros((2, CP, 1), jnp.float32)
    sp = sp.at[0, :C, 0].set(s0).at[1, :C, 0].set(b0)

    # Zero-pad spatially (the conv "SAME" halo), pad channels 4 -> 8, flatten
    # padded positions onto lanes, then add a +-M0 zero margin so every 3x3x3
    # tap inside the kernel is a static lane-offset slice.  (~40 KB total.)
    xp = jnp.pad(x_ncdhw, ((0, 0), (0, CP - C), (1, 1), (1, 1), (1, 1)))
    xf = jnp.pad(xp.reshape(N, CP, Q), ((0, 0), (0, 0), (M0, M0)))

    out = _fused_call(xf, w1, w2, w3, b, sp, _interior_mask())
    out = out[:, :C, :].reshape(N, C, D + 2, H + 2, W + 2)
    return out[:, :, 1:1 + D, 1:1 + H, 1:1 + W]


# ------------------------------ pure-JAX reference ----------------------------

def ref_forward(x_ndhwc, p):
    def bn(y, g, b, m, v):
        return (y - m) / jnp.sqrt(v + EPS) * g + b

    def conv(y, w, cb):
        wd = jnp.transpose(w, (2, 3, 4, 1, 0))  # DHWIO
        o = lax.conv_general_dilated(y, wd, (1, 1, 1), "SAME",
                                     dimension_numbers=("NDHWC", "DHWIO", "NDHWC"))
        return o + cb

    h = jax.nn.relu(bn(conv(x_ndhwc, p["w1"], p["cb1"]), p["g1"], p["be1"], p["m1"], p["v1"]))
    h = jax.nn.relu(bn(conv(h, p["w2"], p["cb2"]), p["g2"], p["be2"], p["m2"], p["v2"]))
    h = bn(conv(h, p["w3"], p["cb3"]), p["g3"], p["be3"], p["m3"], p["v3"])
    skip = jax.nn.relu(bn(x_ndhwc, p["g0"], p["be0"], p["m0"], p["v0"]))
    return h + skip


# ------------------------------ main ------------------------------------------

def make_params(key):
    p = {}
    ks = iter(jax.random.split(key, 32))
    for i in range(4):                     # bn0 (standalone skip) + bn1..bn3
        p[f"g{i}"] = jax.random.uniform(next(ks), (C,), minval=0.5, maxval=1.5)
        p[f"be{i}"] = 0.1 * jax.random.normal(next(ks), (C,))
        p[f"m{i}"] = 0.1 * jax.random.normal(next(ks), (C,))
        p[f"v{i}"] = jax.random.uniform(next(ks), (C,), minval=0.5, maxval=1.5)
    for i in range(1, 4):                  # conv1..conv3
        p[f"w{i}"] = 0.1 * jax.random.normal(next(ks), (C, C, 3, 3, 3))
        p[f"cb{i}"] = 0.1 * jax.random.normal(next(ks), (C,))
    return jax.tree.map(lambda a: a.astype(jnp.float32), p)


if __name__ == "__main__":
    key = jax.random.PRNGKey(0)
    kx, kp = jax.random.split(key)
    params = make_params(kp)

    # PyTorch-style NCDHW input.
    x = jax.random.normal(kx, (N, C, D, H, W), dtype=jnp.float32)

    out = residual_block(x, params)
    out = jax.block_until_ready(out)

    ref = jnp.transpose(
        ref_forward(jnp.transpose(x, (0, 2, 3, 4, 1)), params), (0, 4, 1, 2, 3))

    assert out.shape == (N, C, D, H, W)
    err = float(jnp.max(jnp.abs(out - ref)))
    assert jnp.allclose(out, ref, rtol=2e-3, atol=2e-3), err

    print("KERNEL_OK")
</pallas_src>

<mosaic_0001>
module attributes {stable_mosaic.version = 11 : i64} {
  func.func @_resblock_kernel(%arg0: i32, %arg1: memref<1x8x1222xf32, #tpu.memory_space<vmem>>, %arg2: memref<27x8x8xf32, #tpu.memory_space<vmem>>, %arg3: memref<27x8x8xf32, #tpu.memory_space<vmem>>, %arg4: memref<27x8x8xf32, #tpu.memory_space<vmem>>, %arg5: memref<3x8x1xf32, #tpu.memory_space<vmem>>, %arg6: memref<2x8x1xf32, #tpu.memory_space<vmem>>, %arg7: memref<1x1000xf32, #tpu.memory_space<vmem>>, %arg8: memref<1x8x1000xf32, #tpu.memory_space<vmem>>, %arg9: memref<8x1222xf32, #tpu.memory_space<vmem>>) attributes {dimension_semantics = [#tpu.dimension_semantics<parallel>], iteration_bounds = array<i64: 2>, scalar_prefetch = 0 : i64, scratch_operands = 1 : i64, tpu.core_type = #tpu.core_type<tc>, window_params = [{transform_indices = @transform_0, window_bounds = array<i64: 1, 8, 1222>}, {pipeline_mode = #tpu.pipeline_mode<synchronous>, transform_indices = @transform_1, window_bounds = array<i64: 27, 8, 8>}, {pipeline_mode = #tpu.pipeline_mode<synchronous>, transform_indices = @transform_2, window_bounds = array<i64: 27, 8, 8>}, {pipeline_mode = #tpu.pipeline_mode<synchronous>, transform_indices = @transform_3, window_bounds = array<i64: 27, 8, 8>}, {pipeline_mode = #tpu.pipeline_mode<synchronous>, transform_indices = @transform_4, window_bounds = array<i64: 3, 8, 1>}, {pipeline_mode = #tpu.pipeline_mode<synchronous>, transform_indices = @transform_5, window_bounds = array<i64: 2, 8, 1>}, {pipeline_mode = #tpu.pipeline_mode<synchronous>, transform_indices = @transform_6, window_bounds = array<i64: 1, 1000>}, {transform_indices = @transform_7, window_bounds = array<i64: 1, 8, 1000>}]} {
    %c0 = arith.constant 0 : index
    %c0_0 = arith.constant 0 : index
    %0 = vector.load %arg7[%c0, %c0_0] : memref<1x1000xf32, #tpu.memory_space<vmem>>, vector<1x1000xf32>
    %cst = arith.constant 0.000000e+00 : f32
    %1 = vector.broadcast %cst : f32 to vector<8x1222xf32>
    %c0_1 = arith.constant 0 : index
    %c0_2 = arith.constant 0 : index
    %2 = vector.load %arg9[%c0_1, %c0_2] : memref<8x1222xf32, #tpu.memory_space<vmem>>, vector<8x1222xf32>
    tpu.vector_store %arg9[%c0_1, %c0_2], %1 {strides = array<i32>} : memref<8x1222xf32, #tpu.memory_space<vmem>>, vector<8x1222xf32>,
    %cst_3 = arith.constant 0.000000e+00 : f32
    %3 = vector.broadcast %cst_3 : f32 to vector<8x1000xf32>
    %c0_4 = arith.constant 0 : index
    %c0_5 = arith.constant 0 : index
    %c0_6 = arith.constant 0 : index
    %4 = vector.load %arg1[%c0_4, %c0_5, %c0_6] : memref<1x8x1222xf32, #tpu.memory_space<vmem>>, vector<1x8x1000xf32>
    %5 = vector.shape_cast %4 : vector<1x8x1000xf32> to vector<8x1000xf32>
    %c0_7 = arith.constant 0 : index
    %c0_8 = arith.constant 0 : index
    %c0_9 = arith.constant 0 : index
    %6 = vector.load %arg2[%c0_7, %c0_8, %c0_9] : memref<27x8x8xf32, #tpu.memory_space<vmem>>, vector<1x8x8xf32>
    %7 = vector.shape_cast %6 : vector<1x8x8xf32> to vector<8x8xf32>
    %cst_10 = arith.constant dense<0.000000e+00> : vector<8x1000xf32>
    %8 = tpu.matmul %7, %5, %cst_10 {dimension_numbers = #tpu.dot_dimension_numbers<[1], [0], [0], [1], [0, 0, 1, 1], [], []>} : vector<8x8xf32>, vector<8x1000xf32>, vector<8x1000xf32> -> vector<8x1000xf32>
    %9 = arith.addf %3, %8 : vector<8x1000xf32>
    %c0_11 = arith.constant 0 : index
    %c0_12 = arith.constant 0 : index
    %c1 = arith.constant 1 : index
    %10 = vector.load %arg1[%c0_11, %c0_12, %c1] : memref<1x8x1222xf32, #tpu.memory_space<vmem>>, vector<1x8x1000xf32>
    %11 = vector.shape_cast %10 : vector<1x8x1000xf32> to vector<8x1000xf32>
    %c1_13 = arith.constant 1 : index
    %c0_14 = arith.constant 0 : index
    %c0_15 = arith.constant 0 : index
    %12 = vector.load %arg2[%c1_13, %c0_14, %c0_15] : memref<27x8x8xf32, #tpu.memory_space<vmem>>, vector<1x8x8xf32>
    %13 = vector.shape_cast %12 : vector<1x8x8xf32> to vector<8x8xf32>
    %cst_16 = arith.constant dense<0.000000e+00> : vector<8x1000xf32>
    %14 = tpu.matmul %13, %11, %cst_16 {dimension_numbers = #tpu.dot_dimension_numbers<[1], [0], [0], [1], [0, 0, 1, 1], [], []>} : vector<8x8xf32>, vector<8x1000xf32>, vector<8x1000xf32> -> vector<8x1000xf32>
    %15 = arith.addf %9, %14 : vector<8x1000xf32>
    %c0_17 = arith.constant 0 : index
    %c0_18 = arith.constant 0 : index
    %c2 = arith.constant 2 : index
    %16 = vector.load %arg1[%c0_17, %c0_18, %c2] : memref<1x8x1222xf32, #tpu.memory_space<vmem>>, vector<1x8x1000xf32>
    %17 = vector.shape_cast %16 : vector<1x8x1000xf32> to vector<8x1000xf32>
    %c2_19 = arith.constant 2 : index
    %c0_20 = arith.constant 0 : index
    %c0_21 = arith.constant 0 : index
    %18 = vector.load %arg2[%c2_19, %c0_20, %c0_21] : memref<27x8x8xf32, #tpu.memory_space<vmem>>, vector<1x8x8xf32>
    %19 = vector.shape_cast %18 : vector<1x8x8xf32> to vector<8x8xf32>
    %cst_22 = arith.constant dense<0.000000e+00> : vector<8x1000xf32>
    %20 = tpu.matmul %19, %17, %cst_22 {dimension_numbers = #tpu.dot_dimension_numbers<[1], [0], [0], [1], [0, 0, 1, 1], [], []>} : vector<8x8xf32>, vector<8x1000xf32>, vector<8x1000xf32> -> vector<8x1000xf32>
    %21 = arith.addf %15, %20 : vector<8x1000xf32>
    %c0_23 = arith.constant 0 : index
    %c0_24 = arith.constant 0 : index
    %c10 = arith.constant 10 : index
    %22 = vector.load %arg1[%c0_23, %c0_24, %c10] : memref<1x8x1222xf32, #tpu.memory_space<vmem>>, vector<1x8x1000xf32>
    %23 = vector.shape_cast %22 : vector<1x8x1000xf32> to vector<8x1000xf32>
    %c3 = arith.constant 3 : index
    %c0_25 = arith.constant 0 : index
    %c0_26 = arith.constant 0 : index
    %24 = vector.load %arg2[%c3, %c0_25, %c0_26] : memref<27x8x8xf32, #tpu.memory_space<vmem>>, vector<1x8x8xf32>
    %25 = vector.shape_cast %24 : vector<1x8x8xf32> to vector<8x8xf32>
    %cst_27 = arith.constant dense<0.000000e+00> : vector<8x1000xf32>
    %26 = tpu.matmul %25, %23, %cst_27 {dimension_numbers = #tpu.dot_dimension_numbers<[1], [0], [0], [1], [0, 0, 1, 1], [], []>} : vector<8x8xf32>, vector<8x1000xf32>, vector<8x1000xf32> -> vector<8x1000xf32>
    %27 = arith.addf %21, %26 : vector<8x1000xf32>
    %c0_28 = arith.constant 0 : index
    %c0_29 = arith.constant 0 : index
    %c11 = arith.constant 11 : index
    %28 = vector.load %arg1[%c0_28, %c0_29, %c11] : memref<1x8x1222xf32, #tpu.memory_space<vmem>>, vector<1x8x1000xf32>
    %29 = vector.shape_cast %28 : vector<1x8x1000xf32> to vector<8x1000xf32>
    %c4 = arith.constant 4 : index
    %c0_30 = arith.constant 0 : index
    %c0_31 = arith.constant 0 : index
    %30 = vector.load %arg2[%c4, %c0_30, %c0_31] : memref<27x8x8xf32, #tpu.memory_space<vmem>>, vector<1x8x8xf32>
    %31 = vector.shape_cast %30 : vector<1x8x8xf32> to vector<8x8xf32>
    %cst_32 = arith.constant dense<0.000000e+00> : vector<8x1000xf32>
    %32 = tpu.matmul %31, %29, %cst_32 {dimension_numbers = #tpu.dot_dimension_numbers<[1], [0], [0], [1], [0, 0, 1, 1], [], []>} : vector<8x8xf32>, vector<8x1000xf32>, vector<8x1000xf32> -> vector<8x1000xf32>
    %33 = arith.addf %27, %32 : vector<8x1000xf32>
    %c0_33 = arith.constant 0 : index
    %c0_34 = arith.constant 0 : index
    %c12 = arith.constant 12 : index
    %34 = vector.load %arg1[%c0_33, %c0_34, %c12] : memref<1x8x1222xf32, #tpu.memory_space<vmem>>, vector<1x8x1000xf32>
    %35 = vector.shape_cast %34 : vector<1x8x1000xf32> to vector<8x1000xf32>
    %c5 = arith.constant 5 : index
    %c0_35 = arith.constant 0 : index
    %c0_36 = arith.constant 0 : index
    %36 = vector.load %arg2[%c5, %c0_35, %c0_36] : memref<27x8x8xf32, #tpu.memory_space<vmem>>, vector<1x8x8xf32>
    %37 = vector.shape_cast %36 : vector<1x8x8xf32> to vector<8x8xf32>
    %cst_37 = arith.constant dense<0.000000e+00> : vector<8x1000xf32>
    %38 = tpu.matmul %37, %35, %cst_37 {dimension_numbers = #tpu.dot_dimension_numbers<[1], [0], [0], [1], [0, 0, 1, 1], [], []>} : vector<8x8xf32>, vector<8x1000xf32>, vector<8x1000xf32> -> vector<8x1000xf32>
    %39 = arith.addf %33, %38 : vector<8x1000xf32>
    %c0_38 = arith.constant 0 : index
    %c0_39 = arith.constant 0 : index
    %c20 = arith.constant 20 : index
    %40 = vector.load %arg1[%c0_38, %c0_39, %c20] : memref<1x8x1222xf32, #tpu.memory_space<vmem>>, vector<1x8x1000xf32>
    %41 = vector.shape_cast %40 : vector<1x8x1000xf32> to vector<8x1000xf32>
    %c6 = arith.constant 6 : index
    %c0_40 = arith.constant 0 : index
    %c0_41 = arith.constant 0 : index
    %42 = vector.load %arg2[%c6, %c0_40, %c0_41] : memref<27x8x8xf32, #tpu.memory_space<vmem>>, vector<1x8x8xf32>
    %43 = vector.shape_cast %42 : vector<1x8x8xf32> to vector<8x8xf32>
    %cst_42 = arith.constant dense<0.000000e+00> : vector<8x1000xf32>
    %44 = tpu.matmul %43, %41, %cst_42 {dimension_numbers = #tpu.dot_dimension_numbers<[1], [0], [0], [1], [0, 0, 1, 1], [], []>} : vector<8x8xf32>, vector<8x1000xf32>, vector<8x1000xf32> -> vector<8x1000xf32>
    %45 = arith.addf %39, %44 : vector<8x1000xf32>
    %c0_43 = arith.constant 0 : index
    %c0_44 = arith.constant 0 : index
    %c21 = arith.constant 21 : index
    %46 = vector.load %arg1[%c0_43, %c0_44, %c21] : memref<1x8x1222xf32, #tpu.memory_space<vmem>>, vector<1x8x1000xf32>
    %47 = vector.shape_cast %46 : vector<1x8x1000xf32> to vector<8x1000xf32>
    %c7 = arith.constant 7 : index
    %c0_45 = arith.constant 0 : index
    %c0_46 = arith.constant 0 : index
    %48 = vector.load %arg2[%c7, %c0_45, %c0_46] : memref<27x8x8xf32, #tpu.memory_space<vmem>>, vector<1x8x8xf32>
    %49 = vector.shape_cast %48 : vector<1x8x8xf32> to vector<8x8xf32>
    %cst_47 = arith.constant dense<0.000000e+00> : vector<8x1000xf32>
    %50 = tpu.matmul %49, %47, %cst_47 {dimension_numbers = #tpu.dot_dimension_numbers<[1], [0], [0], [1], [0, 0, 1, 1], [], []>} : vector<8x8xf32>, vector<8x1000xf32>, vector<8x1000xf32> -> vector<8x1000xf32>
    %51 = arith.addf %45, %50 : vector<8x1000xf32>
    %c0_48 = arith.constant 0 : index
    %c0_49 = arith.constant 0 : index
    %c22 = arith.constant 22 : index
    %52 = vector.load %arg1[%c0_48, %c0_49, %c22] : memref<1x8x1222xf32, #tpu.memory_space<vmem>>, vector<1x8x1000xf32>
    %53 = vector.shape_cast %52 : vector<1x8x1000xf32> to vector<8x1000xf32>
    %c8 = arith.constant 8 : index
    %c0_50 = arith.constant 0 : index
    %c0_51 = arith.constant 0 : index
    %54 = vector.load %arg2[%c8, %c0_50, %c0_51] : memref<27x8x8xf32, #tpu.memory_space<vmem>>, vector<1x8x8xf32>
    %55 = vector.shape_cast %54 : vector<1x8x8xf32> to vector<8x8xf32>
    %cst_52 = arith.constant dense<0.000000e+00> : vector<8x1000xf32>
    %56 = tpu.matmul %55, %53, %cst_52 {dimension_numbers = #tpu.dot_dimension_numbers<[1], [0], [0], [1], [0, 0, 1, 1], [], []>} : vector<8x8xf32>, vector<8x1000xf32>, vector<8x1000xf32> -> vector<8x1000xf32>
    %57 = arith.addf %51, %56 : vector<8x1000xf32>
    %c0_53 = arith.constant 0 : index
    %c0_54 = arith.constant 0 : index
    %c100 = arith.constant 100 : index
    %58 = vector.load %arg1[%c0_53, %c0_54, %c100] : memref<1x8x1222xf32, #tpu.memory_space<vmem>>, vector<1x8x1000xf32>
    %59 = vector.shape_cast %58 : vector<1x8x1000xf32> to vector<8x1000xf32>
    %c9 = arith.constant 9 : index
    %c0_55 = arith.constant 0 : index
    %c0_56 = arith.constant 0 : index
    %60 = vector.load %arg2[%c9, %c0_55, %c0_56] : memref<27x8x8xf32, #tpu.memory_space<vmem>>, vector<1x8x8xf32>
    %61 = vector.shape_cast %60 : vector<1x8x8xf32> to vector<8x8xf32>
    %cst_57 = arith.constant dense<0.000000e+00> : vector<8x1000xf32>
    %62 = tpu.matmul %61, %59, %cst_57 {dimension_numbers = #tpu.dot_dimension_numbers<[1], [0], [0], [1], [0, 0, 1, 1], [], []>} : vector<8x8xf32>, vector<8x1000xf32>, vector<8x1000xf32> -> vector<8x1000xf32>
    %63 = arith.addf %57, %62 : vector<8x1000xf32>
    %c0_58 = arith.constant 0 : index
    %c0_59 = arith.constant 0 : index
    %c101 = arith.constant 101 : index
    %64 = vector.load %arg1[%c0_58, %c0_59, %c101] : memref<1x8x1222xf32, #tpu.memory_space<vmem>>, vector<1x8x1000xf32>
    %65 = vector.shape_cast %64 : vector<1x8x1000xf32> to vector<8x1000xf32>
    %c10_60 = arith.constant 10 : index
    %c0_61 = arith.constant 0 : index
    %c0_62 = arith.constant 0 : index
    %66 = vector.load %arg2[%c10_60, %c0_61, %c0_62] : memref<27x8x8xf32, #tpu.memory_space<vmem>>, vector<1x8x8xf32>
    %67 = vector.shape_cast %66 : vector<1x8x8xf32> to vector<8x8xf32>
    %cst_63 = arith.constant dense<0.000000e+00> : vector<8x1000xf32>
    %68 = tpu.matmul %67, %65, %cst_63 {dimension_numbers = #tpu.dot_dimension_numbers<[1], [0], [0], [1], [0, 0, 1, 1], [], []>} : vector<8x8xf32>, vector<8x1000xf32>, vector<8x1000xf32> -> vector<8x1000xf32>
    %69 = arith.addf %63, %68 : vector<8x1000xf32>
    %c0_64 = arith.constant 0 : index
    %c0_65 = arith.constant 0 : index
    %c102 = arith.constant 102 : index
    %70 = vector.load %arg1[%c0_64, %c0_65, %c102] : memref<1x8x1222xf32, #tpu.memory_space<vmem>>, vector<1x8x1000xf32>
    %71 = vector.shape_cast %70 : vector<1x8x1000xf32> to vector<8x1000xf32>
    %c11_66 = arith.constant 11 : index
    %c0_67 = arith.constant 0 : index
    %c0_68 = arith.constant 0 : index
    %72 = vector.load %arg2[%c11_66, %c0_67, %c0_68] : memref<27x8x8xf32, #tpu.memory_space<vmem>>, vector<1x8x8xf32>
    %73 = vector.shape_cast %72 : vector<1x8x8xf32> to vector<8x8xf32>
    %cst_69 = arith.constant dense<0.000000e+00> : vector<8x1000xf32>
    %74 = tpu.matmul %73, %71, %cst_69 {dimension_numbers = #tpu.dot_dimension_numbers<[1], [0], [0], [1], [0, 0, 1, 1], [], []>} : vector<8x8xf32>, vector<8x1000xf32>, vector<8x1000xf32> -> vector<8x1000xf32>
    %75 = arith.addf %69, %74 : vector<8x1000xf32>
    %c0_70 = arith.constant 0 : index
    %c0_71 = arith.constant 0 : index
    %c110 = arith.constant 110 : index
    %76 = vector.load %arg1[%c0_70, %c0_71, %c110] : memref<1x8x1222xf32, #tpu.memory_space<vmem>>, vector<1x8x1000xf32>
    %77 = vector.shape_cast %76 : vector<1x8x1000xf32> to vector<8x1000xf32>
    %c12_72 = arith.constant 12 : index
    %c0_73 = arith.constant 0 : index
    %c0_74 = arith.constant 0 : index
    %78 = vector.load %arg2[%c12_72, %c0_73, %c0_74] : memref<27x8x8xf32, #tpu.memory_space<vmem>>, vector<1x8x8xf32>
    %79 = vector.shape_cast %78 : vector<1x8x8xf32> to vector<8x8xf32>
    %cst_75 = arith.constant dense<0.000000e+00> : vector<8x1000xf32>
    %80 = tpu.matmul %79, %77, %cst_75 {dimension_numbers = #tpu.dot_dimension_numbers<[1], [0], [0], [1], [0, 0, 1, 1], [], []>} : vector<8x8xf32>, vector<8x1000xf32>, vector<8x1000xf32> -> vector<8x1000xf32>
    %81 = arith.addf %75, %80 : vector<8x1000xf32>
    %c0_76 = arith.constant 0 : index
    %c0_77 = arith.constant 0 : index
    %c111 = arith.constant 111 : index
    %82 = vector.load %arg1[%c0_76, %c0_77, %c111] : memref<1x8x1222xf32, #tpu.memory_space<vmem>>, vector<1x8x1000xf32>
    %83 = vector.shape_cast %82 : vector<1x8x1000xf32> to vector<8x1000xf32>
    %c13 = arith.constant 13 : index
    %c0_78 = arith.constant 0 : index
    %c0_79 = arith.constant 0 : index
    %84 = vector.load %arg2[%c13, %c0_78, %c0_79] : memref<27x8x8xf32, #tpu.memory_space<vmem>>, vector<1x8x8xf32>
    %85 = vector.shape_cast %84 : vector<1x8x8xf32> to vector<8x8xf32>
    %cst_80 = arith.constant dense<0.000000e+00> : vector<8x1000xf32>
    %86 = tpu.matmul %85, %83, %cst_80 {dimension_numbers = #tpu.dot_dimension_numbers<[1], [0], [0], [1], [0, 0, 1, 1], [], []>} : vector<8x8xf32>, vector<8x1000xf32>, vector<8x1000xf32> -> vector<8x1000xf32>
    %87 = arith.addf %81, %86 : vector<8x1000xf32>
    %c0_81 = arith.constant 0 : index
    %c0_82 = arith.constant 0 : index
    %c112 = arith.constant 112 : index
    %88 = vector.load %arg1[%c0_81, %c0_82, %c112] : memref<1x8x1222xf32, #tpu.memory_space<vmem>>, vector<1x8x1000xf32>
    %89 = vector.shape_cast %88 : vector<1x8x1000xf32> to vector<8x1000xf32>
    %c14 = arith.constant 14 : index
    %c0_83 = arith.constant 0 : index
    %c0_84 = arith.constant 0 : index
    %90 = vector.load %arg2[%c14, %c0_83, %c0_84] : memref<27x8x8xf32, #tpu.memory_space<vmem>>, vector<1x8x8xf32>
    %91 = vector.shape_cast %90 : vector<1x8x8xf32> to vector<8x8xf32>
    %cst_85 = arith.constant dense<0.000000e+00> : vector<8x1000xf32>
    %92 = tpu.matmul %91, %89, %cst_85 {dimension_numbers = #tpu.dot_dimension_numbers<[1], [0], [0], [1], [0, 0, 1, 1], [], []>} : vector<8x8xf32>, vector<8x1000xf32>, vector<8x1000xf32> -> vector<8x1000xf32>
    %93 = arith.addf %87, %92 : vector<8x1000xf32>
    %c0_86 = arith.constant 0 : index
    %c0_87 = arith.constant 0 : index
    %c120 = arith.constant 120 : index
    %94 = vector.load %arg1[%c0_86, %c0_87, %c120] : memref<1x8x1222xf32, #tpu.memory_space<vmem>>, vector<1x8x1000xf32>
    %95 = vector.shape_cast %94 : vector<1x8x1000xf32> to vector<8x1000xf32>
    %c15 = arith.constant 15 : index
    %c0_88 = arith.constant 0 : index
    %c0_89 = arith.constant 0 : index
    %96 = vector.load %arg2[%c15, %c0_88, %c0_89] : memref<27x8x8xf32, #tpu.memory_space<vmem>>, vector<1x8x8xf32>
    %97 = vector.shape_cast %96 : vector<1x8x8xf32> to vector<8x8xf32>
    %cst_90 = arith.constant dense<0.000000e+00> : vector<8x1000xf32>
    %98 = tpu.matmul %97, %95, %cst_90 {dimension_numbers = #tpu.dot_dimension_numbers<[1], [0], [0], [1], [0, 0, 1, 1], [], []>} : vector<8x8xf32>, vector<8x1000xf32>, vector<8x1000xf32> -> vector<8x1000xf32>
    %99 = arith.addf %93, %98 : vector<8x1000xf32>
    %c0_91 = arith.constant 0 : index
    %c0_92 = arith.constant 0 : index
    %c121 = arith.constant 121 : index
    %100 = vector.load %arg1[%c0_91, %c0_92, %c121] : memref<1x8x1222xf32, #tpu.memory_space<vmem>>, vector<1x8x1000xf32>
    %101 = vector.shape_cast %100 : vector<1x8x1000xf32> to vector<8x1000xf32>
    %c16 = arith.constant 16 : index
    %c0_93 = arith.constant 0 : index
    %c0_94 = arith.constant 0 : index
    %102 = vector.load %arg2[%c16, %c0_93, %c0_94] : memref<27x8x8xf32, #tpu.memory_space<vmem>>, vector<1x8x8xf32>
    %103 = vector.shape_cast %102 : vector<1x8x8xf32> to vector<8x8xf32>
    %cst_95 = arith.constant dense<0.000000e+00> : vector<8x1000xf32>
    %104 = tpu.matmul %103, %101, %cst_95 {dimension_numbers = #tpu.dot_dimension_numbers<[1], [0], [0], [1], [0, 0, 1, 1], [], []>} : vector<8x8xf32>, vector<8x1000xf32>, vector<8x1000xf32> -> vector<8x1000xf32>
    %105 = arith.addf %99, %104 : vector<8x1000xf32>
    %c0_96 = arith.constant 0 : index
    %c0_97 = arith.constant 0 : index
    %c122 = arith.constant 122 : index
    %106 = vector.load %arg1[%c0_96, %c0_97, %c122] : memref<1x8x1222xf32, #tpu.memory_space<vmem>>, vector<1x8x1000xf32>
    %107 = vector.shape_cast %106 : vector<1x8x1000xf32> to vector<8x1000xf32>
    %c17 = arith.constant 17 : index
    %c0_98 = arith.constant 0 : index
    %c0_99 = arith.constant 0 : index
    %108 = vector.load %arg2[%c17, %c0_98, %c0_99] : memref<27x8x8xf32, #tpu.memory_space<vmem>>, vector<1x8x8xf32>
    %109 = vector.shape_cast %108 : vector<1x8x8xf32> to vector<8x8xf32>
    %cst_100 = arith.constant dense<0.000000e+00> : vector<8x1000xf32>
    %110 = tpu.matmul %109, %107, %cst_100 {dimension_numbers = #tpu.dot_dimension_numbers<[1], [0], [0], [1], [0, 0, 1, 1], [], []>} : vector<8x8xf32>, vector<8x1000xf32>, vector<8x1000xf32> -> vector<8x1000xf32>
    %111 = arith.addf %105, %110 : vector<8x1000xf32>
    %c0_101 = arith.constant 0 : index
    %c0_102 = arith.constant 0 : index
    %c200 = arith.constant 200 : index
    %112 = vector.load %arg1[%c0_101, %c0_102, %c200] : memref<1x8x1222xf32, #tpu.memory_space<vmem>>, vector<1x8x1000xf32>
    %113 = vector.shape_cast %112 : vector<1x8x1000xf32> to vector<8x1000xf32>
    %c18 = arith.constant 18 : index
    %c0_103 = arith.constant 0 : index
    %c0_104 = arith.constant 0 : index
    %114 = vector.load %arg2[%c18, %c0_103, %c0_104] : memref<27x8x8xf32, #tpu.memory_space<vmem>>, vector<1x8x8xf32>
    %115 = vector.shape_cast %114 : vector<1x8x8xf32> to vector<8x8xf32>
    %cst_105 = arith.constant dense<0.000000e+00> : vector<8x1000xf32>
    %116 = tpu.matmul %115, %113, %cst_105 {dimension_numbers = #tpu.dot_dimension_numbers<[1], [0], [0], [1], [0, 0, 1, 1], [], []>} : vector<8x8xf32>, vector<8x1000xf32>, vector<8x1000xf32> -> vector<8x1000xf32>
    %117 = arith.addf %111, %116 : vector<8x1000xf32>
    %c0_106 = arith.constant 0 : index
    %c0_107 = arith.constant 0 : index
    %c201 = arith.constant 201 : index
    %118 = vector.load %arg1[%c0_106, %c0_107, %c201] : memref<1x8x1222xf32, #tpu.memory_space<vmem>>, vector<1x8x1000xf32>
    %119 = vector.shape_cast %118 : vector<1x8x1000xf32> to vector<8x1000xf32>
    %c19 = arith.constant 19 : index
    %c0_108 = arith.constant 0 : index
    %c0_109 = arith.constant 0 : index
    %120 = vector.load %arg2[%c19, %c0_108, %c0_109] : memref<27x8x8xf32, #tpu.memory_space<vmem>>, vector<1x8x8xf32>
    %121 = vector.shape_cast %120 : vector<1x8x8xf32> to vector<8x8xf32>
    %cst_110 = arith.constant dense<0.000000e+00> : vector<8x1000xf32>
    %122 = tpu.matmul %121, %119, %cst_110 {dimension_numbers = #tpu.dot_dimension_numbers<[1], [0], [0], [1], [0, 0, 1, 1], [], []>} : vector<8x8xf32>, vector<8x1000xf32>, vector<8x1000xf32> -> vector<8x1000xf32>
    %123 = arith.addf %117, %122 : vector<8x1000xf32>
    %c0_111 = arith.constant 0 : index
    %c0_112 = arith.constant 0 : index
    %c202 = arith.constant 202 : index
    %124 = vector.load %arg1[%c0_111, %c0_112, %c202] : memref<1x8x1222xf32, #tpu.memory_space<vmem>>, vector<1x8x1000xf32>
    %125 = vector.shape_cast %124 : vector<1x8x1000xf32> to vector<8x1000xf32>
    %c20_113 = arith.constant 20 : index
    %c0_114 = arith.constant 0 : index
    %c0_115 = arith.constant 0 : index
    %126 = vector.load %arg2[%c20_113, %c0_114, %c0_115] : memref<27x8x8xf32, #tpu.memory_space<vmem>>, vector<1x8x8xf32>
    %127 = vector.shape_cast %126 : vector<1x8x8xf32> to vector<8x8xf32>
    %cst_116 = arith.constant dense<0.000000e+00> : vector<8x1000xf32>
    %128 = tpu.matmul %127, %125, %cst_116 {dimension_numbers = #tpu.dot_dimension_numbers<[1], [0], [0], [1], [0, 0, 1, 1], [], []>} : vector<8x8xf32>, vector<8x1000xf32>, vector<8x1000xf32> -> vector<8x1000xf32>
    %129 = arith.addf %123, %128 : vector<8x1000xf32>
    %c0_117 = arith.constant 0 : index
    %c0_118 = arith.constant 0 : index
    %c210 = arith.constant 210 : index
    %130 = vector.load %arg1[%c0_117, %c0_118, %c210] : memref<1x8x1222xf32, #tpu.memory_space<vmem>>, vector<1x8x1000xf32>
    %131 = vector.shape_cast %130 : vector<1x8x1000xf32> to vector<8x1000xf32>
    %c21_119 = arith.constant 21 : index
    %c0_120 = arith.constant 0 : index
    %c0_121 = arith.constant 0 : index
    %132 = vector.load %arg2[%c21_119, %c0_120, %c0_121] : memref<27x8x8xf32, #tpu.memory_space<vmem>>, vector<1x8x8xf32>
    %133 = vector.shape_cast %132 : vector<1x8x8xf32> to vector<8x8xf32>
    %cst_122 = arith.constant dense<0.000000e+00> : vector<8x1000xf32>
    %134 = tpu.matmul %133, %131, %cst_122 {dimension_numbers = #tpu.dot_dimension_numbers<[1], [0], [0], [1], [0, 0, 1, 1], [], []>} : vector<8x8xf32>, vector<8x1000xf32>, vector<8x1000xf32> -> vector<8x1000xf32>
    %135 = arith.addf %129, %134 : vector<8x1000xf32>
    %c0_123 = arith.constant 0 : index
    %c0_124 = arith.constant 0 : index
    %c211 = arith.constant 211 : index
    %136 = vector.load %arg1[%c0_123, %c0_124, %c211] : memref<1x8x1222xf32, #tpu.memory_space<vmem>>, vector<1x8x1000xf32>
    %137 = vector.shape_cast %136 : vector<1x8x1000xf32> to vector<8x1000xf32>
    %c22_125 = arith.constant 22 : index
    %c0_126 = arith.constant 0 : index
    %c0_127 = arith.constant 0 : index
    %138 = vector.load %arg2[%c22_125, %c0_126, %c0_127] : memref<27x8x8xf32, #tpu.memory_space<vmem>>, vector<1x8x8xf32>
    %139 = vector.shape_cast %138 : vector<1x8x8xf32> to vector<8x8xf32>
    %cst_128 = arith.constant dense<0.000000e+00> : vector<8x1000xf32>
    %140 = tpu.matmul %139, %137, %cst_128 {dimension_numbers = #tpu.dot_dimension_numbers<[1], [0], [0], [1], [0, 0, 1, 1], [], []>} : vector<8x8xf32>, vector<8x1000xf32>, vector<8x1000xf32> -> vector<8x1000xf32>
    %141 = arith.addf %135, %140 : vector<8x1000xf32>
    %c0_129 = arith.constant 0 : index
    %c0_130 = arith.constant 0 : index
    %c212 = arith.constant 212 : index
    %142 = vector.load %arg1[%c0_129, %c0_130, %c212] : memref<1x8x1222xf32, #tpu.memory_space<vmem>>, vector<1x8x1000xf32>
    %143 = vector.shape_cast %142 : vector<1x8x1000xf32> to vector<8x1000xf32>
    %c23 = arith.constant 23 : index
    %c0_131 = arith.constant 0 : index
    %c0_132 = arith.constant 0 : index
    %144 = vector.load %arg2[%c23, %c0_131, %c0_132] : memref<27x8x8xf32, #tpu.memory_space<vmem>>, vector<1x8x8xf32>
    %145 = vector.shape_cast %144 : vector<1x8x8xf32> to vector<8x8xf32>
    %cst_133 = arith.constant dense<0.000000e+00> : vector<8x1000xf32>
    %146 = tpu.matmul %145, %143, %cst_133 {dimension_numbers = #tpu.dot_dimension_numbers<[1], [0], [0], [1], [0, 0, 1, 1], [], []>} : vector<8x8xf32>, vector<8x1000xf32>, vector<8x1000xf32> -> vector<8x1000xf32>
    %147 = arith.addf %141, %146 : vector<8x1000xf32>
    %c0_134 = arith.constant 0 : index
    %c0_135 = arith.constant 0 : index
    %c220 = arith.constant 220 : index
    %148 = vector.load %arg1[%c0_134, %c0_135, %c220] : memref<1x8x1222xf32, #tpu.memory_space<vmem>>, vector<1x8x1000xf32>
    %149 = vector.shape_cast %148 : vector<1x8x1000xf32> to vector<8x1000xf32>
    %c24 = arith.constant 24 : index
    %c0_136 = arith.constant 0 : index
    %c0_137 = arith.constant 0 : index
    %150 = vector.load %arg2[%c24, %c0_136, %c0_137] : memref<27x8x8xf32, #tpu.memory_space<vmem>>, vector<1x8x8xf32>
    %151 = vector.shape_cast %150 : vector<1x8x8xf32> to vector<8x8xf32>
    %cst_138 = arith.constant dense<0.000000e+00> : vector<8x1000xf32>
    %152 = tpu.matmul %151, %149, %cst_138 {dimension_numbers = #tpu.dot_dimension_numbers<[1], [0], [0], [1], [0, 0, 1, 1], [], []>} : vector<8x8xf32>, vector<8x1000xf32>, vector<8x1000xf32> -> vector<8x1000xf32>
    %153 = arith.addf %147, %152 : vector<8x1000xf32>
    %c0_139 = arith.constant 0 : index
    %c0_140 = arith.constant 0 : index
    %c221 = arith.constant 221 : index
    %154 = vector.load %arg1[%c0_139, %c0_140, %c221] : memref<1x8x1222xf32, #tpu.memory_space<vmem>>, vector<1x8x1000xf32>
    %155 = vector.shape_cast %154 : vector<1x8x1000xf32> to vector<8x1000xf32>
    %c25 = arith.constant 25 : index
    %c0_141 = arith.constant 0 : index
    %c0_142 = arith.constant 0 : index
    %156 = vector.load %arg2[%c25, %c0_141, %c0_142] : memref<27x8x8xf32, #tpu.memory_space<vmem>>, vector<1x8x8xf32>
    %157 = vector.shape_cast %156 : vector<1x8x8xf32> to vector<8x8xf32>
    %cst_143 = arith.constant dense<0.000000e+00> : vector<8x1000xf32>
    %158 = tpu.matmul %157, %155, %cst_143 {dimension_numbers = #tpu.dot_dimension_numbers<[1], [0], [0], [1], [0, 0, 1, 1], [], []>} : vector<8x8xf32>, vector<8x1000xf32>, vector<8x1000xf32> -> vector<8x1000xf32>
    %159 = arith.addf %153, %158 : vector<8x1000xf32>
    %c0_144 = arith.constant 0 : index
    %c0_145 = arith.constant 0 : index
    %c222 = arith.constant 222 : index
    %160 = vector.load %arg1[%c0_144, %c0_145, %c222] : memref<1x8x1222xf32, #tpu.memory_space<vmem>>, vector<1x8x1000xf32>
    %161 = vector.shape_cast %160 : vector<1x8x1000xf32> to vector<8x1000xf32>
    %c26 = arith.constant 26 : index
    %c0_146 = arith.constant 0 : index
    %c0_147 = arith.constant 0 : index
    %162 = vector.load %arg2[%c26, %c0_146, %c0_147] : memref<27x8x8xf32, #tpu.memory_space<vmem>>, vector<1x8x8xf32>
    %163 = vector.shape_cast %162 : vector<1x8x8xf32> to vector<8x8xf32>
    %cst_148 = arith.constant dense<0.000000e+00> : vector<8x1000xf32>
    %164 = tpu.matmul %163, %161, %cst_148 {dimension_numbers = #tpu.dot_dimension_numbers<[1], [0], [0], [1], [0, 0, 1, 1], [], []>} : vector<8x8xf32>, vector<8x1000xf32>, vector<8x1000xf32> -> vector<8x1000xf32>
    %165 = arith.addf %159, %164 : vector<8x1000xf32>
    %c0_149 = arith.constant 0 : index
    %c0_150 = arith.constant 0 : index
    %c0_151 = arith.constant 0 : index
    %166 = vector.load %arg5[%c0_149, %c0_150, %c0_151] : memref<3x8x1xf32, #tpu.memory_space<vmem>>, vector<1x8x1xf32>
    %167 = vector.shape_cast %166 : vector<1x8x1xf32> to vector<8x1xf32>
    %168 = vector.broadcast %167 : vector<8x1xf32> to vector<8x1000xf32>
    %169 = arith.addf %165, %168 : vector<8x1000xf32>
    %cst_152 = arith.constant 0.000000e+00 : f32
    %170 = vector.broadcast %cst_152 : f32 to vector<8x1000xf32>
    %171 = arith.maximumf %169, %170 : vector<8x1000xf32>
    %172 = vector.broadcast %0 : vector<1x1000xf32> to vector<8x1000xf32>
    %173 = arith.mulf %171, %172 : vector<8x1000xf32>
    %c0_153 = arith.constant 0 : index
    %c111_154 = arith.constant 111 : index
    %174 = vector.load %arg9[%c0_153, %c111_154] : memref<8x1222xf32, #tpu.memory_space<vmem>>, vector<8x1000xf32>
    tpu.vector_store %arg9[%c0_153, %c111_154], %173 {strides = array<i32>} : memref<8x1222xf32, #tpu.memory_space<vmem>>, vector<8x1000xf32>,
    %cst_155 = arith.constant 0.000000e+00 : f32
    %175 = vector.broadcast %cst_155 : f32 to vector<8x1000xf32>
    %c0_156 = arith.constant 0 : index
    %c0_157 = arith.constant 0 : index
    %176 = vector.load %arg9[%c0_156, %c0_157] : memref<8x1222xf32, #tpu.memory_space<vmem>>, vector<8x1000xf32>
    %c0_158 = arith.constant 0 : index
    %c0_159 = arith.constant 0 : index
    %c0_160 = arith.constant 0 : index
    %177 = vector.load %arg3[%c0_158, %c0_159, %c0_160] : memref<27x8x8xf32, #tpu.memory_space<vmem>>, vector<1x8x8xf32>
    %178 = vector.shape_cast %177 : vector<1x8x8xf32> to vector<8x8xf32>
    %cst_161 = arith.constant dense<0.000000e+00> : vector<8x1000xf32>
    %179 = tpu.matmul %178, %176, %cst_161 {dimension_numbers = #tpu.dot_dimension_numbers<[1], [0], [0], [1], [0, 0, 1, 1], [], []>} : vector<8x8xf32>, vector<8x1000xf32>, vector<8x1000xf32> -> vector<8x1000xf32>
    %180 = arith.addf %175, %179 : vector<8x1000xf32>
    %c0_162 = arith.constant 0 : index
    %c1_163 = arith.constant 1 : index
    %181 = vector.load %arg9[%c0_162, %c1_163] : memref<8x1222xf32, #tpu.memory_space<vmem>>, vector<8x1000xf32>
    %c1_164 = arith.constant 1 : index
    %c0_165 = arith.constant 0 : index
    %c0_166 = arith.constant 0 : index
    %182 = vector.load %arg3[%c1_164, %c0_165, %c0_166] : memref<27x8x8xf32, #tpu.memory_space<vmem>>, vector<1x8x8xf32>
    %183 = vector.shape_cast %182 : vector<1x8x8xf32> to vector<8x8xf32>
    %cst_167 = arith.constant dense<0.000000e+00> : vector<8x1000xf32>
    %184 = tpu.matmul %183, %181, %cst_167 {dimension_numbers = #tpu.dot_dimension_numbers<[1], [0], [0], [1], [0, 0, 1, 1], [], []>} : vector<8x8xf32>, vector<8x1000xf32>, vector<8x1000xf32> -> vector<8x1000xf32>
    %185 = arith.addf %180, %184 : vector<8x1000xf32>
    %c0_168 = arith.constant 0 : index
    %c2_169 = arith.constant 2 : index
    %186 = vector.load %arg9[%c0_168, %c2_169] : memref<8x1222xf32, #tpu.memory_space<vmem>>, vector<8x1000xf32>
    %c2_170 = arith.constant 2 : index
    %c0_171 = arith.constant 0 : index
    %c0_172 = arith.constant 0 : index
    %187 = vector.load %arg3[%c2_170, %c0_171, %c0_172] : memref<27x8x8xf32, #tpu.memory_space<vmem>>, vector<1x8x8xf32>
    %188 = vector.shape_cast %187 : vector<1x8x8xf32> to vector<8x8xf32>
    %cst_173 = arith.constant dense<0.000000e+00> : vector<8x1000xf32>
    %189 = tpu.matmul %188, %186, %cst_173 {dimension_numbers = #tpu.dot_dimension_numbers<[1], [0], [0], [1], [0, 0, 1, 1], [], []>} : vector<8x8xf32>, vector<8x1000xf32>, vector<8x1000xf32> -> vector<8x1000xf32>
    %190 = arith.addf %185, %189 : vector<8x1000xf32>
    %c0_174 = arith.constant 0 : index
    %c10_175 = arith.constant 10 : index
    %191 = vector.load %arg9[%c0_174, %c10_175] : memref<8x1222xf32, #tpu.memory_space<vmem>>, vector<8x1000xf32>
    %c3_176 = arith.constant 3 : index
    %c0_177 = arith.constant 0 : index
    %c0_178 = arith.constant 0 : index
    %192 = vector.load %arg3[%c3_176, %c0_177, %c0_178] : memref<27x8x8xf32, #tpu.memory_space<vmem>>, vector<1x8x8xf32>
    %193 = vector.shape_cast %192 : vector<1x8x8xf32> to vector<8x8xf32>
    %cst_179 = arith.constant dense<0.000000e+00> : vector<8x1000xf32>
    %194 = tpu.matmul %193, %191, %cst_179 {dimension_numbers = #tpu.dot_dimension_numbers<[1], [0], [0], [1], [0, 0, 1, 1], [], []>} : vector<8x8xf32>, vector<8x1000xf32>, vector<8x1000xf32> -> vector<8x1000xf32>
    %195 = arith.addf %190, %194 : vector<8x1000xf32>
    %c0_180 = arith.constant 0 : index
    %c11_181 = arith.constant 11 : index
    %196 = vector.load %arg9[%c0_180, %c11_181] : memref<8x1222xf32, #tpu.memory_space<vmem>>, vector<8x1000xf32>
    %c4_182 = arith.constant 4 : index
    %c0_183 = arith.constant 0 : index
    %c0_184 = arith.constant 0 : index
    %197 = vector.load %arg3[%c4_182, %c0_183, %c0_184] : memref<27x8x8xf32, #tpu.memory_space<vmem>>, vector<1x8x8xf32>
    %198 = vector.shape_cast %197 : vector<1x8x8xf32> to vector<8x8xf32>
    %cst_185 = arith.constant dense<0.000000e+00> : vector<8x1000xf32>
    %199 = tpu.matmul %198, %196, %cst_185 {dimension_numbers = #tpu.dot_dimension_numbers<[1], [0], [0], [1], [0, 0, 1, 1], [], []>} : vector<8x8xf32>, vector<8x1000xf32>, vector<8x1000xf32> -> vector<8x1000xf32>
    %200 = arith.addf %195, %199 : vector<8x1000xf32>
    %c0_186 = arith.constant 0 : index
    %c12_187 = arith.constant 12 : index
    %201 = vector.load %arg9[%c0_186, %c12_187] : memref<8x1222xf32, #tpu.memory_space<vmem>>, vector<8x1000xf32>
    %c5_188 = arith.constant 5 : index
    %c0_189 = arith.constant 0 : index
    %c0_190 = arith.constant 0 : index
    %202 = vector.load %arg3[%c5_188, %c0_189, %c0_190] : memref<27x8x8xf32, #tpu.memory_space<vmem>>, vector<1x8x8xf32>
    %203 = vector.shape_cast %202 : vector<1x8x8xf32> to vector<8x8xf32>
    %cst_191 = arith.constant dense<0.000000e+00> : vector<8x1000xf32>
    %204 = tpu.matmul %203, %201, %cst_191 {dimension_numbers = #tpu.dot_dimension_numbers<[1], [0], [0], [1], [0, 0, 1, 1], [], []>} : vector<8x8xf32>, vector<8x1000xf32>, vector<8x1000xf32> -> vector<8x1000xf32>
    %205 = arith.addf %200, %204 : vector<8x1000xf32>
    %c0_192 = arith.constant 0 : index
    %c20_193 = arith.constant 20 : index
    %206 = vector.load %arg9[%c0_192, %c20_193] : memref<8x1222xf32, #tpu.memory_space<vmem>>, vector<8x1000xf32>
    %c6_194 = arith.constant 6 : index
    %c0_195 = arith.constant 0 : index
    %c0_196 = arith.constant 0 : index
    %207 = vector.load %arg3[%c6_194, %c0_195, %c0_196] : memref<27x8x8xf32, #tpu.memory_space<vmem>>, vector<1x8x8xf32>
    %208 = vector.shape_cast %207 : vector<1x8x8xf32> to vector<8x8xf32>
    %cst_197 = arith.constant dense<0.000000e+00> : vector<8x1000xf32>
    %209 = tpu.matmul %208, %206, %cst_197 {dimension_numbers = #tpu.dot_dimension_numbers<[1], [0], [0], [1], [0, 0, 1, 1], [], []>} : vector<8x8xf32>, vector<8x1000xf32>, vector<8x1000xf32> -> vector<8x1000xf32>
    %210 = arith.addf %205, %209 : vector<8x1000xf32>
    %c0_198 = arith.constant 0 : index
    %c21_199 = arith.constant 21 : index
    %211 = vector.load %arg9[%c0_198, %c21_199] : memref<8x1222xf32, #tpu.memory_space<vmem>>, vector<8x1000xf32>
    %c7_200 = arith.constant 7 : index
    %c0_201 = arith.constant 0 : index
    %c0_202 = arith.constant 0 : index
    %212 = vector.load %arg3[%c7_200, %c0_201, %c0_202] : memref<27x8x8xf32, #tpu.memory_space<vmem>>, vector<1x8x8xf32>
    %213 = vector.shape_cast %212 : vector<1x8x8xf32> to vector<8x8xf32>
    %cst_203 = arith.constant dense<0.000000e+00> : vector<8x1000xf32>
    %214 = tpu.matmul %213, %211, %cst_203 {dimension_numbers = #tpu.dot_dimension_numbers<[1], [0], [0], [1], [0, 0, 1, 1], [], []>} : vector<8x8xf32>, vector<8x1000xf32>, vector<8x1000xf32> -> vector<8x1000xf32>
    %215 = arith.addf %210, %214 : vector<8x1000xf32>
    %c0_204 = arith.constant 0 : index
    %c22_205 = arith.constant 22 : index
    %216 = vector.load %arg9[%c0_204, %c22_205] : memref<8x1222xf32, #tpu.memory_space<vmem>>, vector<8x1000xf32>
    %c8_206 = arith.constant 8 : index
    %c0_207 = arith.constant 0 : index
    %c0_208 = arith.constant 0 : index
    %217 = vector.load %arg3[%c8_206, %c0_207, %c0_208] : memref<27x8x8xf32, #tpu.memory_space<vmem>>, vector<1x8x8xf32>
    %218 = vector.shape_cast %217 : vector<1x8x8xf32> to vector<8x8xf32>
    %cst_209 = arith.constant dense<0.000000e+00> : vector<8x1000xf32>
    %219 = tpu.matmul %218, %216, %cst_209 {dimension_numbers = #tpu.dot_dimension_numbers<[1], [0], [0], [1], [0, 0, 1, 1], [], []>} : vector<8x8xf32>, vector<8x1000xf32>, vector<8x1000xf32> -> vector<8x1000xf32>
    %220 = arith.addf %215, %219 : vector<8x1000xf32>
    %c0_210 = arith.constant 0 : index
    %c100_211 = arith.constant 100 : index
    %221 = vector.load %arg9[%c0_210, %c100_211] : memref<8x1222xf32, #tpu.memory_space<vmem>>, vector<8x1000xf32>
    %c9_212 = arith.constant 9 : index
    %c0_213 = arith.constant 0 : index
    %c0_214 = arith.constant 0 : index
    %222 = vector.load %arg3[%c9_212, %c0_213, %c0_214] : memref<27x8x8xf32, #tpu.memory_space<vmem>>, vector<1x8x8xf32>
    %223 = vector.shape_cast %222 : vector<1x8x8xf32> to vector<8x8xf32>
    %cst_215 = arith.constant dense<0.000000e+00> : vector<8x1000xf32>
    %224 = tpu.matmul %223, %221, %cst_215 {dimension_numbers = #tpu.dot_dimension_numbers<[1], [0], [0], [1], [0, 0, 1, 1], [], []>} : vector<8x8xf32>, vector<8x1000xf32>, vector<8x1000xf32> -> vector<8x1000xf32>
    %225 = arith.addf %220, %224 : vector<8x1000xf32>
    %c0_216 = arith.constant 0 : index
    %c101_217 = arith.constant 101 : index
    %226 = vector.load %arg9[%c0_216, %c101_217] : memref<8x1222xf32, #tpu.memory_space<vmem>>, vector<8x1000xf32>
    %c10_218 = arith.constant 10 : index
    %c0_219 = arith.constant 0 : index
    %c0_220 = arith.constant 0 : index
    %227 = vector.load %arg3[%c10_218, %c0_219, %c0_220] : memref<27x8x8xf32, #tpu.memory_space<vmem>>, vector<1x8x8xf32>
    %228 = vector.shape_cast %227 : vector<1x8x8xf32> to vector<8x8xf32>
    %cst_221 = arith.constant dense<0.000000e+00> : vector<8x1000xf32>
    %229 = tpu.matmul %228, %226, %cst_221 {dimension_numbers = #tpu.dot_dimension_numbers<[1], [0], [0], [1], [0, 0, 1, 1], [], []>} : vector<8x8xf32>, vector<8x1000xf32>, vector<8x1000xf32> -> vector<8x1000xf32>
    %230 = arith.addf %225, %229 : vector<8x1000xf32>
    %c0_222 = arith.constant 0 : index
    %c102_223 = arith.constant 102 : index
    %231 = vector.load %arg9[%c0_222, %c102_223] : memref<8x1222xf32, #tpu.memory_space<vmem>>, vector<8x1000xf32>
    %c11_224 = arith.constant 11 : index
    %c0_225 = arith.constant 0 : index
    %c0_226 = arith.constant 0 : index
    %232 = vector.load %arg3[%c11_224, %c0_225, %c0_226] : memref<27x8x8xf32, #tpu.memory_space<vmem>>, vector<1x8x8xf32>
    %233 = vector.shape_cast %232 : vector<1x8x8xf32> to vector<8x8xf32>
    %cst_227 = arith.constant dense<0.000000e+00> : vector<8x1000xf32>
    %234 = tpu.matmul %233, %231, %cst_227 {dimension_numbers = #tpu.dot_dimension_numbers<[1], [0], [0], [1], [0, 0, 1, 1], [], []>} : vector<8x8xf32>, vector<8x1000xf32>, vector<8x1000xf32> -> vector<8x1000xf32>
    %235 = arith.addf %230, %234 : vector<8x1000xf32>
    %c0_228 = arith.constant 0 : index
    %c110_229 = arith.constant 110 : index
    %236 = vector.load %arg9[%c0_228, %c110_229] : memref<8x1222xf32, #tpu.memory_space<vmem>>, vector<8x1000xf32>
    %c12_230 = arith.constant 12 : index
    %c0_231 = arith.constant 0 : index
    %c0_232 = arith.constant 0 : index
    %237 = vector.load %arg3[%c12_230, %c0_231, %c0_232] : memref<27x8x8xf32, #tpu.memory_space<vmem>>, vector<1x8x8xf32>
    %238 = vector.shape_cast %237 : vector<1x8x8xf32> to vector<8x8xf32>
    %cst_233 = arith.constant dense<0.000000e+00> : vector<8x1000xf32>
    %239 = tpu.matmul %238, %236, %cst_233 {dimension_numbers = #tpu.dot_dimension_numbers<[1], [0], [0], [1], [0, 0, 1, 1], [], []>} : vector<8x8xf32>, vector<8x1000xf32>, vector<8x1000xf32> -> vector<8x1000xf32>
    %240 = arith.addf %235, %239 : vector<8x1000xf32>
    %c0_234 = arith.constant 0 : index
    %c111_235 = arith.constant 111 : index
    %241 = vector.load %arg9[%c0_234, %c111_235] : memref<8x1222xf32, #tpu.memory_space<vmem>>, vector<8x1000xf32>
    %c13_236 = arith.constant 13 : index
    %c0_237 = arith.constant 0 : index
    %c0_238 = arith.constant 0 : index
    %242 = vector.load %arg3[%c13_236, %c0_237, %c0_238] : memref<27x8x8xf32, #tpu.memory_space<vmem>>, vector<1x8x8xf32>
    %243 = vector.shape_cast %242 : vector<1x8x8xf32> to vector<8x8xf32>
    %cst_239 = arith.constant dense<0.000000e+00> : vector<8x1000xf32>
    %244 = tpu.matmul %243, %241, %cst_239 {dimension_numbers = #tpu.dot_dimension_numbers<[1], [0], [0], [1], [0, 0, 1, 1], [], []>} : vector<8x8xf32>, vector<8x1000xf32>, vector<8x1000xf32> -> vector<8x1000xf32>
    %245 = arith.addf %240, %244 : vector<8x1000xf32>
    %c0_240 = arith.constant 0 : index
    %c112_241 = arith.constant 112 : index
    %246 = vector.load %arg9[%c0_240, %c112_241] : memref<8x1222xf32, #tpu.memory_space<vmem>>, vector<8x1000xf32>
    %c14_242 = arith.constant 14 : index
    %c0_243 = arith.constant 0 : index
    %c0_244 = arith.constant 0 : index
    %247 = vector.load %arg3[%c14_242, %c0_243, %c0_244] : memref<27x8x8xf32, #tpu.memory_space<vmem>>, vector<1x8x8xf32>
    %248 = vector.shape_cast %247 : vector<1x8x8xf32> to vector<8x8xf32>
    %cst_245 = arith.constant dense<0.000000e+00> : vector<8x1000xf32>
    %249 = tpu.matmul %248, %246, %cst_245 {dimension_numbers = #tpu.dot_dimension_numbers<[1], [0], [0], [1], [0, 0, 1, 1], [], []>} : vector<8x8xf32>, vector<8x1000xf32>, vector<8x1000xf32> -> vector<8x1000xf32>
    %250 = arith.addf %245, %249 : vector<8x1000xf32>
    %c0_246 = arith.constant 0 : index
    %c120_247 = arith.constant 120 : index
    %251 = vector.load %arg9[%c0_246, %c120_247] : memref<8x1222xf32, #tpu.memory_space<vmem>>, vector<8x1000xf32>
    %c15_248 = arith.constant 15 : index
    %c0_249 = arith.constant 0 : index
    %c0_250 = arith.constant 0 : index
    %252 = vector.load %arg3[%c15_248, %c0_249, %c0_250] : memref<27x8x8xf32, #tpu.memory_space<vmem>>, vector<1x8x8xf32>
    %253 = vector.shape_cast %252 : vector<1x8x8xf32> to vector<8x8xf32>
    %cst_251 = arith.constant dense<0.000000e+00> : vector<8x1000xf32>
    %254 = tpu.matmul %253, %251, %cst_251 {dimension_numbers = #tpu.dot_dimension_numbers<[1], [0], [0], [1], [0, 0, 1, 1], [], []>} : vector<8x8xf32>, vector<8x1000xf32>, vector<8x1000xf32> -> vector<8x1000xf32>
    %255 = arith.addf %250, %254 : vector<8x1000xf32>
    %c0_252 = arith.constant 0 : index
    %c121_253 = arith.constant 121 : index
    %256 = vector.load %arg9[%c0_252, %c121_253] : memref<8x1222xf32, #tpu.memory_space<vmem>>, vector<8x1000xf32>
    %c16_254 = arith.constant 16 : index
    %c0_255 = arith.constant 0 : index
    %c0_256 = arith.constant 0 : index
    %257 = vector.load %arg3[%c16_254, %c0_255, %c0_256] : memref<27x8x8xf32, #tpu.memory_space<vmem>>, vector<1x8x8xf32>
    %258 = vector.shape_cast %257 : vector<1x8x8xf32> to vector<8x8xf32>
    %cst_257 = arith.constant dense<0.000000e+00> : vector<8x1000xf32>
    %259 = tpu.matmul %258, %256, %cst_257 {dimension_numbers = #tpu.dot_dimension_numbers<[1], [0], [0], [1], [0, 0, 1, 1], [], []>} : vector<8x8xf32>, vector<8x1000xf32>, vector<8x1000xf32> -> vector<8x1000xf32>
    %260 = arith.addf %255, %259 : vector<8x1000xf32>
    %c0_258 = arith.constant 0 : index
    %c122_259 = arith.constant 122 : index
    %261 = vector.load %arg9[%c0_258, %c122_259] : memref<8x1222xf32, #tpu.memory_space<vmem>>, vector<8x1000xf32>
    %c17_260 = arith.constant 17 : index
    %c0_261 = arith.constant 0 : index
    %c0_262 = arith.constant 0 : index
    %262 = vector.load %arg3[%c17_260, %c0_261, %c0_262] : memref<27x8x8xf32, #tpu.memory_space<vmem>>, vector<1x8x8xf32>
    %263 = vector.shape_cast %262 : vector<1x8x8xf32> to vector<8x8xf32>
    %cst_263 = arith.constant dense<0.000000e+00> : vector<8x1000xf32>
    %264 = tpu.matmul %263, %261, %cst_263 {dimension_numbers = #tpu.dot_dimension_numbers<[1], [0], [0], [1], [0, 0, 1, 1], [], []>} : vector<8x8xf32>, vector<8x1000xf32>, vector<8x1000xf32> -> vector<8x1000xf32>
    %265 = arith.addf %260, %264 : vector<8x1000xf32>
    %c0_264 = arith.constant 0 : index
    %c200_265 = arith.constant 200 : index
    %266 = vector.load %arg9[%c0_264, %c200_265] : memref<8x1222xf32, #tpu.memory_space<vmem>>, vector<8x1000xf32>
    %c18_266 = arith.constant 18 : index
    %c0_267 = arith.constant 0 : index
    %c0_268 = arith.constant 0 : index
    %267 = vector.load %arg3[%c18_266, %c0_267, %c0_268] : memref<27x8x8xf32, #tpu.memory_space<vmem>>, vector<1x8x8xf32>
    %268 = vector.shape_cast %267 : vector<1x8x8xf32> to vector<8x8xf32>
    %cst_269 = arith.constant dense<0.000000e+00> : vector<8x1000xf32>
    %269 = tpu.matmul %268, %266, %cst_269 {dimension_numbers = #tpu.dot_dimension_numbers<[1], [0], [0], [1], [0, 0, 1, 1], [], []>} : vector<8x8xf32>, vector<8x1000xf32>, vector<8x1000xf32> -> vector<8x1000xf32>
    %270 = arith.addf %265, %269 : vector<8x1000xf32>
    %c0_270 = arith.constant 0 : index
    %c201_271 = arith.constant 201 : index
    %271 = vector.load %arg9[%c0_270, %c201_271] : memref<8x1222xf32, #tpu.memory_space<vmem>>, vector<8x1000xf32>
    %c19_272 = arith.constant 19 : index
    %c0_273 = arith.constant 0 : index
    %c0_274 = arith.constant 0 : index
    %272 = vector.load %arg3[%c19_272, %c0_273, %c0_274] : memref<27x8x8xf32, #tpu.memory_space<vmem>>, vector<1x8x8xf32>
    %273 = vector.shape_cast %272 : vector<1x8x8xf32> to vector<8x8xf32>
    %cst_275 = arith.constant dense<0.000000e+00> : vector<8x1000xf32>
    %274 = tpu.matmul %273, %271, %cst_275 {dimension_numbers = #tpu.dot_dimension_numbers<[1], [0], [0], [1], [0, 0, 1, 1], [], []>} : vector<8x8xf32>, vector<8x1000xf32>, vector<8x1000xf32> -> vector<8x1000xf32>
    %275 = arith.addf %270, %274 : vector<8x1000xf32>
    %c0_276 = arith.constant 0 : index
    %c202_277 = arith.constant 202 : index
    %276 = vector.load %arg9[%c0_276, %c202_277] : memref<8x1222xf32, #tpu.memory_space<vmem>>, vector<8x1000xf32>
    %c20_278 = arith.constant 20 : index
    %c0_279 = arith.constant 0 : index
    %c0_280 = arith.constant 0 : index
    %277 = vector.load %arg3[%c20_278, %c0_279, %c0_280] : memref<27x8x8xf32, #tpu.memory_space<vmem>>, vector<1x8x8xf32>
    %278 = vector.shape_cast %277 : vector<1x8x8xf32> to vector<8x8xf32>
    %cst_281 = arith.constant dense<0.000000e+00> : vector<8x1000xf32>
    %279 = tpu.matmul %278, %276, %cst_281 {dimension_numbers = #tpu.dot_dimension_numbers<[1], [0], [0], [1], [0, 0, 1, 1], [], []>} : vector<8x8xf32>, vector<8x1000xf32>, vector<8x1000xf32> -> vector<8x1000xf32>
    %280 = arith.addf %275, %279 : vector<8x1000xf32>
    %c0_282 = arith.constant 0 : index
    %c210_283 = arith.constant 210 : index
    %281 = vector.load %arg9[%c0_282, %c210_283] : memref<8x1222xf32, #tpu.memory_space<vmem>>, vector<8x1000xf32>
    %c21_284 = arith.constant 21 : index
    %c0_285 = arith.constant 0 : index
    %c0_286 = arith.constant 0 : index
    %282 = vector.load %arg3[%c21_284, %c0_285, %c0_286] : memref<27x8x8xf32, #tpu.memory_space<vmem>>, vector<1x8x8xf32>
    %283 = vector.shape_cast %282 : vector<1x8x8xf32> to vector<8x8xf32>
    %cst_287 = arith.constant dense<0.000000e+00> : vector<8x1000xf32>
    %284 = tpu.matmul %283, %281, %cst_287 {dimension_numbers = #tpu.dot_dimension_numbers<[1], [0], [0], [1], [0, 0, 1, 1], [], []>} : vector<8x8xf32>, vector<8x1000xf32>, vector<8x1000xf32> -> vector<8x1000xf32>
    %285 = arith.addf %280, %284 : vector<8x1000xf32>
    %c0_288 = arith.constant 0 : index
    %c211_289 = arith.constant 211 : index
    %286 = vector.load %arg9[%c0_288, %c211_289] : memref<8x1222xf32, #tpu.memory_space<vmem>>, vector<8x1000xf32>
    %c22_290 = arith.constant 22 : index
    %c0_291 = arith.constant 0 : index
    %c0_292 = arith.constant 0 : index
    %287 = vector.load %arg3[%c22_290, %c0_291, %c0_292] : memref<27x8x8xf32, #tpu.memory_space<vmem>>, vector<1x8x8xf32>
    %288 = vector.shape_cast %287 : vector<1x8x8xf32> to vector<8x8xf32>
    %cst_293 = arith.constant dense<0.000000e+00> : vector<8x1000xf32>
    %289 = tpu.matmul %288, %286, %cst_293 {dimension_numbers = #tpu.dot_dimension_numbers<[1], [0], [0], [1], [0, 0, 1, 1], [], []>} : vector<8x8xf32>, vector<8x1000xf32>, vector<8x1000xf32> -> vector<8x1000xf32>
    %290 = arith.addf %285, %289 : vector<8x1000xf32>
    %c0_294 = arith.constant 0 : index
    %c212_295 = arith.constant 212 : index
    %291 = vector.load %arg9[%c0_294, %c212_295] : memref<8x1222xf32, #tpu.memory_space<vmem>>, vector<8x1000xf32>
    %c23_296 = arith.constant 23 : index
    %c0_297 = arith.constant 0 : index
    %c0_298 = arith.constant 0 : index
    %292 = vector.load %arg3[%c23_296, %c0_297, %c0_298] : memref<27x8x8xf32, #tpu.memory_space<vmem>>, vector<1x8x8xf32>
    %293 = vector.shape_cast %292 : vector<1x8x8xf32> to vector<8x8xf32>
    %cst_299 = arith.constant dense<0.000000e+00> : vector<8x1000xf32>
    %294 = tpu.matmul %293, %291, %cst_299 {dimension_numbers = #tpu.dot_dimension_numbers<[1], [0], [0], [1], [0, 0, 1, 1], [], []>} : vector<8x8xf32>, vector<8x1000xf32>, vector<8x1000xf32> -> vector<8x1000xf32>
    %295 = arith.addf %290, %294 : vector<8x1000xf32>
    %c0_300 = arith.constant 0 : index
    %c220_301 = arith.constant 220 : index
    %296 = vector.load %arg9[%c0_300, %c220_301] : memref<8x1222xf32, #tpu.memory_space<vmem>>, vector<8x1000xf32>
    %c24_302 = arith.constant 24 : index
    %c0_303 = arith.constant 0 : index
    %c0_304 = arith.constant 0 : index
    %297 = vector.load %arg3[%c24_302, %c0_303, %c0_304] : memref<27x8x8xf32, #tpu.memory_space<vmem>>, vector<1x8x8xf32>
    %298 = vector.shape_cast %297 : vector<1x8x8xf32> to vector<8x8xf32>
    %cst_305 = arith.constant dense<0.000000e+00> : vector<8x1000xf32>
    %299 = tpu.matmul %298, %296, %cst_305 {dimension_numbers = #tpu.dot_dimension_numbers<[1], [0], [0], [1], [0, 0, 1, 1], [], []>} : vector<8x8xf32>, vector<8x1000xf32>, vector<8x1000xf32> -> vector<8x1000xf32>
    %300 = arith.addf %295, %299 : vector<8x1000xf32>
    %c0_306 = arith.constant 0 : index
    %c221_307 = arith.constant 221 : index
    %301 = vector.load %arg9[%c0_306, %c221_307] : memref<8x1222xf32, #tpu.memory_space<vmem>>, vector<8x1000xf32>
    %c25_308 = arith.constant 25 : index
    %c0_309 = arith.constant 0 : index
    %c0_310 = arith.constant 0 : index
    %302 = vector.load %arg3[%c25_308, %c0_309, %c0_310] : memref<27x8x8xf32, #tpu.memory_space<vmem>>, vector<1x8x8xf32>
    %303 = vector.shape_cast %302 : vector<1x8x8xf32> to vector<8x8xf32>
    %cst_311 = arith.constant dense<0.000000e+00> : vector<8x1000xf32>
    %304 = tpu.matmul %303, %301, %cst_311 {dimension_numbers = #tpu.dot_dimension_numbers<[1], [0], [0], [1], [0, 0, 1, 1], [], []>} : vector<8x8xf32>, vector<8x1000xf32>, vector<8x1000xf32> -> vector<8x1000xf32>
    %305 = arith.addf %300, %304 : vector<8x1000xf32>
    %c0_312 = arith.constant 0 : index
    %c222_313 = arith.constant 222 : index
    %306 = vector.load %arg9[%c0_312, %c222_313] : memref<8x1222xf32, #tpu.memory_space<vmem>>, vector<8x1000xf32>
    %c26_314 = arith.constant 26 : index
    %c0_315 = arith.constant 0 : index
    %c0_316 = arith.constant 0 : index
    %307 = vector.load %arg3[%c26_314, %c0_315, %c0_316] : memref<27x8x8xf32, #tpu.memory_space<vmem>>, vector<1x8x8xf32>
    %308 = vector.shape_cast %307 : vector<1x8x8xf32> to vector<8x8xf32>
    %cst_317 = arith.constant dense<0.000000e+00> : vector<8x1000xf32>
    %309 = tpu.matmul %308, %306, %cst_317 {dimension_numbers = #tpu.dot_dimension_numbers<[1], [0], [0], [1], [0, 0, 1, 1], [], []>} : vector<8x8xf32>, vector<8x1000xf32>, vector<8x1000xf32> -> vector<8x1000xf32>
    %310 = arith.addf %305, %309 : vector<8x1000xf32>
    %c1_318 = arith.constant 1 : index
    %c0_319 = arith.constant 0 : index
    %c0_320 = arith.constant 0 : index
    %311 = vector.load %arg5[%c1_318, %c0_319, %c0_320] : memref<3x8x1xf32, #tpu.memory_space<vmem>>, vector<1x8x1xf32>
    %312 = vector.shape_cast %311 : vector<1x8x1xf32> to vector<8x1xf32>
    %313 = vector.broadcast %312 : vector<8x1xf32> to vector<8x1000xf32>
    %314 = arith.addf %310, %313 : vector<8x1000xf32>
    %cst_321 = arith.constant 0.000000e+00 : f32
    %315 = vector.broadcast %cst_321 : f32 to vector<8x1000xf32>
    %316 = arith.maximumf %314, %315 : vector<8x1000xf32>
    %317 = vector.broadcast %0 : vector<1x1000xf32> to vector<8x1000xf32>
    %318 = arith.mulf %316, %317 : vector<8x1000xf32>
    %c0_322 = arith.constant 0 : index
    %c111_323 = arith.constant 111 : index
    %319 = vector.load %arg9[%c0_322, %c111_323] : memref<8x1222xf32, #tpu.memory_space<vmem>>, vector<8x1000xf32>
    tpu.vector_store %arg9[%c0_322, %c111_323], %318 {strides = array<i32>} : memref<8x1222xf32, #tpu.memory_space<vmem>>, vector<8x1000xf32>,
    %cst_324 = arith.constant 0.000000e+00 : f32
    %320 = vector.broadcast %cst_324 : f32 to vector<8x1000xf32>
    %c0_325 = arith.constant 0 : index
    %c0_326 = arith.constant 0 : index
    %321 = vector.load %arg9[%c0_325, %c0_326] : memref<8x1222xf32, #tpu.memory_space<vmem>>, vector<8x1000xf32>
    %c0_327 = arith.constant 0 : index
    %c0_328 = arith.constant 0 : index
    %c0_329 = arith.constant 0 : index
    %322 = vector.load %arg4[%c0_327, %c0_328, %c0_329] : memref<27x8x8xf32, #tpu.memory_space<vmem>>, vector<1x8x8xf32>
    %323 = vector.shape_cast %322 : vector<1x8x8xf32> to vector<8x8xf32>
    %cst_330 = arith.constant dense<0.000000e+00> : vector<8x1000xf32>
    %324 = tpu.matmul %323, %321, %cst_330 {dimension_numbers = #tpu.dot_dimension_numbers<[1], [0], [0], [1], [0, 0, 1, 1], [], []>} : vector<8x8xf32>, vector<8x1000xf32>, vector<8x1000xf32> -> vector<8x1000xf32>
    %325 = arith.addf %320, %324 : vector<8x1000xf32>
    %c0_331 = arith.constant 0 : index
    %c1_332 = arith.constant 1 : index
    %326 = vector.load %arg9[%c0_331, %c1_332] : memref<8x1222xf32, #tpu.memory_space<vmem>>, vector<8x1000xf32>
    %c1_333 = arith.constant 1 : index
    %c0_334 = arith.constant 0 : index
    %c0_335 = arith.constant 0 : index
    %327 = vector.load %arg4[%c1_333, %c0_334, %c0_335] : memref<27x8x8xf32, #tpu.memory_space<vmem>>, vector<1x8x8xf32>
    %328 = vector.shape_cast %327 : vector<1x8x8xf32> to vector<8x8xf32>
    %cst_336 = arith.constant dense<0.000000e+00> : vector<8x1000xf32>
    %329 = tpu.matmul %328, %326, %cst_336 {dimension_numbers = #tpu.dot_dimension_numbers<[1], [0], [0], [1], [0, 0, 1, 1], [], []>} : vector<8x8xf32>, vector<8x1000xf32>, vector<8x1000xf32> -> vector<8x1000xf32>
    %330 = arith.addf %325, %329 : vector<8x1000xf32>
    %c0_337 = arith.constant 0 : index
    %c2_338 = arith.constant 2 : index
    %331 = vector.load %arg9[%c0_337, %c2_338] : memref<8x1222xf32, #tpu.memory_space<vmem>>, vector<8x1000xf32>
    %c2_339 = arith.constant 2 : index
    %c0_340 = arith.constant 0 : index
    %c0_341 = arith.constant 0 : index
    %332 = vector.load %arg4[%c2_339, %c0_340, %c0_341] : memref<27x8x8xf32, #tpu.memory_space<vmem>>, vector<1x8x8xf32>
    %333 = vector.shape_cast %332 : vector<1x8x8xf32> to vector<8x8xf32>
    %cst_342 = arith.constant dense<0.000000e+00> : vector<8x1000xf32>
    %334 = tpu.matmul %333, %331, %cst_342 {dimension_numbers = #tpu.dot_dimension_numbers<[1], [0], [0], [1], [0, 0, 1, 1], [], []>} : vector<8x8xf32>, vector<8x1000xf32>, vector<8x1000xf32> -> vector<8x1000xf32>
    %335 = arith.addf %330, %334 : vector<8x1000xf32>
    %c0_343 = arith.constant 0 : index
    %c10_344 = arith.constant 10 : index
    %336 = vector.load %arg9[%c0_343, %c10_344] : memref<8x1222xf32, #tpu.memory_space<vmem>>, vector<8x1000xf32>
    %c3_345 = arith.constant 3 : index
    %c0_346 = arith.constant 0 : index
    %c0_347 = arith.constant 0 : index
    %337 = vector.load %arg4[%c3_345, %c0_346, %c0_347] : memref<27x8x8xf32, #tpu.memory_space<vmem>>, vector<1x8x8xf32>
    %338 = vector.shape_cast %337 : vector<1x8x8xf32> to vector<8x8xf32>
    %cst_348 = arith.constant dense<0.000000e+00> : vector<8x1000xf32>
    %339 = tpu.matmul %338, %336, %cst_348 {dimension_numbers = #tpu.dot_dimension_numbers<[1], [0], [0], [1], [0, 0, 1, 1], [], []>} : vector<8x8xf32>, vector<8x1000xf32>, vector<8x1000xf32> -> vector<8x1000xf32>
    %340 = arith.addf %335, %339 : vector<8x1000xf32>
    %c0_349 = arith.constant 0 : index
    %c11_350 = arith.constant 11 : index
    %341 = vector.load %arg9[%c0_349, %c11_350] : memref<8x1222xf32, #tpu.memory_space<vmem>>, vector<8x1000xf32>
    %c4_351 = arith.constant 4 : index
    %c0_352 = arith.constant 0 : index
    %c0_353 = arith.constant 0 : index
    %342 = vector.load %arg4[%c4_351, %c0_352, %c0_353] : memref<27x8x8xf32, #tpu.memory_space<vmem>>, vector<1x8x8xf32>
    %343 = vector.shape_cast %342 : vector<1x8x8xf32> to vector<8x8xf32>
    %cst_354 = arith.constant dense<0.000000e+00> : vector<8x1000xf32>
    %344 = tpu.matmul %343, %341, %cst_354 {dimension_numbers = #tpu.dot_dimension_numbers<[1], [0], [0], [1], [0, 0, 1, 1], [], []>} : vector<8x8xf32>, vector<8x1000xf32>, vector<8x1000xf32> -> vector<8x1000xf32>
    %345 = arith.addf %340, %344 : vector<8x1000xf32>
    %c0_355 = arith.constant 0 : index
    %c12_356 = arith.constant 12 : index
    %346 = vector.load %arg9[%c0_355, %c12_356] : memref<8x1222xf32, #tpu.memory_space<vmem>>, vector<8x1000xf32>
    %c5_357 = arith.constant 5 : index
    %c0_358 = arith.constant 0 : index
    %c0_359 = arith.constant 0 : index
    %347 = vector.load %arg4[%c5_357, %c0_358, %c0_359] : memref<27x8x8xf32, #tpu.memory_space<vmem>>, vector<1x8x8xf32>
    %348 = vector.shape_cast %347 : vector<1x8x8xf32> to vector<8x8xf32>
    %cst_360 = arith.constant dense<0.000000e+00> : vector<8x1000xf32>
    %349 = tpu.matmul %348, %346, %cst_360 {dimension_numbers = #tpu.dot_dimension_numbers<[1], [0], [0], [1], [0, 0, 1, 1], [], []>} : vector<8x8xf32>, vector<8x1000xf32>, vector<8x1000xf32> -> vector<8x1000xf32>
    %350 = arith.addf %345, %349 : vector<8x1000xf32>
    %c0_361 = arith.constant 0 : index
    %c20_362 = arith.constant 20 : index
    %351 = vector.load %arg9[%c0_361, %c20_362] : memref<8x1222xf32, #tpu.memory_space<vmem>>, vector<8x1000xf32>
    %c6_363 = arith.constant 6 : index
    %c0_364 = arith.constant 0 : index
    %c0_365 = arith.constant 0 : index
    %352 = vector.load %arg4[%c6_363, %c0_364, %c0_365] : memref<27x8x8xf32, #tpu.memory_space<vmem>>, vector<1x8x8xf32>
    %353 = vector.shape_cast %352 : vector<1x8x8xf32> to vector<8x8xf32>
    %cst_366 = arith.constant dense<0.000000e+00> : vector<8x1000xf32>
    %354 = tpu.matmul %353, %351, %cst_366 {dimension_numbers = #tpu.dot_dimension_numbers<[1], [0], [0], [1], [0, 0, 1, 1], [], []>} : vector<8x8xf32>, vector<8x1000xf32>, vector<8x1000xf32> -> vector<8x1000xf32>
    %355 = arith.addf %350, %354 : vector<8x1000xf32>
    %c0_367 = arith.constant 0 : index
    %c21_368 = arith.constant 21 : index
    %356 = vector.load %arg9[%c0_367, %c21_368] : memref<8x1222xf32, #tpu.memory_space<vmem>>, vector<8x1000xf32>
    %c7_369 = arith.constant 7 : index
    %c0_370 = arith.constant 0 : index
    %c0_371 = arith.constant 0 : index
    %357 = vector.load %arg4[%c7_369, %c0_370, %c0_371] : memref<27x8x8xf32, #tpu.memory_space<vmem>>, vector<1x8x8xf32>
    %358 = vector.shape_cast %357 : vector<1x8x8xf32> to vector<8x8xf32>
    %cst_372 = arith.constant dense<0.000000e+00> : vector<8x1000xf32>
    %359 = tpu.matmul %358, %356, %cst_372 {dimension_numbers = #tpu.dot_dimension_numbers<[1], [0], [0], [1], [0, 0, 1, 1], [], []>} : vector<8x8xf32>, vector<8x1000xf32>, vector<8x1000xf32> -> vector<8x1000xf32>
    %360 = arith.addf %355, %359 : vector<8x1000xf32>
    %c0_373 = arith.constant 0 : index
    %c22_374 = arith.constant 22 : index
    %361 = vector.load %arg9[%c0_373, %c22_374] : memref<8x1222xf32, #tpu.memory_space<vmem>>, vector<8x1000xf32>
    %c8_375 = arith.constant 8 : index
    %c0_376 = arith.constant 0 : index
    %c0_377 = arith.constant 0 : index
    %362 = vector.load %arg4[%c8_375, %c0_376, %c0_377] : memref<27x8x8xf32, #tpu.memory_space<vmem>>, vector<1x8x8xf32>
    %363 = vector.shape_cast %362 : vector<1x8x8xf32> to vector<8x8xf32>
    %cst_378 = arith.constant dense<0.000000e+00> : vector<8x1000xf32>
    %364 = tpu.matmul %363, %361, %cst_378 {dimension_numbers = #tpu.dot_dimension_numbers<[1], [0], [0], [1], [0, 0, 1, 1], [], []>} : vector<8x8xf32>, vector<8x1000xf32>, vector<8x1000xf32> -> vector<8x1000xf32>
    %365 = arith.addf %360, %364 : vector<8x1000xf32>
    %c0_379 = arith.constant 0 : index
    %c100_380 = arith.constant 100 : index
    %366 = vector.load %arg9[%c0_379, %c100_380] : memref<8x1222xf32, #tpu.memory_space<vmem>>, vector<8x1000xf32>
    %c9_381 = arith.constant 9 : index
    %c0_382 = arith.constant 0 : index
    %c0_383 = arith.constant 0 : index
    %367 = vector.load %arg4[%c9_381, %c0_382, %c0_383] : memref<27x8x8xf32, #tpu.memory_space<vmem>>, vector<1x8x8xf32>
    %368 = vector.shape_cast %367 : vector<1x8x8xf32> to vector<8x8xf32>
    %cst_384 = arith.constant dense<0.000000e+00> : vector<8x1000xf32>
    %369 = tpu.matmul %368, %366, %cst_384 {dimension_numbers = #tpu.dot_dimension_numbers<[1], [0], [0], [1], [0, 0, 1, 1], [], []>} : vector<8x8xf32>, vector<8x1000xf32>, vector<8x1000xf32> -> vector<8x1000xf32>
    %370 = arith.addf %365, %369 : vector<8x1000xf32>
    %c0_385 = arith.constant 0 : index
    %c101_386 = arith.constant 101 : index
    %371 = vector.load %arg9[%c0_385, %c101_386] : memref<8x1222xf32, #tpu.memory_space<vmem>>, vector<8x1000xf32>
    %c10_387 = arith.constant 10 : index
    %c0_388 = arith.constant 0 : index
    %c0_389 = arith.constant 0 : index
    %372 = vector.load %arg4[%c10_387, %c0_388, %c0_389] : memref<27x8x8xf32, #tpu.memory_space<vmem>>, vector<1x8x8xf32>
    %373 = vector.shape_cast %372 : vector<1x8x8xf32> to vector<8x8xf32>
    %cst_390 = arith.constant dense<0.000000e+00> : vector<8x1000xf32>
    %374 = tpu.matmul %373, %371, %cst_390 {dimension_numbers = #tpu.dot_dimension_numbers<[1], [0], [0], [1], [0, 0, 1, 1], [], []>} : vector<8x8xf32>, vector<8x1000xf32>, vector<8x1000xf32> -> vector<8x1000xf32>
    %375 = arith.addf %370, %374 : vector<8x1000xf32>
    %c0_391 = arith.constant 0 : index
    %c102_392 = arith.constant 102 : index
    %376 = vector.load %arg9[%c0_391, %c102_392] : memref<8x1222xf32, #tpu.memory_space<vmem>>, vector<8x1000xf32>
    %c11_393 = arith.constant 11 : index
    %c0_394 = arith.constant 0 : index
    %c0_395 = arith.constant 0 : index
    %377 = vector.load %arg4[%c11_393, %c0_394, %c0_395] : memref<27x8x8xf32, #tpu.memory_space<vmem>>, vector<1x8x8xf32>
    %378 = vector.shape_cast %377 : vector<1x8x8xf32> to vector<8x8xf32>
    %cst_396 = arith.constant dense<0.000000e+00> : vector<8x1000xf32>
    %379 = tpu.matmul %378, %376, %cst_396 {dimension_numbers = #tpu.dot_dimension_numbers<[1], [0], [0], [1], [0, 0, 1, 1], [], []>} : vector<8x8xf32>, vector<8x1000xf32>, vector<8x1000xf32> -> vector<8x1000xf32>
    %380 = arith.addf %375, %379 : vector<8x1000xf32>
    %c0_397 = arith.constant 0 : index
    %c110_398 = arith.constant 110 : index
    %381 = vector.load %arg9[%c0_397, %c110_398] : memref<8x1222xf32, #tpu.memory_space<vmem>>, vector<8x1000xf32>
    %c12_399 = arith.constant 12 : index
    %c0_400 = arith.constant 0 : index
    %c0_401 = arith.constant 0 : index
    %382 = vector.load %arg4[%c12_399, %c0_400, %c0_401] : memref<27x8x8xf32, #tpu.memory_space<vmem>>, vector<1x8x8xf32>
    %383 = vector.shape_cast %382 : vector<1x8x8xf32> to vector<8x8xf32>
    %cst_402 = arith.constant dense<0.000000e+00> : vector<8x1000xf32>
    %384 = tpu.matmul %383, %381, %cst_402 {dimension_numbers = #tpu.dot_dimension_numbers<[1], [0], [0], [1], [0, 0, 1, 1], [], []>} : vector<8x8xf32>, vector<8x1000xf32>, vector<8x1000xf32> -> vector<8x1000xf32>
    %385 = arith.addf %380, %384 : vector<8x1000xf32>
    %c0_403 = arith.constant 0 : index
    %c111_404 = arith.constant 111 : index
    %386 = vector.load %arg9[%c0_403, %c111_404] : memref<8x1222xf32, #tpu.memory_space<vmem>>, vector<8x1000xf32>
    %c13_405 = arith.constant 13 : index
    %c0_406 = arith.constant 0 : index
    %c0_407 = arith.constant 0 : index
    %387 = vector.load %arg4[%c13_405, %c0_406, %c0_407] : memref<27x8x8xf32, #tpu.memory_space<vmem>>, vector<1x8x8xf32>
    %388 = vector.shape_cast %387 : vector<1x8x8xf32> to vector<8x8xf32>
    %cst_408 = arith.constant dense<0.000000e+00> : vector<8x1000xf32>
    %389 = tpu.matmul %388, %386, %cst_408 {dimension_numbers = #tpu.dot_dimension_numbers<[1], [0], [0], [1], [0, 0, 1, 1], [], []>} : vector<8x8xf32>, vector<8x1000xf32>, vector<8x1000xf32> -> vector<8x1000xf32>
    %390 = arith.addf %385, %389 : vector<8x1000xf32>
    %c0_409 = arith.constant 0 : index
    %c112_410 = arith.constant 112 : index
    %391 = vector.load %arg9[%c0_409, %c112_410] : memref<8x1222xf32, #tpu.memory_space<vmem>>, vector<8x1000xf32>
    %c14_411 = arith.constant 14 : index
    %c0_412 = arith.constant 0 : index
    %c0_413 = arith.constant 0 : index
    %392 = vector.load %arg4[%c14_411, %c0_412, %c0_413] : memref<27x8x8xf32, #tpu.memory_space<vmem>>, vector<1x8x8xf32>
    %393 = vector.shape_cast %392 : vector<1x8x8xf32> to vector<8x8xf32>
    %cst_414 = arith.constant dense<0.000000e+00> : vector<8x1000xf32>
    %394 = tpu.matmul %393, %391, %cst_414 {dimension_numbers = #tpu.dot_dimension_numbers<[1], [0], [0], [1], [0, 0, 1, 1], [], []>} : vector<8x8xf32>, vector<8x1000xf32>, vector<8x1000xf32> -> vector<8x1000xf32>
    %395 = arith.addf %390, %394 : vector<8x1000xf32>
    %c0_415 = arith.constant 0 : index
    %c120_416 = arith.constant 120 : index
    %396 = vector.load %arg9[%c0_415, %c120_416] : memref<8x1222xf32, #tpu.memory_space<vmem>>, vector<8x1000xf32>
    %c15_417 = arith.constant 15 : index
    %c0_418 = arith.constant 0 : index
    %c0_419 = arith.constant 0 : index
    %397 = vector.load %arg4[%c15_417, %c0_418, %c0_419] : memref<27x8x8xf32, #tpu.memory_space<vmem>>, vector<1x8x8xf32>
    %398 = vector.shape_cast %397 : vector<1x8x8xf32> to vector<8x8xf32>
    %cst_420 = arith.constant dense<0.000000e+00> : vector<8x1000xf32>
    %399 = tpu.matmul %398, %396, %cst_420 {dimension_numbers = #tpu.dot_dimension_numbers<[1], [0], [0], [1], [0, 0, 1, 1], [], []>} : vector<8x8xf32>, vector<8x1000xf32>, vector<8x1000xf32> -> vector<8x1000xf32>
    %400 = arith.addf %395, %399 : vector<8x1000xf32>
    %c0_421 = arith.constant 0 : index
    %c121_422 = arith.constant 121 : index
    %401 = vector.load %arg9[%c0_421, %c121_422] : memref<8x1222xf32, #tpu.memory_space<vmem>>, vector<8x1000xf32>
    %c16_423 = arith.constant 16 : index
    %c0_424 = arith.constant 0 : index
    %c0_425 = arith.constant 0 : index
    %402 = vector.load %arg4[%c16_423, %c0_424, %c0_425] : memref<27x8x8xf32, #tpu.memory_space<vmem>>, vector<1x8x8xf32>
    %403 = vector.shape_cast %402 : vector<1x8x8xf32> to vector<8x8xf32>
    %cst_426 = arith.constant dense<0.000000e+00> : vector<8x1000xf32>
    %404 = tpu.matmul %403, %401, %cst_426 {dimension_numbers = #tpu.dot_dimension_numbers<[1], [0], [0], [1], [0, 0, 1, 1], [], []>} : vector<8x8xf32>, vector<8x1000xf32>, vector<8x1000xf32> -> vector<8x1000xf32>
    %405 = arith.addf %400, %404 : vector<8x1000xf32>
    %c0_427 = arith.constant 0 : index
    %c122_428 = arith.constant 122 : index
    %406 = vector.load %arg9[%c0_427, %c122_428] : memref<8x1222xf32, #tpu.memory_space<vmem>>, vector<8x1000xf32>
    %c17_429 = arith.constant 17 : index
    %c0_430 = arith.constant 0 : index
    %c0_431 = arith.constant 0 : index
    %407 = vector.load %arg4[%c17_429, %c0_430, %c0_431] : memref<27x8x8xf32, #tpu.memory_space<vmem>>, vector<1x8x8xf32>
    %408 = vector.shape_cast %407 : vector<1x8x8xf32> to vector<8x8xf32>
    %cst_432 = arith.constant dense<0.000000e+00> : vector<8x1000xf32>
    %409 = tpu.matmul %408, %406, %cst_432 {dimension_numbers = #tpu.dot_dimension_numbers<[1], [0], [0], [1], [0, 0, 1, 1], [], []>} : vector<8x8xf32>, vector<8x1000xf32>, vector<8x1000xf32> -> vector<8x1000xf32>
    %410 = arith.addf %405, %409 : vector<8x1000xf32>
    %c0_433 = arith.constant 0 : index
    %c200_434 = arith.constant 200 : index
    %411 = vector.load %arg9[%c0_433, %c200_434] : memref<8x1222xf32, #tpu.memory_space<vmem>>, vector<8x1000xf32>
    %c18_435 = arith.constant 18 : index
    %c0_436 = arith.constant 0 : index
    %c0_437 = arith.constant 0 : index
    %412 = vector.load %arg4[%c18_435, %c0_436, %c0_437] : memref<27x8x8xf32, #tpu.memory_space<vmem>>, vector<1x8x8xf32>
    %413 = vector.shape_cast %412 : vector<1x8x8xf32> to vector<8x8xf32>
    %cst_438 = arith.constant dense<0.000000e+00> : vector<8x1000xf32>
    %414 = tpu.matmul %413, %411, %cst_438 {dimension_numbers = #tpu.dot_dimension_numbers<[1], [0], [0], [1], [0, 0, 1, 1], [], []>} : vector<8x8xf32>, vector<8x1000xf32>, vector<8x1000xf32> -> vector<8x1000xf32>
    %415 = arith.addf %410, %414 : vector<8x1000xf32>
    %c0_439 = arith.constant 0 : index
    %c201_440 = arith.constant 201 : index
    %416 = vector.load %arg9[%c0_439, %c201_440] : memref<8x1222xf32, #tpu.memory_space<vmem>>, vector<8x1000xf32>
    %c19_441 = arith.constant 19 : index
    %c0_442 = arith.constant 0 : index
    %c0_443 = arith.constant 0 : index
    %417 = vector.load %arg4[%c19_441, %c0_442, %c0_443] : memref<27x8x8xf32, #tpu.memory_space<vmem>>, vector<1x8x8xf32>
    %418 = vector.shape_cast %417 : vector<1x8x8xf32> to vector<8x8xf32>
    %cst_444 = arith.constant dense<0.000000e+00> : vector<8x1000xf32>
    %419 = tpu.matmul %418, %416, %cst_444 {dimension_numbers = #tpu.dot_dimension_numbers<[1], [0], [0], [1], [0, 0, 1, 1], [], []>} : vector<8x8xf32>, vector<8x1000xf32>, vector<8x1000xf32> -> vector<8x1000xf32>
    %420 = arith.addf %415, %419 : vector<8x1000xf32>
    %c0_445 = arith.constant 0 : index
    %c202_446 = arith.constant 202 : index
    %421 = vector.load %arg9[%c0_445, %c202_446] : memref<8x1222xf32, #tpu.memory_space<vmem>>, vector<8x1000xf32>
    %c20_447 = arith.constant 20 : index
    %c0_448 = arith.constant 0 : index
    %c0_449 = arith.constant 0 : index
    %422 = vector.load %arg4[%c20_447, %c0_448, %c0_449] : memref<27x8x8xf32, #tpu.memory_space<vmem>>, vector<1x8x8xf32>
    %423 = vector.shape_cast %422 : vector<1x8x8xf32> to vector<8x8xf32>
    %cst_450 = arith.constant dense<0.000000e+00> : vector<8x1000xf32>
    %424 = tpu.matmul %423, %421, %cst_450 {dimension_numbers = #tpu.dot_dimension_numbers<[1], [0], [0], [1], [0, 0, 1, 1], [], []>} : vector<8x8xf32>, vector<8x1000xf32>, vector<8x1000xf32> -> vector<8x1000xf32>
    %425 = arith.addf %420, %424 : vector<8x1000xf32>
    %c0_451 = arith.constant 0 : index
    %c210_452 = arith.constant 210 : index
    %426 = vector.load %arg9[%c0_451, %c210_452] : memref<8x1222xf32, #tpu.memory_space<vmem>>, vector<8x1000xf32>
    %c21_453 = arith.constant 21 : index
    %c0_454 = arith.constant 0 : index
    %c0_455 = arith.constant 0 : index
    %427 = vector.load %arg4[%c21_453, %c0_454, %c0_455] : memref<27x8x8xf32, #tpu.memory_space<vmem>>, vector<1x8x8xf32>
    %428 = vector.shape_cast %427 : vector<1x8x8xf32> to vector<8x8xf32>
    %cst_456 = arith.constant dense<0.000000e+00> : vector<8x1000xf32>
    %429 = tpu.matmul %428, %426, %cst_456 {dimension_numbers = #tpu.dot_dimension_numbers<[1], [0], [0], [1], [0, 0, 1, 1], [], []>} : vector<8x8xf32>, vector<8x1000xf32>, vector<8x1000xf32> -> vector<8x1000xf32>
    %430 = arith.addf %425, %429 : vector<8x1000xf32>
    %c0_457 = arith.constant 0 : index
    %c211_458 = arith.constant 211 : index
    %431 = vector.load %arg9[%c0_457, %c211_458] : memref<8x1222xf32, #tpu.memory_space<vmem>>, vector<8x1000xf32>
    %c22_459 = arith.constant 22 : index
    %c0_460 = arith.constant 0 : index
    %c0_461 = arith.constant 0 : index
    %432 = vector.load %arg4[%c22_459, %c0_460, %c0_461] : memref<27x8x8xf32, #tpu.memory_space<vmem>>, vector<1x8x8xf32>
    %433 = vector.shape_cast %432 : vector<1x8x8xf32> to vector<8x8xf32>
    %cst_462 = arith.constant dense<0.000000e+00> : vector<8x1000xf32>
    %434 = tpu.matmul %433, %431, %cst_462 {dimension_numbers = #tpu.dot_dimension_numbers<[1], [0], [0], [1], [0, 0, 1, 1], [], []>} : vector<8x8xf32>, vector<8x1000xf32>, vector<8x1000xf32> -> vector<8x1000xf32>
    %435 = arith.addf %430, %434 : vector<8x1000xf32>
    %c0_463 = arith.constant 0 : index
    %c212_464 = arith.constant 212 : index
    %436 = vector.load %arg9[%c0_463, %c212_464] : memref<8x1222xf32, #tpu.memory_space<vmem>>, vector<8x1000xf32>
    %c23_465 = arith.constant 23 : index
    %c0_466 = arith.constant 0 : index
    %c0_467 = arith.constant 0 : index
    %437 = vector.load %arg4[%c23_465, %c0_466, %c0_467] : memref<27x8x8xf32, #tpu.memory_space<vmem>>, vector<1x8x8xf32>
    %438 = vector.shape_cast %437 : vector<1x8x8xf32> to vector<8x8xf32>
    %cst_468 = arith.constant dense<0.000000e+00> : vector<8x1000xf32>
    %439 = tpu.matmul %438, %436, %cst_468 {dimension_numbers = #tpu.dot_dimension_numbers<[1], [0], [0], [1], [0, 0, 1, 1], [], []>} : vector<8x8xf32>, vector<8x1000xf32>, vector<8x1000xf32> -> vector<8x1000xf32>
    %440 = arith.addf %435, %439 : vector<8x1000xf32>
    %c0_469 = arith.constant 0 : index
    %c220_470 = arith.constant 220 : index
    %441 = vector.load %arg9[%c0_469, %c220_470] : memref<8x1222xf32, #tpu.memory_space<vmem>>, vector<8x1000xf32>
    %c24_471 = arith.constant 24 : index
    %c0_472 = arith.constant 0 : index
    %c0_473 = arith.constant 0 : index
    %442 = vector.load %arg4[%c24_471, %c0_472, %c0_473] : memref<27x8x8xf32, #tpu.memory_space<vmem>>, vector<1x8x8xf32>
    %443 = vector.shape_cast %442 : vector<1x8x8xf32> to vector<8x8xf32>
    %cst_474 = arith.constant dense<0.000000e+00> : vector<8x1000xf32>
    %444 = tpu.matmul %443, %441, %cst_474 {dimension_numbers = #tpu.dot_dimension_numbers<[1], [0], [0], [1], [0, 0, 1, 1], [], []>} : vector<8x8xf32>, vector<8x1000xf32>, vector<8x1000xf32> -> vector<8x1000xf32>
    %445 = arith.addf %440, %444 : vector<8x1000xf32>
    %c0_475 = arith.constant 0 : index
    %c221_476 = arith.constant 221 : index
    %446 = vector.load %arg9[%c0_475, %c221_476] : memref<8x1222xf32, #tpu.memory_space<vmem>>, vector<8x1000xf32>
    %c25_477 = arith.constant 25 : index
    %c0_478 = arith.constant 0 : index
    %c0_479 = arith.constant 0 : index
    %447 = vector.load %arg4[%c25_477, %c0_478, %c0_479] : memref<27x8x8xf32, #tpu.memory_space<vmem>>, vector<1x8x8xf32>
    %448 = vector.shape_cast %447 : vector<1x8x8xf32> to vector<8x8xf32>
    %cst_480 = arith.constant dense<0.000000e+00> : vector<8x1000xf32>
    %449 = tpu.matmul %448, %446, %cst_480 {dimension_numbers = #tpu.dot_dimension_numbers<[1], [0], [0], [1], [0, 0, 1, 1], [], []>} : vector<8x8xf32>, vector<8x1000xf32>, vector<8x1000xf32> -> vector<8x1000xf32>
    %450 = arith.addf %445, %449 : vector<8x1000xf32>
    %c0_481 = arith.constant 0 : index
    %c222_482 = arith.constant 222 : index
    %451 = vector.load %arg9[%c0_481, %c222_482] : memref<8x1222xf32, #tpu.memory_space<vmem>>, vector<8x1000xf32>
    %c26_483 = arith.constant 26 : index
    %c0_484 = arith.constant 0 : index
    %c0_485 = arith.constant 0 : index
    %452 = vector.load %arg4[%c26_483, %c0_484, %c0_485] : memref<27x8x8xf32, #tpu.memory_space<vmem>>, vector<1x8x8xf32>
    %453 = vector.shape_cast %452 : vector<1x8x8xf32> to vector<8x8xf32>
    %cst_486 = arith.constant dense<0.000000e+00> : vector<8x1000xf32>
    %454 = tpu.matmul %453, %451, %cst_486 {dimension_numbers = #tpu.dot_dimension_numbers<[1], [0], [0], [1], [0, 0, 1, 1], [], []>} : vector<8x8xf32>, vector<8x1000xf32>, vector<8x1000xf32> -> vector<8x1000xf32>
    %455 = arith.addf %450, %454 : vector<8x1000xf32>
    %c2_487 = arith.constant 2 : index
    %c0_488 = arith.constant 0 : index
    %c0_489 = arith.constant 0 : index
    %456 = vector.load %arg5[%c2_487, %c0_488, %c0_489] : memref<3x8x1xf32, #tpu.memory_space<vmem>>, vector<1x8x1xf32>
    %457 = vector.shape_cast %456 : vector<1x8x1xf32> to vector<8x1xf32>
    %458 = vector.broadcast %457 : vector<8x1xf32> to vector<8x1000xf32>
    %459 = arith.addf %455, %458 : vector<8x1000xf32>
    %c0_490 = arith.constant 0 : index
    %c0_491 = arith.constant 0 : index
    %c111_492 = arith.constant 111 : index
    %460 = vector.load %arg1[%c0_490, %c0_491, %c111_492] : memref<1x8x1222xf32, #tpu.memory_space<vmem>>, vector<1x8x1000xf32>
    %461 = vector.shape_cast %460 : vector<1x8x1000xf32> to vector<8x1000xf32>
    %c0_493 = arith.constant 0 : index
    %c0_494 = arith.constant 0 : index
    %c0_495 = arith.constant 0 : index
    %462 = vector.load %arg6[%c0_493, %c0_494, %c0_495] : memref<2x8x1xf32, #tpu.memory_space<vmem>>, vector<1x8x1xf32>
    %463 = vector.shape_cast %462 : vector<1x8x1xf32> to vector<8x1xf32>
    %464 = vector.broadcast %463 : vector<8x1xf32> to vector<8x1000xf32>
    %465 = arith.mulf %461, %464 : vector<8x1000xf32>
    %c1_496 = arith.constant 1 : index
    %c0_497 = arith.constant 0 : index
    %c0_498 = arith.constant 0 : index
    %466 = vector.load %arg6[%c1_496, %c0_497, %c0_498] : memref<2x8x1xf32, #tpu.memory_space<vmem>>, vector<1x8x1xf32>
    %467 = vector.shape_cast %466 : vector<1x8x1xf32> to vector<8x1xf32>
    %468 = vector.broadcast %467 : vector<8x1xf32> to vector<8x1000xf32>
    %469 = arith.addf %465, %468 : vector<8x1000xf32>
    %cst_499 = arith.constant 0.000000e+00 : f32
    %470 = vector.broadcast %cst_499 : f32 to vector<8x1000xf32>
    %471 = arith.maximumf %469, %470 : vector<8x1000xf32>
    %472 = arith.addf %459, %471 : vector<8x1000xf32>
    %c0_500 = arith.constant 0 : index
    %c0_501 = arith.constant 0 : index
    %c0_502 = arith.constant 0 : index
    %473 = vector.load %arg8[%c0_500, %c0_501, %c0_502] : memref<1x8x1000xf32, #tpu.memory_space<vmem>>, vector<1x8x1000xf32>
    %474 = vector.shape_cast %473 : vector<1x8x1000xf32> to vector<8x1000xf32>
    %475 = vector.shape_cast %472 : vector<8x1000xf32> to vector<1x8x1000xf32>
    tpu.vector_store %arg8[%c0_500, %c0_501, %c0_502], %475 {strides = array<i32>} : memref<1x8x1000xf32, #tpu.memory_space<vmem>>, vector<1x8x1000xf32>,
    return
  }
  func.func @transform_0(%arg0: i32) -> (i32, i32, i32) {
    %c0_i32 = arith.constant 0 : i32
    %c0_i32_0 = arith.constant 0 : i32
    %c0_i32_1 = arith.constant 0 : i32
    return %arg0, %c0_i32, %c0_i32_0 : i32, i32, i32
  }
  func.func @transform_1(%arg0: i32) -> (i32, i32, i32) {
    %c0_i32 = arith.constant 0 : i32
    %c0_i32_0 = arith.constant 0 : i32
    %c0_i32_1 = arith.constant 0 : i32
    %c0_i32_2 = arith.constant 0 : i32
    return %c0_i32, %c0_i32_0, %c0_i32_1 : i32, i32, i32
  }
  func.func @transform_2(%arg0: i32) -> (i32, i32, i32) {
    %c0_i32 = arith.constant 0 : i32
    %c0_i32_0 = arith.constant 0 : i32
    %c0_i32_1 = arith.constant 0 : i32
    %c0_i32_2 = arith.constant 0 : i32
    return %c0_i32, %c0_i32_0, %c0_i32_1 : i32, i32, i32
  }
  func.func @transform_3(%arg0: i32) -> (i32, i32, i32) {
    %c0_i32 = arith.constant 0 : i32
    %c0_i32_0 = arith.constant 0 : i32
    %c0_i32_1 = arith.constant 0 : i32
    %c0_i32_2 = arith.constant 0 : i32
    return %c0_i32, %c0_i32_0, %c0_i32_1 : i32, i32, i32
  }
  func.func @transform_4(%arg0: i32) -> (i32, i32, i32) {
    %c0_i32 = arith.constant 0 : i32
    %c0_i32_0 = arith.constant 0 : i32
    %c0_i32_1 = arith.constant 0 : i32
    %c0_i32_2 = arith.constant 0 : i32
    return %c0_i32, %c0_i32_0, %c0_i32_1 : i32, i32, i32
  }
  func.func @transform_5(%arg0: i32) -> (i32, i32, i32) {
    %c0_i32 = arith.constant 0 : i32
    %c0_i32_0 = arith.constant 0 : i32
    %c0_i32_1 = arith.constant 0 : i32
    %c0_i32_2 = arith.constant 0 : i32
    return %c0_i32, %c0_i32_0, %c0_i32_1 : i32, i32, i32
  }
  func.func @transform_6(%arg0: i32) -> (i32, i32) {
    %c0_i32 = arith.constant 0 : i32
    %c0_i32_0 = arith.constant 0 : i32
    %c0_i32_1 = arith.constant 0 : i32
    return %c0_i32, %c0_i32_0 : i32, i32
  }
  func.func @transform_7(%arg0: i32) -> (i32, i32, i32) {
    %c0_i32 = arith.constant 0 : i32
    %c0_i32_0 = arith.constant 0 : i32
    %c0_i32_1 = arith.constant 0 : i32
    return %arg0, %c0_i32, %c0_i32_0 : i32, i32, i32
  }
}

</mosaic_0001>

<bundles_post_ra>
// kernel: residual_block.1
= control target key start
LH: loop header
LB: loop body
LE: loop exit
PB: predicated region body
PF: predicated region fallthrough
CT: control target
= control target key end

     0   :  { %s28616_s24 = smov 0   ;;  %s33202_s0 = inlined_call_operand.vmem [shape: f32[2,8,1222], index: 0, kind: input, shape index: {}]   ;;  %s33203_s1 = inlined_call_operand.vmem [shape: f32[27,8,8], index: 1, kind: input, shape index: {}]   ;;  %s33204_s2 = inlined_call_operand.vmem [shape: f32[27,8,8], index: 2, kind: input, shape index: {}]   ;;  %s33205_s3 = inlined_call_operand.vmem [shape: f32[27,8,8], index: 3, kind: input, shape index: {}]   ;;  %s33206_s4 = inlined_call_operand.vmem [shape: f32[3,8,1], index: 4, kind: input, shape index: {}]   ;;  %s33207_s5 = inlined_call_operand.vmem [shape: f32[2,8,1], index: 5, kind: input, shape index: {}]   ;;  %s33208_s6 = inlined_call_operand.vmem [shape: f32[1,1000], index: 6, kind: input, shape index: {}]   ;;  %s33209_s7 = inlined_call_operand.vmem [shape: f32[2,8,1000], index: 7, kind: output, shape index: {}]  }
   0x1   :  { %33366 = sst [smem:[#allocation69_spill]] %s33202_s0 }
   0x2   :  { %33367 = sst [smem:[#allocation70_spill]] %s33203_s1 }
   0x3   :  { %33368 = sst [smem:[#allocation71_spill]] %s33204_s2 }
   0x4   :  { %33369 = sst [smem:[#allocation72_spill]] %s33208_s6 }
   0x5   :  { %33370 = sst [smem:[#allocation73_spill]] %s33209_s7 }
   0x6 LB: > { %33371 = sst [smem:[#allocation3_spill]] %s28545_s24  ;;  %s27441_s25 = sadd.s32 4294967295, %s28545_s24   ;;  %s28545_s24 = sphi %s28616_s24, %s17_s24  }
   0x7   : > { %p27445_p0 = scmp.ge.s32.totalorder %s28545_s24, 1  ;;  %p237_p1 = scmp.lt.s32.totalorder %s28545_s24, 3 }
   0x9   : > { %p238_p2 = pnand %p27445_p0, %p237_p1 }
   0xb   : > { %241 = sbr.rel (%p238_p2) target bundleno = 2661 (0xa65), region = 48 }
  0x12   : > { %p269_p3 = scmp.lt.s32.totalorder %s27441_s25, 1  ;;  %s33373_s0 = sld [smem:[#allocation69_spill]]  ;;  %v28547_v0 = vmov 0.0   ;;  %vm326_vm0 = vcmask 1039360   ;;  %vm342_vm1 = vcmask 64512   ;;  %vm935_vm2 = vcmask 1031168  }
  0x13   : > { %410 = vmatprep.mubr.f32.mxu0 %v28547_v0  ;;  %280 = vst [vmem:[#allocation2] sm:$0xff] %v28547_v0  ;;  %288 = vst [vmem:[#allocation2 + $0x40] sm:$0xff] %v28547_v0  ;;  %481 = vmatprep.mubr.f32.mxu1 %v28547_v0  ;;  %s33305_s30 = smov 127   ;;  %s33307_s8 = smov 126   ;;  %vm1264_vm3 = vcmask 965632   ;;  %vm1593_vm4 = vcmask 957440  }
  0x14   : > { %s33838_s25 = smov (!%p269_p3, %s27441_s25), 1  ;;  %s33295_s9 = smov 118   ;;  %vm1922_vm5 = vcmask 949248   ;;  %vm2251_vm6 = vcmask 883712   ;;  %vm2580_vm7 = vcmask 875520   ;;  %vm2909_vm8 = vcmask 867328  }
  0x15   : > { %33372 = sst [smem:[#allocation4_spill]] %s33838_s25  ;;  %s28481_s26 = smul.u32 80, %s33838_s25  ;;  %vm3258_vm9 = vcmask 228352   ;;  %vm3590_vm10 = vcmask 220160   ;;  %vm33282_vm11 = vcmask 211968   ;;  %vm33280_vm12 = vcmask 146432  }
  0x16   : > { %s33291_s10 = smov 117   ;;  %s33289_s11 = smov 116   ;;  %vm33281_vm13 = vcmask 138240   ;;  %vm33218_vm14 = vcmask 130048   ;;  %vm33221_vm15 = vcmask 56320  }
  0x17   : > { %s33287_s12 = smov 108   ;;  %s33285_s13 = smov 107  }
  0x18   : > { %s28630_s29 = scalar_lea.vmem %s33373_s0, %s28481_s26  ;;  %s33283_s14 = smov 106  }
  0x19   : > { %v28637_v1 = vld [vmem:[%s28630_s29 + $0x8] sm:$0xff]  ;;  %v28640_v2 = vld [vmem:[%s28630_s29] sm:$0xff]  ;;  %v28647_v3 = vld [vmem:[%s28630_s29 + $0x10] sm:$0xff]  ;;  %s33374_s1 = sld [smem:[#allocation70_spill]]  ;;  %s33278_s17 = smov 28  }
  0x1a   : > { %312 = vrot.lane.b32.xlu0 %v28637_v1, %s33305_s30  ;;  %310 = vrot.lane.b32.xlu1 %v28640_v2, %s33305_s30  ;;  %v28650_v4 = vld [vmem:[%s28630_s29 + $0x18] sm:$0xff]  ;;  %v28657_v5 = vld [vmem:[%s28630_s29 + $0x20] sm:$0xff]  ;;  %s33297_s22 = smov 27   ;;  %s33276_s27 = smov 26  }
  0x1b   : > { %v28660_v6 = vld [vmem:[%s28630_s29 + $0x28] sm:$0xff]  ;;  %v28667_v7 = vld [vmem:[%s28630_s29 + $0x30] sm:$0xff]  ;;  %v28670_v8 = vld [vmem:[%s28630_s29 + $0x38] sm:$0xff]  ;;  %s33299_s16 = smov 18   ;;  %s33274_s23 = smov 17  }
  0x1c   : > { %v28844_v38 = vld [vmem:[%s28630_s29 + $0x40] sm:$0xff]  ;;  %s33301_s15 = smov 16   ;;  %s33272_s20 = smov 8  }
  0x1d   : > { %s33303_s28 = smov 7   ;;  %s33270_s21 = smov 6  }
  0x1e   : > { %314 = vrot.lane.b32.xlu0 %v28647_v3, %s33305_s30  ;;  %316 = vrot.lane.b32.xlu1 %v28650_v4, %s33305_s30  ;;  %s33210_s19 = smov 56   ;;  %s33212_s26 = smov 55  }
  0x1f   : > { %v27449_v14 = vld [vmem:[%s33374_s1 + $0x8] sm:$0xff]  ;;  %v299_v27 = vld [vmem:[%s33374_s1] sm:$0xff]  ;;  %v27458_v39 = vld [vmem:[%s33374_s1 + $0x10] sm:$0xff]  ;;  %s33375_s6 = sld [smem:[#allocation72_spill]]  ;;  %s33389_s2 = sld [smem:[#allocation71_spill]] }
  0x20   : > { %v27463_v49 = vld [vmem:[%s33374_s1 + $0x18] sm:$0xff]  ;;  %s33545_s18 = smov 117   ;;  %s33554_s0 = smov 8  }
  0x21   : > { %s33564_s24 = smov 126  }
  0x22   : > { %318 = vrot.lane.b32.xlu0 %v28657_v5, %s33305_s30  ;;  %320 = vrot.lane.b32.xlu1 %v28660_v6, %s33305_s30 }
  0x26   : > { %322 = vrot.lane.b32.xlu0 %v28667_v7, %s33305_s30  ;;  %324 = vrot.lane.b32.xlu1 %v28670_v8, %s33305_s30 }
  0x2a   : > { %921 = vrot.lane.b32.xlu0 %v28637_v1, %s33307_s8  ;;  %923 = vrot.lane.b32.xlu1 %v28647_v3, %s33307_s8 }
  0x2e   : > { %919 = vrot.lane.b32.xlu0 %v28640_v2, %s33307_s8  ;;  %925 = vrot.lane.b32.xlu1 %v28650_v4, %s33307_s8 }
  0x32   : > { %927 = vrot.lane.b32.xlu0 %v28657_v5, %s33307_s8  ;;  %929 = vrot.lane.b32.xlu1 %v28660_v6, %s33307_s8 }
  0x36   : > { %931 = vrot.lane.b32.xlu0 %v28667_v7, %s33307_s8  ;;  %933 = vrot.lane.b32.xlu1 %v28670_v8, %s33307_s8 }
  0x3a   : > { %1250 = vrot.lane.b32.xlu0 %v28637_v1, %s33295_s9  ;;  %1252 = vrot.lane.b32.xlu1 %v28647_v3, %s33295_s9 }
  0x3e   : > { %1248 = vrot.lane.b32.xlu0 %v28640_v2, %s33295_s9  ;;  %1254 = vrot.lane.b32.xlu1 %v28650_v4, %s33295_s9 }
  0x42   : > { %1256 = vrot.lane.b32.xlu0 %v28657_v5, %s33295_s9  ;;  %1258 = vrot.lane.b32.xlu1 %v28660_v6, %s33295_s9 }
  0x46   : > { %1260 = vrot.lane.b32.xlu0 %v28667_v7, %s33295_s9  ;;  %1262 = vrot.lane.b32.xlu1 %v28670_v8, %s33295_s9 }
  0x4a   : > { %1579 = vrot.lane.b32.xlu0 %v28637_v1, %s33291_s10  ;;  %1581 = vrot.lane.b32.xlu1 %v28647_v3, %s33291_s10 }
  0x4e   : > { %1577 = vrot.lane.b32.xlu0 %v28640_v2, %s33291_s10  ;;  %1583 = vrot.lane.b32.xlu1 %v28650_v4, %s33291_s10 }
  0x52   : > { %1585 = vrot.lane.b32.xlu0 %v28657_v5, %s33291_s10  ;;  %1587 = vrot.lane.b32.xlu1 %v28660_v6, %s33291_s10 }
  0x56   : > { %1589 = vrot.lane.b32.xlu0 %v28667_v7, %s33291_s10  ;;  %1591 = vrot.lane.b32.xlu1 %v28670_v8, %s33291_s10 }
  0x5a   : > { %1908 = vrot.lane.b32.xlu0 %v28637_v1, %s33289_s11  ;;  %1910 = vrot.lane.b32.xlu1 %v28647_v3, %s33289_s11 }
  0x5e   : > { %1906 = vrot.lane.b32.xlu0 %v28640_v2, %s33289_s11  ;;  %1912 = vrot.lane.b32.xlu1 %v28650_v4, %s33289_s11 }
  0x62   : > { %1914 = vrot.lane.b32.xlu0 %v28657_v5, %s33289_s11  ;;  %1916 = vrot.lane.b32.xlu1 %v28660_v6, %s33289_s11 }
  0x66   : > { %1918 = vrot.lane.b32.xlu0 %v28667_v7, %s33289_s11  ;;  %1920 = vrot.lane.b32.xlu1 %v28670_v8, %s33289_s11 }
  0x6a   : > { %2237 = vrot.lane.b32.xlu0 %v28637_v1, %s33287_s12  ;;  %2239 = vrot.lane.b32.xlu1 %v28647_v3, %s33287_s12 }
  0x6e   : > { %2235 = vrot.lane.b32.xlu0 %v28640_v2, %s33287_s12  ;;  %2241 = vrot.lane.b32.xlu1 %v28650_v4, %s33287_s12 }
  0x72   : > { %2243 = vrot.lane.b32.xlu0 %v28657_v5, %s33287_s12  ;;  %2245 = vrot.lane.b32.xlu1 %v28660_v6, %s33287_s12 }
  0x76   : > { %2247 = vrot.lane.b32.xlu0 %v28667_v7, %s33287_s12  ;;  %2249 = vrot.lane.b32.xlu1 %v28670_v8, %s33287_s12 }
  0x7a   : > { %2566 = vrot.lane.b32.xlu0 %v28637_v1, %s33285_s13  ;;  %2568 = vrot.lane.b32.xlu1 %v28647_v3, %s33285_s13 }
  0x7e   : > { %2564 = vrot.lane.b32.xlu0 %v28640_v2, %s33285_s13  ;;  %2570 = vrot.lane.b32.xlu1 %v28650_v4, %s33285_s13 }
  0x82   : > { %2572 = vrot.lane.b32.xlu0 %v28657_v5, %s33285_s13  ;;  %2574 = vrot.lane.b32.xlu1 %v28660_v6, %s33285_s13 }
  0x86   : > { %2576 = vrot.lane.b32.xlu0 %v28667_v7, %s33285_s13  ;;  %2578 = vrot.lane.b32.xlu1 %v28670_v8, %s33285_s13 }
  0x8a   : > { %2895 = vrot.lane.b32.xlu0 %v28637_v1, %s33283_s14  ;;  %2897 = vrot.lane.b32.xlu1 %v28647_v3, %s33283_s14 }
  0x8c   : > { %v313_v9 = vpop.permute.xlu0 %312  ;;  %v311_v10 = vpop.permute.xlu1 %310 }
  0x8d   : > { %v327_v15 = vsel %vm326_vm0, %v311_v10, %v313_v9 }
  0x8e   : > { %2893 = vrot.lane.b32.xlu0 %v28640_v2, %s33283_s14  ;;  %2899 = vrot.lane.b32.xlu1 %v28650_v4, %s33283_s14 }
  0x90   : > { %v315_v11 = vpop.permute.xlu0 %314  ;;  %v317_v12 = vpop.permute.xlu1 %316 }
  0x91   : > { %v328_v13 = vsel %vm326_vm0, %v313_v9, %v315_v11  ;;  %v329_v19 = vsel %vm326_vm0, %v315_v11, %v317_v12  ;;  %v27468_v9 = vld [vmem:[%s33374_s1 + $0x20] sm:$0xff] }
  0x92   : > { %346 = vmatprep.subr.mxu0 %v328_v13  ;;  %2901 = vrot.lane.b32.xlu0 %v28657_v5, %s33283_s14 }
  0x93   : > { %2903 = vrot.lane.b32.xlu1 %v28660_v6, %s33283_s14  ;;  %347 = vmatpush1.msra.mxu0 %v327_v15 }
  0x94   : > { %v319_v16 = vpop.permute.xlu0 %318  ;;  %v321_v17 = vpop.permute.xlu1 %320  ;;  %27450 = vmatmul.mubr.msk.f32.vlgmr.msra.gmra.mrb[0].mxu0 %vm342_vm1, %v27449_v14 }
  0x95   : > { %v330_v18 = vsel %vm326_vm0, %v317_v12, %v319_v16  ;;  %552 = vmatprep.mubr.f32.mxu0 %v28547_v0  ;;  %v331_v24 = vsel %vm326_vm0, %v319_v16, %v321_v17 }
  0x96   : > { %2905 = vrot.lane.b32.xlu0 %v28667_v7, %s33283_s14  ;;  %417 = vmatprep.subr.mxu1 %v330_v18 }
  0x97   : > { %2907 = vrot.lane.b32.xlu1 %v28670_v8, %s33283_s14  ;;  %418 = vmatpush1.msra.mxu1 %v329_v19 }
  0x98   : > { %v323_v20 = vpop.permute.xlu0 %322  ;;  %v325_v21 = vpop.permute.xlu1 %324  ;;  %27451 = vmatmul.mubr.msk.f32.vlgmr.msra.gmra.mrb[0].mxu1 %vm342_vm1, %v27449_v14 }
  0x99   : > { %559 = vmatprep.subr.mxu1 %v325_v21  ;;  %v332_v22 = vsel %vm326_vm0, %v321_v17, %v323_v20  ;;  %v333_v23 = vsel %vm326_vm0, %v323_v20, %v325_v21  ;;  %623 = vmatprep.mubr.f32.mxu1 %v28547_v0 }
  0x9a   : > { %3242 = vrot.lane.b32.xlu0 %v28637_v1, %s33278_s17  ;;  %488 = vmatprep.subr.mxu0 %v332_v22 }
  0x9b   : > { %3244 = vrot.lane.b32.xlu1 %v28647_v3, %s33278_s17  ;;  %560 = vmatpush1.msra.mxu1 %v333_v23 }
  0x9c   : > { %489 = vmatpush1.msra.mxu0 %v331_v24  ;;  %v922_v25 = vpop.permute.xlu0 %921  ;;  %v924_v26 = vpop.permute.xlu1 %923  ;;  %27453 = vmatmul.mubr.msk.f32.vlgmr.msra.gmra.mrb[2].mxu1 %vm342_vm1, %v27449_v14 }
  0x9d   : > { %27452 = vmatmul.mubr.msk.f32.vlgmr.msra.gmra.mrb[2].mxu0 %vm342_vm1, %v27449_v14  ;;  %633 = vmatprep.subr.mxu0 %v28637_v1  ;;  %v937_v30 = vsel %vm935_vm2, %v922_v25, %v924_v26 }
  0x9e   : > { %3240 = vrot.lane.b32.xlu0 %v28640_v2, %s33278_s17  ;;  %634 = vmatpush1.msra.mxu0 %v28640_v2 }
  0x9f   : > { %3246 = vrot.lane.b32.xlu1 %v28650_v4, %s33278_s17  ;;  %697 = vmatprep.mubr.f32.mxu0 %v28547_v0 }
  0xa0   : > { %775 = vmatprep.subr.mxu0 %v28660_v6  ;;  %v920_v28 = vpop.permute.xlu0 %919  ;;  %704 = vmatprep.subr.mxu1 %v28650_v4  ;;  %v926_v29 = vpop.permute.xlu1 %925 }
  0xa1   : > { %27454 = vmatmul.mubr.msk.f32.vlgmr.msra.gmra.mrb[0].mxu0 %vm342_vm1, %v299_v27  ;;  %705 = vmatpush1.msra.mxu1 %v28647_v3  ;;  %v936_v33 = vsel %vm935_vm2, %v920_v28, %v922_v25  ;;  %v938_v37 = vsel %vm935_vm2, %v924_v26, %v926_v29  ;;  %v27473_v25 = vld [vmem:[%s33374_s1 + $0x28] sm:$0xff] }
  0xa2   : > { %776 = vmatpush1.msra.mxu0 %v28657_v5  ;;  %768 = vmatprep.mubr.f32.mxu1 %v28547_v0 }
  0xa3   : > { %954 = vmatprep.subr.mxu0 %v937_v30  ;;  %3248 = vrot.lane.b32.xlu0 %v28657_v5, %s33278_s17 }
  0xa4   : > { %3250 = vrot.lane.b32.xlu1 %v28660_v6, %s33278_s17  ;;  %27455 = vmatmul.mubr.msk.f32.vlgmr.msra.gmra.mrb[0].mxu1 %vm342_vm1, %v299_v27  ;;  %v928_v31 = vpop.permute.xlu0 %927  ;;  %v930_v32 = vpop.permute.xlu1 %929 }
  0xa5   : > { %839 = vmatprep.mubr.f32.mxu0 %v28547_v0  ;;  %846 = vmatprep.subr.mxu1 %v28670_v8  ;;  %v939_v34 = vsel %vm935_vm2, %v926_v29, %v928_v31  ;;  %v940_v44 = vsel %vm935_vm2, %v928_v31, %v930_v32 }
  0xa6   : > { %27456 = vmatmul.mubr.msk.f32.vlgmr.msra.gmra.mrb[2].mxu0 %vm342_vm1, %v299_v27  ;;  %847 = vmatpush1.msra.mxu1 %v28667_v7 }
  0xa7   : > { %955 = vmatpush1.msra.mxu0 %v936_v33  ;;  %910 = vmatprep.mubr.f32.mxu1 %v28547_v0 }
  0xa8   : > { %3252 = vrot.lane.b32.xlu0 %v28667_v7, %s33278_s17  ;;  %3254 = vrot.lane.b32.xlu1 %v28670_v8, %s33278_s17  ;;  %v932_v35 = vpop.permute.xlu0 %931  ;;  %v934_v36 = vpop.permute.xlu1 %933 }
  0xa9   : > { %27457 = vmatmul.mubr.msk.f32.vlgmr.msra.gmra.mrb[2].mxu1 %vm342_vm1, %v299_v27  ;;  %1025 = vmatprep.subr.mxu1 %v939_v34  ;;  %v941_v40 = vsel %vm935_vm2, %v930_v32, %v932_v35  ;;  %v942_v41 = vsel %vm935_vm2, %v932_v35, %v934_v36 }
  0xaa   : > { %1026 = vmatpush1.msra.mxu1 %v938_v37  ;;  %1089 = vmatprep.mubr.f32.mxu1 %v28547_v0 }
  0xab   : > { %1167 = vmatprep.subr.mxu1 %v934_v36  ;;  %1018 = vmatprep.mubr.f32.mxu0 %v28547_v0 }
  0xac   : > { %3256 = vrot.lane.b32.xlu0 %v28844_v38, %s33278_s17  ;;  %3574 = vrot.lane.b32.xlu1 %v28637_v1, %s33297_s22  ;;  %v1251_v42 = vpop.permute.xlu0 %1250  ;;  %v1253_v43 = vpop.permute.xlu1 %1252 }
  0xad   : > { %27460 = vmatmul.mubr.msk.f32.vlgmr.msra.gmra.mrb[0].mxu1 %vm342_vm1, %v27458_v39  ;;  %1096 = vmatprep.subr.mxu0 %v941_v40  ;;  %v1266_v45 = vsel %vm1264_vm3, %v1251_v42, %v1253_v43 }
  0xae   : > { %1168 = vmatpush1.msra.mxu1 %v942_v41  ;;  %27459 = vmatmul.mubr.msk.f32.vlgmr.msra.gmra.mrb[0].mxu0 %vm342_vm1, %v27458_v39 }
  0xaf   : > { %1097 = vmatpush1.msra.mxu0 %v940_v44  ;;  %1160 = vmatprep.mubr.f32.mxu0 %v28547_v0 }
  0xb0   : > { %3576 = vrot.lane.b32.xlu0 %v28647_v3, %s33297_s22  ;;  %3572 = vrot.lane.b32.xlu1 %v28640_v2, %s33297_s22  ;;  %v1249_v46 = vpop.permute.xlu0 %1248  ;;  %v1255_v47 = vpop.permute.xlu1 %1254 }
  0xb1   : > { %1283 = vmatprep.subr.mxu0 %v1266_v45  ;;  %v1265_v48 = vsel %vm1264_vm3, %v1249_v46, %v1251_v42  ;;  %1231 = vmatprep.mubr.f32.mxu1 %v28547_v0  ;;  %v1267_v53 = vsel %vm1264_vm3, %v1253_v43, %v1255_v47  ;;  %v27478_v42 = vld [vmem:[%s33374_s1 + $0x30] sm:$0xff] }
  0xb2   : > { %27461 = vmatmul.mubr.msk.f32.vlgmr.msra.gmra.mrb[2].mxu0 %vm342_vm1, %v27458_v39  ;;  %27462 = vmatmul.mubr.msk.f32.vlgmr.msra.gmra.mrb[2].mxu1 %vm342_vm1, %v27458_v39 }
  0xb3   : > { %1284 = vmatpush1.msra.mxu0 %v1265_v48  ;;  %1418 = vmatprep.mubr.f32.mxu1 %v28547_v0 }
  0xb4   : > { %3578 = vrot.lane.b32.xlu0 %v28650_v4, %s33297_s22  ;;  %3580 = vrot.lane.b32.xlu1 %v28657_v5, %s33297_s22  ;;  %v1257_v50 = vpop.permute.xlu0 %1256  ;;  %v1259_v51 = vpop.permute.xlu1 %1258 }
  0xb5   : > { %v1268_v52 = vsel %vm1264_vm3, %v1255_v47, %v1257_v50  ;;  %1347 = vmatprep.mubr.f32.mxu0 %v28547_v0  ;;  %v1269_v58 = vsel %vm1264_vm3, %v1257_v50, %v1259_v51 }
  0xb6   : > { %1354 = vmatprep.subr.mxu1 %v1268_v52  ;;  %27464 = vmatmul.mubr.msk.f32.vlgmr.msra.gmra.mrb[0].mxu0 %vm342_vm1, %v27463_v49 }
  0xb7   : > { %1355 = vmatpush1.msra.mxu1 %v1267_v53  ;;  %1489 = vmatprep.mubr.f32.mxu0 %v28547_v0 }
  0xb8   : > { %3582 = vrot.lane.b32.xlu0 %v28660_v6, %s33297_s22  ;;  %3584 = vrot.lane.b32.xlu1 %v28667_v7, %s33297_s22  ;;  %v1261_v54 = vpop.permute.xlu0 %1260  ;;  %v1263_v55 = vpop.permute.xlu1 %1262 }
  0xb9   : > { %1496 = vmatprep.subr.mxu1 %v1263_v55  ;;  %27465 = vmatmul.mubr.msk.f32.vlgmr.msra.gmra.mrb[0].mxu1 %vm342_vm1, %v27463_v49  ;;  %v1270_v56 = vsel %vm1264_vm3, %v1259_v51, %v1261_v54  ;;  %v1271_v57 = vsel %vm1264_vm3, %v1261_v54, %v1263_v55 }
  0xba   : > { %1425 = vmatprep.subr.mxu0 %v1270_v56  ;;  %1497 = vmatpush1.msra.mxu1 %v1271_v57 }
  0xbb   : > { %1426 = vmatpush1.msra.mxu0 %v1269_v58  ;;  %1560 = vmatprep.mubr.f32.mxu1 %v28547_v0  ;;  %v27483_v58 = vld [vmem:[%s33374_s1 + $0x38] sm:$0xff] }
  0xbc   : > { %3586 = vrot.lane.b32.xlu0 %v28670_v8, %s33297_s22  ;;  %3588 = vrot.lane.b32.xlu1 %v28844_v38, %s33297_s22  ;;  %v1580_v59 = vpop.permute.xlu0 %1579  ;;  %v1582_v60 = vpop.permute.xlu1 %1581 }
  0xbd   : > { %v1595_v61 = vsel %vm1593_vm4, %v1580_v59, %v1582_v60  ;;  %27466 = vmatmul.mubr.msk.f32.vlgmr.msra.gmra.mrb[2].mxu0 %vm342_vm1, %v27463_v49  ;;  %27467 = vmatmul.mubr.msk.f32.vlgmr.msra.gmra.mrb[2].mxu1 %vm342_vm1, %v27463_v49 }
  0xbe   : > { %1612 = vmatprep.subr.mxu0 %v1595_v61  ;;  %1747 = vmatprep.mubr.f32.mxu1 %v28547_v0 }
  0xbf   : > { %1676 = vmatprep.mubr.f32.mxu0 %v28547_v0 }
  0xc0   : > { %3906 = vrot.lane.b32.xlu0 %v28637_v1, %s33276_s27  ;;  %3908 = vrot.lane.b32.xlu1 %v28647_v3, %s33276_s27  ;;  %v1578_v62 = vpop.permute.xlu0 %1577  ;;  %v1584_v63 = vpop.permute.xlu1 %1583 }
  0xc1   : > { %v1594_v10 = vsel %vm1593_vm4, %v1578_v62, %v1580_v59  ;;  %v1596_v14 = vsel %vm1593_vm4, %v1582_v60, %v1584_v63 }
  0xc2   : > { %1613 = vmatpush1.msra.mxu0 %v1594_v10 }
  0xc3   : > { %27469 = vmatmul.mubr.msk.f32.vlgmr.msra.gmra.mrb[0].mxu0 %vm342_vm1, %v27468_v9 }
  0xc4   : > { %3904 = vrot.lane.b32.xlu0 %v28640_v2, %s33276_s27  ;;  %3910 = vrot.lane.b32.xlu1 %v28650_v4, %s33276_s27  ;;  %v1586_v11 = vpop.permute.xlu0 %1585  ;;  %v1588_v12 = vpop.permute.xlu1 %1587 }
  0xc5   : > { %v1597_v13 = vsel %vm1593_vm4, %v1584_v63, %v1586_v11  ;;  %1818 = vmatprep.mubr.f32.mxu0 %v28547_v0  ;;  %v1598_v19 = vsel %vm1593_vm4, %v1586_v11, %v1588_v12 }
  0xc6   : > { %1683 = vmatprep.subr.mxu1 %v1597_v13 }
  0xc7   : > { %1684 = vmatpush1.msra.mxu1 %v1596_v14 }
  0xc8   : > { %3912 = vrot.lane.b32.xlu0 %v28657_v5, %s33276_s27  ;;  %3914 = vrot.lane.b32.xlu1 %v28660_v6, %s33276_s27  ;;  %v1590_v15 = vpop.permute.xlu0 %1589  ;;  %v1592_v16 = vpop.permute.xlu1 %1591 }
  0xc9   : > { %1825 = vmatprep.subr.mxu1 %v1592_v16  ;;  %27470 = vmatmul.mubr.msk.f32.vlgmr.msra.gmra.mrb[0].mxu1 %vm342_vm1, %v27468_v9  ;;  %v1599_v17 = vsel %vm1593_vm4, %v1588_v12, %v1590_v15  ;;  %v1600_v18 = vsel %vm1593_vm4, %v1590_v15, %v1592_v16 }
  0xca   : > { %1754 = vmatprep.subr.mxu0 %v1599_v17  ;;  %1826 = vmatpush1.msra.mxu1 %v1600_v18 }
  0xcb   : > { %1755 = vmatpush1.msra.mxu0 %v1598_v19  ;;  %1889 = vmatprep.mubr.f32.mxu1 %v28547_v0  ;;  %v27488_v19 = vld [vmem:[%s33374_s1 + $0x40] sm:$0xff] }
  0xcc   : > { %3916 = vrot.lane.b32.xlu0 %v28667_v7, %s33276_s27  ;;  %3918 = vrot.lane.b32.xlu1 %v28670_v8, %s33276_s27  ;;  %v1909_v20 = vpop.permute.xlu0 %1908  ;;  %v1911_v21 = vpop.permute.xlu1 %1910 }
  0xcd   : > { %v1924_v22 = vsel %vm1922_vm5, %v1909_v20, %v1911_v21  ;;  %27471 = vmatmul.mubr.msk.f32.vlgmr.msra.gmra.mrb[2].mxu0 %vm342_vm1, %v27468_v9  ;;  %27472 = vmatmul.mubr.msk.f32.vlgmr.msra.gmra.mrb[2].mxu1 %vm342_vm1, %v27468_v9 }
  0xce   : > { %1941 = vmatprep.subr.mxu0 %v1924_v22  ;;  %2076 = vmatprep.mubr.f32.mxu1 %v28547_v0 }
  0xcf   : > { %2005 = vmatprep.mubr.f32.mxu0 %v28547_v0 }
  0xd0   : > { %3920 = vrot.lane.b32.xlu0 %v28844_v38, %s33276_s27  ;;  %4238 = vrot.lane.b32.xlu1 %v28637_v1, %s33299_s16  ;;  %v1907_v23 = vpop.permute.xlu0 %1906  ;;  %v1913_v24 = vpop.permute.xlu1 %1912 }
  0xd1   : > { %v1923_v26 = vsel %vm1922_vm5, %v1907_v23, %v1909_v20  ;;  %v1925_v30 = vsel %vm1922_vm5, %v1911_v21, %v1913_v24 }
  0xd2   : > { %1942 = vmatpush1.msra.mxu0 %v1923_v26 }
  0xd3   : > { %27474 = vmatmul.mubr.msk.f32.vlgmr.msra.gmra.mrb[0].mxu0 %vm342_vm1, %v27473_v25 }
  0xd4   : > { %4240 = vrot.lane.b32.xlu0 %v28647_v3, %s33299_s16  ;;  %4236 = vrot.lane.b32.xlu1 %v28640_v2, %s33299_s16  ;;  %v1915_v27 = vpop.permute.xlu0 %1914  ;;  %v1917_v28 = vpop.permute.xlu1 %1916 }
  0xd5   : > { %v1926_v29 = vsel %vm1922_vm5, %v1913_v24, %v1915_v27  ;;  %2147 = vmatprep.mubr.f32.mxu0 %v28547_v0  ;;  %v1927_v35 = vsel %vm1922_vm5, %v1915_v27, %v1917_v28 }
  0xd6   : > { %2012 = vmatprep.subr.mxu1 %v1926_v29 }
  0xd7   : > { %2013 = vmatpush1.msra.mxu1 %v1925_v30 }
  0xd8   : > { %4242 = vrot.lane.b32.xlu0 %v28650_v4, %s33299_s16  ;;  %4244 = vrot.lane.b32.xlu1 %v28657_v5, %s33299_s16  ;;  %v1919_v31 = vpop.permute.xlu0 %1918  ;;  %v1921_v32 = vpop.permute.xlu1 %1920 }
  0xd9   : > { %2154 = vmatprep.subr.mxu1 %v1921_v32  ;;  %27475 = vmatmul.mubr.msk.f32.vlgmr.msra.gmra.mrb[0].mxu1 %vm342_vm1, %v27473_v25  ;;  %v1928_v33 = vsel %vm1922_vm5, %v1917_v28, %v1919_v31  ;;  %v1929_v34 = vsel %vm1922_vm5, %v1919_v31, %v1921_v32 }
  0xda   : > { %2083 = vmatprep.subr.mxu0 %v1928_v33  ;;  %2155 = vmatpush1.msra.mxu1 %v1929_v34  ;;  %v27493_v34 = vld [vmem:[%s33374_s1 + $0x48] sm:$0xff] }
  0xdb   : > { %2084 = vmatpush1.msra.mxu0 %v1927_v35  ;;  %2218 = vmatprep.mubr.f32.mxu1 %v28547_v0 }
  0xdc   : > { %4246 = vrot.lane.b32.xlu0 %v28660_v6, %s33299_s16  ;;  %4248 = vrot.lane.b32.xlu1 %v28667_v7, %s33299_s16  ;;  %v2238_v36 = vpop.permute.xlu0 %2237  ;;  %v2240_v37 = vpop.permute.xlu1 %2239 }
  0xdd   : > { %v2253_v39 = vsel %vm2251_vm6, %v2238_v36, %v2240_v37  ;;  %27476 = vmatmul.mubr.msk.f32.vlgmr.msra.gmra.mrb[2].mxu0 %vm342_vm1, %v27473_v25  ;;  %27477 = vmatmul.mubr.msk.f32.vlgmr.msra.gmra.mrb[2].mxu1 %vm342_vm1, %v27473_v25 }
  0xde   : > { %2270 = vmatprep.subr.mxu0 %v2253_v39  ;;  %2405 = vmatprep.mubr.f32.mxu1 %v28547_v0 }
  0xdf   : > { %2334 = vmatprep.mubr.f32.mxu0 %v28547_v0 }
  0xe0   : > { %4250 = vrot.lane.b32.xlu0 %v28670_v8, %s33299_s16  ;;  %4252 = vrot.lane.b32.xlu1 %v28844_v38, %s33299_s16  ;;  %v2236_v40 = vpop.permute.xlu0 %2235  ;;  %v2242_v41 = vpop.permute.xlu1 %2241 }
  0xe1   : > { %v2252_v43 = vsel %vm2251_vm6, %v2236_v40, %v2238_v36  ;;  %v2254_v47 = vsel %vm2251_vm6, %v2240_v37, %v2242_v41 }
  0xe2   : > { %2271 = vmatpush1.msra.mxu0 %v2252_v43 }
  0xe3   : > { %27479 = vmatmul.mubr.msk.f32.vlgmr.msra.gmra.mrb[0].mxu0 %vm342_vm1, %v27478_v42 }
  0xe4   : > { %4570 = vrot.lane.b32.xlu0 %v28637_v1, %s33274_s23  ;;  %4572 = vrot.lane.b32.xlu1 %v28647_v3, %s33274_s23  ;;  %v2244_v44 = vpop.permute.xlu0 %2243  ;;  %v2246_v45 = vpop.permute.xlu1 %2245 }
  0xe5   : > { %v2255_v46 = vsel %vm2251_vm6, %v2242_v41, %v2244_v44  ;;  %2476 = vmatprep.mubr.f32.mxu0 %v28547_v0  ;;  %v2256_v52 = vsel %vm2251_vm6, %v2244_v44, %v2246_v45 }
  0xe6   : > { %2341 = vmatprep.subr.mxu1 %v2255_v46 }
  0xe7   : > { %2342 = vmatpush1.msra.mxu1 %v2254_v47 }
  0xe8   : > { %4568 = vrot.lane.b32.xlu0 %v28640_v2, %s33274_s23  ;;  %4574 = vrot.lane.b32.xlu1 %v28650_v4, %s33274_s23  ;;  %v2248_v48 = vpop.permute.xlu0 %2247  ;;  %v2250_v49 = vpop.permute.xlu1 %2249 }
  0xe9   : > { %2483 = vmatprep.subr.mxu1 %v2250_v49  ;;  %27480 = vmatmul.mubr.msk.f32.vlgmr.msra.gmra.mrb[0].mxu1 %vm342_vm1, %v27478_v42  ;;  %v2257_v50 = vsel %vm2251_vm6, %v2246_v45, %v2248_v48  ;;  %v2258_v51 = vsel %vm2251_vm6, %v2248_v48, %v2250_v49 }
  0xea   : > { %2412 = vmatprep.subr.mxu0 %v2257_v50  ;;  %2484 = vmatpush1.msra.mxu1 %v2258_v51 }
  0xeb   : > { %2413 = vmatpush1.msra.mxu0 %v2256_v52  ;;  %2547 = vmatprep.mubr.f32.mxu1 %v28547_v0 }
  0xec   : > { %4576 = vrot.lane.b32.xlu0 %v28657_v5, %s33274_s23  ;;  %4578 = vrot.lane.b32.xlu1 %v28660_v6, %s33274_s23  ;;  %v2567_v53 = vpop.permute.xlu0 %2566  ;;  %v2569_v54 = vpop.permute.xlu1 %2568 }
  0xed   : > { %v2582_v55 = vsel %vm2580_vm7, %v2567_v53, %v2569_v54  ;;  %27481 = vmatmul.mubr.msk.f32.vlgmr.msra.gmra.mrb[2].mxu0 %vm342_vm1, %v27478_v42  ;;  %27482 = vmatmul.mubr.msk.f32.vlgmr.msra.gmra.mrb[2].mxu1 %vm342_vm1, %v27478_v42 }
  0xee   : > { %2599 = vmatprep.subr.mxu0 %v2582_v55  ;;  %2734 = vmatprep.mubr.f32.mxu1 %v28547_v0 }
  0xef   : > { %2663 = vmatprep.mubr.f32.mxu0 %v28547_v0 }
  0xf0   : > { %4580 = vrot.lane.b32.xlu0 %v28667_v7, %s33274_s23  ;;  %4582 = vrot.lane.b32.xlu1 %v28670_v8, %s33274_s23  ;;  %v2565_v56 = vpop.permute.xlu0 %2564  ;;  %v2571_v57 = vpop.permute.xlu1 %2570 }
  0xf1   : > { %v2581_v59 = vsel %vm2580_vm7, %v2565_v56, %v2567_v53  ;;  %v2583_v63 = vsel %vm2580_vm7, %v2569_v54, %v2571_v57 }
  0xf2   : > { %2600 = vmatpush1.msra.mxu0 %v2581_v59 }
  0xf3   : > { %27484 = vmatmul.mubr.msk.f32.vlgmr.msra.gmra.mrb[0].mxu0 %vm342_vm1, %v27483_v58 }
  0xf4   : > { %4584 = vrot.lane.b32.xlu0 %v28844_v38, %s33274_s23  ;;  %4902 = vrot.lane.b32.xlu1 %v28637_v1, %s33301_s15  ;;  %v2573_v60 = vpop.permute.xlu0 %2572  ;;  %v2575_v61 = vpop.permute.xlu1 %2574 }
  0xf5   : > { %v2584_v62 = vsel %vm2580_vm7, %v2571_v57, %v2573_v60  ;;  %2805 = vmatprep.mubr.f32.mxu0 %v28547_v0  ;;  %v2585_v13 = vsel %vm2580_vm7, %v2573_v60, %v2575_v61 }
  0xf6   : > { %2670 = vmatprep.subr.mxu1 %v2584_v62 }
  0xf7   : > { %2671 = vmatpush1.msra.mxu1 %v2583_v63 }
  0xf8   : > { %4904 = vrot.lane.b32.xlu0 %v28647_v3, %s33301_s15  ;;  %4900 = vrot.lane.b32.xlu1 %v28640_v2, %s33301_s15  ;;  %v2577_v9 = vpop.permute.xlu0 %2576  ;;  %v2579_v10 = vpop.permute.xlu1 %2578 }
  0xf9   : > { %2812 = vmatprep.subr.mxu1 %v2579_v10  ;;  %27485 = vmatmul.mubr.msk.f32.vlgmr.msra.gmra.mrb[0].mxu1 %vm342_vm1, %v27483_v58  ;;  %v2586_v11 = vsel %vm2580_vm7, %v2575_v61, %v2577_v9  ;;  %v2587_v12 = vsel %vm2580_vm7, %v2577_v9, %v2579_v10 }
  0xfa   : > { %2741 = vmatprep.subr.mxu0 %v2586_v11  ;;  %2813 = vmatpush1.msra.mxu1 %v2587_v12  ;;  %v27503_v12 = vld [vmem:[%s33374_s1 + $0x58] sm:$0xff] }
  0xfb   : > { %2742 = vmatpush1.msra.mxu0 %v2585_v13  ;;  %2876 = vmatprep.mubr.f32.mxu1 %v28547_v0  ;;  %v28524_v13 = vld [vmem:[%s28630_s29 + $0x30] sm:$0xff] }
  0xfc   : > { %4906 = vrot.lane.b32.xlu0 %v28650_v4, %s33301_s15  ;;  %4908 = vrot.lane.b32.xlu1 %v28657_v5, %s33301_s15  ;;  %v2896_v14 = vpop.permute.xlu0 %2895  ;;  %v2898_v15 = vpop.permute.xlu1 %2897 }
  0xfd   : > { %v2911_v16 = vsel %vm2909_vm8, %v2896_v14, %v2898_v15  ;;  %27486 = vmatmul.mubr.msk.f32.vlgmr.msra.gmra.mrb[2].mxu0 %vm342_vm1, %v27483_v58  ;;  %27487 = vmatmul.mubr.msk.f32.vlgmr.msra.gmra.mrb[2].mxu1 %vm342_vm1, %v27483_v58 }
  0xfe   : > { %2928 = vmatprep.subr.mxu0 %v2911_v16  ;;  %3063 = vmatprep.mubr.f32.mxu1 %v28547_v0 }
  0xff   : > { %2992 = vmatprep.mubr.f32.mxu0 %v28547_v0 }
 0x100   : > { %4910 = vrot.lane.b32.xlu0 %v28660_v6, %s33301_s15  ;;  %4912 = vrot.lane.b32.xlu1 %v28667_v7, %s33301_s15  ;;  %v2894_v17 = vpop.permute.xlu0 %2893  ;;  %v2900_v18 = vpop.permute.xlu1 %2899 }
 0x101   : > { %v2910_v20 = vsel %vm2909_vm8, %v2894_v17, %v2896_v14  ;;  %v2912_v24 = vsel %vm2909_vm8, %v2898_v15, %v2900_v18  ;;  %v28525_v14 = vld [vmem:[%s28630_s29 + $0x38] sm:$0xff]  ;;  %v29160_v15 = vld [vmem:[%s28630_s29 + $0x10] sm:$0xff] }
 0x102   : > { %2929 = vmatpush1.msra.mxu0 %v2910_v20  ;;  %v29171_v20 = vld [vmem:[%s28630_s29 + $0x18] sm:$0xff] }
 0x103   : > { %27489 = vmatmul.mubr.msk.f32.vlgmr.msra.gmra.mrb[0].mxu0 %vm342_vm1, %v27488_v19 }
 0x104   : > { %4914 = vrot.lane.b32.xlu0 %v28670_v8, %s33301_s15  ;;  %4916 = vrot.lane.b32.xlu1 %v28844_v38, %s33301_s15  ;;  %v2902_v21 = vpop.permute.xlu0 %2901 }
 0x105   : > { %v2904_v22 = vpop.permute.xlu1 %2903  ;;  %v2913_v23 = vsel %vm2909_vm8, %v2900_v18, %v2902_v21  ;;  %3134 = vmatprep.mubr.f32.mxu0 %v28547_v0 }
 0x106   : > { %2999 = vmatprep.subr.mxu1 %v2913_v23  ;;  %v2914_v29 = vsel %vm2909_vm8, %v2902_v21, %v2904_v22  ;;  %v29174_v21 = vld [vmem:[%s28630_s29 + $0x8] sm:$0xff] }
 0x107   : > { %3000 = vmatpush1.msra.mxu1 %v2912_v24 }
 0x108   : > { %5234 = vrot.lane.b32.xlu0 %v28637_v1, %s33272_s20  ;;  %5236 = vrot.lane.b32.xlu1 %v28647_v3, %s33272_s20  ;;  %v2906_v25 = vpop.permute.xlu0 %2905 }
 0x109   : > { %v2908_v26 = vpop.permute.xlu1 %2907  ;;  %27490 = vmatmul.mubr.msk.f32.vlgmr.msra.gmra.mrb[0].mxu1 %vm342_vm1, %v27488_v19  ;;  %v2915_v27 = vsel %vm2909_vm8, %v2904_v22, %v2906_v25 }
 0x10a   : > { %3141 = vmatprep.subr.mxu1 %v2908_v26  ;;  %3070 = vmatprep.subr.mxu0 %v2915_v27  ;;  %v2916_v28 = vsel %vm2909_vm8, %v2906_v25, %v2908_v26  ;;  %v29184_v26 = vld [vmem:[%s28630_s29 + $0x20] sm:$0xff]  ;;  %v29187_v27 = vld [vmem:[%s28630_s29 + $0x28] sm:$0xff] }
 0x10b   : > { %3142 = vmatpush1.msra.mxu1 %v2916_v28  ;;  %3071 = vmatpush1.msra.mxu0 %v2914_v29 }
 0x10c   : > { %5232 = vrot.lane.b32.xlu0 %v28640_v2, %s33272_s20  ;;  %5238 = vrot.lane.b32.xlu1 %v28650_v4, %s33272_s20  ;;  %v3243_v30 = vpop.permute.xlu0 %3242 }
 0x10d   : > { %v3245_v31 = vpop.permute.xlu1 %3244  ;;  %27491 = vmatmul.mubr.msk.f32.vlgmr.msra.gmra.mrb[2].mxu0 %vm342_vm1, %v27488_v19  ;;  %3205 = vmatprep.mubr.f32.mxu1 %v28547_v0 }
 0x10e   : > { %v3260_v32 = vsel %vm3258_vm9, %v3243_v30, %v3245_v31  ;;  %27492 = vmatmul.mubr.msk.f32.vlgmr.msra.gmra.mrb[2].mxu1 %vm342_vm1, %v27488_v19  ;;  %3342 = vmatprep.mubr.f32.mxu0 %v28547_v0 }
 0x10f   : > { %3278 = vmatprep.subr.mxu0 %v3260_v32  ;;  %3413 = vmatprep.mubr.f32.mxu1 %v28547_v0  ;;  %v29198_v32 = vld [vmem:[%s28630_s29 + $0x30] sm:$0xff] }
 0x110   : > { %5240 = vrot.lane.b32.xlu0 %v28657_v5, %s33272_s20  ;;  %5242 = vrot.lane.b32.xlu1 %v28660_v6, %s33272_s20  ;;  %v3241_v33 = vpop.permute.xlu0 %3240 }
 0x111   : > { %v3259_v35 = vsel %vm3258_vm9, %v3241_v33, %v3243_v30  ;;  %v3247_v36 = vpop.permute.xlu1 %3246  ;;  %v29201_v33 = vld [vmem:[%s28630_s29 + $0x38] sm:$0xff] }
 0x112   : > { %3279 = vmatpush1.msra.mxu0 %v3259_v35  ;;  %v3261_v41 = vsel %vm3258_vm9, %v3245_v31, %v3247_v36 }
 0x113   : > { %27494 = vmatmul.mubr.msk.f32.vlgmr.msra.gmra.mrb[0].mxu0 %vm342_vm1, %v27493_v34 }
 0x114   : > { %5244 = vrot.lane.b32.xlu0 %v28667_v7, %s33272_s20  ;;  %5246 = vrot.lane.b32.xlu1 %v28670_v8, %s33272_s20 }
 0x115   : > { %v3249_v37 = vpop.permute.xlu0 %3248  ;;  %3484 = vmatprep.mubr.f32.mxu0 %v28547_v0 }
 0x116   : > { %v3251_v39 = vpop.permute.xlu1 %3250  ;;  %v3262_v40 = vsel %vm3258_vm9, %v3247_v36, %v3249_v37 }
 0x117   : > { %3349 = vmatprep.subr.mxu1 %v3262_v40  ;;  %v3263_v45 = vsel %vm3258_vm9, %v3249_v37, %v3251_v39  ;;  %v29215_v40 = vld [vmem:[%s28630_s29 + $0x48] sm:$0xff] }
 0x118   : > { %5248 = vrot.lane.b32.xlu0 %v28844_v38, %s33272_s20  ;;  %5565 = vrot.lane.b32.xlu1 %v28637_v1, %s33303_s28 }
 0x119   : > { %3350 = vmatpush1.msra.mxu1 %v3261_v41 }
 0x11a   : > { %v3253_v42 = vpop.permute.xlu0 %3252  ;;  %v3255_v43 = vpop.permute.xlu1 %3254  ;;  %27495 = vmatmul.mubr.msk.f32.vlgmr.msra.gmra.mrb[0].mxu1 %vm342_vm1, %v27493_v34 }
 0x11b   : > { %v3264_v44 = vsel %vm3258_vm9, %v3251_v39, %v3253_v42  ;;  %3555 = vmatprep.mubr.f32.mxu1 %v28547_v0  ;;  %v3265_v49 = vsel %vm3258_vm9, %v3253_v42, %v3255_v43  ;;  %v27508_v39 = vld [vmem:[%s33374_s1 + $0x60] sm:$0xff] }
 0x11c   : > { %5567 = vrot.lane.b32.xlu0 %v28647_v3, %s33303_s28  ;;  %5563 = vrot.lane.b32.xlu1 %v28640_v2, %s33303_s28 }
 0x11d   : > { %3420 = vmatprep.subr.mxu0 %v3264_v44 }
 0x11e   : > { %3421 = vmatpush1.msra.mxu0 %v3263_v45  ;;  %v3257_v46 = vpop.permute.xlu0 %3256  ;;  %v3575_v47 = vpop.permute.xlu1 %3574 }
 0x11f   : > { %v3266_v48 = vsel %vm3258_vm9, %v3255_v43, %v3257_v46  ;;  %27496 = vmatmul.mubr.msk.f32.vlgmr.msra.gmra.mrb[2].mxu0 %vm342_vm1, %v27493_v34 }
 0x120   : > { %5569 = vrot.lane.b32.xlu0 %v28650_v4, %s33303_s28  ;;  %5571 = vrot.lane.b32.xlu1 %v28657_v5, %s33303_s28  ;;  %v27498_v5 = vld [vmem:[%s33374_s1 + $0x50] sm:$0xff] }
 0x121   : > { %3491 = vmatprep.subr.mxu1 %v3266_v48  ;;  %3674 = vmatprep.mubr.f32.mxu0 %v28547_v0 }
 0x122   : > { %3492 = vmatpush1.msra.mxu1 %v3265_v49  ;;  %v3577_v50 = vpop.permute.xlu0 %3576  ;;  %v3573_v51 = vpop.permute.xlu1 %3572 }
 0x123   : > { %v3591_v52 = vsel %vm3590_vm10, %v3573_v51, %v3575_v47  ;;  %v3592_v53 = vsel %vm3590_vm10, %v3575_v47, %v3577_v50  ;;  %27497 = vmatmul.mubr.msk.f32.vlgmr.msra.gmra.mrb[2].mxu1 %vm342_vm1, %v27493_v34 }
 0x124   : > { %5573 = vrot.lane.b32.xlu0 %v28660_v6, %s33303_s28  ;;  %5575 = vrot.lane.b32.xlu1 %v28667_v7, %s33303_s28 }
 0x125   : > { %3610 = vmatprep.subr.mxu0 %v3592_v53  ;;  %3745 = vmatprep.mubr.f32.mxu1 %v28547_v0 }
 0x126   : > { %3611 = vmatpush1.msra.mxu0 %v3591_v52  ;;  %v3579_v54 = vpop.permute.xlu0 %3578  ;;  %v3581_v55 = vpop.permute.xlu1 %3580 }
 0x127   : > { %v3594_v56 = vsel %vm3590_vm10, %v3579_v54, %v3581_v55  ;;  %v3593_v57 = vsel %vm3590_vm10, %v3577_v50, %v3579_v54  ;;  %27499 = vmatmul.mubr.msk.f32.vlgmr.msra.gmra.mrb[0].mxu0 %vm342_vm1, %v27498_v5 }
 0x128   : > { %5577 = vrot.lane.b32.xlu0 %v28670_v8, %s33303_s28  ;;  %5579 = vrot.lane.b32.xlu1 %v28844_v38, %s33303_s28 }
 0x129   : > { %3681 = vmatprep.subr.mxu1 %v3594_v56  ;;  %3816 = vmatprep.mubr.f32.mxu0 %v28547_v0 }
 0x12a   : > { %3682 = vmatpush1.msra.mxu1 %v3593_v57  ;;  %v3583_v6 = vpop.permute.xlu0 %3582  ;;  %v3585_v7 = vpop.permute.xlu1 %3584 }
 0x12b   : > { %v3596_v58 = vsel %vm3590_vm10, %v3583_v6, %v3585_v7  ;;  %v3595_v59 = vsel %vm3590_vm10, %v3581_v55, %v3583_v6  ;;  %27500 = vmatmul.mubr.msk.f32.vlgmr.msra.gmra.mrb[0].mxu1 %vm342_vm1, %v27498_v5  ;;  %v27513_v6 = vld [vmem:[%s33374_s1 + $0x68] sm:$0xff] }
 0x12c   : > { %5897 = vrot.lane.b32.xlu0 %v28637_v1, %s33270_s21  ;;  %5899 = vrot.lane.b32.xlu1 %v28647_v3, %s33270_s21 }
 0x12d   : > { %3752 = vmatprep.subr.mxu0 %v3596_v58  ;;  %3887 = vmatprep.mubr.f32.mxu1 %v28547_v0  ;;  %v29141_v0 = vld [vmem:[#allocation2] sm:$0xff] }
 0x12e   : > { %3753 = vmatpush1.msra.mxu0 %v3595_v59  ;;  %v3587_v8 = vpop.permute.xlu0 %3586  ;;  %v3589_v60 = vpop.permute.xlu1 %3588 }
 0x12f   : > { %v3598_v61 = vsel %vm3590_vm10, %v3587_v8, %v3589_v60  ;;  %v3597_v62 = vsel %vm3590_vm10, %v3585_v7, %v3587_v8  ;;  %27501 = vmatmul.mubr.msk.f32.vlgmr.msra.gmra.mrb[2].mxu0 %vm342_vm1, %v27498_v5 }
 0x130   : > { %5895 = vrot.lane.b32.xlu0 %v28640_v2, %s33270_s21  ;;  %5901 = vrot.lane.b32.xlu1 %v28650_v4, %s33270_s21  ;;  %v28522_v2 = vld [vmem:[%s28630_s29 + $0x20] sm:$0xff]  ;;  %v28523_v4 = vld [vmem:[%s28630_s29 + $0x28] sm:$0xff] }
 0x131   : > { %3823 = vmatprep.subr.mxu1 %v3598_v61  ;;  %4006 = vmatprep.mubr.f32.mxu0 %v29141_v0 }
 0x132   : > { %3824 = vmatpush1.msra.mxu1 %v3597_v62  ;;  %v3907_v1 = vpop.permute.xlu0 %3906  ;;  %v3909_v3 = vpop.permute.xlu1 %3908 }
 0x133   : > { %v3924_v63 = vsel %vm33282_vm11, %v3907_v1, %v3909_v3  ;;  %27502 = vmatmul.mubr.msk.f32.vlgmr.msra.gmra.mrb[2].mxu1 %vm342_vm1, %v27498_v5 }
 0x134   : > { %5903 = vrot.lane.b32.xlu0 %v28522_v2, %s33270_s21  ;;  %5905 = vrot.lane.b32.xlu1 %v28523_v4, %s33270_s21 }
 0x135   : > { %3942 = vmatprep.subr.mxu0 %v3924_v63  ;;  %4077 = vmatprep.mubr.f32.mxu1 %v29141_v0 }
 0x136   : > { %v3905_v9 = vpop.permute.xlu0 %3904  ;;  %v3911_v10 = vpop.permute.xlu1 %3910 }
 0x137   : > { %v3923_v11 = vsel %vm33282_vm11, %v3905_v9, %v3907_v1  ;;  %v3925_v19 = vsel %vm33282_vm11, %v3909_v3, %v3911_v10 }
 0x138   : > { %5907 = vrot.lane.b32.xlu0 %v28524_v13, %s33270_s21  ;;  %5909 = vrot.lane.b32.xlu1 %v28525_v14, %s33270_s21 }
 0x139   : > { %3943 = vmatpush1.msra.mxu0 %v3923_v11 }
 0x13a   : > { %v3913_v16 = vpop.permute.xlu0 %3912  ;;  %v3915_v17 = vpop.permute.xlu1 %3914  ;;  %27504 = vmatmul.mubr.msk.f32.vlgmr.msra.gmra.mrb[0].mxu0 %vm342_vm1, %v27503_v12 }
 0x13b   : > { %v3926_v18 = vsel %vm33282_vm11, %v3911_v10, %v3913_v16  ;;  %4148 = vmatprep.mubr.f32.mxu0 %v29141_v0  ;;  %v3927_v25 = vsel %vm33282_vm11, %v3913_v16, %v3915_v17 }
 0x13c   : > { %5911 = vrot.lane.b32.xlu0 %v28844_v38, %s33270_s21  ;;  %6247 = vrot.lane.b32.xlu1 %v29160_v15, %s33210_s19 }
 0x13d   : > { %4013 = vmatprep.subr.mxu1 %v3926_v18  ;;  %v29296_v18 = vld [vmem:[%s28630_s29 + $0x40] sm:$0xff] }
 0x13e   : > { %4014 = vmatpush1.msra.mxu1 %v3925_v19  ;;  %v3917_v22 = vpop.permute.xlu0 %3916  ;;  %v3919_v23 = vpop.permute.xlu1 %3918 }
 0x13f   : > { %v3928_v24 = vsel %vm33282_vm11, %v3915_v17, %v3917_v22  ;;  %27505 = vmatmul.mubr.msk.f32.vlgmr.msra.gmra.mrb[0].mxu1 %vm342_vm1, %v27503_v12  ;;  %v3929_v31 = vsel %vm33282_vm11, %v3917_v22, %v3919_v23 }
 0x140   : > { %6249 = vrot.lane.b32.xlu0 %v29171_v20, %s33210_s19  ;;  %6245 = vrot.lane.b32.xlu1 %v29174_v21, %s33210_s19 }
 0x141   : > { %4084 = vmatprep.subr.mxu0 %v3928_v24  ;;  %4219 = vmatprep.mubr.f32.mxu1 %v29141_v0 }
 0x142   : > { %4085 = vmatpush1.msra.mxu0 %v3927_v25  ;;  %v3921_v28 = vpop.permute.xlu0 %3920  ;;  %v4239_v29 = vpop.permute.xlu1 %4238 }
 0x143   : > { %v3930_v30 = vsel %vm33282_vm11, %v3919_v23, %v3921_v28  ;;  %27506 = vmatmul.mubr.msk.f32.vlgmr.msra.gmra.mrb[2].mxu0 %vm342_vm1, %v27503_v12 }
 0x144   : > { %6251 = vrot.lane.b32.xlu0 %v29184_v26, %s33210_s19  ;;  %6253 = vrot.lane.b32.xlu1 %v29187_v27, %s33210_s19 }
 0x145   : > { %4155 = vmatprep.subr.mxu1 %v3930_v30  ;;  %4338 = vmatprep.mubr.f32.mxu0 %v29141_v0 }
 0x146   : > { %4156 = vmatpush1.msra.mxu1 %v3929_v31  ;;  %v4241_v34 = vpop.permute.xlu0 %4240  ;;  %v4237_v35 = vpop.permute.xlu1 %4236 }
 0x147   : > { %v4255_v36 = vsel %vm33280_vm12, %v4237_v35, %v4239_v29  ;;  %v4256_v37 = vsel %vm33280_vm12, %v4239_v29, %v4241_v34  ;;  %27507 = vmatmul.mubr.msk.f32.vlgmr.msra.gmra.mrb[2].mxu1 %vm342_vm1, %v27503_v12  ;;  %v27518_v12 = vld [vmem:[%s33374_s1 + $0x70] sm:$0xff] }
 0x148   : > { %6255 = vrot.lane.b32.xlu0 %v29198_v32, %s33210_s19  ;;  %6257 = vrot.lane.b32.xlu1 %v29201_v33, %s33210_s19 }
 0x149   : > { %4274 = vmatprep.subr.mxu0 %v4256_v37  ;;  %4409 = vmatprep.mubr.f32.mxu1 %v29141_v0 }
 0x14a   : > { %4275 = vmatpush1.msra.mxu0 %v4255_v36  ;;  %v4243_v41 = vpop.permute.xlu0 %4242  ;;  %v4245_v42 = vpop.permute.xlu1 %4244 }
 0x14b   : > { %v4258_v43 = vsel %vm33280_vm12, %v4243_v41, %v4245_v42  ;;  %v4257_v44 = vsel %vm33280_vm12, %v4241_v34, %v4243_v41  ;;  %27509 = vmatmul.mubr.msk.f32.vlgmr.msra.gmra.mrb[0].mxu0 %vm342_vm1, %v27508_v39  ;;  %v27523_v41 = vld [vmem:[%s33374_s1 + $0x78] sm:$0xff] }
 0x14c   : > { %6259 = vrot.lane.b32.xlu0 %v28844_v38, %s33210_s19  ;;  %6261 = vrot.lane.b32.xlu1 %v29215_v40, %s33210_s19  ;;  %s33214_s19 = smov 54  }
 0x14d   : > { %4345 = vmatprep.subr.mxu1 %v4258_v43  ;;  %4480 = vmatprep.mubr.f32.mxu0 %v29141_v0 }
 0x14e   : > { %4346 = vmatpush1.msra.mxu1 %v4257_v44  ;;  %v4247_v45 = vpop.permute.xlu0 %4246  ;;  %v4249_v46 = vpop.permute.xlu1 %4248 }
 0x14f   : > { %v4260_v47 = vsel %vm33280_vm12, %v4247_v45, %v4249_v46  ;;  %v4259_v48 = vsel %vm33280_vm12, %v4245_v42, %v4247_v45  ;;  %27510 = vmatmul.mubr.msk.f32.vlgmr.msra.gmra.mrb[0].mxu1 %vm342_vm1, %v27508_v39 }
 0x150   : > { %6579 = vrot.lane.b32.xlu0 %v29160_v15, %s33212_s26  ;;  %6581 = vrot.lane.b32.xlu1 %v29171_v20, %s33212_s26 }
 0x151   : > { %4416 = vmatprep.subr.mxu0 %v4260_v47  ;;  %4551 = vmatprep.mubr.f32.mxu1 %v29141_v0 }
 0x152   : > { %4417 = vmatpush1.msra.mxu0 %v4259_v48  ;;  %v4251_v49 = vpop.permute.xlu0 %4250  ;;  %v4253_v50 = vpop.permute.xlu1 %4252 }
 0x153   : > { %v4262_v51 = vsel %vm33280_vm12, %v4251_v49, %v4253_v50  ;;  %v4261_v52 = vsel %vm33280_vm12, %v4249_v46, %v4251_v49  ;;  %27511 = vmatmul.mubr.msk.f32.vlgmr.msra.gmra.mrb[2].mxu0 %vm342_vm1, %v27508_v39 }
 0x154   : > { %6577 = vrot.lane.b32.xlu0 %v29174_v21, %s33212_s26  ;;  %6583 = vrot.lane.b32.xlu1 %v29184_v26, %s33212_s26 }
 0x155   : > { %4487 = vmatprep.subr.mxu1 %v4262_v51  ;;  %4670 = vmatprep.mubr.f32.mxu0 %v29141_v0 }
 0x156   : > { %4488 = vmatpush1.msra.mxu1 %v4261_v52  ;;  %v4571_v53 = vpop.permute.xlu0 %4570  ;;  %v4573_v5 = vpop.permute.xlu1 %4572 }
 0x157   : > { %v4588_v54 = vsel %vm33281_vm13, %v4571_v53, %v4573_v5  ;;  %27512 = vmatmul.mubr.msk.f32.vlgmr.msra.gmra.mrb[2].mxu1 %vm342_vm1, %v27508_v39 }
 0x158   : > { %6585 = vrot.lane.b32.xlu0 %v29187_v27, %s33212_s26  ;;  %6587 = vrot.lane.b32.xlu1 %v29198_v32, %s33212_s26 }
 0x159   : > { %4606 = vmatprep.subr.mxu0 %v4588_v54  ;;  %4741 = vmatprep.mubr.f32.mxu1 %v29141_v0 }
 0x15a   : > { %v4569_v55 = vpop.permute.xlu0 %4568  ;;  %v4575_v56 = vpop.permute.xlu1 %4574 }
 0x15b   : > { %v4587_v57 = vsel %vm33281_vm13, %v4569_v55, %v4571_v53  ;;  %v4589_v8 = vsel %vm33281_vm13, %v4573_v5, %v4575_v56 }
 0x15c   : > { %6589 = vrot.lane.b32.xlu0 %v29201_v33, %s33212_s26  ;;  %6591 = vrot.lane.b32.xlu1 %v28844_v38, %s33212_s26 }
 0x15d   : > { %4607 = vmatpush1.msra.mxu0 %v4587_v57  ;;  %v27528_v57 = vld [vmem:[%s33374_s1 + $0x80] sm:$0xff] }
 0x15e   : > { %v4577_v7 = vpop.permute.xlu0 %4576  ;;  %v4579_v58 = vpop.permute.xlu1 %4578  ;;  %27514 = vmatmul.mubr.msk.f32.vlgmr.msra.gmra.mrb[0].mxu0 %vm342_vm1, %v27513_v6 }
 0x15f   : > { %v4590_v59 = vsel %vm33281_vm13, %v4575_v56, %v4577_v7  ;;  %4812 = vmatprep.mubr.f32.mxu0 %v29141_v0  ;;  %v4591_v62 = vsel %vm33281_vm13, %v4577_v7, %v4579_v58 }
 0x160   : > { %6593 = vrot.lane.b32.xlu0 %v29215_v40, %s33212_s26  ;;  %6911 = vrot.lane.b32.xlu1 %v29160_v15, %s33214_s19  ;;  %s33216_s26 = smov 46  }
 0x161   : > { %4677 = vmatprep.subr.mxu1 %v4590_v59 }
 0x162   : > { %4678 = vmatpush1.msra.mxu1 %v4589_v8  ;;  %v4581_v38 = vpop.permute.xlu0 %4580  ;;  %v4583_v60 = vpop.permute.xlu1 %4582 }
 0x163   : > { %v4592_v61 = vsel %vm33281_vm13, %v4579_v58, %v4581_v38  ;;  %27515 = vmatmul.mubr.msk.f32.vlgmr.msra.gmra.mrb[0].mxu1 %vm342_vm1, %v27513_v6  ;;  %v4593_v2 = vsel %vm33281_vm13, %v4581_v38, %v4583_v60 }
 0x164   : > { %6913 = vrot.lane.b32.xlu0 %v29171_v20, %s33214_s19  ;;  %6909 = vrot.lane.b32.xlu1 %v29174_v21, %s33214_s19 }
 0x165   : > { %4748 = vmatprep.subr.mxu0 %v4592_v61  ;;  %4883 = vmatprep.mubr.f32.mxu1 %v29141_v0 }
 0x166   : > { %4749 = vmatpush1.msra.mxu0 %v4591_v62  ;;  %v4585_v1 = vpop.permute.xlu0 %4584  ;;  %v4903_v3 = vpop.permute.xlu1 %4902 }
 0x167   : > { %v4594_v63 = vsel %vm33281_vm13, %v4583_v60, %v4585_v1  ;;  %27516 = vmatmul.mubr.msk.f32.vlgmr.msra.gmra.mrb[2].mxu0 %vm342_vm1, %v27513_v6 }
 0x168   : > { %6915 = vrot.lane.b32.xlu0 %v29184_v26, %s33214_s19  ;;  %6917 = vrot.lane.b32.xlu1 %v29187_v27, %s33214_s19 }
 0x169   : > { %4819 = vmatprep.subr.mxu1 %v4594_v63  ;;  %5002 = vmatprep.mubr.f32.mxu0 %v29141_v0 }
 0x16a   : > { %4820 = vmatpush1.msra.mxu1 %v4593_v2  ;;  %v4905_v4 = vpop.permute.xlu0 %4904  ;;  %v4901_v9 = vpop.permute.xlu1 %4900 }
 0x16b   : > { %v4919_v10 = vsel %vm33218_vm14, %v4901_v9, %v4903_v3  ;;  %v4920_v11 = vsel %vm33218_vm14, %v4903_v3, %v4905_v4  ;;  %27517 = vmatmul.mubr.msk.f32.vlgmr.msra.gmra.mrb[2].mxu1 %vm342_vm1, %v27513_v6 }
 0x16c   : > { %6919 = vrot.lane.b32.xlu0 %v29198_v32, %s33214_s19  ;;  %6921 = vrot.lane.b32.xlu1 %v29201_v33, %s33214_s19 }
 0x16d   : > { %4938 = vmatprep.subr.mxu0 %v4920_v11  ;;  %5073 = vmatprep.mubr.f32.mxu1 %v29141_v0 }
 0x16e   : > { %4939 = vmatpush1.msra.mxu0 %v4919_v10  ;;  %v4907_v13 = vpop.permute.xlu0 %4906  ;;  %v4909_v14 = vpop.permute.xlu1 %4908 }
 0x16f   : > { %v4922_v16 = vsel %vm33218_vm14, %v4907_v13, %v4909_v14  ;;  %v4921_v17 = vsel %vm33218_vm14, %v4905_v4, %v4907_v13  ;;  %27519 = vmatmul.mubr.msk.f32.vlgmr.msra.gmra.mrb[0].mxu0 %vm342_vm1, %v27518_v12  ;;  %v27533_v13 = vld [vmem:[%s33374_s1 + $0x88] sm:$0xff] }
 0x170   : > { %6923 = vrot.lane.b32.xlu0 %v29296_v18, %s33214_s19  ;;  %6925 = vrot.lane.b32.xlu1 %v29215_v40, %s33214_s19  ;;  %s33219_s19 = smov 45  }
 0x171   : > { %5009 = vmatprep.subr.mxu1 %v4922_v16  ;;  %5144 = vmatprep.mubr.f32.mxu0 %v29141_v0 }
 0x172   : > { %5010 = vmatpush1.msra.mxu1 %v4921_v17  ;;  %v4911_v19 = vpop.permute.xlu0 %4910  ;;  %v4913_v22 = vpop.permute.xlu1 %4912 }
 0x173   : > { %v4924_v23 = vsel %vm33218_vm14, %v4911_v19, %v4913_v22  ;;  %v4923_v24 = vsel %vm33218_vm14, %v4909_v14, %v4911_v19  ;;  %27520 = vmatmul.mubr.msk.f32.vlgmr.msra.gmra.mrb[0].mxu1 %vm342_vm1, %v27518_v12 }
 0x174   : > { %7243 = vrot.lane.b32.xlu0 %v29160_v15, %s33216_s26  ;;  %7245 = vrot.lane.b32.xlu1 %v29171_v20, %s33216_s26 }
 0x175   : > { %5080 = vmatprep.subr.mxu0 %v4924_v23  ;;  %5215 = vmatprep.mubr.f32.mxu1 %v29141_v0 }
 0x176   : > { %5081 = vmatpush1.msra.mxu0 %v4923_v24  ;;  %v4915_v25 = vpop.permute.xlu0 %4914  ;;  %v4917_v28 = vpop.permute.xlu1 %4916 }
 0x177   : > { %v4926_v29 = vsel %vm33218_vm14, %v4915_v25, %v4917_v28  ;;  %v4925_v30 = vsel %vm33218_vm14, %v4913_v22, %v4915_v25  ;;  %27521 = vmatmul.mubr.msk.f32.vlgmr.msra.gmra.mrb[2].mxu0 %vm342_vm1, %v27518_v12  ;;  %vm33224_vm14 = vcmask 48128  }
 0x178   : > { %7241 = vrot.lane.b32.xlu0 %v29174_v21, %s33216_s26  ;;  %7247 = vrot.lane.b32.xlu1 %v29184_v26, %s33216_s26 }
 0x179   : > { %5151 = vmatprep.subr.mxu1 %v4926_v29  ;;  %5333 = vmatprep.mubr.f32.mxu0 %v29141_v0 }
 0x17a   : > { %5152 = vmatpush1.msra.mxu1 %v4925_v30  ;;  %v5235_v31 = vpop.permute.xlu0 %5234  ;;  %v5237_v34 = vpop.permute.xlu1 %5236 }
 0x17b   : > { %v5251_v35 = vsel %vm342_vm1, %v5235_v31, %v5237_v34  ;;  %27522 = vmatmul.mubr.msk.f32.vlgmr.msra.gmra.mrb[2].mxu1 %vm342_vm1, %v27518_v12 }
 0x17c   : > { %7249 = vrot.lane.b32.xlu0 %v29187_v27, %s33216_s26  ;;  %7251 = vrot.lane.b32.xlu1 %v29198_v32, %s33216_s26 }
 0x17d   : > { %5269 = vmatprep.subr.mxu0 %v5251_v35  ;;  %5404 = vmatprep.mubr.f32.mxu1 %v29141_v0 }
 0x17e   : > { %v5233_v36 = vpop.permute.xlu0 %5232  ;;  %v5239_v37 = vpop.permute.xlu1 %5238 }
 0x17f   : > { %v5250_v39 = vsel %vm342_vm1, %v5233_v36, %v5235_v31  ;;  %v5252_v45 = vsel %vm342_vm1, %v5237_v34, %v5239_v37 }
 0x180   : > { %7253 = vrot.lane.b32.xlu0 %v29201_v33, %s33216_s26  ;;  %7255 = vrot.lane.b32.xlu1 %v29296_v18, %s33216_s26 }
 0x181   : > { %5270 = vmatpush1.msra.mxu0 %v5250_v39  ;;  %v27538_v39 = vld [vmem:[%s33374_s1 + $0x90] sm:$0xff] }
 0x182   : > { %v5241_v42 = vpop.permute.xlu0 %5240  ;;  %v5243_v43 = vpop.permute.xlu1 %5242  ;;  %27524 = vmatmul.mubr.msk.f32.vlgmr.msra.gmra.mrb[0].mxu0 %vm342_vm1, %v27523_v41 }
 0x183   : > { %v5253_v44 = vsel %vm342_vm1, %v5239_v37, %v5241_v42  ;;  %5475 = vmatprep.mubr.f32.mxu0 %v29141_v0  ;;  %v5254_v49 = vsel %vm342_vm1, %v5241_v42, %v5243_v43 }
 0x184   : > { %7257 = vrot.lane.b32.xlu0 %v29215_v40, %s33216_s26  ;;  %7575 = vrot.lane.b32.xlu1 %v29160_v15, %s33219_s19  ;;  %s33222_s26 = smov 44  }
 0x185   : > { %5340 = vmatprep.subr.mxu1 %v5253_v44 }
 0x186   : > { %5341 = vmatpush1.msra.mxu1 %v5252_v45  ;;  %v5245_v46 = vpop.permute.xlu0 %5244  ;;  %v5247_v47 = vpop.permute.xlu1 %5246 }
 0x187   : > { %v5255_v48 = vsel %vm342_vm1, %v5243_v43, %v5245_v46  ;;  %27525 = vmatmul.mubr.msk.f32.vlgmr.msra.gmra.mrb[0].mxu1 %vm342_vm1, %v27523_v41  ;;  %v5256_v53 = vsel %vm342_vm1, %v5245_v46, %v5247_v47 }
 0x188   : > { %7577 = vrot.lane.b32.xlu0 %v29171_v20, %s33219_s19  ;;  %7573 = vrot.lane.b32.xlu1 %v29174_v21, %s33219_s19 }
 0x189   : > { %5411 = vmatprep.subr.mxu0 %v5255_v48  ;;  %5546 = vmatprep.mubr.f32.mxu1 %v29141_v0 }
 0x18a   : > { %5412 = vmatpush1.msra.mxu0 %v5254_v49  ;;  %v5249_v50 = vpop.permute.xlu0 %5248  ;;  %v5566_v51 = vpop.permute.xlu1 %5565 }
 0x18b   : > { %v5257_v52 = vsel %vm342_vm1, %v5247_v47, %v5249_v50  ;;  %27526 = vmatmul.mubr.msk.f32.vlgmr.msra.gmra.mrb[2].mxu0 %vm342_vm1, %v27523_v41 }
 0x18c   : > { %7579 = vrot.lane.b32.xlu0 %v29184_v26, %s33219_s19  ;;  %7581 = vrot.lane.b32.xlu1 %v29187_v27, %s33219_s19 }
 0x18d   : > { %5482 = vmatprep.subr.mxu1 %v5257_v52  ;;  %5665 = vmatprep.mubr.f32.mxu0 %v29141_v0 }
 0x18e   : > { %5483 = vmatpush1.msra.mxu1 %v5256_v53  ;;  %v5568_v5 = vpop.permute.xlu0 %5567  ;;  %v5564_v54 = vpop.permute.xlu1 %5563 }
 0x18f   : > { %v5582_v55 = vsel %vm33221_vm15, %v5564_v54, %v5566_v51  ;;  %v5583_v56 = vsel %vm33221_vm15, %v5566_v51, %v5568_v5  ;;  %27527 = vmatmul.mubr.msk.f32.vlgmr.msra.gmra.mrb[2].mxu1 %vm342_vm1, %v27523_v41 }
 0x190   : > { %7583 = vrot.lane.b32.xlu0 %v29198_v32, %s33219_s19  ;;  %7585 = vrot.lane.b32.xlu1 %v29201_v33, %s33219_s19 }
 0x191   : > { %5601 = vmatprep.subr.mxu0 %v5583_v56  ;;  %5736 = vmatprep.mubr.f32.mxu1 %v29141_v0 }
 0x192   : > { %5602 = vmatpush1.msra.mxu0 %v5582_v55  ;;  %v5570_v6 = vpop.permute.xlu0 %5569  ;;  %v5572_v7 = vpop.permute.xlu1 %5571 }
 0x193   : > { %v5585_v58 = vsel %vm33221_vm15, %v5570_v6, %v5572_v7  ;;  %v5584_v59 = vsel %vm33221_vm15, %v5568_v5, %v5570_v6  ;;  %27529 = vmatmul.mubr.msk.f32.vlgmr.msra.gmra.mrb[0].mxu0 %vm342_vm1, %v27528_v57  ;;  %v27543_v6 = vld [vmem:[%s33374_s1 + $0x98] sm:$0xff] }
 0x194   : > { %7587 = vrot.lane.b32.xlu0 %v29296_v18, %s33219_s19  ;;  %7589 = vrot.lane.b32.xlu1 %v29215_v40, %s33219_s19  ;;  %s33225_s19 = smov 36  }
 0x195   : > { %5672 = vmatprep.subr.mxu1 %v5585_v58  ;;  %5807 = vmatprep.mubr.f32.mxu0 %v29141_v0 }
 0x196   : > { %5673 = vmatpush1.msra.mxu1 %v5584_v59  ;;  %v5574_v8 = vpop.permute.xlu0 %5573  ;;  %v5576_v38 = vpop.permute.xlu1 %5575 }
 0x197   : > { %v5587_v60 = vsel %vm33221_vm15, %v5574_v8, %v5576_v38  ;;  %v5586_v61 = vsel %vm33221_vm15, %v5572_v7, %v5574_v8  ;;  %27530 = vmatmul.mubr.msk.f32.vlgmr.msra.gmra.mrb[0].mxu1 %vm342_vm1, %v27528_v57 }
 0x198   : > { %7907 = vrot.lane.b32.xlu0 %v29160_v15, %s33222_s26  ;;  %7909 = vrot.lane.b32.xlu1 %v29171_v20, %s33222_s26 }
 0x199   : > { %5743 = vmatprep.subr.mxu0 %v5587_v60  ;;  %5878 = vmatprep.mubr.f32.mxu1 %v29141_v0 }
 0x19a   : > { %5744 = vmatpush1.msra.mxu0 %v5586_v61  ;;  %v5578_v62 = vpop.permute.xlu0 %5577  ;;  %v5580_v1 = vpop.permute.xlu1 %5579 }
 0x19b   : > { %v5589_v3 = vsel %vm33221_vm15, %v5578_v62, %v5580_v1  ;;  %v5588_v63 = vsel %vm33221_vm15, %v5576_v38, %v5578_v62  ;;  %27531 = vmatmul.mubr.msk.f32.vlgmr.msra.gmra.mrb[2].mxu0 %vm342_vm1, %v27528_v57  ;;  %vm33227_vm15 = vcmask 457728  }
 0x19c   : > { %7905 = vrot.lane.b32.xlu0 %v29174_v21, %s33222_s26  ;;  %7911 = vrot.lane.b32.xlu1 %v29184_v26, %s33222_s26 }
 0x19d   : > { %5814 = vmatprep.subr.mxu1 %v5589_v3  ;;  %5997 = vmatprep.mubr.f32.mxu0 %v29141_v0 }
 0x19e   : > { %5815 = vmatpush1.msra.mxu1 %v5588_v63  ;;  %v5898_v2 = vpop.permute.xlu0 %5897  ;;  %v5900_v4 = vpop.permute.xlu1 %5899  ;;  %v28574_v63 = vmov 0  }
 0x19f   : > { %v5915_v9 = vsel %vm33224_vm14, %v5898_v2, %v5900_v4  ;;  %27532 = vmatmul.mubr.msk.f32.vlgmr.msra.gmra.mrb[2].mxu1 %vm342_vm1, %v27528_v57  ;;  %28519 = vset.pattern.permute.xlu0 %v28574_v63 }
 0x1a0   : > { %7913 = vrot.lane.b32.xlu0 %v29187_v27, %s33222_s26  ;;  %7915 = vrot.lane.b32.xlu1 %v29198_v32, %s33222_s26 }
 0x1a1   : > { %5933 = vmatprep.subr.mxu0 %v5915_v9  ;;  %6068 = vmatprep.mubr.f32.mxu1 %v29141_v0 }
 0x1a2   : > { %v5896_v10 = vpop.permute.xlu0 %5895  ;;  %v5902_v11 = vpop.permute.xlu1 %5901  ;;  %28520 = vset.pattern.permute.xlu1 %v28574_v63 }
 0x1a3   : > { %v5914_v12 = vsel %vm33224_vm14, %v5896_v10, %v5898_v2  ;;  %v5916_v19 = vsel %vm33224_vm14, %v5900_v4, %v5902_v11 }
 0x1a4   : > { %7917 = vrot.lane.b32.xlu0 %v29201_v33, %s33222_s26  ;;  %7919 = vrot.lane.b32.xlu1 %v29296_v18, %s33222_s26 }
 0x1a5   : > { %5934 = vmatpush1.msra.mxu0 %v5914_v12 }
 0x1a6   : > { %v5904_v14 = vpop.permute.xlu0 %5903  ;;  %v5906_v16 = vpop.permute.xlu1 %5905  ;;  %27534 = vmatmul.mubr.msk.f32.vlgmr.msra.gmra.mrb[0].mxu0 %vm342_vm1, %v27533_v13 }
 0x1a7   : > { %v5917_v17 = vsel %vm33224_vm14, %v5902_v11, %v5904_v14  ;;  %6139 = vmatprep.mubr.f32.mxu0 %v29141_v0  ;;  %v5918_v25 = vsel %vm33224_vm14, %v5904_v14, %v5906_v16 }
 0x1a8   : > { %7921 = vrot.lane.b32.xlu0 %v29215_v40, %s33222_s26  ;;  %8239 = vrot.lane.b32.xlu1 %v29160_v15, %s33225_s19  ;;  %s33228_s26 = smov 35  }
 0x1a9   : > { %6004 = vmatprep.subr.mxu1 %v5917_v17 }
 0x1aa   : > { %6005 = vmatpush1.msra.mxu1 %v5916_v19  ;;  %v5908_v22 = vpop.permute.xlu0 %5907  ;;  %v5910_v23 = vpop.permute.xlu1 %5909 }
 0x1ab   : > { %v5919_v24 = vsel %vm33224_vm14, %v5906_v16, %v5908_v22  ;;  %27535 = vmatmul.mubr.msk.f32.vlgmr.msra.gmra.mrb[0].mxu1 %vm342_vm1, %v27533_v13  ;;  %v5920_v31 = vsel %vm33224_vm14, %v5908_v22, %v5910_v23 }
 0x1ac   : > { %8241 = vrot.lane.b32.xlu0 %v29171_v20, %s33225_s19  ;;  %8237 = vrot.lane.b32.xlu1 %v29174_v21, %s33225_s19 }
 0x1ad   : > { %6075 = vmatprep.subr.mxu0 %v5919_v24  ;;  %6210 = vmatprep.mubr.f32.mxu1 %v29141_v0 }
 0x1ae   : > { %6076 = vmatpush1.msra.mxu0 %v5918_v25  ;;  %v5912_v28 = vpop.permute.xlu0 %5911  ;;  %v6248_v29 = vpop.permute.xlu1 %6247 }
 0x1af   : > { %v5921_v30 = vsel %vm33224_vm14, %v5910_v23, %v5912_v28  ;;  %27536 = vmatmul.mubr.msk.f32.vlgmr.msra.gmra.mrb[2].mxu0 %vm342_vm1, %v27533_v13  ;;  %vm33230_vm14 = vcmask 449536  }
 0x1b0   : > { %8243 = vrot.lane.b32.xlu0 %v29184_v26, %s33225_s19  ;;  %8245 = vrot.lane.b32.xlu1 %v29187_v27, %s33225_s19 }
 0x1b1   : > { %6146 = vmatprep.subr.mxu1 %v5921_v30  ;;  %6347 = vmatprep.mubr.f32.mxu0 %v29141_v0 }
 0x1b2   : > { %6147 = vmatpush1.msra.mxu1 %v5920_v31  ;;  %v6250_v34 = vpop.permute.xlu0 %6249  ;;  %v6246_v35 = vpop.permute.xlu1 %6245 }
 0x1b3   : > { %v6264_v36 = vsel %vm33227_vm15, %v6246_v35, %v6248_v29  ;;  %v6265_v37 = vsel %vm33227_vm15, %v6248_v29, %v6250_v34  ;;  %27537 = vmatmul.mubr.msk.f32.vlgmr.msra.gmra.mrb[2].mxu1 %vm342_vm1, %v27533_v13  ;;  %v9231_v13 = vld [vmem:[%s33206_s4] sm:$0xff]  ;;  %v27553_v29 = vld [vmem:[%s33374_s1 + $0xa8] sm:$0xff] }
 0x1b4   : > { %8247 = vrot.lane.b32.xlu0 %v29198_v32, %s33225_s19  ;;  %8249 = vrot.lane.b32.xlu1 %v29201_v33, %s33225_s19 }
 0x1b5   : > { %6283 = vmatprep.subr.mxu0 %v6265_v37  ;;  %6418 = vmatprep.mubr.f32.mxu1 %v29141_v0 }
 0x1b6   : > { %6284 = vmatpush1.msra.mxu0 %v6264_v36  ;;  %v6252_v41 = vpop.permute.xlu0 %6251  ;;  %v6254_v42 = vpop.permute.xlu1 %6253 }
 0x1b7   : > { %v6267_v43 = vsel %vm33227_vm15, %v6252_v41, %v6254_v42  ;;  %v6266_v44 = vsel %vm33227_vm15, %v6250_v34, %v6252_v41  ;;  %27539 = vmatmul.mubr.msk.f32.vlgmr.msra.gmra.mrb[0].mxu0 %vm342_vm1, %v27538_v39 }
 0x1b8   : > { %8251 = vrot.lane.b32.xlu0 %v29296_v18, %s33225_s19  ;;  %8253 = vrot.lane.b32.xlu1 %v29215_v40, %s33225_s19  ;;  %s33293_s19 = smov 34  }
 0x1b9   : > { %6354 = vmatprep.subr.mxu1 %v6267_v43  ;;  %6489 = vmatprep.mubr.f32.mxu0 %v29141_v0 }
 0x1ba   : > { %6355 = vmatpush1.msra.mxu1 %v6266_v44  ;;  %v6256_v45 = vpop.permute.xlu0 %6255  ;;  %v6258_v46 = vpop.permute.xlu1 %6257 }
 0x1bb   : > { %v6269_v47 = vsel %vm33227_vm15, %v6256_v45, %v6258_v46  ;;  %v6268_v48 = vsel %vm33227_vm15, %v6254_v42, %v6256_v45  ;;  %27540 = vmatmul.mubr.msk.f32.vlgmr.msra.gmra.mrb[0].mxu1 %vm342_vm1, %v27538_v39 }
 0x1bc   : > { %8571 = vrot.lane.b32.xlu0 %v29160_v15, %s33228_s26  ;;  %8573 = vrot.lane.b32.xlu1 %v29171_v20, %s33228_s26 }
 0x1bd   : > { %6425 = vmatprep.subr.mxu0 %v6269_v47  ;;  %6560 = vmatprep.mubr.f32.mxu1 %v29141_v0 }
 0x1be   : > { %6426 = vmatpush1.msra.mxu0 %v6268_v48  ;;  %v6260_v49 = vpop.permute.xlu0 %6259  ;;  %v6262_v50 = vpop.permute.xlu1 %6261 }
 0x1bf   : > { %v6271_v51 = vsel %vm33227_vm15, %v6260_v49, %v6262_v50  ;;  %v6270_v52 = vsel %vm33227_vm15, %v6258_v46, %v6260_v49  ;;  %27541 = vmatmul.mubr.msk.f32.vlgmr.msra.gmra.mrb[2].mxu0 %vm342_vm1, %v27538_v39  ;;  %vm33231_vm15 = vcmask 441344  }
 0x1c0   : > { %8569 = vrot.lane.b32.xlu0 %v29174_v21, %s33228_s26  ;;  %8575 = vrot.lane.b32.xlu1 %v29184_v26, %s33228_s26 }
 0x1c1   : > { %6496 = vmatprep.subr.mxu1 %v6271_v51  ;;  %6679 = vmatprep.mubr.f32.mxu0 %v29141_v0  ;;  %v27558_v51 = vld [vmem:[%s33374_s1 + $0xb0] sm:$0xff] }
 0x1c2   : > { %6497 = vmatpush1.msra.mxu1 %v6270_v52  ;;  %v6580_v53 = vpop.permute.xlu0 %6579  ;;  %v6582_v5 = vpop.permute.xlu1 %6581 }
 0x1c3   : > { %v6597_v54 = vsel %vm33230_vm14, %v6580_v53, %v6582_v5  ;;  %27542 = vmatmul.mubr.msk.f32.vlgmr.msra.gmra.mrb[2].mxu1 %vm342_vm1, %v27538_v39 }
 0x1c4   : > { %8577 = vrot.lane.b32.xlu0 %v29187_v27, %s33228_s26  ;;  %8579 = vrot.lane.b32.xlu1 %v29198_v32, %s33228_s26 }
 0x1c5   : > { %6615 = vmatprep.subr.mxu0 %v6597_v54  ;;  %6750 = vmatprep.mubr.f32.mxu1 %v29141_v0 }
 0x1c6   : > { %v6578_v55 = vpop.permute.xlu0 %6577  ;;  %v6584_v56 = vpop.permute.xlu1 %6583 }
 0x1c7   : > { %v6596_v57 = vsel %vm33230_vm14, %v6578_v55, %v6580_v53  ;;  %v6598_v8 = vsel %vm33230_vm14, %v6582_v5, %v6584_v56 }
 0x1c8   : > { %8581 = vrot.lane.b32.xlu0 %v29201_v33, %s33228_s26  ;;  %8583 = vrot.lane.b32.xlu1 %v29296_v18, %s33228_s26 }
 0x1c9   : > { %6616 = vmatpush1.msra.mxu0 %v6596_v57 }
 0x1ca   : > { %v6586_v7 = vpop.permute.xlu0 %6585  ;;  %v6588_v58 = vpop.permute.xlu1 %6587  ;;  %27544 = vmatmul.mubr.msk.f32.vlgmr.msra.gmra.mrb[0].mxu0 %vm342_vm1, %v27543_v6 }
 0x1cb   : > { %v6599_v59 = vsel %vm33230_vm14, %v6584_v56, %v6586_v7  ;;  %6821 = vmatprep.mubr.f32.mxu0 %v29141_v0  ;;  %v6600_v62 = vsel %vm33230_vm14, %v6586_v7, %v6588_v58  ;;  %v29569_v7 = vld [vmem:[#allocation2] sm:$0xff] }
 0x1cc   : > { %8585 = vrot.lane.b32.xlu0 %v29215_v40, %s33228_s26  ;;  %8903 = vrot.lane.b32.xlu1 %v29160_v15, %s33293_s19  ;;  %s33239_s26 = smov 111  }
 0x1cd   : > { %6686 = vmatprep.subr.mxu1 %v6599_v59 }
 0x1ce   : > { %6687 = vmatpush1.msra.mxu1 %v6598_v8  ;;  %v6590_v38 = vpop.permute.xlu0 %6589  ;;  %v6592_v60 = vpop.permute.xlu1 %6591 }
 0x1cf   : > { %v6601_v61 = vsel %vm33230_vm14, %v6588_v58, %v6590_v38  ;;  %27545 = vmatmul.mubr.msk.f32.vlgmr.msra.gmra.mrb[0].mxu1 %vm342_vm1, %v27543_v6 }
 0x1d0   : > { %8905 = vrot.lane.b32.xlu0 %v29171_v20, %s33293_s19  ;;  %8901 = vrot.lane.b32.xlu1 %v29174_v21, %s33293_s19  ;;  %v6602_v20 = vsel %vm33230_vm14, %v6590_v38, %v6592_v60 }
 0x1d1   : > { %6757 = vmatprep.subr.mxu0 %v6601_v61  ;;  %6892 = vmatprep.mubr.f32.mxu1 %v29141_v0 }
 0x1d2   : > { %6758 = vmatpush1.msra.mxu0 %v6600_v62  ;;  %v6594_v15 = vpop.permute.xlu0 %6593  ;;  %v6912_v1 = vpop.permute.xlu1 %6911 }
 0x1d3   : > { %v6603_v3 = vsel %vm33230_vm14, %v6592_v60, %v6594_v15  ;;  %27546 = vmatmul.mubr.msk.f32.vlgmr.msra.gmra.mrb[2].mxu0 %vm342_vm1, %v27543_v6  ;;  %vm33232_vm14 = vcmask 375808  }
 0x1d4   : > { %8907 = vrot.lane.b32.xlu0 %v29184_v26, %s33293_s19  ;;  %8909 = vrot.lane.b32.xlu1 %v29187_v27, %s33293_s19  ;;  %v27548_v26 = vld [vmem:[%s33374_s1 + $0xa0] sm:$0xff] }
 0x1d5   : > { %6828 = vmatprep.subr.mxu1 %v6603_v3  ;;  %7011 = vmatprep.mubr.f32.mxu0 %v29141_v0 }
 0x1d6   : > { %6829 = vmatpush1.msra.mxu1 %v6602_v20  ;;  %v6914_v21 = vpop.permute.xlu0 %6913  ;;  %v6910_v2 = vpop.permute.xlu1 %6909 }
 0x1d7   : > { %v6928_v4 = vsel %vm33231_vm15, %v6910_v2, %v6912_v1  ;;  %v6929_v9 = vsel %vm33231_vm15, %v6912_v1, %v6914_v21  ;;  %27547 = vmatmul.mubr.msk.f32.vlgmr.msra.gmra.mrb[2].mxu1 %vm342_vm1, %v27543_v6  ;;  %v27563_v1 = vld [vmem:[%s33374_s1 + $0xb8] sm:$0xff] }
 0x1d8   : > { %8911 = vrot.lane.b32.xlu0 %v29198_v32, %s33293_s19  ;;  %8913 = vrot.lane.b32.xlu1 %v29201_v33, %s33293_s19 }
 0x1d9   : > { %6947 = vmatprep.subr.mxu0 %v6929_v9  ;;  %7082 = vmatprep.mubr.f32.mxu1 %v29141_v0 }
 0x1da   : > { %6948 = vmatpush1.msra.mxu0 %v6928_v4  ;;  %v6916_v27 = vpop.permute.xlu0 %6915  ;;  %v6918_v10 = vpop.permute.xlu1 %6917 }
 0x1db   : > { %v6931_v11 = vsel %vm33231_vm15, %v6916_v27, %v6918_v10  ;;  %v6930_v12 = vsel %vm33231_vm15, %v6914_v21, %v6916_v27  ;;  %27549 = vmatmul.mubr.msk.f32.vlgmr.msra.gmra.mrb[0].mxu0 %vm342_vm1, %v27548_v26 }
 0x1dc   : > { %8915 = vrot.lane.b32.xlu0 %v29296_v18, %s33293_s19  ;;  %8917 = vrot.lane.b32.xlu1 %v29215_v40, %s33293_s19 }
 0x1dd   : > { %7018 = vmatprep.subr.mxu1 %v6931_v11  ;;  %7153 = vmatprep.mubr.f32.mxu0 %v29141_v0 }
 0x1de   : > { %7019 = vmatpush1.msra.mxu1 %v6930_v12  ;;  %v6920_v32 = vpop.permute.xlu0 %6919  ;;  %v6922_v33 = vpop.permute.xlu1 %6921 }
 0x1df   : > { %v6933_v14 = vsel %vm33231_vm15, %v6920_v32, %v6922_v33  ;;  %v6932_v16 = vsel %vm33231_vm15, %v6918_v10, %v6920_v32  ;;  %27550 = vmatmul.mubr.msk.f32.vlgmr.msra.gmra.mrb[0].mxu1 %vm342_vm1, %v27548_v26 }
 0x1e0   : > { %7089 = vmatprep.subr.mxu0 %v6933_v14  ;;  %7224 = vmatprep.mubr.f32.mxu1 %v29141_v0 }
 0x1e1   : > { %7090 = vmatpush1.msra.mxu0 %v6932_v16  ;;  %9234 = vperm.xlu0 %28519, %v9231_v13  }
 0x1e2   : > { %v6924_v40 = vpop.permute.xlu0 %6923  ;;  %v6926_v18 = vpop.permute.xlu1 %6925  ;;  %27551 = vmatmul.mubr.msk.f32.vlgmr.msra.gmra.mrb[2].mxu0 %vm342_vm1, %v27548_v26 }
 0x1e3   : > { %v6935_v17 = vsel %vm33231_vm15, %v6924_v40, %v6926_v18  ;;  %v6934_v19 = vsel %vm33231_vm15, %v6922_v33, %v6924_v40  ;;  %7343 = vmatprep.mubr.f32.mxu0 %v29141_v0  ;;  %vm33233_vm15 = vcmask 367616   ;;  %v27568_v40 = vld [vmem:[%s33374_s1 + $0xc0] sm:$0xff] }
 0x1e4   : > { %7160 = vmatprep.subr.mxu1 %v6935_v17 }
 0x1e5   : > { %7161 = vmatpush1.msra.mxu1 %v6934_v19 }
 0x1e6   : > { %v7244_v22 = vpop.permute.xlu0 %7243  ;;  %v7246_v23 = vpop.permute.xlu1 %7245  ;;  %27552 = vmatmul.mubr.msk.f32.vlgmr.msra.gmra.mrb[2].mxu1 %vm342_vm1, %v27548_v26 }
 0x1e7   : > { %v7261_v24 = vsel %vm33232_vm14, %v7244_v22, %v7246_v23  ;;  %7414 = vmatprep.mubr.f32.mxu1 %v29141_v0 }
 0x1e8   : > { %7279 = vmatprep.subr.mxu0 %v7261_v24 }
 0x1ea   : > { %v7242_v25 = vpop.permute.xlu0 %7241  ;;  %v7248_v28 = vpop.permute.xlu1 %7247 }
 0x1eb   : > { %v7260_v30 = vsel %vm33232_vm14, %v7242_v25, %v7244_v22  ;;  %v7262_v36 = vsel %vm33232_vm14, %v7246_v23, %v7248_v28 }
 0x1ec   : > { %7280 = vmatpush1.msra.mxu0 %v7260_v30 }
 0x1ed   : > { %27554 = vmatmul.mubr.msk.f32.vlgmr.msra.gmra.mrb[0].mxu0 %vm342_vm1, %v27553_v29 }
 0x1ee   : > { %v7250_v31 = vpop.permute.xlu0 %7249  ;;  %v7252_v34 = vpop.permute.xlu1 %7251  ;;  %7485 = vmatprep.mubr.f32.mxu0 %v29141_v0 }
 0x1ef   : > { %v7263_v35 = vsel %vm33232_vm14, %v7248_v28, %v7250_v31  ;;  %v7264_v42 = vsel %vm33232_vm14, %v7250_v31, %v7252_v34 }
 0x1f0   : > { %7350 = vmatprep.subr.mxu1 %v7263_v35 }
 0x1f1   : > { %7351 = vmatpush1.msra.mxu1 %v7262_v36 }
 0x1f2   : > { %v7254_v37 = vpop.permute.xlu0 %7253  ;;  %v7256_v39 = vpop.permute.xlu1 %7255  ;;  %27555 = vmatmul.mubr.msk.f32.vlgmr.msra.gmra.mrb[0].mxu1 %vm342_vm1, %v27553_v29 }
 0x1f3   : > { %v7265_v41 = vsel %vm33232_vm14, %v7252_v34, %v7254_v37  ;;  %7556 = vmatprep.mubr.f32.mxu1 %v29141_v0  ;;  %v7266_v46 = vsel %vm33232_vm14, %v7254_v37, %v7256_v39 }
 0x1f4   : > { %7421 = vmatprep.subr.mxu0 %v7265_v41 }
 0x1f5   : > { %7422 = vmatpush1.msra.mxu0 %v7264_v42  ;;  %v27573_v42 = vld [vmem:[%s33374_s1 + $0xc8] sm:$0xff] }
 0x1f6   : > { %v7258_v43 = vpop.permute.xlu0 %7257  ;;  %v7576_v44 = vpop.permute.xlu1 %7575  ;;  %27556 = vmatmul.mubr.msk.f32.vlgmr.msra.gmra.mrb[2].mxu0 %vm342_vm1, %v27553_v29 }
 0x1f7   : > { %v7267_v45 = vsel %vm33232_vm14, %v7256_v39, %v7258_v43  ;;  %7675 = vmatprep.mubr.f32.mxu0 %v29141_v0  ;;  %vm33234_vm14 = vcmask 359424  }
 0x1f8   : > { %7492 = vmatprep.subr.mxu1 %v7267_v45 }
 0x1f9   : > { %7493 = vmatpush1.msra.mxu1 %v7266_v46 }
 0x1fa   : > { %v7578_v47 = vpop.permute.xlu0 %7577  ;;  %v7574_v48 = vpop.permute.xlu1 %7573  ;;  %27557 = vmatmul.mubr.msk.f32.vlgmr.msra.gmra.mrb[2].mxu1 %vm342_vm1, %v27553_v29 }
 0x1fb   : > { %v7592_v49 = vsel %vm33233_vm15, %v7574_v48, %v7576_v44  ;;  %v7593_v50 = vsel %vm33233_vm15, %v7576_v44, %v7578_v47  ;;  %7746 = vmatprep.mubr.f32.mxu1 %v29141_v0 }
 0x1fc   : > { %7611 = vmatprep.subr.mxu0 %v7593_v50 }
 0x1fd   : > { %7612 = vmatpush1.msra.mxu0 %v7592_v49 }
 0x1fe   : > { %v7580_v52 = vpop.permute.xlu0 %7579  ;;  %v7582_v53 = vpop.permute.xlu1 %7581  ;;  %27559 = vmatmul.mubr.msk.f32.vlgmr.msra.gmra.mrb[0].mxu0 %vm342_vm1, %v27558_v51 }
 0x1ff   : > { %v7595_v5 = vsel %vm33233_vm15, %v7580_v52, %v7582_v53  ;;  %v7594_v54 = vsel %vm33233_vm15, %v7578_v47, %v7580_v52  ;;  %7817 = vmatprep.mubr.f32.mxu0 %v29141_v0 }
 0x200   : > { %7682 = vmatprep.subr.mxu1 %v7595_v5 }
 0x201   : > { %7683 = vmatpush1.msra.mxu1 %v7594_v54 }
 0x202   : > { %v7584_v55 = vpop.permute.xlu0 %7583  ;;  %v7586_v56 = vpop.permute.xlu1 %7585  ;;  %27560 = vmatmul.mubr.msk.f32.vlgmr.msra.gmra.mrb[0].mxu1 %vm342_vm1, %v27558_v51 }
 0x203   : > { %v7597_v57 = vsel %vm33233_vm15, %v7584_v55, %v7586_v56  ;;  %v7596_v6 = vsel %vm33233_vm15, %v7582_v53, %v7584_v55  ;;  %7888 = vmatprep.mubr.f32.mxu1 %v29569_v7 }
 0x204   : > { %7753 = vmatprep.subr.mxu0 %v7597_v57 }
 0x205   : > { %7754 = vmatpush1.msra.mxu0 %v7596_v6 }
 0x206   : > { %v7588_v58 = vpop.permute.xlu0 %7587  ;;  %v7590_v59 = vpop.permute.xlu1 %7589  ;;  %27561 = vmatmul.mubr.msk.f32.vlgmr.msra.gmra.mrb[2].mxu0 %vm342_vm1, %v27558_v51 }
 0x207   : > { %v7599_v0 = vsel %vm33233_vm15, %v7588_v58, %v7590_v59  ;;  %v7598_v8 = vsel %vm33233_vm15, %v7586_v56, %v7588_v58  ;;  %8007 = vmatprep.mubr.f32.mxu0 %v29569_v7  ;;  %vm33235_vm15 = vcmask 293888   ;;  %v27578_v58 = vld [vmem:[%s33374_s1 + $0xd0] sm:$0xff]  ;;  %s33556_s1 = smov 27  }
 0x208   : > { %7824 = vmatprep.subr.mxu1 %v7599_v0 }
 0x209   : > { %7825 = vmatpush1.msra.mxu1 %v7598_v8 }
 0x20a   : > { %v7908_v38 = vpop.permute.xlu0 %7907  ;;  %v7910_v60 = vpop.permute.xlu1 %7909  ;;  %27562 = vmatmul.mubr.msk.f32.vlgmr.msra.gmra.mrb[2].mxu1 %vm342_vm1, %v27558_v51 }
 0x20b   : > { %v7925_v61 = vsel %vm33234_vm14, %v7908_v38, %v7910_v60  ;;  %8078 = vmatprep.mubr.f32.mxu1 %v29569_v7 }
 0x20c   : > { %7943 = vmatprep.subr.mxu0 %v7925_v61 }
 0x20e   : > { %v7906_v62 = vpop.permute.xlu0 %7905  ;;  %v7912_v15 = vpop.permute.xlu1 %7911 }
 0x20f   : > { %v7924_v3 = vsel %vm33234_vm14, %v7906_v62, %v7908_v38  ;;  %v7926_v2 = vsel %vm33234_vm14, %v7910_v60, %v7912_v15 }
 0x210   : > { %7944 = vmatpush1.msra.mxu0 %v7924_v3 }
 0x211   : > { %27564 = vmatmul.mubr.msk.f32.vlgmr.msra.gmra.mrb[0].mxu0 %vm342_vm1, %v27563_v1 }
 0x212   : > { %v7914_v63 = vpop.permute.xlu0 %7913  ;;  %v7916_v20 = vpop.permute.xlu1 %7915  ;;  %8149 = vmatprep.mubr.f32.mxu0 %v29569_v7 }
 0x213   : > { %v7927_v21 = vsel %vm33234_vm14, %v7912_v15, %v7914_v63  ;;  %v7928_v27 = vsel %vm33234_vm14, %v7914_v63, %v7916_v20 }
 0x214   : > { %8014 = vmatprep.subr.mxu1 %v7927_v21  ;;  %v9254_v21 = vlaneseq }
 0x215   : > { %8015 = vmatpush1.msra.mxu1 %v7926_v2 }
 0x216   : > { %v7918_v4 = vpop.permute.xlu0 %7917  ;;  %v7920_v9 = vpop.permute.xlu1 %7919  ;;  %27565 = vmatmul.mubr.msk.f32.vlgmr.msra.gmra.mrb[0].mxu1 %vm342_vm1, %v27563_v1  ;;  %v9255_v2 = vshrl.u32 %v9254_v21, 7 }
 0x217   : > { %v7929_v26 = vsel %vm33234_vm14, %v7916_v20, %v7918_v4  ;;  %8220 = vmatprep.mubr.f32.mxu1 %v29569_v7  ;;  %v7930_v32 = vsel %vm33234_vm14, %v7918_v4, %v7920_v9 }
 0x218   : > { %8085 = vmatprep.subr.mxu0 %v7929_v26  ;;  %v9256_v4 = vsub.s32 0, %v9255_v2  ;;  %v279_v26 = vld [vmem:[%s33375_s6] sm:$0xff]  ;;  %s33562_s6 = smov 127  }
 0x219   : > { %8086 = vmatpush1.msra.mxu0 %v7928_v27 }
 0x21a   : > { %v7922_v10 = vpop.permute.xlu0 %7921  ;;  %v8240_v11 = vpop.permute.xlu1 %8239  ;;  %27566 = vmatmul.mubr.msk.f32.vlgmr.msra.gmra.mrb[2].mxu0 %vm342_vm1, %v27563_v1 }
 0x21b   : > { %v7931_v12 = vsel %vm33234_vm14, %v7920_v9, %v7922_v10  ;;  %8339 = vmatprep.mubr.f32.mxu0 %v29569_v7  ;;  %vm33237_vm14 = vcmask 285696   ;;  %v9260_v10 = vsub.s32 1, %v9255_v2 }
 0x21c   : > { %8156 = vmatprep.subr.mxu1 %v7931_v12  ;;  %v29657_v12 = vrot.slane %v279_v26, %v9256_v4 }
 0x21d   : > { %8157 = vmatpush1.msra.mxu1 %v7930_v32 }
 0x21e   : > { %v8242_v33 = vpop.permute.xlu0 %8241  ;;  %v8238_v13 = vpop.permute.xlu1 %8237  ;;  %27567 = vmatmul.mubr.msk.f32.vlgmr.msra.gmra.mrb[2].mxu1 %vm342_vm1, %v27563_v1  ;;  %33376 = vst [vmem:[#allocation5_spill] sm:$0xff] %v29657_v12 }
 0x21f   : > { %v8256_v14 = vsel %vm33235_vm15, %v8238_v13, %v8240_v11  ;;  %v8257_v16 = vsel %vm33235_vm15, %v8240_v11, %v8242_v33  ;;  %8410 = vmatprep.mubr.f32.mxu1 %v29569_v7 }
 0x220   : > { %8275 = vmatprep.subr.mxu0 %v8257_v16  ;;  %v29659_v16 = vrot.slane %v279_v26, %v9260_v10 }
 0x221   : > { %8276 = vmatpush1.msra.mxu0 %v8256_v14 }
 0x222   : > { %v8244_v18 = vpop.permute.xlu0 %8243  ;;  %v8246_v17 = vpop.permute.xlu1 %8245  ;;  %27569 = vmatmul.mubr.msk.f32.vlgmr.msra.gmra.mrb[0].mxu0 %vm342_vm1, %v27568_v40  ;;  %33377 = vst [vmem:[#allocation6_spill] sm:$0xff] %v29659_v16 }
 0x223   : > { %v8259_v19 = vsel %vm33235_vm15, %v8244_v18, %v8246_v17  ;;  %v8258_v22 = vsel %vm33235_vm15, %v8242_v33, %v8244_v18  ;;  %8481 = vmatprep.mubr.f32.mxu0 %v29569_v7  ;;  %v9264_v33 = vsub.s32 2, %v9255_v2  ;;  %v9268_v18 = vsub.s32 3, %v9255_v2 }
 0x224   : > { %8346 = vmatprep.subr.mxu1 %v8259_v19 }
 0x225   : > { %8347 = vmatpush1.msra.mxu1 %v8258_v22 }
 0x226   : > { %v8248_v23 = vpop.permute.xlu0 %8247  ;;  %v8250_v24 = vpop.permute.xlu1 %8249  ;;  %27570 = vmatmul.mubr.msk.f32.vlgmr.msra.gmra.mrb[0].mxu1 %vm342_vm1, %v27568_v40 }
 0x227   : > { %v8261_v25 = vsel %vm33235_vm15, %v8248_v23, %v8250_v24  ;;  %v8260_v28 = vsel %vm33235_vm15, %v8246_v17, %v8248_v23  ;;  %8552 = vmatprep.mubr.f32.mxu1 %v29569_v7  ;;  %v9272_v17 = vsub.s32 4, %v9255_v2 }
 0x228   : > { %8417 = vmatprep.subr.mxu0 %v8261_v25 }
 0x229   : > { %8418 = vmatpush1.msra.mxu0 %v8260_v28 }
 0x22a   : > { %v8252_v29 = vpop.permute.xlu0 %8251  ;;  %v8254_v30 = vpop.permute.xlu1 %8253  ;;  %27571 = vmatmul.mubr.msk.f32.vlgmr.msra.gmra.mrb[2].mxu0 %vm342_vm1, %v27568_v40 }
 0x22b   : > { %v8263_v31 = vsel %vm33235_vm15, %v8252_v29, %v8254_v30  ;;  %v8262_v34 = vsel %vm33235_vm15, %v8250_v24, %v8252_v29  ;;  %8671 = vmatprep.mubr.f32.mxu0 %v29569_v7  ;;  %vm33236_vm15 = vcmask 277504   ;;  %v29662_v24 = vrot.slane %v279_v26, %v9264_v33 }
 0x22c   : > { %8488 = vmatprep.subr.mxu1 %v8263_v31  ;;  %v29665_v30 = vrot.slane %v279_v26, %v9268_v18 }
 0x22d   : > { %8489 = vmatpush1.msra.mxu1 %v8262_v34  ;;  %33378 = vst [vmem:[#allocation7_spill] sm:$0xff] %v29662_v24  ;;  %v29667_v34 = vrot.slane %v279_v26, %v9272_v17 }
 0x22e   : > { %v8572_v35 = vpop.permute.xlu0 %8571  ;;  %v8574_v36 = vpop.permute.xlu1 %8573  ;;  %27572 = vmatmul.mubr.msk.f32.vlgmr.msra.gmra.mrb[2].mxu1 %vm342_vm1, %v27568_v40  ;;  %33379 = vst [vmem:[#allocation8_spill] sm:$0xff] %v29665_v30 }
 0x22f   : > { %v8589_v37 = vsel %vm33237_vm14, %v8572_v35, %v8574_v36  ;;  %8742 = vmatprep.mubr.f32.mxu1 %v29569_v7  ;;  %33380 = vst [vmem:[#allocation9_spill] sm:$0xff] %v29667_v34 }
 0x230   : > { %8607 = vmatprep.subr.mxu0 %v8589_v37 }
 0x232   : > { %v8570_v39 = vpop.permute.xlu0 %8569  ;;  %v8576_v41 = vpop.permute.xlu1 %8575 }
 0x233   : > { %v8588_v43 = vsel %vm33237_vm14, %v8570_v39, %v8572_v35  ;;  %v8590_v47 = vsel %vm33237_vm14, %v8574_v36, %v8576_v41  ;;  %v9276_v35 = vsub.s32 5, %v9255_v2  ;;  %v9280_v36 = vsub.s32 6, %v9255_v2 }
 0x234   : > { %8608 = vmatpush1.msra.mxu0 %v8588_v43 }
 0x235   : > { %27574 = vmatmul.mubr.msk.f32.vlgmr.msra.gmra.mrb[0].mxu0 %vm342_vm1, %v27573_v42 }
 0x236   : > { %v8578_v44 = vpop.permute.xlu0 %8577  ;;  %v8580_v45 = vpop.permute.xlu1 %8579  ;;  %8813 = vmatprep.mubr.f32.mxu0 %v29569_v7 }
 0x237   : > { %v8591_v46 = vsel %vm33237_vm14, %v8576_v41, %v8578_v44  ;;  %v8592_v51 = vsel %vm33237_vm14, %v8578_v44, %v8580_v45 }
 0x238   : > { %8678 = vmatprep.subr.mxu1 %v8591_v46  ;;  %v29673_v46 = vrot.slane %v279_v26, %v9276_v35 }
 0x239   : > { %8679 = vmatpush1.msra.mxu1 %v8590_v47 }
 0x23a   : > { %v8582_v48 = vpop.permute.xlu0 %8581  ;;  %v8584_v49 = vpop.permute.xlu1 %8583  ;;  %27575 = vmatmul.mubr.msk.f32.vlgmr.msra.gmra.mrb[0].mxu1 %vm342_vm1, %v27573_v42  ;;  %33381 = vst [vmem:[#allocation10_spill] sm:$0xff] %v29673_v46 }
 0x23b   : > { %v8593_v50 = vsel %vm33237_vm14, %v8580_v45, %v8582_v48  ;;  %8884 = vmatprep.mubr.f32.mxu1 %v29569_v7  ;;  %v8594_v54 = vsel %vm33237_vm14, %v8582_v48, %v8584_v49  ;;  %v29675_v48 = vrot.slane %v279_v26, %v9280_v36 }
 0x23c   : > { %8749 = vmatprep.subr.mxu0 %v8593_v50 }
 0x23d   : > { %8750 = vmatpush1.msra.mxu0 %v8592_v51  ;;  %33382 = vst [vmem:[#allocation11_spill] sm:$0xff] %v29675_v48 }
 0x23e   : > { %v8586_v52 = vpop.permute.xlu0 %8585  ;;  %v8904_v53 = vpop.permute.xlu1 %8903  ;;  %27576 = vmatmul.mubr.msk.f32.vlgmr.msra.gmra.mrb[2].mxu0 %vm342_vm1, %v27573_v42 }
 0x23f   : > { %v8595_v5 = vsel %vm33237_vm14, %v8584_v49, %v8586_v52  ;;  %9003 = vmatprep.mubr.f32.mxu0 %v29569_v7  ;;  %v9284_v49 = vsub.s32 7, %v9255_v2  ;;  %vm9326_vm14 = vcmask 908288  }
 0x240   : > { %8820 = vmatprep.subr.mxu1 %v8595_v5 }
 0x241   : > { %8821 = vmatpush1.msra.mxu1 %v8594_v54 }
 0x242   : > { %v8906_v55 = vpop.permute.xlu0 %8905  ;;  %v8902_v56 = vpop.permute.xlu1 %8901  ;;  %27577 = vmatmul.mubr.msk.f32.vlgmr.msra.gmra.mrb[2].mxu1 %vm342_vm1, %v27573_v42 }
 0x243   : > { %v8920_v57 = vsel %vm33236_vm15, %v8902_v56, %v8904_v53  ;;  %v8921_v6 = vsel %vm33236_vm15, %v8904_v53, %v8906_v55  ;;  %9074 = vmatprep.mubr.f32.mxu1 %v29569_v7 }
 0x244   : > { %8939 = vmatprep.subr.mxu0 %v8921_v6 }
 0x245   : > { %8940 = vmatpush1.msra.mxu0 %v8920_v57 }
 0x246   : > { %v8908_v59 = vpop.permute.xlu0 %8907  ;;  %27579 = vmatmul.mubr.msk.f32.vlgmr.msra.gmra.mrb[0].mxu0 %vm342_vm1, %v27578_v58  ;;  %v8910_v0 = vpop.permute.xlu1 %8909 }
 0x247   : > { %v8923_v8 = vsel %vm33236_vm15, %v8908_v59, %v8910_v0  ;;  %v8922_v38 = vsel %vm33236_vm15, %v8906_v55, %v8908_v59  ;;  %9145 = vmatprep.mubr.f32.mxu0 %v29569_v7 }
 0x248   : > { %9010 = vmatprep.subr.mxu1 %v8923_v8 }
 0x249   : > { %9011 = vmatpush1.msra.mxu1 %v8922_v38 }
 0x24a   : > { %v8912_v60 = vpop.permute.xlu0 %8911  ;;  %27580 = vmatmul.mubr.msk.f32.vlgmr.msra.gmra.mrb[0].mxu1 %vm342_vm1, %v27578_v58  ;;  %v8914_v61 = vpop.permute.xlu1 %8913 }
 0x24b   : > { %v8925_v62 = vsel %vm33236_vm15, %v8912_v60, %v8914_v61  ;;  %v8924_v15 = vsel %vm33236_vm15, %v8910_v0, %v8912_v60  ;;  %9216 = vmatprep.mubr.f32.mxu1 %v29569_v7 }
 0x24c   : > { %9081 = vmatprep.subr.mxu0 %v8925_v62 }
 0x24d   : > { %9082 = vmatpush1.msra.mxu0 %v8924_v15 }
 0x24e   : > { %v8916_v1 = vpop.permute.xlu0 %8915  ;;  %27581 = vmatmul.mubr.msk.f32.vlgmr.msra.gmra.mrb[2].mxu0 %vm342_vm1, %v27578_v58  ;;  %v8918_v3 = vpop.permute.xlu1 %8917 }
 0x24f   : > { %v8927_v63 = vsel %vm33236_vm15, %v8916_v1, %v8918_v3  ;;  %v8926_v20 = vsel %vm33236_vm15, %v8914_v61, %v8916_v1  ;;  %9471 = vmatprep.mubr.f32.mxu0 %v29569_v7  ;;  %vm33238_vm15 = vcmask 1048440  }
 0x250   : > { %9152 = vmatprep.subr.mxu1 %v8927_v63 }
 0x251   : > { %9153 = vmatpush1.msra.mxu1 %v8926_v20 }
 0x252   : > { %27582 = vmatmul.mubr.msk.f32.vlgmr.msra.gmra.mrb[2].mxu1 %vm342_vm1, %v27578_v58  ;;  %v29683_v58 = vrot.slane %v279_v26, %v9284_v49  ;;  %v29942_v49 = vld [vmem:[%s33389_s2 + $0x8] sm:$0xff] }
 0x253   : > { %9542 = vmatprep.mubr.f32.mxu1 %v29569_v7 }
 0x254   : > { %33383 = vst [vmem:[#allocation12_spill] sm:$0xff] %v29683_v58 }
 0x260   : > { %v9235_v9 = vpop.permute.xlu0 %9234 }
 0x319   : > { %v9005_v27 = vpop.f32.mrb[0].mxu0 }
 0x31a   : > { %v9237_v11 = vadd.f32 %v9235_v9, %v9005_v27  ;;  %v9007_v32 = vpop.f32.mrb[1].mxu0 }
 0x31b   : > { %v9238_v13 = vadd.f32 %v9235_v9, %v9007_v32 }
 0x31c   : > { %v9245_v14 = vmax.f32 %v9237_v11, 0.0 }
 0x31d   : > { %v9076_v40 = vpop.f32.mrb[0].mxu1  ;;  %v9246_v22 = vmax.f32 %v9238_v13, 0.0 }
 0x31e   : > { %v9294_v19 = vmul.f32 %v29657_v12, %v9245_v14  ;;  %v9239_v23 = vadd.f32 %v9235_v9, %v9076_v40  ;;  %v9078_v25 = vpop.f32.mrb[1].mxu1 }
 0x31f   : > { %v9240_v28 = vadd.f32 %v9235_v9, %v9078_v25  ;;  %v9295_v37 = vmul.f32 %v29659_v16, %v9246_v22 }
 0x320   : > { %v9247_v29 = vmax.f32 %v9239_v23, 0.0  ;;  %9310 = vrot.lane.b32.xlu1 %v9294_v19, %s33239_s26 }
 0x321   : > { %v9147_v31 = vpop.f32.mrb[2].mxu0  ;;  %v9248_v41 = vmax.f32 %v9240_v28, 0.0 }
 0x322   : > { %v9296_v39 = vmul.f32 %v29662_v24, %v9247_v29  ;;  %v9241_v42 = vadd.f32 %v9235_v9, %v9147_v31  ;;  %v9149_v43 = vpop.f32.mrb[3].mxu0 }
 0x323   : > { %v9242_v44 = vadd.f32 %v9235_v9, %v9149_v43  ;;  %v9297_v50 = vmul.f32 %v29665_v30, %v9248_v41 }
 0x324   : > { %v9249_v45 = vmax.f32 %v9241_v42, 0.0  ;;  %9312 = vrot.lane.b32.xlu1 %v9295_v37, %s33239_s26  ;;  %9314 = vrot.lane.b32.xlu0 %v9296_v39, %s33239_s26 }
 0x325   : > { %v9218_v47 = vpop.f32.mrb[2].mxu1  ;;  %v9250_v52 = vmax.f32 %v9242_v44, 0.0 }
 0x326   : > { %v9298_v51 = vmul.f32 %v29667_v34, %v9249_v45  ;;  %v9243_v53 = vadd.f32 %v9235_v9, %v9218_v47  ;;  %v9220_v5 = vpop.f32.mrb[3].mxu1 }
 0x327   : > { %v9244_v54 = vadd.f32 %v9235_v9, %v9220_v5  ;;  %v9299_v56 = vmul.f32 %v29673_v46, %v9250_v52 }
 0x328   : > { %v9251_v55 = vmax.f32 %v9243_v53, 0.0  ;;  %9316 = vrot.lane.b32.xlu1 %v9297_v50, %s33239_s26  ;;  %9318 = vrot.lane.b32.xlu0 %v9298_v51, %s33239_s26 }
 0x329   : > { %v9252_v6 = vmax.f32 %v9244_v54, 0.0 }
 0x32a   : > { %v9300_v57 = vmul.f32 %v29675_v48, %v9251_v55 }
 0x32b   : > { %v9301_v59 = vmul.f32 %v29683_v58, %v9252_v6 }
 0x32c   : > { %9320 = vrot.lane.b32.xlu1 %v9299_v56, %s33239_s26  ;;  %9322 = vrot.lane.b32.xlu0 %v9300_v57, %s33239_s26 }
 0x330   : > { %9324 = vrot.lane.b32.xlu1 %v9301_v59, %s33239_s26  ;;  %s33414_s26 = smov 56  }
 0x392   : > { %v9311_v0 = vpop.permute.xlu1 %9310 }
 0x393   : > { %9344 = vst.msk [vmem:[#allocation2] sm:$0xff] %vm33238_vm15, %v9311_v0  ;;  %vm33241_vm15 = vcmask 711680  }
 0x396   : > { %v9313_v8 = vpop.permute.xlu1 %9312  ;;  %v9315_v62 = vpop.permute.xlu0 %9314 }
 0x397   : > { %v29705_v15 = vsel %vm9326_vm14, %v9313_v8, %v9315_v62  ;;  %v29752_v63 = vsel %vm9326_vm14, %v9311_v0, %v9313_v8 }
 0x39a   : > { %v29690_v38 = vpop.permute.xlu1 %9316  ;;  %v29692_v60 = vld [vmem:[#allocation2] sm:$0xff]  ;;  %v9319_v20 = vpop.permute.xlu0 %9318 }
 0x39b   : > { %12625 = vrot.lane.b32.xlu1 %v29692_v60, %s33297_s22  ;;  %9373 = vrot.lane.b32.xlu0 %v29692_v60, %s33305_s30  ;;  %v29717_v3 = vsel %vm9326_vm14, %v9315_v62, %v29690_v38  ;;  %v29816_v21 = vsel %vm9326_vm14, %v29690_v38, %v9319_v20 }
 0x39e   : > { %v29698_v61 = vpop.permute.xlu1 %9320  ;;  %v9323_v4 = vpop.permute.xlu0 %9322 }
 0x39f   : > { %13287 = vrot.lane.b32.xlu1 %v29692_v60, %s33299_s16  ;;  %9980 = vrot.lane.b32.xlu0 %v29692_v60, %s33307_s8  ;;  %v29844_v11 = vsel %vm9326_vm14, %v9319_v20, %v29698_v61  ;;  %v29924_v42 = vsel %vm9326_vm14, %v29698_v61, %v9323_v4 }
 0x3a2   : > { %v29707_v1 = vpop.permute.xlu1 %9324 }
 0x3a3   : > { %9353 = vst.msk [vmem:[#allocation2 + $0x40] sm:$0xff] %vm33241_vm15, %v29707_v1  ;;  %10308 = vrot.lane.b32.xlu0 %v29692_v60, %s33295_s9  ;;  %9377 = vrot.lane.b32.xlu1 %v29705_v15, %s33305_s30  ;;  %v29856_v13 = vsel %vm9326_vm14, %v9323_v4, %v29707_v1  ;;  %vm289_vm15 = vcmask 572416  }
 0x3a4   : > { %290 = vst.msk [vmem:[#allocation2 + $0x48] sm:$0xff] %vm289_vm15, %v29569_v7  ;;  %vm33448_vm15 = vcmask 130048  }
 0x3a7   : > { %10636 = vrot.lane.b32.xlu0 %v29692_v60, %s33291_s10  ;;  %9379 = vrot.lane.b32.xlu1 %v29717_v3, %s33305_s30 }
 0x3aa   : > { %v29822_v2 = vld [vmem:[#allocation2 + $0x40] sm:$0xff] }
 0x3ab   : > { %10964 = vrot.lane.b32.xlu0 %v29692_v60, %s33289_s11  ;;  %9984 = vrot.lane.b32.xlu1 %v29705_v15, %s33307_s8 }
 0x3af   : > { %11292 = vrot.lane.b32.xlu0 %v29692_v60, %s33287_s12  ;;  %9986 = vrot.lane.b32.xlu1 %v29717_v3, %s33307_s8 }
 0x3b3   : > { %11620 = vrot.lane.b32.xlu0 %v29692_v60, %s33285_s13  ;;  %10312 = vrot.lane.b32.xlu1 %v29705_v15, %s33295_s9 }
 0x3b7   : > { %11948 = vrot.lane.b32.xlu0 %v29692_v60, %s33283_s14  ;;  %10314 = vrot.lane.b32.xlu1 %v29717_v3, %s33295_s9 }
 0x3bb   : > { %12294 = vrot.lane.b32.xlu0 %v29692_v60, %s33278_s17  ;;  %10640 = vrot.lane.b32.xlu1 %v29705_v15, %s33291_s10 }
 0x3bf   : > { %12956 = vrot.lane.b32.xlu0 %v29692_v60, %s33276_s27  ;;  %10642 = vrot.lane.b32.xlu1 %v29717_v3, %s33291_s10 }
 0x3c3   : > { %13618 = vrot.lane.b32.xlu0 %v29692_v60, %s33274_s23  ;;  %10968 = vrot.lane.b32.xlu1 %v29705_v15, %s33289_s11 }
 0x3c7   : > { %9375 = vrot.lane.b32.xlu0 %v29752_v63, %s33305_s30  ;;  %10970 = vrot.lane.b32.xlu1 %v29717_v3, %s33289_s11 }
 0x3cb   : > { %9982 = vrot.lane.b32.xlu0 %v29752_v63, %s33307_s8  ;;  %11296 = vrot.lane.b32.xlu1 %v29705_v15, %s33287_s12 }
 0x3cf   : > { %10310 = vrot.lane.b32.xlu0 %v29752_v63, %s33295_s9  ;;  %11298 = vrot.lane.b32.xlu1 %v29717_v3, %s33287_s12 }
 0x3d3   : > { %10638 = vrot.lane.b32.xlu0 %v29752_v63, %s33291_s10  ;;  %11624 = vrot.lane.b32.xlu1 %v29705_v15, %s33285_s13 }
 0x3d7   : > { %10966 = vrot.lane.b32.xlu0 %v29752_v63, %s33289_s11  ;;  %11626 = vrot.lane.b32.xlu1 %v29717_v3, %s33285_s13 }
 0x3db   : > { %11294 = vrot.lane.b32.xlu0 %v29752_v63, %s33287_s12  ;;  %11952 = vrot.lane.b32.xlu1 %v29705_v15, %s33283_s14 }
 0x3df   : > { %11622 = vrot.lane.b32.xlu0 %v29752_v63, %s33285_s13  ;;  %11954 = vrot.lane.b32.xlu1 %v29717_v3, %s33283_s14 }
 0x3e3   : > { %11950 = vrot.lane.b32.xlu0 %v29752_v63, %s33283_s14  ;;  %12298 = vrot.lane.b32.xlu1 %v29705_v15, %s33278_s17 }
 0x3e7   : > { %12296 = vrot.lane.b32.xlu0 %v29752_v63, %s33278_s17  ;;  %12300 = vrot.lane.b32.xlu1 %v29717_v3, %s33278_s17 }
 0x3eb   : > { %12629 = vrot.lane.b32.xlu0 %v29705_v15, %s33297_s22  ;;  %12627 = vrot.lane.b32.xlu1 %v29752_v63, %s33297_s22 }
 0x3ef   : > { %12631 = vrot.lane.b32.xlu0 %v29717_v3, %s33297_s22  ;;  %12960 = vrot.lane.b32.xlu1 %v29705_v15, %s33276_s27 }
 0x3f3   : > { %12958 = vrot.lane.b32.xlu0 %v29752_v63, %s33276_s27  ;;  %12962 = vrot.lane.b32.xlu1 %v29717_v3, %s33276_s27 }
 0x3f7   : > { %13291 = vrot.lane.b32.xlu0 %v29705_v15, %s33299_s16  ;;  %13289 = vrot.lane.b32.xlu1 %v29752_v63, %s33299_s16 }
 0x3fb   : > { %13293 = vrot.lane.b32.xlu0 %v29717_v3, %s33299_s16  ;;  %13622 = vrot.lane.b32.xlu1 %v29705_v15, %s33274_s23 }
 0x3ff   : > { %13620 = vrot.lane.b32.xlu0 %v29752_v63, %s33274_s23  ;;  %13624 = vrot.lane.b32.xlu1 %v29717_v3, %s33274_s23 }
 0x403   : > { %9381 = vrot.lane.b32.xlu0 %v29816_v21, %s33305_s30  ;;  %12633 = vrot.lane.b32.xlu1 %v29816_v21, %s33297_s22 }
 0x407   : > { %9988 = vrot.lane.b32.xlu0 %v29816_v21, %s33307_s8  ;;  %12641 = vrot.lane.b32.xlu1 %v29822_v2, %s33297_s22 }
 0x40b   : > { %10316 = vrot.lane.b32.xlu0 %v29816_v21, %s33295_s9  ;;  %13295 = vrot.lane.b32.xlu1 %v29816_v21, %s33299_s16 }
 0x40d   : > { %v9374_v9 = vpop.permute.xlu0 %9373  ;;  %v29832_v26 = vpop.permute.xlu1 %12625 }
 0x40e   : > { %33384 = vst [vmem:[#allocation13_spill] sm:$0xff] %v29832_v26 }
 0x40f   : > { %10644 = vrot.lane.b32.xlu0 %v29816_v21, %s33291_s10  ;;  %13303 = vrot.lane.b32.xlu1 %v29822_v2, %s33299_s16 }
 0x411   : > { %v29838_v27 = vpop.permute.xlu0 %9980  ;;  %v29840_v10 = vpop.permute.xlu1 %13287 }
 0x412   : > { %33385 = vst [vmem:[#allocation14_spill] sm:$0xff] %v29840_v10 }
 0x413   : > { %10972 = vrot.lane.b32.xlu0 %v29816_v21, %s33289_s11  ;;  %9383 = vrot.lane.b32.xlu1 %v29844_v11, %s33305_s30 }
 0x415   : > { %v29850_v32 = vpop.permute.xlu0 %10308  ;;  %v29852_v33 = vpop.permute.xlu1 %9377 }
 0x417   : > { %11300 = vrot.lane.b32.xlu0 %v29816_v21, %s33287_s12  ;;  %9387 = vrot.lane.b32.xlu1 %v29856_v13, %s33305_s30 }
 0x419   : > { %v29862_v14 = vpop.permute.xlu0 %10636  ;;  %v29864_v40 = vpop.permute.xlu1 %9379 }
 0x41b   : > { %11628 = vrot.lane.b32.xlu0 %v29816_v21, %s33285_s13  ;;  %9990 = vrot.lane.b32.xlu1 %v29844_v11, %s33307_s8 }
 0x41d   : > { %v29870_v18 = vpop.permute.xlu0 %10964  ;;  %v29872_v17 = vpop.permute.xlu1 %9984 }
 0x41f   : > { %11956 = vrot.lane.b32.xlu0 %v29816_v21, %s33283_s14  ;;  %9994 = vrot.lane.b32.xlu1 %v29856_v13, %s33307_s8 }
 0x421   : > { %v29878_v19 = vpop.permute.xlu0 %11292  ;;  %v29880_v22 = vpop.permute.xlu1 %9986 }
 0x423   : > { %12302 = vrot.lane.b32.xlu0 %v29816_v21, %s33278_s17  ;;  %10318 = vrot.lane.b32.xlu1 %v29844_v11, %s33295_s9 }
 0x425   : > { %v29886_v23 = vpop.permute.xlu0 %11620  ;;  %v29888_v25 = vpop.permute.xlu1 %10312 }
 0x427   : > { %12310 = vrot.lane.b32.xlu0 %v29822_v2, %s33278_s17  ;;  %10322 = vrot.lane.b32.xlu1 %v29856_v13, %s33295_s9 }
 0x429   : > { %v29894_v28 = vpop.permute.xlu0 %11948  ;;  %v29896_v29 = vpop.permute.xlu1 %10314 }
 0x42b   : > { %12964 = vrot.lane.b32.xlu0 %v29816_v21, %s33276_s27  ;;  %10646 = vrot.lane.b32.xlu1 %v29844_v11, %s33291_s10 }
 0x42d   : > { %v29902_v31 = vpop.permute.xlu0 %12294  ;;  %v29904_v35 = vpop.permute.xlu1 %10640 }
 0x42e   : > { %33386 = vst [vmem:[#allocation15_spill] sm:$0xff] %v29902_v31 }
 0x42f   : > { %12972 = vrot.lane.b32.xlu0 %v29822_v2, %s33276_s27  ;;  %10650 = vrot.lane.b32.xlu1 %v29856_v13, %s33291_s10 }
 0x431   : > { %v29910_v36 = vpop.permute.xlu0 %12956  ;;  %v29912_v37 = vpop.permute.xlu1 %10642 }
 0x432   : > { %33387 = vst [vmem:[#allocation16_spill] sm:$0xff] %v29910_v36 }
 0x433   : > { %13626 = vrot.lane.b32.xlu0 %v29816_v21, %s33274_s23  ;;  %10974 = vrot.lane.b32.xlu1 %v29844_v11, %s33289_s11 }
 0x435   : > { %v29918_v39 = vpop.permute.xlu0 %13618  ;;  %v29920_v41 = vpop.permute.xlu1 %10968 }
 0x436   : > { %33388 = vst [vmem:[#allocation17_spill] sm:$0xff] %v29918_v39  ;;  %v9391_v39 = vsel %vm326_vm0, %v29852_v33, %v29864_v40 }
 0x437   : > { %9385 = vrot.lane.b32.xlu0 %v29924_v42, %s33305_s30  ;;  %10978 = vrot.lane.b32.xlu1 %v29856_v13, %s33289_s11 }
 0x439   : > { %v9376_v43 = vpop.permute.xlu0 %9375  ;;  %v29930_v44 = vpop.permute.xlu1 %10970 }
 0x43a   : > { %v9390_v45 = vsel %vm326_vm0, %v9376_v43, %v29852_v33  ;;  %v9389_v47 = vsel %vm326_vm0, %v9374_v9, %v9376_v43 }
 0x43b   : > { %9992 = vrot.lane.b32.xlu0 %v29924_v42, %s33307_s8  ;;  %11302 = vrot.lane.b32.xlu1 %v29844_v11, %s33287_s12 }
 0x43c   : > { %9407 = vmatprep.subr.mxu0 %v9390_v45 }
 0x43d   : > { %9408 = vmatpush1.msra.mxu0 %v9389_v47  ;;  %v29944_v50 = vpop.permute.xlu0 %9982  ;;  %v29946_v51 = vpop.permute.xlu1 %11296 }
 0x43e   : > { %27584 = vmatmul.mubr.msk.f32.vlgmr.msra.gmra.mrb[4].mxu0 %vm342_vm1, %v29942_v49 }
 0x43f   : > { %10320 = vrot.lane.b32.xlu0 %v29924_v42, %s33295_s9  ;;  %11306 = vrot.lane.b32.xlu1 %v29856_v13, %s33287_s12 }
 0x440   : > { %9613 = vmatprep.mubr.f32.mxu0 %v29569_v7 }
 0x441   : > { %v29955_v52 = vpop.permute.xlu0 %10310  ;;  %v29957_v53 = vpop.permute.xlu1 %11298 }
 0x443   : > { %10648 = vrot.lane.b32.xlu0 %v29924_v42, %s33291_s10  ;;  %11630 = vrot.lane.b32.xlu1 %v29844_v11, %s33285_s13  ;;  %s33546_s10 = smov 116  }
 0x445   : > { %v29963_v5 = vpop.permute.xlu0 %10638  ;;  %v29965_v54 = vpop.permute.xlu1 %11624 }
 0x447   : > { %10976 = vrot.lane.b32.xlu0 %v29924_v42, %s33289_s11  ;;  %11634 = vrot.lane.b32.xlu1 %v29856_v13, %s33285_s13  ;;  %s33547_s11 = smov 108  }
 0x449   : > { %v29971_v55 = vpop.permute.xlu0 %10966  ;;  %v29973_v56 = vpop.permute.xlu1 %11626 }
 0x44b   : > { %11304 = vrot.lane.b32.xlu0 %v29924_v42, %s33287_s12  ;;  %11958 = vrot.lane.b32.xlu1 %v29844_v11, %s33283_s14  ;;  %s33536_s12 = smov 111  }
 0x44d   : > { %v29979_v57 = vpop.permute.xlu0 %11294  ;;  %v29981_v6 = vpop.permute.xlu1 %11952 }
 0x44f   : > { %11632 = vrot.lane.b32.xlu0 %v29924_v42, %s33285_s13  ;;  %11962 = vrot.lane.b32.xlu1 %v29856_v13, %s33283_s14  ;;  %s33461_s13 = smov 36  }
 0x451   : > { %v29988_v59 = vpop.permute.xlu0 %11622  ;;  %v29990_v0 = vpop.permute.xlu1 %11954 }
 0x453   : > { %11960 = vrot.lane.b32.xlu0 %v29924_v42, %s33283_s14  ;;  %12304 = vrot.lane.b32.xlu1 %v29844_v11, %s33278_s17  ;;  %s33453_s14 = smov 44  }
 0x455   : > { %v29996_v8 = vpop.permute.xlu0 %11950  ;;  %v29998_v38 = vpop.permute.xlu1 %12298 }
 0x456   : > { %33390 = vst [vmem:[#allocation18_spill] sm:$0xff] %v29998_v38 }
 0x457   : > { %12306 = vrot.lane.b32.xlu0 %v29924_v42, %s33278_s17  ;;  %12308 = vrot.lane.b32.xlu1 %v29856_v13, %s33278_s17  ;;  %s33476_s17 = smov 35  }
 0x459   : > { %v30004_v61 = vpop.permute.xlu0 %12296  ;;  %v30006_v62 = vpop.permute.xlu1 %12300 }
 0x45a   : > { %33391 = vst [vmem:[#allocation19_spill] sm:$0xff] %v30004_v61  ;;  %33392 = vst [vmem:[#allocation20_spill] sm:$0xff] %v30006_v62 }
 0x45b   : > { %12635 = vrot.lane.b32.xlu0 %v29844_v11, %s33297_s22  ;;  %12637 = vrot.lane.b32.xlu1 %v29924_v42, %s33297_s22 }
 0x45d   : > { %v30012_v1 = vpop.permute.xlu0 %12629  ;;  %v30014_v20 = vpop.permute.xlu1 %12627 }
 0x45e   : > { %33393 = vst [vmem:[#allocation21_spill] sm:$0xff] %v30012_v1  ;;  %33394 = vst [vmem:[#allocation22_spill] sm:$0xff] %v30014_v20 }
 0x45f   : > { %12639 = vrot.lane.b32.xlu0 %v29856_v13, %s33297_s22  ;;  %12966 = vrot.lane.b32.xlu1 %v29844_v11, %s33276_s27 }
 0x461   : > { %v30020_v4 = vpop.permute.xlu0 %12631  ;;  %v30022_v9 = vpop.permute.xlu1 %12960 }
 0x462   : > { %33395 = vst [vmem:[#allocation23_spill] sm:$0xff] %v30020_v4  ;;  %33396 = vst [vmem:[#allocation24_spill] sm:$0xff] %v30022_v9 }
 0x463   : > { %12968 = vrot.lane.b32.xlu0 %v29924_v42, %s33276_s27  ;;  %12970 = vrot.lane.b32.xlu1 %v29856_v13, %s33276_s27  ;;  %s33440_s27 = smov 45  }
 0x465   : > { %v30028_v43 = vpop.permute.xlu0 %12958  ;;  %v30030_v45 = vpop.permute.xlu1 %12962 }
 0x466   : > { %33397 = vst [vmem:[#allocation25_spill] sm:$0xff] %v30028_v43  ;;  %33398 = vst [vmem:[#allocation26_spill] sm:$0xff] %v30030_v45 }
 0x467   : > { %13297 = vrot.lane.b32.xlu0 %v29844_v11, %s33299_s16  ;;  %13299 = vrot.lane.b32.xlu1 %v29924_v42, %s33299_s16 }
 0x469   : > { %v30036_v47 = vpop.permute.xlu0 %13291  ;;  %v30038_v58 = vpop.permute.xlu1 %13289 }
 0x46a   : > { %33399 = vst [vmem:[#allocation27_spill] sm:$0xff] %v30036_v47  ;;  %33400 = vst [vmem:[#allocation28_spill] sm:$0xff] %v30038_v58 }
 0x46b   : > { %13301 = vrot.lane.b32.xlu0 %v29856_v13, %s33299_s16  ;;  %13628 = vrot.lane.b32.xlu1 %v29844_v11, %s33274_s23 }
 0x46d   : > { %v30044_v48 = vpop.permute.xlu0 %13293  ;;  %v30046_v46 = vpop.permute.xlu1 %13622 }
 0x46e   : > { %33401 = vst [vmem:[#allocation29_spill] sm:$0xff] %v30044_v48  ;;  %33402 = vst [vmem:[#allocation30_spill] sm:$0xff] %v30046_v46 }
 0x46f   : > { %13630 = vrot.lane.b32.xlu0 %v29924_v42, %s33274_s23  ;;  %13632 = vrot.lane.b32.xlu1 %v29856_v13, %s33274_s23 }
 0x471   : > { %v30052_v34 = vpop.permute.xlu0 %13620  ;;  %v30054_v30 = vpop.permute.xlu1 %13624 }
 0x472   : > { %33403 = vst [vmem:[#allocation31_spill] sm:$0xff] %v30052_v34  ;;  %33404 = vst [vmem:[#allocation32_spill] sm:$0xff] %v30054_v30 }
 0x473   : > { %13634 = vrot.lane.b32.xlu0 %v29822_v2, %s33274_s23  ;;  %13951 = vrot.lane.b32.xlu1 %v29752_v63, %s33301_s15  ;;  %s33416_s23 = smov 54  }
 0x475   : > { %v30060_v24 = vpop.permute.xlu0 %9381  ;;  %v30062_v16 = vpop.permute.xlu1 %12633 }
 0x476   : > { %33405 = vst [vmem:[#allocation33_spill] sm:$0xff] %v30062_v16  ;;  %v9392_v12 = vsel %vm326_vm0, %v29864_v40, %v30060_v24 }
 0x477   : > { %13953 = vrot.lane.b32.xlu0 %v29705_v15, %s33301_s15  ;;  %9478 = vmatprep.subr.mxu1 %v9392_v12 }
 0x478   : > { %13949 = vrot.lane.b32.xlu1 %v29692_v60, %s33301_s15  ;;  %9479 = vmatpush1.msra.mxu1 %v9391_v39 }
 0x479   : > { %v30074_v34 = vpop.permute.xlu0 %9988  ;;  %v30076_v46 = vpop.permute.xlu1 %12641  ;;  %27585 = vmatmul.mubr.msk.f32.vlgmr.msra.gmra.mrb[4].mxu1 %vm342_vm1, %v29942_v49 }
 0x47a   : > { %33406 = vst [vmem:[#allocation34_spill] sm:$0xff] %v30076_v46  ;;  %9684 = vmatprep.mubr.f32.mxu1 %v29569_v7 }
 0x47b   : > { %13955 = vrot.lane.b32.xlu0 %v29717_v3, %s33301_s15 }
 0x47c   : > { %13957 = vrot.lane.b32.xlu1 %v29816_v21, %s33301_s15 }
 0x47d   : > { %v30085_v12 = vpop.permute.xlu0 %10316  ;;  %v30087_v33 = vpop.permute.xlu1 %13295 }
 0x47e   : > { %33407 = vst [vmem:[#allocation35_spill] sm:$0xff] %v30087_v33 }
 0x47f   : > { %13959 = vrot.lane.b32.xlu0 %v29844_v11, %s33301_s15 }
 0x480   : > { %13961 = vrot.lane.b32.xlu1 %v29924_v42, %s33301_s15 }
 0x481   : > { %v30093_v40 = vpop.permute.xlu0 %10644  ;;  %v30095_v39 = vpop.permute.xlu1 %13303 }
 0x482   : > { %33408 = vst [vmem:[#allocation36_spill] sm:$0xff] %v30095_v39 }
 0x483   : > { %13963 = vrot.lane.b32.xlu0 %v29856_v13, %s33301_s15 }
 0x484   : > { %13965 = vrot.lane.b32.xlu1 %v29822_v2, %s33301_s15 }
 0x485   : > { %v30101_v30 = vpop.permute.xlu0 %10972  ;;  %v9384_v10 = vpop.permute.xlu1 %9383 }
 0x487   : > { %14282 = vrot.lane.b32.xlu0 %v29752_v63, %s33272_s20 }
 0x488   : > { %14284 = vrot.lane.b32.xlu1 %v29705_v15, %s33272_s20 }
 0x489   : > { %v30107_v58 = vpop.permute.xlu0 %11300  ;;  %v9388_v47 = vpop.permute.xlu1 %9387 }
 0x48a   : > { %9620 = vmatprep.subr.mxu1 %v9388_v47 }
 0x48b   : > { %14280 = vrot.lane.b32.xlu0 %v29692_v60, %s33272_s20 }
 0x48c   : > { %14286 = vrot.lane.b32.xlu1 %v29717_v3, %s33272_s20 }
 0x48d   : > { %v30113_v39 = vpop.permute.xlu0 %11628  ;;  %v30115_v48 = vpop.permute.xlu1 %9990 }
 0x48f   : > { %14288 = vrot.lane.b32.xlu0 %v29816_v21, %s33272_s20 }
 0x490   : > { %14290 = vrot.lane.b32.xlu1 %v29844_v11, %s33272_s20 }
 0x491   : > { %v30121_v33 = vpop.permute.xlu0 %11956  ;;  %v30123_v36 = vpop.permute.xlu1 %9994 }
 0x493   : > { %14292 = vrot.lane.b32.xlu0 %v29924_v42, %s33272_s20 }
 0x494   : > { %14294 = vrot.lane.b32.xlu1 %v29856_v13, %s33272_s20 }
 0x495   : > { %v30129_v43 = vpop.permute.xlu0 %12302  ;;  %v30131_v9 = vpop.permute.xlu1 %10318 }
 0x496   : > { %33409 = vst [vmem:[#allocation37_spill] sm:$0xff] %v30129_v43 }
 0x497   : > { %14296 = vrot.lane.b32.xlu0 %v29822_v2, %s33272_s20  ;;  %s33415_s20 = smov 55  }
 0x498   : > { %14613 = vrot.lane.b32.xlu1 %v29752_v63, %s33303_s28 }
 0x499   : > { %v30137_v45 = vpop.permute.xlu0 %12310  ;;  %v30139_v46 = vpop.permute.xlu1 %10322 }
 0x49a   : > { %33410 = vst [vmem:[#allocation38_spill] sm:$0xff] %v30137_v45 }
 0x49b   : > { %14615 = vrot.lane.b32.xlu0 %v29705_v15, %s33303_s28 }
 0x49c   : > { %14611 = vrot.lane.b32.xlu1 %v29692_v60, %s33303_s28 }
 0x49d   : > { %v30145_v26 = vpop.permute.xlu0 %12964  ;;  %v30147_v20 = vpop.permute.xlu1 %10646 }
 0x49e   : > { %33411 = vst [vmem:[#allocation39_spill] sm:$0xff] %v30145_v26 }
 0x49f   : > { %14617 = vrot.lane.b32.xlu0 %v29717_v3, %s33303_s28 }
 0x4a0   : > { %14619 = vrot.lane.b32.xlu1 %v29816_v21, %s33303_s28 }
 0x4a1   : > { %v30153_v1 = vpop.permute.xlu0 %12972  ;;  %v30155_v4 = vpop.permute.xlu1 %10650 }
 0x4a2   : > { %33412 = vst [vmem:[#allocation40_spill] sm:$0xff] %v30153_v1 }
 0x4a3   : > { %14621 = vrot.lane.b32.xlu0 %v29844_v11, %s33303_s28 }
 0x4a4   : > { %14623 = vrot.lane.b32.xlu1 %v29924_v42, %s33303_s28 }
 0x4a5   : > { %v30161_v16 = vpop.permute.xlu0 %13626  ;;  %v30163_v26 = vpop.permute.xlu1 %10974 }
 0x4a6   : > { %33413 = vst [vmem:[#allocation41_spill] sm:$0xff] %v30161_v16  ;;  %v9393_v16 = vsel %vm326_vm0, %v30060_v24, %v9384_v10 }
 0x4a7   : > { %14625 = vrot.lane.b32.xlu0 %v29856_v13, %s33303_s28 }
 0x4a8   : > { %14627 = vrot.lane.b32.xlu1 %v29822_v2, %s33303_s28 }
 0x4a9   : > { %v9386_v45 = vpop.permute.xlu0 %9385  ;;  %v30169_v1 = vpop.permute.xlu1 %10978 }
 0x4aa   : > { %v9394_v31 = vsel %vm326_vm0, %v9384_v10, %v9386_v45  ;;  %v9395_v61 = vsel %vm326_vm0, %v9386_v45, %v9388_v47  ;;  %v9998_v45 = vsel %vm935_vm2, %v29872_v17, %v29880_v22  ;;  %v9996_v47 = vsel %vm935_vm2, %v29838_v27, %v29944_v50 }
 0x4ab   : > { %14944 = vrot.lane.b32.xlu0 %v29752_v63, %s33270_s21  ;;  %9549 = vmatprep.subr.mxu0 %v9394_v31  ;;  %v9997_v31 = vsel %vm935_vm2, %v29944_v50, %v29872_v17  ;;  %v27592_v17 = vld [vmem:[%s33389_s2 + $0x10] sm:$0xff] }
 0x4ac   : > { %14946 = vrot.lane.b32.xlu1 %v29705_v15, %s33270_s21  ;;  %9621 = vmatpush1.msra.mxu1 %v9395_v61 }
 0x4ad   : > { %9550 = vmatpush1.msra.mxu0 %v9393_v16  ;;  %27587 = vmatmul.mubr.msk.f32.vlgmr.msra.gmra.mrb[6].mxu1 %vm342_vm1, %v29942_v49  ;;  %v9993_v38 = vpop.permute.xlu0 %9992  ;;  %v30181_v62 = vpop.permute.xlu1 %11302  ;;  %v9362_v16 = vld [vmem:[%s33389_s2] sm:$0xff] }
 0x4ae   : > { %9765 = vmatprep.subr.mxu1 %v29717_v3  ;;  %27586 = vmatmul.mubr.msk.f32.vlgmr.msra.gmra.mrb[6].mxu0 %vm342_vm1, %v29942_v49  ;;  %v10001_v43 = vsel %vm935_vm2, %v30115_v48, %v9993_v38  ;;  %v10002_v27 = vsel %vm935_vm2, %v9993_v38, %v30123_v36  ;;  %v10326_v38 = vsel %vm1264_vm3, %v29888_v25, %v29896_v29 }
 0x4af   : > { %9694 = vmatprep.subr.mxu0 %v29752_v63  ;;  %9766 = vmatpush1.msra.mxu1 %v29705_v15 }
 0x4b0   : > { %9695 = vmatpush1.msra.mxu0 %v29692_v60  ;;  %9907 = vmatprep.subr.mxu1 %v29856_v13 }
 0x4b1   : > { %14942 = vrot.lane.b32.xlu0 %v29692_v60, %s33270_s21  ;;  %14948 = vrot.lane.b32.xlu1 %v29717_v3, %s33270_s21  ;;  %v30197_v24 = vpop.permute.xlu0 %10320  ;;  %v30199_v10 = vpop.permute.xlu1 %11306  ;;  %v9999_v60 = vsel %vm935_vm2, %v29880_v22, %v30074_v34 }
 0x4b2   : > { %9829 = vmatprep.mubr.f32.mxu1 %v29569_v7  ;;  %9836 = vmatprep.subr.mxu0 %v29844_v11 }
 0x4b3   : > { %9758 = vmatprep.mubr.f32.mxu0 %v29569_v7  ;;  %27589 = vmatmul.mubr.msk.f32.vlgmr.msra.gmra.mrb[4].mxu1 %vm342_vm1, %v9362_v16 }
 0x4b4   : > { %9908 = vmatpush1.msra.mxu1 %v29924_v42  ;;  %27588 = vmatmul.mubr.msk.f32.vlgmr.msra.gmra.mrb[4].mxu0 %vm342_vm1, %v9362_v16 }
 0x4b5   : > { %9837 = vmatpush1.msra.mxu0 %v29816_v21  ;;  %10085 = vmatprep.subr.mxu1 %v9999_v60  ;;  %v30214_v49 = vpop.permute.xlu0 %10648  ;;  %v30216_v61 = vpop.permute.xlu1 %11630 }
 0x4b6   : > { %10014 = vmatprep.subr.mxu0 %v9997_v31  ;;  %14950 = vrot.lane.b32.xlu0 %v29816_v21, %s33270_s21 }
 0x4b7   : > { %14952 = vrot.lane.b32.xlu1 %v29844_v11, %s33270_s21  ;;  %9971 = vmatprep.mubr.f32.mxu1 %v29569_v7 }
 0x4b8   : > { %9900 = vmatprep.mubr.f32.mxu0 %v29569_v7  ;;  %27591 = vmatmul.mubr.msk.f32.vlgmr.msra.gmra.mrb[6].mxu1 %vm342_vm1, %v9362_v16 }
 0x4b9   : > { %10086 = vmatpush1.msra.mxu1 %v9998_v45  ;;  %27590 = vmatmul.mubr.msk.f32.vlgmr.msra.gmra.mrb[6].mxu0 %vm342_vm1, %v9362_v16  ;;  %v30232_v60 = vpop.permute.xlu0 %10976  ;;  %v30234_v31 = vpop.permute.xlu1 %11634  ;;  %v10327_v16 = vsel %vm1264_vm3, %v29896_v29, %v30085_v12  ;;  %v10324_v45 = vsel %vm1264_vm3, %v29850_v32, %v29955_v52  ;;  %v10330_v32 = vsel %vm1264_vm3, %v30197_v24, %v30139_v46 }
 0x4ba   : > { %10015 = vmatpush1.msra.mxu0 %v9996_v47  ;;  %10227 = vmatprep.subr.mxu1 %v30123_v36  ;;  %v10325_v36 = vsel %vm1264_vm3, %v29955_v52, %v29888_v25  ;;  %v10329_v47 = vsel %vm1264_vm3, %v30131_v9, %v30197_v24  ;;  %v10328_v52 = vsel %vm1264_vm3, %v30085_v12, %v30131_v9 }
 0x4bb   : > { %10156 = vmatprep.subr.mxu0 %v10001_v43  ;;  %14954 = vrot.lane.b32.xlu0 %v29924_v42, %s33270_s21  ;;  %v10000_v43 = vsel %vm935_vm2, %v30074_v34, %v30115_v48  ;;  %v10654_v9 = vsel %vm1593_vm4, %v29904_v35, %v29912_v37  ;;  %v10652_v12 = vsel %vm1593_vm4, %v29862_v14, %v29963_v5 }
 0x4bc   : > { %14956 = vrot.lane.b32.xlu1 %v29856_v13, %s33270_s21  ;;  %10149 = vmatprep.mubr.f32.mxu1 %v29569_v7  ;;  %v10658_v14 = vsel %vm1593_vm4, %v30214_v49, %v30155_v4 }
 0x4bd   : > { %10078 = vmatprep.mubr.f32.mxu0 %v29569_v7  ;;  %27594 = vmatmul.mubr.msk.f32.vlgmr.msra.gmra.mrb[4].mxu1 %vm342_vm1, %v27592_v17  ;;  %v30251_v22 = vpop.permute.xlu0 %11304  ;;  %v30253_v50 = vpop.permute.xlu1 %11958 }
 0x4be   : > { %10228 = vmatpush1.msra.mxu1 %v10002_v27  ;;  %27593 = vmatmul.mubr.msk.f32.vlgmr.msra.gmra.mrb[4].mxu0 %vm342_vm1, %v27592_v17  ;;  %v27597_v27 = vld [vmem:[%s33389_s2 + $0x18] sm:$0xff] }
 0x4bf   : > { %10157 = vmatpush1.msra.mxu0 %v10000_v43  ;;  %10413 = vmatprep.subr.mxu1 %v10327_v16  ;;  %v10653_v43 = vsel %vm1593_vm4, %v29963_v5, %v29904_v35  ;;  %v27602_v35 = vld [vmem:[%s33389_s2 + $0x20] sm:$0xff] }
 0x4c0   : > { %10342 = vmatprep.subr.mxu0 %v10325_v36  ;;  %14958 = vrot.lane.b32.xlu0 %v29822_v2, %s33270_s21  ;;  %s33427_s21 = smov 46  }
 0x4c1   : > { %15293 = vrot.lane.b32.xlu1 %v29705_v15, %s33414_s26  ;;  %10291 = vmatprep.mubr.f32.mxu1 %v29569_v7  ;;  %v30270_v34 = vpop.permute.xlu0 %11632  ;;  %v30272_v48 = vpop.permute.xlu1 %11962 }
 0x4c2   : > { %10220 = vmatprep.mubr.f32.mxu0 %v29569_v7  ;;  %27596 = vmatmul.mubr.msk.f32.vlgmr.msra.gmra.mrb[6].mxu1 %vm342_vm1, %v27592_v17 }
 0x4c3   : > { %10414 = vmatpush1.msra.mxu1 %v10326_v38  ;;  %27595 = vmatmul.mubr.msk.f32.vlgmr.msra.gmra.mrb[6].mxu0 %vm342_vm1, %v27592_v17  ;;  %v10655_v17 = vsel %vm1593_vm4, %v29912_v37, %v30093_v40  ;;  %v10657_v38 = vsel %vm1593_vm4, %v30147_v20, %v30214_v49  ;;  %v10982_v49 = vsel %vm1922_vm5, %v29920_v41, %v29930_v44 }
 0x4c4   : > { %10343 = vmatpush1.msra.mxu0 %v10324_v45  ;;  %10555 = vmatprep.subr.mxu1 %v30139_v46  ;;  %v10656_v45 = vsel %vm1593_vm4, %v30093_v40, %v30147_v20 }
 0x4c5   : > { %10484 = vmatprep.subr.mxu0 %v10329_v47  ;;  %15295 = vrot.lane.b32.xlu0 %v29717_v3, %s33414_s26  ;;  %v30292_v25 = vpop.permute.xlu0 %11960  ;;  %v30294_v29 = vpop.permute.xlu1 %12304  ;;  %v10983_v47 = vsel %vm1922_vm5, %v29930_v44, %v30101_v30 }
 0x4c6   : > { %15291 = vrot.lane.b32.xlu1 %v29752_v63, %s33414_s26  ;;  %10477 = vmatprep.mubr.f32.mxu1 %v29569_v7 }
 0x4c7   : > { %10406 = vmatprep.mubr.f32.mxu0 %v29569_v7  ;;  %27599 = vmatmul.mubr.msk.f32.vlgmr.msra.gmra.mrb[4].mxu1 %vm342_vm1, %v27597_v27 }
 0x4c8   : > { %10556 = vmatpush1.msra.mxu1 %v10330_v32  ;;  %27598 = vmatmul.mubr.msk.f32.vlgmr.msra.gmra.mrb[4].mxu0 %vm342_vm1, %v27597_v27  ;;  %v10980_v32 = vsel %vm1922_vm5, %v29870_v18, %v29971_v55  ;;  %v10986_v18 = vsel %vm1922_vm5, %v30232_v60, %v30169_v1 }
 0x4c9   : > { %10485 = vmatpush1.msra.mxu0 %v10328_v52  ;;  %10741 = vmatprep.subr.mxu1 %v10655_v17  ;;  %v30314_v16 = vpop.permute.xlu0 %12306  ;;  %v30316_v46 = vpop.permute.xlu1 %12308  ;;  %v10985_v52 = vsel %vm1922_vm5, %v30163_v26, %v30232_v60  ;;  %v27607_v17 = vld [vmem:[%s33389_s2 + $0x28] sm:$0xff] }
 0x4ca   : > { %10670 = vmatprep.subr.mxu0 %v10653_v43  ;;  %15297 = vrot.lane.b32.xlu0 %v29816_v21, %s33414_s26  ;;  %v11311_v43 = vsel %vm2251_vm6, %v29957_v53, %v30107_v58 }
 0x4cb   : > { %15299 = vrot.lane.b32.xlu1 %v29844_v11, %s33414_s26  ;;  %10619 = vmatprep.mubr.f32.mxu1 %v29569_v7 }
 0x4cc   : > { %10548 = vmatprep.mubr.f32.mxu0 %v29569_v7  ;;  %27601 = vmatmul.mubr.msk.f32.vlgmr.msra.gmra.mrb[6].mxu1 %vm342_vm1, %v27597_v27 }
 0x4cd   : > { %10742 = vmatpush1.msra.mxu1 %v10654_v9  ;;  %27600 = vmatmul.mubr.msk.f32.vlgmr.msra.gmra.mrb[6].mxu0 %vm342_vm1, %v27597_v27  ;;  %v30332_v24 = vpop.permute.xlu0 %12635  ;;  %v30334_v36 = vpop.permute.xlu1 %12637  ;;  %v30364_v27 = vld [vmem:[#allocation2 + $0x48] sm:$0xff]  ;;  %v11309_v9 = vsel %vm2251_vm6, %v29979_v57, %v29946_v51 }
 0x4ce   : > { %10671 = vmatpush1.msra.mxu0 %v10652_v12  ;;  %10883 = vmatprep.subr.mxu1 %v30155_v4  ;;  %v10981_v4 = vsel %vm1922_vm5, %v29971_v55, %v29920_v41  ;;  %v10984_v55 = vsel %vm1922_vm5, %v30101_v30, %v30163_v26  ;;  %v11310_v30 = vsel %vm2251_vm6, %v29946_v51, %v29957_v53  ;;  %v27612_v51 = vld [vmem:[%s33389_s2 + $0x30] sm:$0xff] }
 0x4cf   : > { %10812 = vmatprep.subr.mxu0 %v10657_v38  ;;  %15301 = vrot.lane.b32.xlu0 %v29924_v42, %s33414_s26  ;;  %v11308_v26 = vsel %vm2251_vm6, %v29878_v19, %v29979_v57  ;;  %v11314_v19 = vsel %vm2251_vm6, %v30251_v22, %v30199_v10 }
 0x4d0   : > { %15303 = vrot.lane.b32.xlu1 %v29856_v13, %s33414_s26  ;;  %10805 = vmatprep.mubr.f32.mxu1 %v29569_v7 }
 0x4d1   : > { %10734 = vmatprep.mubr.f32.mxu0 %v29569_v7  ;;  %27604 = vmatmul.mubr.msk.f32.vlgmr.msra.gmra.mrb[4].mxu1 %vm342_vm1, %v27602_v35  ;;  %v30353_v37 = vpop.permute.xlu0 %12639  ;;  %v30355_v5 = vpop.permute.xlu1 %12966 }
 0x4d2   : > { %10884 = vmatpush1.msra.mxu1 %v10658_v14  ;;  %27603 = vmatmul.mubr.msk.f32.vlgmr.msra.gmra.mrb[4].mxu0 %vm342_vm1, %v27602_v35  ;;  %v11312_v14 = vsel %vm2251_vm6, %v30107_v58, %v30181_v62 }
 0x4d3   : > { %10813 = vmatpush1.msra.mxu0 %v10656_v45  ;;  %11069 = vmatprep.subr.mxu1 %v10983_v47  ;;  %v11639_v45 = vsel %vm2580_vm7, %v29973_v56, %v30113_v39  ;;  %v11636_v47 = vsel %vm2580_vm7, %v29886_v23, %v29988_v59 }
 0x4d4   : > { %10998 = vmatprep.subr.mxu0 %v10981_v4  ;;  %15305 = vrot.lane.b32.xlu0 %v29822_v2, %s33414_s26  ;;  %v11641_v4 = vsel %vm2580_vm7, %v30216_v61, %v30270_v34 }
 0x4d5   : > { %15307 = vrot.lane.b32.xlu1 %v30364_v27, %s33414_s26  ;;  %10947 = vmatprep.mubr.f32.mxu1 %v29569_v7  ;;  %v30374_v20 = vpop.permute.xlu0 %12968  ;;  %v30376_v40 = vpop.permute.xlu1 %12970 }
 0x4d6   : > { %10876 = vmatprep.mubr.f32.mxu0 %v29569_v7  ;;  %27606 = vmatmul.mubr.msk.f32.vlgmr.msra.gmra.mrb[6].mxu1 %vm342_vm1, %v27602_v35 }
 0x4d7   : > { %11070 = vmatpush1.msra.mxu1 %v10982_v49  ;;  %27605 = vmatmul.mubr.msk.f32.vlgmr.msra.gmra.mrb[6].mxu0 %vm342_vm1, %v27602_v35  ;;  %v11313_v35 = vsel %vm2251_vm6, %v30181_v62, %v30251_v22  ;;  %v11638_v62 = vsel %vm2580_vm7, %v29965_v54, %v29973_v56  ;;  %v11640_v49 = vsel %vm2580_vm7, %v30113_v39, %v30216_v61 }
 0x4d8   : > { %10999 = vmatpush1.msra.mxu0 %v10980_v32  ;;  %11211 = vmatprep.subr.mxu1 %v30169_v1  ;;  %v11967_v32 = vsel %vm2909_vm8, %v29990_v0, %v30121_v33  ;;  %v11966_v39 = vsel %vm2909_vm8, %v29981_v6, %v29990_v0  ;;  %v11964_v61 = vsel %vm2909_vm8, %v29894_v28, %v29996_v8 }
 0x4d9   : > { %11140 = vmatprep.subr.mxu0 %v10985_v52  ;;  %15624 = vrot.lane.b32.xlu0 %v29705_v15, %s33415_s20  ;;  %v30396_v41 = vpop.permute.xlu0 %13297  ;;  %v30398_v44 = vpop.permute.xlu1 %13299  ;;  %v11965_v52 = vsel %vm2909_vm8, %v29996_v8, %v29981_v6  ;;  %v27622_v6 = vld [vmem:[%s33389_s2 + $0x40] sm:$0xff]  ;;  %v11970_v28 = vsel %vm2909_vm8, %v30292_v25, %v30272_v48 }
 0x4da   : > { %15626 = vrot.lane.b32.xlu1 %v29717_v3, %s33415_s20  ;;  %11133 = vmatprep.mubr.f32.mxu1 %v29569_v7 }
 0x4db   : > { %11062 = vmatprep.mubr.f32.mxu0 %v29569_v7  ;;  %27609 = vmatmul.mubr.msk.f32.vlgmr.msra.gmra.mrb[4].mxu1 %vm342_vm1, %v27607_v17 }
 0x4dc   : > { %11212 = vmatpush1.msra.mxu1 %v10986_v18  ;;  %27608 = vmatmul.mubr.msk.f32.vlgmr.msra.gmra.mrb[4].mxu0 %vm342_vm1, %v27607_v17  ;;  %v11969_v18 = vsel %vm2909_vm8, %v30253_v50, %v30292_v25 }
 0x4dd   : > { %11141 = vmatpush1.msra.mxu0 %v10984_v55  ;;  %11397 = vmatprep.subr.mxu1 %v11311_v43  ;;  %v30418_v12 = vpop.permute.xlu0 %13301  ;;  %v30420_v1 = vpop.permute.xlu1 %13628  ;;  %v11968_v55 = vsel %vm2909_vm8, %v30121_v33, %v30253_v50  ;;  %v33417_v43 = vld [vmem:[#allocation37_spill] sm:$0xff] }
 0x4de   : > { %11326 = vmatprep.subr.mxu0 %v11309_v9  ;;  %15622 = vrot.lane.b32.xlu0 %v29752_v63, %s33415_s20  ;;  %v33418_v9 = vld [vmem:[#allocation20_spill] sm:$0xff] }
 0x4df   : > { %15628 = vrot.lane.b32.xlu1 %v29816_v21, %s33415_s20  ;;  %11275 = vmatprep.mubr.f32.mxu1 %v29569_v7 }
 0x4e0   : > { %11204 = vmatprep.mubr.f32.mxu0 %v29569_v7  ;;  %27611 = vmatmul.mubr.msk.f32.vlgmr.msra.gmra.mrb[6].mxu1 %vm342_vm1, %v27607_v17 }
 0x4e1   : > { %11398 = vmatpush1.msra.mxu1 %v11310_v30  ;;  %27610 = vmatmul.mubr.msk.f32.vlgmr.msra.gmra.mrb[6].mxu0 %vm342_vm1, %v27607_v17  ;;  %v30436_v60 = vpop.permute.xlu0 %13630  ;;  %v30438_v38 = vpop.permute.xlu1 %13632  ;;  %v12315_v30 = vsel %vm3258_vm9, %v33418_v9, %v33417_v43 }
 0x4e2   : > { %11327 = vmatpush1.msra.mxu0 %v11308_v26  ;;  %11539 = vmatprep.subr.mxu1 %v30199_v10  ;;  %v11637_v10 = vsel %vm2580_vm7, %v29988_v59, %v29965_v54  ;;  %v27617_v54 = vld [vmem:[%s33389_s2 + $0x38] sm:$0xff]  ;;  %v11642_v59 = vsel %vm2580_vm7, %v30270_v34, %v30234_v31 }
 0x4e3   : > { %11468 = vmatprep.subr.mxu0 %v11313_v35  ;;  %15630 = vrot.lane.b32.xlu0 %v29844_v11, %s33415_s20  ;;  %v33419_v35 = vld [vmem:[#allocation18_spill] sm:$0xff] }
 0x4e4   : > { %15632 = vrot.lane.b32.xlu1 %v29924_v42, %s33415_s20  ;;  %11461 = vmatprep.mubr.f32.mxu1 %v29569_v7  ;;  %v12314_v50 = vsel %vm3258_vm9, %v33419_v35, %v33418_v9 }
 0x4e5   : > { %11390 = vmatprep.mubr.f32.mxu0 %v29569_v7  ;;  %27614 = vmatmul.mubr.msk.f32.vlgmr.msra.gmra.mrb[4].mxu1 %vm342_vm1, %v27612_v51  ;;  %v30457_v53 = vpop.permute.xlu0 %13634  ;;  %v30459_v57 = vpop.permute.xlu1 %13951 }
 0x4e6   : > { %11540 = vmatpush1.msra.mxu1 %v11314_v19  ;;  %27613 = vmatmul.mubr.msk.f32.vlgmr.msra.gmra.mrb[4].mxu0 %vm342_vm1, %v27612_v51  ;;  %v33421_v19 = vld [vmem:[#allocation15_spill] sm:$0xff] }
 0x4e7   : > { %11469 = vmatpush1.msra.mxu0 %v11312_v14  ;;  %11725 = vmatprep.subr.mxu1 %v11639_v45  ;;  %v33422_v45 = vld [vmem:[#allocation38_spill] sm:$0xff] }
 0x4e8   : > { %11654 = vmatprep.subr.mxu0 %v11637_v10  ;;  %15634 = vrot.lane.b32.xlu0 %v29856_v13, %s33415_s20  ;;  %v12319_v10 = vsel %vm3258_vm9, %v30316_v46, %v33422_v45  ;;  %v33431_v45 = vld [vmem:[#allocation26_spill] sm:$0xff] }
 0x4e9   : > { %15636 = vrot.lane.b32.xlu1 %v29822_v2, %s33415_s20  ;;  %11603 = vmatprep.mubr.f32.mxu1 %v29569_v7  ;;  %v30476_v58 = vpop.permute.xlu0 %13953 }
 0x4ea   : > { %11532 = vmatprep.mubr.f32.mxu0 %v29569_v7  ;;  %27616 = vmatmul.mubr.msk.f32.vlgmr.msra.gmra.mrb[6].mxu1 %vm342_vm1, %v27612_v51  ;;  %v30483_v22 = vpop.permute.xlu1 %13949 }
 0x4eb   : > { %11726 = vmatpush1.msra.mxu1 %v11638_v62  ;;  %27615 = vmatmul.mubr.msk.f32.vlgmr.msra.gmra.mrb[6].mxu0 %vm342_vm1, %v27612_v51  ;;  %v33420_v51 = vld [vmem:[#allocation19_spill] sm:$0xff]  ;;  %v12317_v62 = vsel %vm3258_vm9, %v30294_v29, %v30314_v16 }
 0x4ec   : > { %11655 = vmatpush1.msra.mxu0 %v11636_v47  ;;  %11867 = vmatprep.subr.mxu1 %v30234_v31  ;;  %v12312_v14 = vsel %vm3258_vm9, %v33421_v19, %v33420_v51  ;;  %v27627_v47 = vld [vmem:[%s33389_s2 + $0x48] sm:$0xff] }
 0x4ed   : > { %11796 = vmatprep.subr.mxu0 %v11641_v4  ;;  %15638 = vrot.lane.b32.xlu0 %v30364_v27, %s33415_s20  ;;  %v30498_v56 = vpop.permute.xlu0 %13955 }
 0x4ee   : > { %15955 = vrot.lane.b32.xlu1 %v29705_v15, %s33416_s23  ;;  %11789 = vmatprep.mubr.f32.mxu1 %v29569_v7  ;;  %v30503_v23 = vpop.permute.xlu1 %13957 }
 0x4ef   : > { %11718 = vmatprep.mubr.f32.mxu0 %v29569_v7  ;;  %27619 = vmatmul.mubr.msk.f32.vlgmr.msra.gmra.mrb[4].mxu1 %vm342_vm1, %v27617_v54 }
 0x4f0   : > { %11868 = vmatpush1.msra.mxu1 %v11642_v59  ;;  %27618 = vmatmul.mubr.msk.f32.vlgmr.msra.gmra.mrb[4].mxu0 %vm342_vm1, %v27617_v54  ;;  %v12318_v59 = vsel %vm3258_vm9, %v30314_v16, %v30316_v46  ;;  %v33428_v46 = vld [vmem:[#allocation13_spill] sm:$0xff] }
 0x4f1   : > { %11797 = vmatpush1.msra.mxu0 %v11640_v49  ;;  %12053 = vmatprep.subr.mxu1 %v11967_v32  ;;  %v30520_v17 = vpop.permute.xlu0 %13959  ;;  %v33423_v49 = vld [vmem:[#allocation33_spill] sm:$0xff]  ;;  %v33424_v32 = vld [vmem:[#allocation23_spill] sm:$0xff] }
 0x4f2   : > { %11982 = vmatprep.subr.mxu0 %v11965_v52  ;;  %15957 = vrot.lane.b32.xlu0 %v29717_v3, %s33416_s23  ;;  %v30524_v31 = vpop.permute.xlu1 %13961  ;;  %v12646_v52 = vsel %vm3590_vm10, %v33424_v32, %v33423_v49  ;;  %v12647_v19 = vsel %vm3590_vm10, %v33423_v49, %v30332_v24  ;;  %v33434_v49 = vld [vmem:[#allocation16_spill] sm:$0xff] }
 0x4f3   : > { %15953 = vrot.lane.b32.xlu1 %v29752_v63, %s33416_s23  ;;  %11931 = vmatprep.mubr.f32.mxu1 %v29569_v7 }
 0x4f4   : > { %11860 = vmatprep.mubr.f32.mxu0 %v29569_v7  ;;  %27621 = vmatmul.mubr.msk.f32.vlgmr.msra.gmra.mrb[6].mxu1 %vm342_vm1, %v27617_v54 }
 0x4f5   : > { %12054 = vmatpush1.msra.mxu1 %v11966_v39  ;;  %27620 = vmatmul.mubr.msk.f32.vlgmr.msra.gmra.mrb[6].mxu0 %vm342_vm1, %v27617_v54  ;;  %v30538_v34 = vpop.permute.xlu0 %13963  ;;  %v33425_v39 = vld [vmem:[#allocation21_spill] sm:$0xff] }
 0x4f6   : > { %11983 = vmatpush1.msra.mxu0 %v11964_v61  ;;  %12195 = vmatprep.subr.mxu1 %v30272_v48  ;;  %v30547_v0 = vpop.permute.xlu1 %13965  ;;  %v12313_v48 = vsel %vm3258_vm9, %v33420_v51, %v33419_v35  ;;  %v33426_v61 = vld [vmem:[#allocation22_spill] sm:$0xff]  ;;  %v27632_v35 = vld [vmem:[%s33389_s2 + $0x50] sm:$0xff] }
 0x4f7   : > { %12124 = vmatprep.subr.mxu0 %v11969_v18  ;;  %15959 = vrot.lane.b32.xlu0 %v29816_v21, %s33416_s23  ;;  %v12644_v18 = vsel %vm3590_vm10, %v33426_v61, %v33425_v39 }
 0x4f8   : > { %15961 = vrot.lane.b32.xlu1 %v29844_v11, %s33416_s23  ;;  %12117 = vmatprep.mubr.f32.mxu1 %v29569_v7 }
 0x4f9   : > { %12046 = vmatprep.mubr.f32.mxu0 %v29569_v7  ;;  %27624 = vmatmul.mubr.msk.f32.vlgmr.msra.gmra.mrb[4].mxu1 %vm342_vm1, %v27622_v6  ;;  %v30559_v8 = vpop.permute.xlu0 %14282 }
 0x4fa   : > { %12196 = vmatpush1.msra.mxu1 %v11970_v28  ;;  %27623 = vmatmul.mubr.msk.f32.vlgmr.msra.gmra.mrb[4].mxu0 %vm342_vm1, %v27622_v6  ;;  %v30568_v26 = vpop.permute.xlu1 %14284  ;;  %v12643_v28 = vsel %vm3590_vm10, %v33428_v46, %v33426_v61  ;;  %v12979_v61 = vsel %vm33282_vm11, %v30355_v5, %v30374_v20  ;;  %v30710_v46 = vld [vmem:[#allocation2 + $0x40] sm:$0xff] }
 0x4fb   : > { %12125 = vmatpush1.msra.mxu0 %v11968_v55  ;;  %12402 = vmatprep.subr.mxu1 %v12315_v30  ;;  %v33429_v55 = vld [vmem:[#allocation34_spill] sm:$0xff]  ;;  %v12648_v30 = vsel %vm3590_vm10, %v30332_v24, %v30334_v36 }
 0x4fc   : > { %12331 = vmatprep.subr.mxu0 %v12313_v48  ;;  %15963 = vrot.lane.b32.xlu0 %v29924_v42, %s33416_s23  ;;  %v12649_v48 = vsel %vm3590_vm10, %v30334_v36, %v30353_v37 }
 0x4fd   : > { %15965 = vrot.lane.b32.xlu1 %v29856_v13, %s33416_s23  ;;  %12259 = vmatprep.mubr.f32.mxu1 %v29569_v7  ;;  %v30578_v33 = vpop.permute.xlu0 %14280 }
 0x4fe   : > { %12188 = vmatprep.mubr.f32.mxu0 %v29569_v7  ;;  %27626 = vmatmul.mubr.msk.f32.vlgmr.msra.gmra.mrb[6].mxu1 %vm342_vm1, %v27622_v6  ;;  %v30585_v25 = vpop.permute.xlu1 %14286 }
 0x4ff   : > { %12403 = vmatpush1.msra.mxu1 %v12314_v50  ;;  %27625 = vmatmul.mubr.msk.f32.vlgmr.msra.gmra.mrb[6].mxu0 %vm342_vm1, %v27622_v6 }
 0x500   : > { %12332 = vmatpush1.msra.mxu0 %v12312_v14  ;;  %12544 = vmatprep.subr.mxu1 %v12319_v10  ;;  %v33430_v14 = vld [vmem:[#allocation39_spill] sm:$0xff] }
 0x501   : > { %12473 = vmatprep.subr.mxu0 %v12317_v62  ;;  %15967 = vrot.lane.b32.xlu0 %v29822_v2, %s33416_s23  ;;  %v30602_v4 = vpop.permute.xlu0 %14288  ;;  %v12316_v2 = vsel %vm3258_vm9, %v33417_v43, %v30294_v29  ;;  %v12645_v29 = vsel %vm3590_vm10, %v33425_v39, %v33424_v32  ;;  %v12650_v43 = vsel %vm3590_vm10, %v30353_v37, %v33429_v55 }
 0x502   : > { %15969 = vrot.lane.b32.xlu1 %v30364_v27, %s33416_s23  ;;  %12466 = vmatprep.mubr.f32.mxu1 %v29569_v7  ;;  %v30607_v54 = vpop.permute.xlu1 %14290  ;;  %v12977_v10 = vsel %vm33282_vm11, %v33431_v45, %v33430_v14  ;;  %v12980_v55 = vsel %vm33282_vm11, %v30374_v20, %v30376_v40 }
 0x503   : > { %12395 = vmatprep.mubr.f32.mxu0 %v29569_v7  ;;  %27629 = vmatmul.mubr.msk.f32.vlgmr.msra.gmra.mrb[4].mxu1 %vm342_vm1, %v27627_v47 }
 0x504   : > { %12545 = vmatpush1.msra.mxu1 %v12318_v59  ;;  %27628 = vmatmul.mubr.msk.f32.vlgmr.msra.gmra.mrb[4].mxu0 %vm342_vm1, %v27627_v47  ;;  %v33433_v59 = vld [vmem:[#allocation25_spill] sm:$0xff] }
 0x505   : > { %12474 = vmatpush1.msra.mxu0 %v12316_v2  ;;  %12733 = vmatprep.subr.mxu1 %v12646_v52  ;;  %v30624_v6 = vpop.permute.xlu0 %14292  ;;  %v12974_v32 = vsel %vm33282_vm11, %v33434_v49, %v33433_v59  ;;  %v33435_v52 = vld [vmem:[#allocation40_spill] sm:$0xff]  ;;  %v13310_v49 = vsel %vm33280_vm12, %v30396_v41, %v30398_v44 }
 0x506   : > { %12662 = vmatprep.subr.mxu0 %v12644_v18  ;;  %16286 = vrot.lane.b32.xlu0 %v29705_v15, %s33427_s21  ;;  %v30628_v16 = vpop.permute.xlu1 %14294  ;;  %v12981_v39 = vsel %vm33282_vm11, %v30376_v40, %v33435_v52  ;;  %v27637_v18 = vld [vmem:[%s33389_s2 + $0x58] sm:$0xff] }
 0x507   : > { %16288 = vrot.lane.b32.xlu1 %v29717_v3, %s33427_s21  ;;  %12608 = vmatprep.mubr.f32.mxu1 %v29569_v7  ;;  %v33441_v40 = vld [vmem:[#allocation14_spill] sm:$0xff] }
 0x508   : > { %12537 = vmatprep.mubr.f32.mxu0 %v29569_v7  ;;  %27631 = vmatmul.mubr.msk.f32.vlgmr.msra.gmra.mrb[6].mxu1 %vm342_vm1, %v27627_v47 }
 0x509   : > { %12734 = vmatpush1.msra.mxu1 %v12645_v29  ;;  %27630 = vmatmul.mubr.msk.f32.vlgmr.msra.gmra.mrb[6].mxu0 %vm342_vm1, %v27627_v47  ;;  %v30645_v9 = vpop.permute.xlu0 %14296  ;;  %v33432_v47 = vld [vmem:[#allocation24_spill] sm:$0xff] }
 0x50a   : > { %12663 = vmatpush1.msra.mxu0 %v12643_v28  ;;  %12875 = vmatprep.subr.mxu1 %v12650_v43  ;;  %v30653_v51 = vpop.permute.xlu1 %14613  ;;  %v12975_v36 = vsel %vm33282_vm11, %v33433_v59, %v33432_v47  ;;  %v12976_v37 = vsel %vm33282_vm11, %v33432_v47, %v33431_v45  ;;  %v12978_v43 = vsel %vm33282_vm11, %v33430_v14, %v30355_v5  ;;  %v33439_v45 = vld [vmem:[#allocation28_spill] sm:$0xff] }
 0x50b   : > { %12804 = vmatprep.subr.mxu0 %v12648_v30  ;;  %16284 = vrot.lane.b32.xlu0 %v29752_v63, %s33427_s21  ;;  %v33436_v30 = vld [vmem:[#allocation35_spill] sm:$0xff]  ;;  %v13305_v14 = vsel %vm33280_vm12, %v33441_v40, %v33439_v45  ;;  %v33442_v59 = vld [vmem:[#allocation36_spill] sm:$0xff] }
 0x50c   : > { %16290 = vrot.lane.b32.xlu1 %v29816_v21, %s33427_s21  ;;  %12797 = vmatprep.mubr.f32.mxu1 %v29569_v7  ;;  %v27647_v40 = vld [vmem:[%s33389_s2 + $0x68] sm:$0xff] }
 0x50d   : > { %12726 = vmatprep.mubr.f32.mxu0 %v29569_v7  ;;  %27634 = vmatmul.mubr.msk.f32.vlgmr.msra.gmra.mrb[4].mxu1 %vm342_vm1, %v27632_v35  ;;  %v30665_v50 = vpop.permute.xlu0 %14615 }
 0x50e   : > { %12876 = vmatpush1.msra.mxu1 %v12649_v48  ;;  %27633 = vmatmul.mubr.msk.f32.vlgmr.msra.gmra.mrb[4].mxu0 %vm342_vm1, %v27632_v35  ;;  %v30674_v62 = vpop.permute.xlu1 %14611 }
 0x50f   : > { %12805 = vmatpush1.msra.mxu0 %v12647_v19  ;;  %13064 = vmatprep.subr.mxu1 %v12977_v10  ;;  %v33438_v19 = vld [vmem:[#allocation27_spill] sm:$0xff] }
 0x510   : > { %12993 = vmatprep.subr.mxu0 %v12975_v36  ;;  %16292 = vrot.lane.b32.xlu0 %v29844_v11, %s33427_s21  ;;  %v13306_v10 = vsel %vm33280_vm12, %v33439_v45, %v33438_v19  ;;  %v13312_v36 = vsel %vm33280_vm12, %v30418_v12, %v33442_v59 }
 0x511   : > { %16294 = vrot.lane.b32.xlu1 %v29924_v42, %s33427_s21  ;;  %12939 = vmatprep.mubr.f32.mxu1 %v29569_v7  ;;  %v30684_v24 = vpop.permute.xlu0 %14617 }
 0x512   : > { %12868 = vmatprep.mubr.f32.mxu0 %v29569_v7  ;;  %27636 = vmatmul.mubr.msk.f32.vlgmr.msra.gmra.mrb[6].mxu1 %vm342_vm1, %v27632_v35  ;;  %v30691_v2 = vpop.permute.xlu1 %14619 }
 0x513   : > { %13065 = vmatpush1.msra.mxu1 %v12976_v37  ;;  %27635 = vmatmul.mubr.msk.f32.vlgmr.msra.gmra.mrb[6].mxu0 %vm342_vm1, %v27632_v35  ;;  %v33437_v35 = vld [vmem:[#allocation29_spill] sm:$0xff] }
 0x514   : > { %12994 = vmatpush1.msra.mxu0 %v12974_v32  ;;  %13206 = vmatprep.subr.mxu1 %v12981_v39  ;;  %v13308_v48 = vsel %vm33280_vm12, %v33437_v35, %v33436_v30  ;;  %v13307_v5 = vsel %vm33280_vm12, %v33438_v19, %v33437_v35  ;;  %v27642_v32 = vld [vmem:[%s33389_s2 + $0x60] sm:$0xff]  ;;  %v13311_v39 = vsel %vm33280_vm12, %v30398_v44, %v30418_v12  ;;  %v33445_v35 = vld [vmem:[#allocation30_spill] sm:$0xff]  ;;  %v33447_v12 = vld [vmem:[#allocation17_spill] sm:$0xff] }
 0x515   : > { %13135 = vmatprep.subr.mxu0 %v12979_v61  ;;  %16296 = vrot.lane.b32.xlu0 %v29856_v13, %s33427_s21  ;;  %v30708_v29 = vpop.permute.xlu0 %14621  ;;  %v13309_v61 = vsel %vm33280_vm12, %v33436_v30, %v30396_v41  ;;  %vm33449_vm12 = vmmov %vm33448_vm15 }
 0x516   : > { %16298 = vrot.lane.b32.xlu1 %v30710_v46, %s33427_s21  ;;  %13128 = vmatprep.mubr.f32.mxu1 %v29569_v7  ;;  %v30715_v28 = vpop.permute.xlu1 %14623  ;;  %vm33452_vm11 = vmmov %vm33449_vm12 }
 0x517   : > { %13057 = vmatprep.mubr.f32.mxu0 %v29569_v7  ;;  %27639 = vmatmul.mubr.msk.f32.vlgmr.msra.gmra.mrb[4].mxu1 %vm342_vm1, %v27637_v18 }
 0x518   : > { %13207 = vmatpush1.msra.mxu1 %v12980_v55  ;;  %27638 = vmatmul.mubr.msk.f32.vlgmr.msra.gmra.mrb[4].mxu0 %vm342_vm1, %v27637_v18  ;;  %v33444_v55 = vld [vmem:[#allocation32_spill] sm:$0xff] }
 0x519   : > { %13136 = vmatpush1.msra.mxu0 %v12978_v43  ;;  %13395 = vmatprep.subr.mxu1 %v13308_v48  ;;  %v30732_v47 = vpop.permute.xlu0 %14625  ;;  %v33446_v48 = vld [vmem:[#allocation31_spill] sm:$0xff]  ;;  %v13638_v41 = vsel %vm33281_vm13, %v33445_v35, %v33444_v55 }
 0x51a   : > { %13324 = vmatprep.subr.mxu0 %v13306_v10  ;;  %16300 = vrot.lane.b32.xlu0 %v30364_v27, %s33427_s21  ;;  %v30736_v20 = vpop.permute.xlu1 %14627  ;;  %v13637_v19 = vsel %vm33281_vm13, %v33446_v48, %v33445_v35  ;;  %v13636_v30 = vsel %vm33281_vm13, %v33447_v12, %v33446_v48  ;;  %v13643_v10 = vsel %vm33281_vm13, %v30438_v38, %v30457_v53 }
 0x51b   : > { %16617 = vrot.lane.b32.xlu1 %v29705_v15, %s33440_s27  ;;  %13270 = vmatprep.mubr.f32.mxu1 %v29569_v7  ;;  %v13642_v53 = vsel %vm33281_vm13, %v30436_v60, %v30438_v38  ;;  %v14303_v48 = vsel %vm342_vm1, %v30607_v54, %v30624_v6 }
 0x51c   : > { %13199 = vmatprep.mubr.f32.mxu0 %v29569_v7  ;;  %27641 = vmatmul.mubr.msk.f32.vlgmr.msra.gmra.mrb[6].mxu1 %vm342_vm1, %v27637_v18 }
 0x51d   : > { %13396 = vmatpush1.msra.mxu1 %v13307_v5  ;;  %27640 = vmatmul.mubr.msk.f32.vlgmr.msra.gmra.mrb[6].mxu0 %vm342_vm1, %v27637_v18  ;;  %v30753_v37 = vpop.permute.xlu0 %14944  ;;  %v33443_v18 = vld [vmem:[#allocation41_spill] sm:$0xff]  ;;  %v13641_v5 = vsel %vm33281_vm13, %v30420_v1, %v30436_v60 }
 0x51e   : > { %13325 = vmatpush1.msra.mxu0 %v13305_v14  ;;  %13537 = vmatprep.subr.mxu1 %v13312_v36  ;;  %v30761_v52 = vpop.permute.xlu1 %14946  ;;  %v13639_v43 = vsel %vm33281_vm13, %v33444_v55, %v33443_v18  ;;  %v13640_v36 = vsel %vm33281_vm13, %v33443_v18, %v30420_v1  ;;  %v13969_v1 = vsel %vm33449_vm12, %v30476_v58, %v30498_v56  ;;  %vm33451_vm13 = vmmov %vm33449_vm12 }
 0x51f   : > { %13466 = vmatprep.subr.mxu0 %v13310_v49  ;;  %16619 = vrot.lane.b32.xlu0 %v29717_v3, %s33440_s27  ;;  %v13970_v49 = vsel %vm33448_vm15, %v30498_v56, %v30503_v23  ;;  %vm33450_vm15 = vmmov %vm33449_vm12  ;;  %v13972_v18 = vsel %vm33452_vm11, %v30520_v17, %v30524_v31  ;;  %v14301_v55 = vsel %vm342_vm1, %v30585_v25, %v30602_v4 }
 0x520   : > { %16615 = vrot.lane.b32.xlu1 %v29752_v63, %s33440_s27  ;;  %13459 = vmatprep.mubr.f32.mxu1 %v29569_v7  ;;  %v13967_v38 = vsel %vm33450_vm15, %v30483_v22, %v30459_v57  ;;  %v13973_v22 = vsel %vm33452_vm11, %v30524_v31, %v30538_v34 }
 0x521   : > { %13388 = vmatprep.mubr.f32.mxu0 %v29569_v7  ;;  %27644 = vmatmul.mubr.msk.f32.vlgmr.msra.gmra.mrb[4].mxu1 %vm342_vm1, %v27642_v32 }
 0x522   : > { %13538 = vmatpush1.msra.mxu1 %v13311_v39  ;;  %27643 = vmatmul.mubr.msk.f32.vlgmr.msra.gmra.mrb[4].mxu0 %vm342_vm1, %v27642_v32 }
 0x523   : > { %13467 = vmatpush1.msra.mxu0 %v13309_v61  ;;  %13726 = vmatprep.subr.mxu1 %v13639_v43  ;;  %v30783_v45 = vpop.permute.xlu0 %14942  ;;  %v30785_v44 = vpop.permute.xlu1 %14948  ;;  %v13974_v61 = vsel %vm33451_vm13, %v30538_v34, %v30547_v0  ;;  %vm33454_vm13 = vmmov %vm33452_vm11  ;;  %v14299_v43 = vsel %vm342_vm1, %v30559_v8, %v30568_v26  ;;  %v14305_v34 = vsel %vm342_vm1, %v30628_v16, %v30645_v9 }
 0x524   : > { %13655 = vmatprep.subr.mxu0 %v13637_v19  ;;  %16621 = vrot.lane.b32.xlu0 %v29816_v21, %s33440_s27  ;;  %v13971_v0 = vsel %vm33454_vm13, %v30503_v23, %v30520_v17  ;;  %v14300_v23 = vsel %vm342_vm1, %v30568_v26, %v30585_v25  ;;  %v14298_v17 = vsel %vm342_vm1, %v30578_v33, %v30559_v8  ;;  %v27657_v26 = vld [vmem:[%s33389_s2 + $0x78] sm:$0xff] }
 0x525   : > { %16623 = vrot.lane.b32.xlu1 %v29844_v11, %s33440_s27  ;;  %13601 = vmatprep.mubr.f32.mxu1 %v29569_v7  ;;  %v14304_v33 = vsel %vm342_vm1, %v30624_v6, %v30628_v16  ;;  %v14302_v9 = vsel %vm342_vm1, %v30602_v4, %v30607_v54 }
 0x526   : > { %13530 = vmatprep.mubr.f32.mxu0 %v29569_v7  ;;  %27646 = vmatmul.mubr.msk.f32.vlgmr.msra.gmra.mrb[6].mxu1 %vm342_vm1, %v27642_v32 }
 0x527   : > { %13727 = vmatpush1.msra.mxu1 %v13638_v41  ;;  %27645 = vmatmul.mubr.msk.f32.vlgmr.msra.gmra.mrb[6].mxu0 %vm342_vm1, %v27642_v32  ;;  %v13968_v32 = vsel %vm33449_vm12, %v30459_v57, %v30476_v58  ;;  %v27652_v58 = vld [vmem:[%s33389_s2 + $0x70] sm:$0xff]  ;;  %vm33455_vm12 = vcmask 56320  }
 0x528   : > { %13656 = vmatpush1.msra.mxu0 %v13636_v30  ;;  %13868 = vmatprep.subr.mxu1 %v13643_v10  ;;  %v30810_v14 = vpop.permute.xlu0 %14950  ;;  %v14632_v19 = vsel %vm33455_vm12, %v30684_v24, %v30691_v2  ;;  %vm33456_vm15 = vmmov %vm33455_vm12 }
 0x529   : > { %13797 = vmatprep.subr.mxu0 %v13641_v5  ;;  %16625 = vrot.lane.b32.xlu0 %v29924_v42, %s33440_s27  ;;  %v30814_v59 = vpop.permute.xlu1 %14952  ;;  %v14630_v41 = vsel %vm33456_vm15, %v30653_v51, %v30665_v50  ;;  %vm33457_vm11 = vmmov %vm33455_vm12 }
 0x52a   : > { %16627 = vrot.lane.b32.xlu1 %v29856_v13, %s33440_s27  ;;  %13790 = vmatprep.mubr.f32.mxu1 %v29569_v7  ;;  %v14631_v4 = vsel %vm33457_vm11, %v30665_v50, %v30684_v24  ;;  %vm33458_vm13 = vmmov %vm33457_vm11  ;;  %v27662_v50 = vld [vmem:[%s33389_s2 + $0x80] sm:$0xff] }
 0x52b   : > { %13719 = vmatprep.mubr.f32.mxu0 %v29569_v7  ;;  %27649 = vmatmul.mubr.msk.f32.vlgmr.msra.gmra.mrb[4].mxu1 %vm342_vm1, %v27647_v40  ;;  %v14629_v54 = vsel %vm33458_vm13, %v30674_v62, %v30653_v51  ;;  %vm33459_vm12 = vmmov %vm33457_vm11  ;;  %v14635_v62 = vsel %vm33457_vm11, %v30715_v28, %v30732_v47 }
 0x52c   : > { %13869 = vmatpush1.msra.mxu1 %v13642_v53  ;;  %27648 = vmatmul.mubr.msk.f32.vlgmr.msra.gmra.mrb[4].mxu0 %vm342_vm1, %v27647_v40  ;;  %v14636_v16 = vsel %vm33459_vm12, %v30732_v47, %v30736_v20  ;;  %vm33460_vm15 = vmmov %vm33457_vm11  ;;  %vm33463_vm12 = vcmask 48128  }
 0x52d   : > { %13798 = vmatpush1.msra.mxu0 %v13640_v36  ;;  %14057 = vmatprep.subr.mxu1 %v13970_v49  ;;  %v30834_v39 = vpop.permute.xlu0 %14954  ;;  %v14634_v30 = vsel %vm33460_vm15, %v30708_v29, %v30715_v28  ;;  %vm33462_vm13 = vmmov %vm33457_vm11  ;;  %v14963_v10 = vsel %vm33463_vm12, %v30785_v44, %v30810_v14 }
 0x52e   : > { %13986 = vmatprep.subr.mxu0 %v13968_v32  ;;  %16629 = vrot.lane.b32.xlu0 %v30710_v46, %s33440_s27  ;;  %v30838_v60 = vpop.permute.xlu1 %14956  ;;  %v14633_v20 = vsel %vm33462_vm13, %v30691_v2, %v30708_v29  ;;  %vm33464_vm15 = vmmov %vm33463_vm12 }
 0x52f   : > { %16631 = vrot.lane.b32.xlu1 %v30364_v27, %s33440_s27  ;;  %13932 = vmatprep.mubr.f32.mxu1 %v29569_v7  ;;  %v14961_v5 = vsel %vm33464_vm15, %v30753_v37, %v30761_v52  ;;  %vm33465_vm11 = vmmov %vm33463_vm12 }
 0x530   : > { %13861 = vmatprep.mubr.f32.mxu0 %v29569_v7  ;;  %27651 = vmatmul.mubr.msk.f32.vlgmr.msra.gmra.mrb[6].mxu1 %vm342_vm1, %v27647_v40  ;;  %v14962_v2 = vsel %vm33465_vm11, %v30761_v52, %v30785_v44  ;;  %vm33466_vm13 = vmmov %vm33465_vm11  ;;  %v27667_v52 = vld [vmem:[%s33389_s2 + $0x88] sm:$0xff]  ;;  %v14966_v44 = vsel %vm33465_vm11, %v30834_v39, %v30838_v60 }
 0x531   : > { %14058 = vmatpush1.msra.mxu1 %v13969_v1  ;;  %27650 = vmatmul.mubr.msk.f32.vlgmr.msra.gmra.mrb[6].mxu0 %vm342_vm1, %v27647_v40  ;;  %v14960_v29 = vsel %vm33466_vm13, %v30783_v45, %v30753_v37  ;;  %vm33467_vm12 = vmmov %vm33465_vm11  ;;  %vm33469_vm13 = vcmask 457728  }
 0x532   : > { %13987 = vmatpush1.msra.mxu0 %v13967_v38  ;;  %14199 = vmatprep.subr.mxu1 %v13974_v61  ;;  %v30861_v56 = vpop.permute.xlu0 %14958  ;;  %vm33468_vm15 = vmmov %vm33465_vm11  ;;  %v27672_v38 = vld [vmem:[%s33389_s2 + $0x90] sm:$0xff] }
 0x533   : > { %14128 = vmatprep.subr.mxu0 %v13972_v18  ;;  %16948 = vrot.lane.b32.xlu0 %v29705_v15, %s33453_s14  ;;  %v30865_v57 = vpop.permute.xlu1 %15293  ;;  %v14967_v47 = vsel %vm33467_vm12, %v30838_v60, %v30861_v56  ;;  %v14965_v53 = vsel %vm33468_vm15, %v30814_v59, %v30834_v39  ;;  %vm33470_vm12 = vmmov %vm33465_vm11 }
 0x534   : > { %16950 = vrot.lane.b32.xlu1 %v29717_v3, %s33453_s14  ;;  %14121 = vmatprep.mubr.f32.mxu1 %v29569_v7  ;;  %v14964_v49 = vsel %vm33470_vm12, %v30810_v14, %v30814_v59  ;;  %vm33471_vm15 = vmmov %vm33469_vm13 }
 0x535   : > { %14050 = vmatprep.mubr.f32.mxu0 %v29569_v7  ;;  %27654 = vmatmul.mubr.msk.f32.vlgmr.msra.gmra.mrb[4].mxu1 %vm342_vm1, %v27652_v58  ;;  %vm33472_vm11 = vmmov %vm33469_vm13 }
 0x536   : > { %14200 = vmatpush1.msra.mxu1 %v13973_v22  ;;  %27653 = vmatmul.mubr.msk.f32.vlgmr.msra.gmra.mrb[4].mxu0 %vm342_vm1, %v27652_v58  ;;  %vm33474_vm12 = vmmov %vm33472_vm11 }
 0x537   : > { %14129 = vmatpush1.msra.mxu0 %v13971_v0  ;;  %14388 = vmatprep.subr.mxu1 %v14301_v55  ;;  %v30885_v35 = vpop.permute.xlu0 %15295 }
 0x538   : > { %14317 = vmatprep.subr.mxu0 %v14299_v43  ;;  %16946 = vrot.lane.b32.xlu0 %v29752_v63, %s33453_s14  ;;  %v30889_v31 = vpop.permute.xlu1 %15291  ;;  %v15310_v36 = vsel %vm33469_vm13, %v30865_v57, %v30885_v35  ;;  %vm33473_vm13 = vmmov %vm33472_vm11 }
 0x539   : > { %16952 = vrot.lane.b32.xlu1 %v29816_v21, %s33453_s14  ;;  %14263 = vmatprep.mubr.f32.mxu1 %v29569_v7  ;;  %v15309_v14 = vsel %vm33472_vm11, %v30889_v31, %v30865_v57 }
 0x53a   : > { %14192 = vmatprep.mubr.f32.mxu0 %v29569_v7  ;;  %27656 = vmatmul.mubr.msk.f32.vlgmr.msra.gmra.mrb[6].mxu1 %vm342_vm1, %v27652_v58 }
 0x53b   : > { %14389 = vmatpush1.msra.mxu1 %v14300_v23  ;;  %27655 = vmatmul.mubr.msk.f32.vlgmr.msra.gmra.mrb[6].mxu0 %vm342_vm1, %v27652_v58 }
 0x53c   : > { %14318 = vmatpush1.msra.mxu0 %v14298_v17  ;;  %14530 = vmatprep.subr.mxu1 %v14305_v34  ;;  %v30912_v25 = vpop.permute.xlu0 %15297  ;;  %v27677_v17 = vld [vmem:[%s33389_s2 + $0x98] sm:$0xff] }
 0x53d   : > { %14459 = vmatprep.subr.mxu0 %v14303_v48  ;;  %16954 = vrot.lane.b32.xlu0 %v29844_v11, %s33453_s14  ;;  %v30916_v8 = vpop.permute.xlu1 %15299  ;;  %v15311_v59 = vsel %vm33473_vm13, %v30885_v35, %v30912_v25  ;;  %vm33477_vm13 = vmmov %vm33472_vm11 }
 0x53e   : > { %16956 = vrot.lane.b32.xlu1 %v29924_v42, %s33453_s14  ;;  %14452 = vmatprep.mubr.f32.mxu1 %v29569_v7  ;;  %v15312_v32 = vsel %vm33471_vm15, %v30912_v25, %v30916_v8  ;;  %vm33475_vm15 = vmmov %vm33472_vm11 }
 0x53f   : > { %14381 = vmatprep.mubr.f32.mxu0 %v29569_v7  ;;  %27659 = vmatmul.mubr.msk.f32.vlgmr.msra.gmra.mrb[4].mxu1 %vm342_vm1, %v27657_v26 }
 0x540   : > { %14531 = vmatpush1.msra.mxu1 %v14304_v33  ;;  %27658 = vmatmul.mubr.msk.f32.vlgmr.msra.gmra.mrb[4].mxu0 %vm342_vm1, %v27657_v26 }
 0x541   : > { %14460 = vmatpush1.msra.mxu0 %v14302_v9  ;;  %14719 = vmatprep.subr.mxu1 %v14632_v19  ;;  %v30936_v12 = vpop.permute.xlu0 %15301 }
 0x542   : > { %14648 = vmatprep.subr.mxu0 %v14630_v41  ;;  %16958 = vrot.lane.b32.xlu0 %v29856_v13, %s33453_s14  ;;  %v30940_v6 = vpop.permute.xlu1 %15303  ;;  %v15313_v61 = vsel %vm33475_vm15, %v30916_v8, %v30936_v12 }
 0x543   : > { %16960 = vrot.lane.b32.xlu1 %v30710_v46, %s33453_s14  ;;  %14594 = vmatprep.mubr.f32.mxu1 %v29569_v7  ;;  %v15314_v1 = vsel %vm33474_vm12, %v30936_v12, %v30940_v6  ;;  %vm33478_vm12 = vcmask 449536  }
 0x544   : > { %14523 = vmatprep.mubr.f32.mxu0 %v29569_v7  ;;  %27661 = vmatmul.mubr.msk.f32.vlgmr.msra.gmra.mrb[6].mxu1 %vm342_vm1, %v27657_v26  ;;  %vm33479_vm15 = vmmov %vm33478_vm12 }
 0x545   : > { %14720 = vmatpush1.msra.mxu1 %v14631_v4  ;;  %27660 = vmatmul.mubr.msk.f32.vlgmr.msra.gmra.mrb[6].mxu0 %vm342_vm1, %v27657_v26 }
 0x546   : > { %14649 = vmatpush1.msra.mxu0 %v14629_v54  ;;  %14861 = vmatprep.subr.mxu1 %v14636_v16  ;;  %v30963_v24 = vpop.permute.xlu0 %15305  ;;  %v27682_v16 = vld [vmem:[%s33389_s2 + $0xa0] sm:$0xff] }
 0x547   : > { %14790 = vmatprep.subr.mxu0 %v14634_v30  ;;  %16962 = vrot.lane.b32.xlu0 %v30364_v27, %s33453_s14  ;;  %v30967_v51 = vpop.permute.xlu1 %15307  ;;  %v15315_v57 = vsel %vm33477_vm13, %v30940_v6, %v30963_v24 }
 0x548   : > { %17279 = vrot.lane.b32.xlu1 %v29705_v15, %s33461_s13  ;;  %14783 = vmatprep.mubr.f32.mxu1 %v29569_v7  ;;  %v15316_v56 = vsel %vm33472_vm11, %v30963_v24, %v30967_v51  ;;  %vm33480_vm11 = vmmov %vm33478_vm12 }
 0x549   : > { %14712 = vmatprep.mubr.f32.mxu0 %v29569_v7  ;;  %27664 = vmatmul.mubr.msk.f32.vlgmr.msra.gmra.mrb[4].mxu1 %vm342_vm1, %v27662_v50  ;;  %vm33481_vm13 = vmmov %vm33480_vm11 }
 0x54a   : > { %14862 = vmatpush1.msra.mxu1 %v14635_v62  ;;  %27663 = vmatmul.mubr.msk.f32.vlgmr.msra.gmra.mrb[4].mxu0 %vm342_vm1, %v27662_v50  ;;  %v27687_v62 = vld [vmem:[%s33389_s2 + $0xa8] sm:$0xff] }
 0x54b   : > { %14791 = vmatpush1.msra.mxu0 %v14633_v20  ;;  %15050 = vmatprep.subr.mxu1 %v14963_v10  ;;  %v30987_v40 = vpop.permute.xlu0 %15624  ;;  %v28529_v20 = vld [vmem:[#allocation2 + $0x48] sm:$0xff] }
 0x54c   : > { %14979 = vmatprep.subr.mxu0 %v14961_v5  ;;  %17281 = vrot.lane.b32.xlu0 %v29717_v3, %s33461_s13  ;;  %v30991_v28 = vpop.permute.xlu1 %15626 }
 0x54d   : > { %17277 = vrot.lane.b32.xlu1 %v29752_v63, %s33461_s13  ;;  %14925 = vmatprep.mubr.f32.mxu1 %v29569_v7  ;;  %v15641_v22 = vsel %vm33478_vm12, %v30987_v40, %v30991_v28  ;;  %vm33482_vm12 = vmmov %vm33480_vm11 }
 0x54e   : > { %14854 = vmatprep.mubr.f32.mxu0 %v29569_v7  ;;  %27666 = vmatmul.mubr.msk.f32.vlgmr.msra.gmra.mrb[6].mxu1 %vm342_vm1, %v27662_v50 }
 0x54f   : > { %15051 = vmatpush1.msra.mxu1 %v14962_v2  ;;  %27665 = vmatmul.mubr.msk.f32.vlgmr.msra.gmra.mrb[6].mxu0 %vm342_vm1, %v27662_v50 }
 0x550   : > { %14980 = vmatpush1.msra.mxu0 %v14960_v29  ;;  %17283 = vrot.lane.b32.xlu0 %v29816_v21, %s33461_s13  ;;  %v15623_v37 = vpop.permute.xlu0 %15622 }
 0x551   : > { %15121 = vmatprep.subr.mxu0 %v14965_v53  ;;  %17285 = vrot.lane.b32.xlu1 %v29844_v11, %s33461_s13  ;;  %v15629_v45 = vpop.permute.xlu1 %15628  ;;  %v15640_v55 = vsel %vm33479_vm15, %v15623_v37, %v30987_v40  ;;  %vm33483_vm15 = vmmov %vm33480_vm11 }
 0x552   : > { %15114 = vmatprep.mubr.f32.mxu1 %v29569_v7  ;;  %15192 = vmatprep.subr.mxu1 %v14967_v47  ;;  %v15642_v31 = vsel %vm33481_vm13, %v30991_v28, %v15629_v45  ;;  %vm33484_vm13 = vcmask 441344  }
 0x553   : > { %15043 = vmatprep.mubr.f32.mxu0 %v29569_v7  ;;  %27669 = vmatmul.mubr.msk.f32.vlgmr.msra.gmra.mrb[4].mxu1 %vm342_vm1, %v27667_v52 }
 0x554   : > { %15193 = vmatpush1.msra.mxu1 %v14966_v44  ;;  %27668 = vmatmul.mubr.msk.f32.vlgmr.msra.gmra.mrb[4].mxu0 %vm342_vm1, %v27667_v52 }
 0x555   : > { %15122 = vmatpush1.msra.mxu0 %v14964_v49  ;;  %17287 = vrot.lane.b32.xlu0 %v29924_v42, %s33461_s13  ;;  %v15631_v39 = vpop.permute.xlu0 %15630 }
 0x556   : > { %17289 = vrot.lane.b32.xlu1 %v29856_v13, %s33461_s13  ;;  %15328 = vmatprep.subr.mxu0 %v15310_v36  ;;  %v15633_v60 = vpop.permute.xlu1 %15632  ;;  %v15643_v35 = vsel %vm33480_vm11, %v15629_v45, %v15631_v39 }
 0x557   : > { %15185 = vmatprep.mubr.f32.mxu0 %v29569_v7  ;;  %15256 = vmatprep.mubr.f32.mxu1 %v29569_v7  ;;  %v15644_v25 = vsel %vm33480_vm11, %v15631_v39, %v15633_v60  ;;  %v27692_v39 = vld [vmem:[%s33389_s2 + $0xb0] sm:$0xff] }
 0x558   : > { %27670 = vmatmul.mubr.msk.f32.vlgmr.msra.gmra.mrb[6].mxu0 %vm342_vm1, %v27667_v52  ;;  %15399 = vmatprep.subr.mxu1 %v15312_v32 }
 0x559   : > { %15329 = vmatpush1.msra.mxu0 %v15309_v14  ;;  %17291 = vrot.lane.b32.xlu0 %v30710_v46, %s33461_s13 }
 0x55a   : > { %17293 = vrot.lane.b32.xlu1 %v30364_v27, %s33461_s13  ;;  %27671 = vmatmul.mubr.msk.f32.vlgmr.msra.gmra.mrb[6].mxu1 %vm342_vm1, %v27667_v52  ;;  %v15635_v18 = vpop.permute.xlu0 %15634 }
 0x55b   : > { %15400 = vmatpush1.msra.mxu1 %v15311_v59  ;;  %15392 = vmatprep.mubr.f32.mxu0 %v29569_v7  ;;  %v15637_v58 = vpop.permute.xlu1 %15636  ;;  %v15645_v23 = vsel %vm33482_vm12, %v15633_v60, %v15635_v18  ;;  %vm33485_vm12 = vmmov %vm33480_vm11 }
 0x55c   : > { %15470 = vmatprep.subr.mxu0 %v15314_v1  ;;  %27673 = vmatmul.mubr.msk.f32.vlgmr.msra.gmra.mrb[4].mxu0 %vm342_vm1, %v27672_v38  ;;  %v15646_v9 = vsel %vm33485_vm12, %v15635_v18, %v15637_v58  ;;  %vm33487_vm11 = vmmov %vm33484_vm13 }
 0x55d   : > { %17610 = vrot.lane.b32.xlu0 %v29705_v15, %s33476_s17  ;;  %15471 = vmatpush1.msra.mxu0 %v15313_v61  ;;  %vm33489_vm12 = vmmov %vm33487_vm11 }
 0x55e   : > { %17612 = vrot.lane.b32.xlu1 %v29717_v3, %s33476_s17  ;;  %15463 = vmatprep.mubr.f32.mxu1 %v29569_v7 }
 0x55f   : > { %15541 = vmatprep.subr.mxu1 %v15316_v56  ;;  %27674 = vmatmul.mubr.msk.f32.vlgmr.msra.gmra.mrb[4].mxu1 %vm342_vm1, %v27672_v38  ;;  %v15639_v0 = vpop.permute.xlu0 %15638 }
 0x560   : > { %15542 = vmatpush1.msra.mxu1 %v15315_v57  ;;  %15659 = vmatprep.subr.mxu0 %v15641_v22  ;;  %v15956_v43 = vpop.permute.xlu1 %15955  ;;  %v15647_v26 = vsel %vm33483_vm15, %v15637_v58, %v15639_v0  ;;  %vm33486_vm15 = vmmov %vm33484_vm13 }
 0x561   : > { %17608 = vrot.lane.b32.xlu0 %v29752_v63, %s33476_s17  ;;  %15534 = vmatprep.mubr.f32.mxu0 %v29569_v7 }
 0x562   : > { %17614 = vrot.lane.b32.xlu1 %v29816_v21, %s33476_s17  ;;  %27675 = vmatmul.mubr.msk.f32.vlgmr.msra.gmra.mrb[6].mxu0 %vm342_vm1, %v27672_v38 }
 0x563   : > { %15660 = vmatpush1.msra.mxu0 %v15640_v55  ;;  %15605 = vmatprep.mubr.f32.mxu1 %v29569_v7 }
 0x564   : > { %15730 = vmatprep.subr.mxu1 %v15643_v35  ;;  %27676 = vmatmul.mubr.msk.f32.vlgmr.msra.gmra.mrb[6].mxu1 %vm342_vm1, %v27672_v38  ;;  %v15958_v34 = vpop.permute.xlu0 %15957 }
 0x565   : > { %17616 = vrot.lane.b32.xlu0 %v29844_v11, %s33476_s17  ;;  %15731 = vmatpush1.msra.mxu1 %v15642_v31  ;;  %v15954_v48 = vpop.permute.xlu1 %15953  ;;  %v15972_v8 = vsel %vm33484_vm13, %v15956_v43, %v15958_v34  ;;  %vm33488_vm13 = vmmov %vm33487_vm11 }
 0x566   : > { %17618 = vrot.lane.b32.xlu1 %v29924_v42, %s33476_s17  ;;  %15723 = vmatprep.mubr.f32.mxu0 %v29569_v7  ;;  %v15971_v19 = vsel %vm33486_vm15, %v15954_v48, %v15956_v43  ;;  %vm33490_vm15 = vmmov %vm33487_vm11 }
 0x567   : > { %15801 = vmatprep.subr.mxu0 %v15645_v23  ;;  %27678 = vmatmul.mubr.msk.f32.vlgmr.msra.gmra.mrb[4].mxu0 %vm342_vm1, %v27677_v17 }
 0x568   : > { %15802 = vmatpush1.msra.mxu0 %v15644_v25  ;;  %15794 = vmatprep.mubr.f32.mxu1 %v29569_v7 }
 0x569   : > { %17620 = vrot.lane.b32.xlu0 %v29856_v13, %s33476_s17  ;;  %15872 = vmatprep.subr.mxu1 %v15647_v26  ;;  %v15960_v33 = vpop.permute.xlu0 %15959 }
 0x56a   : > { %17622 = vrot.lane.b32.xlu1 %v30710_v46, %s33476_s17  ;;  %27679 = vmatmul.mubr.msk.f32.vlgmr.msra.gmra.mrb[4].mxu1 %vm342_vm1, %v27677_v17  ;;  %v15962_v41 = vpop.permute.xlu1 %15961  ;;  %v15973_v6 = vsel %vm33488_vm13, %v15958_v34, %v15960_v33  ;;  %vm33491_vm13 = vmmov %vm33487_vm11 }
 0x56b   : > { %15873 = vmatpush1.msra.mxu1 %v15646_v9  ;;  %15865 = vmatprep.mubr.f32.mxu0 %v29569_v7  ;;  %v15974_v12 = vsel %vm33487_vm11, %v15960_v33, %v15962_v41 }
 0x56c   : > { %15990 = vmatprep.subr.mxu0 %v15972_v8  ;;  %27680 = vmatmul.mubr.msk.f32.vlgmr.msra.gmra.mrb[6].mxu0 %vm342_vm1, %v27677_v17 }
 0x56d   : > { %17624 = vrot.lane.b32.xlu0 %v30364_v27, %s33476_s17  ;;  %15991 = vmatpush1.msra.mxu0 %v15971_v19 }
 0x56e   : > { %17941 = vrot.lane.b32.xlu1 %v29705_v15, %s33293_s19  ;;  %15936 = vmatprep.mubr.f32.mxu1 %v29569_v7  ;;  %v15964_v4 = vpop.permute.xlu0 %15963 }
 0x56f   : > { %16061 = vmatprep.subr.mxu1 %v15974_v12  ;;  %27681 = vmatmul.mubr.msk.f32.vlgmr.msra.gmra.mrb[6].mxu1 %vm342_vm1, %v27677_v17  ;;  %v15966_v54 = vpop.permute.xlu1 %15965  ;;  %v15975_v30 = vsel %vm33490_vm15, %v15962_v41, %v15964_v4  ;;  %v27697_v17 = vld [vmem:[%s33389_s2 + $0xb8] sm:$0xff] }
 0x570   : > { %16062 = vmatpush1.msra.mxu1 %v15973_v6  ;;  %16054 = vmatprep.mubr.f32.mxu0 %v29569_v7  ;;  %v15976_v27 = vsel %vm33489_vm12, %v15964_v4, %v15966_v54  ;;  %vm33492_vm12 = vcmask 375808  }
 0x571   : > { %17943 = vrot.lane.b32.xlu0 %v29717_v3, %s33293_s19  ;;  %16132 = vmatprep.subr.mxu0 %v15976_v27  ;;  %vm33493_vm15 = vmmov %vm33492_vm12 }
 0x572   : > { %17939 = vrot.lane.b32.xlu1 %v29752_v63, %s33293_s19  ;;  %27683 = vmatmul.mubr.msk.f32.vlgmr.msra.gmra.mrb[4].mxu0 %vm342_vm1, %v27682_v16 }
 0x573   : > { %16133 = vmatpush1.msra.mxu0 %v15975_v30  ;;  %v15968_v15 = vpop.permute.xlu0 %15967  ;;  %16125 = vmatprep.mubr.f32.mxu1 %v29569_v7 }
 0x574   : > { %v15970_v50 = vpop.permute.xlu1 %15969  ;;  %27684 = vmatmul.mubr.msk.f32.vlgmr.msra.gmra.mrb[4].mxu1 %vm342_vm1, %v27682_v16  ;;  %v15977_v24 = vsel %vm33487_vm11, %v15966_v54, %v15968_v15  ;;  %16196 = vmatprep.mubr.f32.mxu0 %v29569_v7  ;;  %vm33494_vm11 = vmmov %vm33492_vm12 }
 0x575   : > { %17945 = vrot.lane.b32.xlu0 %v29816_v21, %s33293_s19  ;;  %v15978_v3 = vsel %vm33491_vm13, %v15968_v15, %v15970_v50  ;;  %16267 = vmatprep.mubr.f32.mxu1 %v29569_v7  ;;  %vm33495_vm13 = vmmov %vm33494_vm11  ;;  %v27702_v50 = vld [vmem:[%s33389_s2 + $0xc0] sm:$0xff] }
 0x576   : > { %17947 = vrot.lane.b32.xlu1 %v29844_v11, %s33293_s19  ;;  %16203 = vmatprep.subr.mxu1 %v15978_v3 }
 0x577   : > { %16204 = vmatpush1.msra.mxu1 %v15977_v24  ;;  %27685 = vmatmul.mubr.msk.f32.vlgmr.msra.gmra.mrb[6].mxu0 %vm342_vm1, %v27682_v16 }
 0x578   : > { %v16287_v63 = vpop.permute.xlu0 %16286  ;;  %27686 = vmatmul.mubr.msk.f32.vlgmr.msra.gmra.mrb[6].mxu1 %vm342_vm1, %v27682_v16  ;;  %16385 = vmatprep.mubr.f32.mxu0 %v29569_v7 }
 0x579   : > { %17949 = vrot.lane.b32.xlu0 %v29924_v42, %s33293_s19  ;;  %v16289_v21 = vpop.permute.xlu1 %16288  ;;  %16456 = vmatprep.mubr.f32.mxu1 %v29569_v7  ;;  %v27717_v42 = vld [vmem:[%s33206_s4 + $0x8] sm:$0xff] }
 0x57a   : > { %17951 = vrot.lane.b32.xlu1 %v29856_v13, %s33293_s19  ;;  %v16303_v11 = vsel %vm33492_vm12, %v16287_v63, %v16289_v21  ;;  %vm33496_vm12 = vmmov %vm33494_vm11 }
 0x57b   : > { %16321 = vmatprep.subr.mxu0 %v16303_v11 }
 0x57d   : > { %17953 = vrot.lane.b32.xlu0 %v30710_v46, %s33293_s19  ;;  %v16285_v51 = vpop.permute.xlu0 %16284 }
 0x57e   : > { %17955 = vrot.lane.b32.xlu1 %v28529_v20, %s33293_s19  ;;  %v16302_v13 = vsel %vm33493_vm15, %v16285_v51, %v16287_v63  ;;  %v16291_v10 = vpop.permute.xlu1 %16290  ;;  %vm33497_vm15 = vmmov %vm33494_vm11  ;;  %s33549_s19 = smov 106  }
 0x57f   : > { %16322 = vmatpush1.msra.mxu0 %v16302_v13  ;;  %v16304_v28 = vsel %vm33495_vm13, %v16289_v21, %v16291_v10  ;;  %vm33498_vm13 = vmmov %vm33494_vm11 }
 0x580   : > { %27688 = vmatmul.mubr.msk.f32.vlgmr.msra.gmra.mrb[4].mxu0 %vm342_vm1, %v27687_v62 }
 0x581   : > { %18272 = vperm.xlu0 %28519, %v27717_v42   ;;  %16527 = vmatprep.mubr.f32.mxu0 %v29569_v7 }
 0x582   : > { %v16293_v46 = vpop.permute.xlu0 %16292 }
 0x583   : > { %v16295_v5 = vpop.permute.xlu1 %16294  ;;  %v16305_v40 = vsel %vm33494_vm11, %v16291_v10, %v16293_v46 }
 0x584   : > { %16392 = vmatprep.subr.mxu1 %v16305_v40  ;;  %v16306_v53 = vsel %vm33497_vm15, %v16293_v46, %v16295_v5 }
 0x585   : > { %16393 = vmatpush1.msra.mxu1 %v16304_v28 }
 0x586   : > { %27689 = vmatmul.mubr.msk.f32.vlgmr.msra.gmra.mrb[4].mxu1 %vm342_vm1, %v27687_v62 }
 0x587   : > { %v16297_v2 = vpop.permute.xlu0 %16296  ;;  %16598 = vmatprep.mubr.f32.mxu1 %v29569_v7 }
 0x588   : > { %v16299_v29 = vpop.permute.xlu1 %16298  ;;  %v16307_v47 = vsel %vm33496_vm12, %v16295_v5, %v16297_v2  ;;  %vm33499_vm12 = vcmask 367616  }
 0x589   : > { %16463 = vmatprep.subr.mxu0 %v16307_v47  ;;  %v16308_v44 = vsel %vm33498_vm13, %v16297_v2, %v16299_v29  ;;  %vm33500_vm15 = vmmov %vm33499_vm12  ;;  %v27707_v47 = vld [vmem:[%s33389_s2 + $0xc8] sm:$0xff] }
 0x58a   : > { %16464 = vmatpush1.msra.mxu0 %v16306_v53 }
 0x58b   : > { %27690 = vmatmul.mubr.msk.f32.vlgmr.msra.gmra.mrb[6].mxu0 %vm342_vm1, %v27687_v62 }
 0x58c   : > { %v16301_v52 = vpop.permute.xlu0 %16300  ;;  %16716 = vmatprep.mubr.f32.mxu0 %v29569_v7 }
 0x58d   : > { %v16618_v37 = vpop.permute.xlu1 %16617  ;;  %v16309_v45 = vsel %vm33494_vm11, %v16299_v29, %v16301_v52  ;;  %vm33501_vm11 = vmmov %vm33499_vm12 }
 0x58e   : > { %16534 = vmatprep.subr.mxu1 %v16309_v45  ;;  %vm33502_vm13 = vmmov %vm33501_vm11 }
 0x58f   : > { %16535 = vmatpush1.msra.mxu1 %v16308_v44 }
 0x590   : > { %27691 = vmatmul.mubr.msk.f32.vlgmr.msra.gmra.mrb[6].mxu1 %vm342_vm1, %v27687_v62 }
 0x591   : > { %v16620_v36 = vpop.permute.xlu0 %16619  ;;  %16787 = vmatprep.mubr.f32.mxu1 %v29569_v7 }
 0x592   : > { %v16616_v49 = vpop.permute.xlu1 %16615  ;;  %v16634_v32 = vsel %vm33499_vm12, %v16618_v37, %v16620_v36  ;;  %vm33503_vm12 = vmmov %vm33501_vm11 }
 0x593   : > { %v16633_v60 = vsel %vm33500_vm15, %v16616_v49, %v16618_v37  ;;  %16652 = vmatprep.subr.mxu0 %v16634_v32  ;;  %vm33504_vm15 = vmmov %vm33501_vm11 }
 0x594   : > { %16653 = vmatpush1.msra.mxu0 %v16633_v60 }
 0x595   : > { %27693 = vmatmul.mubr.msk.f32.vlgmr.msra.gmra.mrb[4].mxu0 %vm342_vm1, %v27692_v39 }
 0x596   : > { %v16622_v14 = vpop.permute.xlu0 %16621  ;;  %16858 = vmatprep.mubr.f32.mxu0 %v29569_v7 }
 0x597   : > { %v16624_v59 = vpop.permute.xlu1 %16623  ;;  %v16635_v1 = vsel %vm33501_vm11, %v16620_v36, %v16622_v14 }
 0x598   : > { %v16636_v38 = vsel %vm33502_vm13, %v16622_v14, %v16624_v59  ;;  %vm33505_vm13 = vmmov %vm33501_vm11 }
 0x599   : > { %16723 = vmatprep.subr.mxu1 %v16636_v38 }
 0x59a   : > { %16724 = vmatpush1.msra.mxu1 %v16635_v1 }
 0x59b   : > { %v16626_v61 = vpop.permute.xlu0 %16625  ;;  %27694 = vmatmul.mubr.msk.f32.vlgmr.msra.gmra.mrb[4].mxu1 %vm342_vm1, %v27692_v39 }
 0x59c   : > { %v16628_v18 = vpop.permute.xlu1 %16627  ;;  %v16637_v58 = vsel %vm33503_vm12, %v16624_v59, %v16626_v61  ;;  %16929 = vmatprep.mubr.f32.mxu1 %v29569_v7  ;;  %vm33506_vm12 = vcmask 359424  }
 0x59d   : > { %v16638_v56 = vsel %vm33504_vm15, %v16626_v61, %v16628_v18  ;;  %vm33507_vm15 = vmmov %vm33506_vm12 }
 0x59e   : > { %16794 = vmatprep.subr.mxu0 %v16638_v56  ;;  %v27712_v56 = vld [vmem:[%s33389_s2 + $0xd0] sm:$0xff]  ;;  %s33560_s2 = smov 7  }
 0x59f   : > { %16795 = vmatpush1.msra.mxu0 %v16637_v58 }
 0x5a0   : > { %v16630_v57 = vpop.permute.xlu0 %16629  ;;  %27695 = vmatmul.mubr.msk.f32.vlgmr.msra.gmra.mrb[6].mxu0 %vm342_vm1, %v27692_v39 }
 0x5a1   : > { %v16632_v22 = vpop.permute.xlu1 %16631  ;;  %v16639_v0 = vsel %vm33501_vm11, %v16628_v18, %v16630_v57  ;;  %17047 = vmatprep.mubr.f32.mxu0 %v29569_v7  ;;  %vm33508_vm11 = vmmov %vm33506_vm12 }
 0x5a2   : > { %v16640_v55 = vsel %vm33505_vm13, %v16630_v57, %v16632_v22  ;;  %vm33509_vm13 = vmmov %vm33508_vm11 }
 0x5a3   : > { %16865 = vmatprep.subr.mxu1 %v16640_v55 }
 0x5a4   : > { %16866 = vmatpush1.msra.mxu1 %v16639_v0 }
 0x5a5   : > { %v16949_v43 = vpop.permute.xlu0 %16948  ;;  %27696 = vmatmul.mubr.msk.f32.vlgmr.msra.gmra.mrb[6].mxu1 %vm342_vm1, %v27692_v39 }
 0x5a6   : > { %v16951_v35 = vpop.permute.xlu1 %16950  ;;  %17118 = vmatprep.mubr.f32.mxu1 %v29569_v7 }
 0x5a7   : > { %v16965_v31 = vsel %vm33506_vm12, %v16949_v43, %v16951_v35  ;;  %vm33510_vm12 = vmmov %vm33508_vm11 }
 0x5a8   : > { %16983 = vmatprep.subr.mxu0 %v16965_v31 }
 0x5aa   : > { %v16947_v23 = vpop.permute.xlu0 %16946 }
 0x5ab   : > { %v16964_v34 = vsel %vm33507_vm15, %v16947_v23, %v16949_v43  ;;  %v16953_v48 = vpop.permute.xlu1 %16952  ;;  %vm33511_vm15 = vmmov %vm33508_vm11 }
 0x5ac   : > { %16984 = vmatpush1.msra.mxu0 %v16964_v34  ;;  %v16966_v33 = vsel %vm33509_vm13, %v16951_v35, %v16953_v48  ;;  %vm33512_vm13 = vmmov %vm33508_vm11 }
 0x5ad   : > { %27698 = vmatmul.mubr.msk.f32.vlgmr.msra.gmra.mrb[4].mxu0 %vm342_vm1, %v27697_v17 }
 0x5ae   : > { %17189 = vmatprep.mubr.f32.mxu0 %v29569_v7 }
 0x5af   : > { %v16955_v26 = vpop.permute.xlu0 %16954 }
 0x5b0   : > { %v16957_v25 = vpop.permute.xlu1 %16956  ;;  %v16967_v8 = vsel %vm33508_vm11, %v16953_v48, %v16955_v26 }
 0x5b1   : > { %17054 = vmatprep.subr.mxu1 %v16967_v8  ;;  %v16968_v12 = vsel %vm33511_vm15, %v16955_v26, %v16957_v25 }
 0x5b2   : > { %17055 = vmatpush1.msra.mxu1 %v16966_v33 }
 0x5b3   : > { %27699 = vmatmul.mubr.msk.f32.vlgmr.msra.gmra.mrb[4].mxu1 %vm342_vm1, %v27697_v17 }
 0x5b4   : > { %v16959_v9 = vpop.permute.xlu0 %16958  ;;  %17260 = vmatprep.mubr.f32.mxu1 %v29569_v7 }
 0x5b5   : > { %v16961_v19 = vpop.permute.xlu1 %16960  ;;  %v16969_v41 = vsel %vm33510_vm12, %v16957_v25, %v16959_v9  ;;  %vm33513_vm12 = vcmask 293888  }
 0x5b6   : > { %17125 = vmatprep.subr.mxu0 %v16969_v41  ;;  %v16970_v16 = vsel %vm33512_vm13, %v16959_v9, %v16961_v19  ;;  %vm33514_vm15 = vmmov %vm33513_vm12 }
 0x5b7   : > { %17126 = vmatpush1.msra.mxu0 %v16968_v12 }
 0x5b8   : > { %27700 = vmatmul.mubr.msk.f32.vlgmr.msra.gmra.mrb[6].mxu0 %vm342_vm1, %v27697_v17 }
 0x5b9   : > { %v16963_v6 = vpop.permute.xlu0 %16962  ;;  %17378 = vmatprep.mubr.f32.mxu0 %v29569_v7 }
 0x5ba   : > { %v17280_v4 = vpop.permute.xlu1 %17279  ;;  %v16971_v54 = vsel %vm33508_vm11, %v16961_v19, %v16963_v6  ;;  %vm33515_vm11 = vmmov %vm33513_vm12 }
 0x5bb   : > { %17196 = vmatprep.subr.mxu1 %v16971_v54  ;;  %vm33516_vm13 = vmmov %vm33515_vm11 }
 0x5bc   : > { %17197 = vmatpush1.msra.mxu1 %v16970_v16 }
 0x5bd   : > { %27701 = vmatmul.mubr.msk.f32.vlgmr.msra.gmra.mrb[6].mxu1 %vm342_vm1, %v27697_v17 }
 0x5be   : > { %v17282_v27 = vpop.permute.xlu0 %17281  ;;  %17449 = vmatprep.mubr.f32.mxu1 %v29569_v7 }
 0x5bf   : > { %v17278_v30 = vpop.permute.xlu1 %17277  ;;  %v17296_v15 = vsel %vm33513_vm12, %v17280_v4, %v17282_v27  ;;  %vm33517_vm12 = vmmov %vm33515_vm11 }
 0x5c0   : > { %v17295_v24 = vsel %vm33514_vm15, %v17278_v30, %v17280_v4  ;;  %17314 = vmatprep.subr.mxu0 %v17296_v15  ;;  %vm33518_vm15 = vmmov %vm33515_vm11  ;;  %v33534_v4 = vld [vmem:[#allocation5_spill] sm:$0xff] }
 0x5c1   : > { %17315 = vmatpush1.msra.mxu0 %v17295_v24 }
 0x5c2   : > { %v17284_v3 = vpop.permute.xlu0 %17283  ;;  %27703 = vmatmul.mubr.msk.f32.vlgmr.msra.gmra.mrb[4].mxu0 %vm342_vm1, %v27702_v50 }
 0x5c3   : > { %v17286_v63 = vpop.permute.xlu1 %17285  ;;  %v17297_v21 = vsel %vm33515_vm11, %v17282_v27, %v17284_v3  ;;  %17520 = vmatprep.mubr.f32.mxu0 %v29569_v7  ;;  %v33535_v27 = vld [vmem:[#allocation6_spill] sm:$0xff] }
 0x5c4   : > { %v17298_v11 = vsel %vm33516_vm13, %v17284_v3, %v17286_v63  ;;  %vm33519_vm13 = vmmov %vm33515_vm11 }
 0x5c5   : > { %17385 = vmatprep.subr.mxu1 %v17298_v11  ;;  %v33537_v11 = vld [vmem:[#allocation7_spill] sm:$0xff] }
 0x5c6   : > { %17386 = vmatpush1.msra.mxu1 %v17297_v21 }
 0x5c7   : > { %v17288_v51 = vpop.permute.xlu0 %17287  ;;  %27704 = vmatmul.mubr.msk.f32.vlgmr.msra.gmra.mrb[4].mxu1 %vm342_vm1, %v27702_v50 }
 0x5c8   : > { %v17290_v62 = vpop.permute.xlu1 %17289  ;;  %v17299_v20 = vsel %vm33517_vm12, %v17286_v63, %v17288_v51  ;;  %17591 = vmatprep.mubr.f32.mxu1 %v29569_v7  ;;  %vm33520_vm12 = vcmask 285696  }
 0x5c9   : > { %v17300_v42 = vsel %vm33518_vm15, %v17288_v51, %v17290_v62  ;;  %vm33521_vm15 = vmmov %vm33520_vm12 }
 0x5ca   : > { %17456 = vmatprep.subr.mxu0 %v17300_v42  ;;  %v33538_v42 = vld [vmem:[#allocation8_spill] sm:$0xff] }
 0x5cb   : > { %17457 = vmatpush1.msra.mxu0 %v17299_v20  ;;  %v17292_v13 = vpop.permute.xlu0 %17291 }
 0x5cc   : > { %v17294_v10 = vpop.permute.xlu1 %17293  ;;  %v17301_v46 = vsel %vm33515_vm11, %v17290_v62, %v17292_v13  ;;  %27705 = vmatmul.mubr.msk.f32.vlgmr.msra.gmra.mrb[6].mxu0 %vm342_vm1, %v27702_v50  ;;  %vm33522_vm11 = vmmov %vm33520_vm12 }
 0x5cd   : > { %v17302_v5 = vsel %vm33519_vm13, %v17292_v13, %v17294_v10  ;;  %17709 = vmatprep.mubr.f32.mxu0 %v29569_v7  ;;  %vm33523_vm13 = vmmov %vm33522_vm11 }
 0x5ce   : > { %17527 = vmatprep.subr.mxu1 %v17302_v5 }
 0x5cf   : > { %17528 = vmatpush1.msra.mxu1 %v17301_v46  ;;  %v17611_v40 = vpop.permute.xlu0 %17610 }
 0x5d0   : > { %v17613_v28 = vpop.permute.xlu1 %17612  ;;  %27706 = vmatmul.mubr.msk.f32.vlgmr.msra.gmra.mrb[6].mxu1 %vm342_vm1, %v27702_v50 }
 0x5d1   : > { %v17627_v2 = vsel %vm33520_vm12, %v17611_v40, %v17613_v28  ;;  %17780 = vmatprep.mubr.f32.mxu1 %v29569_v7  ;;  %vm33524_vm12 = vmmov %vm33522_vm11 }
 0x5d2   : > { %17645 = vmatprep.subr.mxu0 %v17627_v2 }
 0x5d3   : > { %v17609_v29 = vpop.permute.xlu0 %17608 }
 0x5d4   : > { %v17626_v53 = vsel %vm33521_vm15, %v17609_v29, %v17611_v40  ;;  %v17615_v52 = vpop.permute.xlu1 %17614  ;;  %vm33525_vm15 = vmmov %vm33522_vm11 }
 0x5d5   : > { %17646 = vmatpush1.msra.mxu0 %v17626_v53  ;;  %v17628_v36 = vsel %vm33523_vm13, %v17613_v28, %v17615_v52  ;;  %vm33526_vm13 = vmmov %vm33522_vm11  ;;  %v33539_v28 = vld [vmem:[#allocation9_spill] sm:$0xff]  ;;  %v33540_v53 = vld [vmem:[#allocation10_spill] sm:$0xff] }
 0x5d6   : > { %27708 = vmatmul.mubr.msk.f32.vlgmr.msra.gmra.mrb[4].mxu0 %vm342_vm1, %v27707_v47 }
 0x5d7   : > { %v17617_v37 = vpop.permute.xlu0 %17616  ;;  %17851 = vmatprep.mubr.f32.mxu0 %v29569_v7 }
 0x5d8   : > { %v17619_v45 = vpop.permute.xlu1 %17618  ;;  %v17629_v44 = vsel %vm33522_vm11, %v17615_v52, %v17617_v37 }
 0x5d9   : > { %17716 = vmatprep.subr.mxu1 %v17629_v44  ;;  %v17630_v60 = vsel %vm33525_vm15, %v17617_v37, %v17619_v45 }
 0x5da   : > { %17717 = vmatpush1.msra.mxu1 %v17628_v36  ;;  %v33541_v36 = vld [vmem:[#allocation11_spill] sm:$0xff] }
 0x5db   : > { %v17621_v49 = vpop.permute.xlu0 %17620  ;;  %27709 = vmatmul.mubr.msk.f32.vlgmr.msra.gmra.mrb[4].mxu1 %vm342_vm1, %v27707_v47 }
 0x5dc   : > { %v17623_v32 = vpop.permute.xlu1 %17622  ;;  %v17631_v39 = vsel %vm33524_vm12, %v17619_v45, %v17621_v49  ;;  %17922 = vmatprep.mubr.f32.mxu1 %v29569_v7  ;;  %vm33527_vm12 = vcmask 277504  }
 0x5dd   : > { %17787 = vmatprep.subr.mxu0 %v17631_v39  ;;  %v17632_v38 = vsel %vm33526_vm13, %v17621_v49, %v17623_v32  ;;  %vm33528_vm15 = vmmov %vm33527_vm12 }
 0x5de   : > { %17788 = vmatpush1.msra.mxu0 %v17630_v60 }
 0x5df   : > { %v17625_v14 = vpop.permute.xlu0 %17624  ;;  %27710 = vmatmul.mubr.msk.f32.vlgmr.msra.gmra.mrb[6].mxu0 %vm342_vm1, %v27707_v47 }
 0x5e0   : > { %v17942_v59 = vpop.permute.xlu1 %17941  ;;  %v17633_v1 = vsel %vm33522_vm11, %v17623_v32, %v17625_v14  ;;  %18040 = vmatprep.mubr.f32.mxu0 %v29569_v7  ;;  %vm33529_vm11 = vmmov %vm33527_vm12  ;;  %v33542_v32 = vld [vmem:[#allocation12_spill] sm:$0xff] }
 0x5e1   : > { %17858 = vmatprep.subr.mxu1 %v17633_v1  ;;  %vm33530_vm13 = vmmov %vm33529_vm11 }
 0x5e2   : > { %17859 = vmatpush1.msra.mxu1 %v17632_v38 }
 0x5e3   : > { %v17944_v61 = vpop.permute.xlu0 %17943  ;;  %27711 = vmatmul.mubr.msk.f32.vlgmr.msra.gmra.mrb[6].mxu1 %vm342_vm1, %v27707_v47 }
 0x5e4   : > { %v17940_v18 = vpop.permute.xlu1 %17939  ;;  %v17958_v58 = vsel %vm33527_vm12, %v17942_v59, %v17944_v61  ;;  %18111 = vmatprep.mubr.f32.mxu1 %v29569_v7  ;;  %vm33531_vm12 = vmmov %vm33529_vm11 }
 0x5e5   : > { %v17957_v57 = vsel %vm33528_vm15, %v17940_v18, %v17942_v59  ;;  %17976 = vmatprep.subr.mxu0 %v17958_v58  ;;  %vm33532_vm15 = vmmov %vm33529_vm11 }
 0x5e6   : > { %17977 = vmatpush1.msra.mxu0 %v17957_v57 }
 0x5e7   : > { %v17946_v22 = vpop.permute.xlu0 %17945  ;;  %27713 = vmatmul.mubr.msk.f32.vlgmr.msra.gmra.mrb[4].mxu0 %vm342_vm1, %v27712_v56 }
 0x5e8   : > { %v17948_v0 = vpop.permute.xlu1 %17947  ;;  %v17959_v55 = vsel %vm33529_vm11, %v17944_v61, %v17946_v22  ;;  %18182 = vmatprep.mubr.f32.mxu0 %v29569_v7 }
 0x5e9   : > { %v17960_v43 = vsel %vm33530_vm13, %v17946_v22, %v17948_v0  ;;  %vm33533_vm13 = vmmov %vm33529_vm11 }
 0x5ea   : > { %18047 = vmatprep.subr.mxu1 %v17960_v43 }
 0x5eb   : > { %18048 = vmatpush1.msra.mxu1 %v17959_v55  ;;  %v17950_v35 = vpop.permute.xlu0 %17949 }
 0x5ec   : > { %27714 = vmatmul.mubr.msk.f32.vlgmr.msra.gmra.mrb[4].mxu1 %vm342_vm1, %v27712_v56  ;;  %v17952_v31 = vpop.permute.xlu1 %17951  ;;  %v17961_v23 = vsel %vm33531_vm12, %v17948_v0, %v17950_v35  ;;  %vm33543_vm12 = vcmask 1048440  }
 0x5ed   : > { %v17962_v17 = vsel %vm33532_vm15, %v17950_v35, %v17952_v31  ;;  %18253 = vmatprep.mubr.f32.mxu1 %v29569_v7  ;;  %vm33544_vm15 = vcmask 711680  }
 0x5ee   : > { %18118 = vmatprep.subr.mxu0 %v17962_v17 }
 0x5ef   : > { %18119 = vmatpush1.msra.mxu0 %v17961_v23  ;;  %v17954_v34 = vpop.permute.xlu0 %17953 }
 0x5f0   : > { %27715 = vmatmul.mubr.msk.f32.vlgmr.msra.gmra.mrb[6].mxu0 %vm342_vm1, %v27712_v56  ;;  %v17956_v48 = vpop.permute.xlu1 %17955  ;;  %v17963_v26 = vsel %vm33529_vm11, %v17952_v31, %v17954_v34 }
 0x5f1   : > { %v17964_v25 = vsel %vm33533_vm13, %v17954_v34, %v17956_v48  ;;  %18465 = vmatprep.mubr.f32.mxu0 %v29569_v7  ;;  %vm33652_vm13 = vcmask 146432  }
 0x5f2   : > { %18189 = vmatprep.subr.mxu1 %v17964_v25 }
 0x5f3   : > { %18190 = vmatpush1.msra.mxu1 %v17963_v26 }
 0x5f4   : > { %27716 = vmatmul.mubr.msk.f32.vlgmr.msra.gmra.mrb[6].mxu1 %vm342_vm1, %v27712_v56 }
 0x5f5   : > { %18536 = vmatprep.mubr.f32.mxu1 %v29569_v7 }
 0x600   : > { %v18273_v8 = vpop.permute.xlu0 %18272 }
 0x6ba   : > { %v18042_v33 = vpop.f32.mrb[4].mxu0 }
 0x6bb   : > { %v18275_v9 = vadd.f32 %v18273_v8, %v18042_v33  ;;  %v18044_v19 = vpop.f32.mrb[5].mxu0 }
 0x6bc   : > { %v18276_v41 = vadd.f32 %v18273_v8, %v18044_v19 }
 0x6bd   : > { %v18283_v12 = vmax.f32 %v18275_v9, 0.0 }
 0x6be   : > { %v18284_v6 = vmax.f32 %v18276_v41, 0.0 }
 0x6bf   : > { %v18291_v54 = vmul.f32 %v18283_v12, %v33534_v4  ;;  %v18113_v16 = vpop.f32.mrb[4].mxu1 }
 0x6c0   : > { %v18292_v30 = vmul.f32 %v18284_v6, %v33535_v27  ;;  %v18277_v15 = vadd.f32 %v18273_v8, %v18113_v16  ;;  %v18115_v50 = vpop.f32.mrb[5].mxu1 }
 0x6c1   : > { %v18278_v24 = vadd.f32 %v18273_v8, %v18115_v50  ;;  %18307 = vrot.lane.b32.xlu1 %v18291_v54, %s33536_s12 }
 0x6c2   : > { %v18285_v3 = vmax.f32 %v18277_v15, 0.0  ;;  %18309 = vrot.lane.b32.xlu0 %v18292_v30, %s33536_s12 }
 0x6c3   : > { %v18286_v63 = vmax.f32 %v18278_v24, 0.0  ;;  %v18184_v21 = vpop.f32.mrb[6].mxu0 }
 0x6c4   : > { %v18293_v51 = vmul.f32 %v18285_v3, %v33537_v11  ;;  %v18279_v62 = vadd.f32 %v18273_v8, %v18184_v21  ;;  %v18186_v20 = vpop.f32.mrb[7].mxu0 }
 0x6c5   : > { %v18294_v13 = vmul.f32 %v18286_v63, %v33538_v42  ;;  %v18280_v10 = vadd.f32 %v18273_v8, %v18186_v20 }
 0x6c6   : > { %v18287_v46 = vmax.f32 %v18279_v62, 0.0  ;;  %18311 = vrot.lane.b32.xlu1 %v18293_v51, %s33536_s12 }
 0x6c7   : > { %v18288_v5 = vmax.f32 %v18280_v10, 0.0  ;;  %18313 = vrot.lane.b32.xlu0 %v18294_v13, %s33536_s12  ;;  %v18255_v40 = vpop.f32.mrb[6].mxu1 }
 0x6c8   : > { %v18295_v2 = vmul.f32 %v18287_v46, %v33539_v28  ;;  %v18281_v29 = vadd.f32 %v18273_v8, %v18255_v40  ;;  %v18257_v47 = vpop.f32.mrb[7].mxu1 }
 0x6c9   : > { %v18296_v52 = vmul.f32 %v18288_v5, %v33540_v53  ;;  %v18282_v37 = vadd.f32 %v18273_v8, %v18257_v47 }
 0x6ca   : > { %v18289_v45 = vmax.f32 %v18281_v29, 0.0  ;;  %18315 = vrot.lane.b32.xlu1 %v18295_v2, %s33536_s12 }
 0x6cb   : > { %v18290_v44 = vmax.f32 %v18282_v37, 0.0  ;;  %18317 = vrot.lane.b32.xlu0 %v18296_v52, %s33536_s12 }
 0x6cc   : > { %v18297_v49 = vmul.f32 %v18289_v45, %v33541_v36 }
 0x6cd   : > { %v18298_v39 = vmul.f32 %v18290_v44, %v33542_v32 }
 0x6ce   : > { %18319 = vrot.lane.b32.xlu1 %v18297_v49, %s33536_s12  ;;  %v31601_v49 = vld [vmem:[%s33205_s3 + $0x8] sm:$0xff] }
 0x6cf   : > { %18321 = vrot.lane.b32.xlu0 %v18298_v39, %s33536_s12  ;;  %s33548_s12 = smov 107  }
 0x733   : > { %v18308_v60 = vpop.permute.xlu1 %18307 }
 0x734   : > { %18339 = vst.msk [vmem:[#allocation2] sm:$0xff] %vm33543_vm12, %v18308_v60  ;;  %v18310_v14 = vpop.permute.xlu0 %18309  ;;  %vm33658_vm12 = vmmov %vm33652_vm13 }
 0x735   : > { %v31289_v59 = vsel %vm9326_vm14, %v18308_v60, %v18310_v14 }
 0x736   : > { %18340 = vst [vmem:[#allocation2 + $0x8] sm:$0xff] %v31289_v59 }
 0x738   : > { %v18312_v1 = vpop.permute.xlu1 %18311 }
 0x739   : > { %v31293_v38 = vsel %vm9326_vm14, %v18310_v14, %v18312_v1  ;;  %v18314_v61 = vpop.permute.xlu0 %18313 }
 0x73a   : > { %18341 = vst [vmem:[#allocation2 + $0x10] sm:$0xff] %v31293_v38  ;;  %v31297_v18 = vsel %vm9326_vm14, %v18312_v1, %v18314_v61 }
 0x73b   : > { %18342 = vst [vmem:[#allocation2 + $0x18] sm:$0xff] %v31297_v18  ;;  %v31300_v58 = vld [vmem:[#allocation2] sm:$0xff] }
 0x73c   : > { %v18316_v56 = vpop.permute.xlu1 %18315  ;;  %21619 = vrot.lane.b32.xlu0 %v31300_v58, %s33297_s22  ;;  %18367 = vrot.lane.b32.xlu1 %v31300_v58, %s33305_s30 }
 0x73d   : > { %v31307_v57 = vsel %vm9326_vm14, %v18314_v61, %v18316_v56  ;;  %v18318_v22 = vpop.permute.xlu0 %18317 }
 0x73e   : > { %18343 = vst [vmem:[#allocation2 + $0x20] sm:$0xff] %v31307_v57  ;;  %v31311_v0 = vsel %vm9326_vm14, %v18316_v56, %v18318_v22 }
 0x73f   : > { %18344 = vst [vmem:[#allocation2 + $0x28] sm:$0xff] %v31311_v0 }
 0x740   : > { %v18320_v55 = vpop.permute.xlu1 %18319  ;;  %22281 = vrot.lane.b32.xlu0 %v31300_v58, %s33299_s16  ;;  %18974 = vrot.lane.b32.xlu1 %v31300_v58, %s33307_s8 }
 0x741   : > { %v31319_v43 = vsel %vm9326_vm14, %v18318_v22, %v18320_v55  ;;  %v18322_v35 = vpop.permute.xlu0 %18321 }
 0x742   : > { %18345 = vst [vmem:[#allocation2 + $0x30] sm:$0xff] %v31319_v43  ;;  %v31323_v31 = vsel %vm9326_vm14, %v18320_v55, %v18322_v35  ;;  %18347 = vst.msk [vmem:[#allocation2 + $0x40] sm:$0xff] %vm33544_vm15, %v18322_v35 }
 0x743   : > { %18346 = vst [vmem:[#allocation2 + $0x38] sm:$0xff] %v31323_v31  ;;  %vm33662_vm15 = vmmov %vm33658_vm12 }
 0x744   : > { %22943 = vrot.lane.b32.xlu0 %v31300_v58, %s33301_s15  ;;  %19302 = vrot.lane.b32.xlu1 %v31300_v58, %s33295_s9  ;;  %s33550_s9 = smov 28  }
 0x748   : > { %23605 = vrot.lane.b32.xlu0 %v31300_v58, %s33303_s28  ;;  %19630 = vrot.lane.b32.xlu1 %v31300_v58, %s33545_s18 }
 0x749   : > { %v31638_v55 = vld [vmem:[#allocation2 + $0x40] sm:$0xff] }
 0x74c   : > { %19958 = vrot.lane.b32.xlu1 %v31300_v58, %s33546_s10  ;;  %21621 = vrot.lane.b32.xlu0 %v31289_v59, %s33297_s22  ;;  %s33551_s22 = smov 26  }
 0x750   : > { %20286 = vrot.lane.b32.xlu1 %v31300_v58, %s33547_s11  ;;  %22283 = vrot.lane.b32.xlu0 %v31289_v59, %s33299_s16  ;;  %s33552_s16 = smov 17  }
 0x754   : > { %20614 = vrot.lane.b32.xlu1 %v31300_v58, %s33548_s12  ;;  %22945 = vrot.lane.b32.xlu0 %v31289_v59, %s33301_s15  ;;  %s33553_s15 = smov 118  }
 0x758   : > { %20942 = vrot.lane.b32.xlu1 %v31300_v58, %s33549_s19  ;;  %23607 = vrot.lane.b32.xlu0 %v31289_v59, %s33303_s28  ;;  %s33555_s28 = smov 6  }
 0x75c   : > { %21288 = vrot.lane.b32.xlu1 %v31300_v58, %s33550_s9  ;;  %18371 = vrot.lane.b32.xlu0 %v31293_v38, %s33305_s30 }
 0x760   : > { %21950 = vrot.lane.b32.xlu1 %v31300_v58, %s33551_s22  ;;  %18978 = vrot.lane.b32.xlu0 %v31293_v38, %s33307_s8 }
 0x764   : > { %22612 = vrot.lane.b32.xlu1 %v31300_v58, %s33552_s16  ;;  %19306 = vrot.lane.b32.xlu0 %v31293_v38, %s33553_s15 }
 0x768   : > { %23274 = vrot.lane.b32.xlu1 %v31300_v58, %s33554_s0  ;;  %19634 = vrot.lane.b32.xlu0 %v31293_v38, %s33545_s18 }
 0x76c   : > { %23936 = vrot.lane.b32.xlu1 %v31300_v58, %s33555_s28  ;;  %19962 = vrot.lane.b32.xlu0 %v31293_v38, %s33546_s10 }
 0x770   : > { %18369 = vrot.lane.b32.xlu1 %v31289_v59, %s33305_s30  ;;  %20290 = vrot.lane.b32.xlu0 %v31293_v38, %s33547_s11 }
 0x774   : > { %18976 = vrot.lane.b32.xlu1 %v31289_v59, %s33307_s8  ;;  %20618 = vrot.lane.b32.xlu0 %v31293_v38, %s33548_s12 }
 0x778   : > { %19304 = vrot.lane.b32.xlu1 %v31289_v59, %s33553_s15  ;;  %20946 = vrot.lane.b32.xlu0 %v31293_v38, %s33549_s19 }
 0x77c   : > { %19632 = vrot.lane.b32.xlu1 %v31289_v59, %s33545_s18  ;;  %21292 = vrot.lane.b32.xlu0 %v31293_v38, %s33550_s9 }
 0x780   : > { %19960 = vrot.lane.b32.xlu1 %v31289_v59, %s33546_s10  ;;  %21954 = vrot.lane.b32.xlu0 %v31293_v38, %s33551_s22 }
 0x784   : > { %20288 = vrot.lane.b32.xlu1 %v31289_v59, %s33547_s11  ;;  %22616 = vrot.lane.b32.xlu0 %v31293_v38, %s33552_s16 }
 0x788   : > { %20616 = vrot.lane.b32.xlu1 %v31289_v59, %s33548_s12  ;;  %23278 = vrot.lane.b32.xlu0 %v31293_v38, %s33554_s0 }
 0x78c   : > { %20944 = vrot.lane.b32.xlu1 %v31289_v59, %s33549_s19  ;;  %23940 = vrot.lane.b32.xlu0 %v31293_v38, %s33555_s28 }
 0x790   : > { %21290 = vrot.lane.b32.xlu1 %v31289_v59, %s33550_s9  ;;  %24287 = vrot.lane.b32.xlu0 %v31293_v38, %s33414_s26 }
 0x794   : > { %21952 = vrot.lane.b32.xlu1 %v31289_v59, %s33551_s22  ;;  %18375 = vrot.lane.b32.xlu0 %v31307_v57, %s33305_s30  ;;  %s33557_s30 = smov 18  }
 0x798   : > { %22614 = vrot.lane.b32.xlu1 %v31289_v59, %s33552_s16  ;;  %18982 = vrot.lane.b32.xlu0 %v31307_v57, %s33307_s8  ;;  %s33558_s8 = smov 16  }
 0x79c   : > { %23276 = vrot.lane.b32.xlu1 %v31289_v59, %s33554_s0  ;;  %19310 = vrot.lane.b32.xlu0 %v31307_v57, %s33553_s15 }
 0x7a0   : > { %23938 = vrot.lane.b32.xlu1 %v31289_v59, %s33555_s28  ;;  %19638 = vrot.lane.b32.xlu0 %v31307_v57, %s33545_s18 }
 0x7a4   : > { %21623 = vrot.lane.b32.xlu1 %v31293_v38, %s33556_s1  ;;  %19966 = vrot.lane.b32.xlu0 %v31307_v57, %s33546_s10 }
 0x7a8   : > { %22285 = vrot.lane.b32.xlu1 %v31293_v38, %s33557_s30  ;;  %20294 = vrot.lane.b32.xlu0 %v31307_v57, %s33547_s11 }
 0x7ac   : > { %22947 = vrot.lane.b32.xlu1 %v31293_v38, %s33558_s8  ;;  %20622 = vrot.lane.b32.xlu0 %v31307_v57, %s33548_s12 }
 0x7ae   : > { %v31435_v23 = vpop.permute.xlu0 %21619  ;;  %v18368_v17 = vpop.permute.xlu1 %18367 }
 0x7af   : > { %33559 = vst [vmem:[#allocation37_spill] sm:$0xff] %v31435_v23 }
 0x7b0   : > { %23609 = vrot.lane.b32.xlu1 %v31293_v38, %s33560_s2  ;;  %20950 = vrot.lane.b32.xlu0 %v31307_v57, %s33549_s19 }
 0x7b2   : > { %v31441_v34 = vpop.permute.xlu0 %22281  ;;  %v31443_v48 = vpop.permute.xlu1 %18974 }
 0x7b3   : > { %33561 = vst [vmem:[#allocation20_spill] sm:$0xff] %v31441_v34 }
 0x7b4   : > { %18373 = vrot.lane.b32.xlu1 %v31297_v18, %s33562_s6  ;;  %21296 = vrot.lane.b32.xlu0 %v31307_v57, %s33550_s9 }
 0x7b6   : > { %v31449_v26 = vpop.permute.xlu0 %22943  ;;  %v31451_v25 = vpop.permute.xlu1 %19302 }
 0x7b7   : > { %33563 = vst [vmem:[#allocation18_spill] sm:$0xff] %v31449_v26 }
 0x7b8   : > { %18980 = vrot.lane.b32.xlu1 %v31297_v18, %s33564_s24  ;;  %21625 = vrot.lane.b32.xlu0 %v31297_v18, %s33556_s1 }
 0x7ba   : > { %v31457_v8 = vpop.permute.xlu0 %23605  ;;  %v31459_v33 = vpop.permute.xlu1 %19630 }
 0x7bb   : > { %33565 = vst [vmem:[#allocation19_spill] sm:$0xff] %v31457_v8 }
 0x7bc   : > { %19308 = vrot.lane.b32.xlu1 %v31297_v18, %s33553_s15  ;;  %21958 = vrot.lane.b32.xlu0 %v31307_v57, %s33551_s22 }
 0x7be   : > { %v31465_v9 = vpop.permute.xlu0 %21621  ;;  %v31467_v19 = vpop.permute.xlu1 %19958 }
 0x7bf   : > { %33566 = vst [vmem:[#allocation15_spill] sm:$0xff] %v31465_v9 }
 0x7c0   : > { %19636 = vrot.lane.b32.xlu1 %v31297_v18, %s33545_s18  ;;  %22287 = vrot.lane.b32.xlu0 %v31297_v18, %s33557_s30 }
 0x7c2   : > { %v31473_v41 = vpop.permute.xlu0 %22283  ;;  %v31475_v12 = vpop.permute.xlu1 %20286 }
 0x7c3   : > { %33567 = vst [vmem:[#allocation38_spill] sm:$0xff] %v31473_v41 }
 0x7c4   : > { %19964 = vrot.lane.b32.xlu1 %v31297_v18, %s33546_s10  ;;  %22620 = vrot.lane.b32.xlu0 %v31307_v57, %s33552_s16 }
 0x7c6   : > { %v31481_v6 = vpop.permute.xlu0 %22945  ;;  %v31483_v4 = vpop.permute.xlu1 %20614 }
 0x7c7   : > { %33568 = vst [vmem:[#allocation33_spill] sm:$0xff] %v31481_v6 }
 0x7c8   : > { %20292 = vrot.lane.b32.xlu1 %v31297_v18, %s33547_s11  ;;  %22949 = vrot.lane.b32.xlu0 %v31297_v18, %s33558_s8 }
 0x7ca   : > { %v31489_v54 = vpop.permute.xlu0 %23607  ;;  %v31491_v16 = vpop.permute.xlu1 %20942 }
 0x7cb   : > { %33569 = vst [vmem:[#allocation23_spill] sm:$0xff] %v31489_v54 }
 0x7cc   : > { %20620 = vrot.lane.b32.xlu1 %v31297_v18, %s33548_s12  ;;  %23282 = vrot.lane.b32.xlu0 %v31307_v57, %s33554_s0 }
 0x7ce   : > { %v31497_v27 = vpop.permute.xlu0 %18371  ;;  %v31499_v30 = vpop.permute.xlu1 %21288 }
 0x7d0   : > { %20948 = vrot.lane.b32.xlu1 %v31297_v18, %s33549_s19  ;;  %23611 = vrot.lane.b32.xlu0 %v31297_v18, %s33560_s2 }
 0x7d2   : > { %v31505_v15 = vpop.permute.xlu0 %18978  ;;  %v31507_v50 = vpop.permute.xlu1 %21950 }
 0x7d3   : > { %33570 = vst [vmem:[#allocation21_spill] sm:$0xff] %v31507_v50 }
 0x7d4   : > { %21294 = vrot.lane.b32.xlu1 %v31297_v18, %s33550_s9  ;;  %23944 = vrot.lane.b32.xlu0 %v31307_v57, %s33555_s28 }
 0x7d6   : > { %v31513_v24 = vpop.permute.xlu0 %19306  ;;  %v31515_v3 = vpop.permute.xlu1 %22612 }
 0x7d7   : > { %33571 = vst [vmem:[#allocation22_spill] sm:$0xff] %v31515_v3 }
 0x7d8   : > { %21627 = vrot.lane.b32.xlu1 %v31307_v57, %s33556_s1  ;;  %18377 = vrot.lane.b32.xlu0 %v31311_v0, %s33562_s6 }
 0x7da   : > { %v31521_v63 = vpop.permute.xlu0 %19634  ;;  %v31523_v21 = vpop.permute.xlu1 %23274 }
 0x7db   : > { %33572 = vst [vmem:[#allocation13_spill] sm:$0xff] %v31523_v21 }
 0x7dc   : > { %21956 = vrot.lane.b32.xlu1 %v31297_v18, %s33551_s22  ;;  %18984 = vrot.lane.b32.xlu0 %v31311_v0, %s33564_s24 }
 0x7de   : > { %v31529_v11 = vpop.permute.xlu0 %19962  ;;  %v31531_v51 = vpop.permute.xlu1 %23936 }
 0x7df   : > { %33573 = vst [vmem:[#allocation34_spill] sm:$0xff] %v31531_v51 }
 0x7e0   : > { %22289 = vrot.lane.b32.xlu1 %v31307_v57, %s33557_s30  ;;  %19312 = vrot.lane.b32.xlu0 %v31311_v0, %s33553_s15 }
 0x7e2   : > { %v31537_v62 = vpop.permute.xlu0 %20290  ;;  %v18370_v20 = vpop.permute.xlu1 %18369 }
 0x7e3   : > { %v18384_v42 = vsel %vm326_vm0, %v18370_v20, %v31497_v27  ;;  %v18383_v13 = vsel %vm326_vm0, %v18368_v17, %v18370_v20 }
 0x7e4   : > { %22618 = vrot.lane.b32.xlu1 %v31297_v18, %s33552_s16  ;;  %19640 = vrot.lane.b32.xlu0 %v31311_v0, %s33545_s18 }
 0x7e5   : > { %18401 = vmatprep.subr.mxu0 %v18384_v42 }
 0x7e6   : > { %18402 = vmatpush1.msra.mxu0 %v18383_v13  ;;  %v31546_v10 = vpop.permute.xlu0 %20618  ;;  %v31548_v46 = vpop.permute.xlu1 %18976 }
 0x7e7   : > { %27719 = vmatmul.mubr.msk.f32.vlgmr.msra.gmra.mrb[8].mxu0 %vm342_vm1, %v31601_v49 }
 0x7e8   : > { %22951 = vrot.lane.b32.xlu1 %v31307_v57, %s33558_s8  ;;  %19968 = vrot.lane.b32.xlu0 %v31311_v0, %s33546_s10 }
 0x7e9   : > { %18607 = vmatprep.mubr.f32.mxu0 %v29569_v7 }
 0x7ea   : > { %v31554_v5 = vpop.permute.xlu0 %20946  ;;  %v31556_v40 = vpop.permute.xlu1 %19304 }
 0x7ec   : > { %23280 = vrot.lane.b32.xlu1 %v31297_v18, %s33554_s0  ;;  %20296 = vrot.lane.b32.xlu0 %v31311_v0, %s33547_s11 }
 0x7ee   : > { %v31562_v28 = vpop.permute.xlu0 %21292  ;;  %v31564_v2 = vpop.permute.xlu1 %19632 }
 0x7f0   : > { %23613 = vrot.lane.b32.xlu1 %v31307_v57, %s33560_s2  ;;  %20624 = vrot.lane.b32.xlu0 %v31311_v0, %s33548_s12 }
 0x7f2   : > { %v31570_v29 = vpop.permute.xlu0 %21954  ;;  %v31572_v47 = vpop.permute.xlu1 %19960 }
 0x7f3   : > { %33574 = vst [vmem:[#allocation39_spill] sm:$0xff] %v31570_v29 }
 0x7f4   : > { %23942 = vrot.lane.b32.xlu1 %v31297_v18, %s33555_s28  ;;  %20952 = vrot.lane.b32.xlu0 %v31311_v0, %s33549_s19 }
 0x7f6   : > { %v31578_v53 = vpop.permute.xlu0 %22616  ;;  %v31580_v52 = vpop.permute.xlu1 %20288 }
 0x7f7   : > { %33575 = vst [vmem:[#allocation26_spill] sm:$0xff] %v31578_v53 }
 0x7f8   : > { %24289 = vrot.lane.b32.xlu1 %v31297_v18, %s33414_s26  ;;  %21298 = vrot.lane.b32.xlu0 %v31311_v0, %s33550_s9 }
 0x7fa   : > { %v31586_v37 = vpop.permute.xlu0 %23278  ;;  %v31588_v45 = vpop.permute.xlu1 %20616 }
 0x7fb   : > { %33576 = vst [vmem:[#allocation24_spill] sm:$0xff] %v31586_v37 }
 0x7fc   : > { %21960 = vrot.lane.b32.xlu0 %v31311_v0, %s33551_s22  ;;  %21629 = vrot.lane.b32.xlu1 %v31311_v0, %s33556_s1 }
 0x7fe   : > { %v31594_v44 = vpop.permute.xlu0 %23940  ;;  %v31596_v36 = vpop.permute.xlu1 %20944 }
 0x7ff   : > { %33577 = vst [vmem:[#allocation25_spill] sm:$0xff] %v31594_v44 }
 0x800   : > { %22622 = vrot.lane.b32.xlu0 %v31311_v0, %s33552_s16  ;;  %22291 = vrot.lane.b32.xlu1 %v31311_v0, %s33557_s30 }
 0x802   : > { %v31610_v32 = vpop.permute.xlu0 %24287  ;;  %v31612_v39 = vpop.permute.xlu1 %21290 }
 0x803   : > { %33578 = vst [vmem:[#allocation16_spill] sm:$0xff] %v31610_v32 }
 0x804   : > { %23284 = vrot.lane.b32.xlu0 %v31311_v0, %s33554_s0  ;;  %22953 = vrot.lane.b32.xlu1 %v31311_v0, %s33558_s8 }
 0x806   : > { %v31618_v60 = vpop.permute.xlu0 %18375  ;;  %v31620_v14 = vpop.permute.xlu1 %21952 }
 0x807   : > { %33579 = vst [vmem:[#allocation40_spill] sm:$0xff] %v31620_v14 }
 0x808   : > { %23946 = vrot.lane.b32.xlu0 %v31311_v0, %s33555_s28  ;;  %23615 = vrot.lane.b32.xlu1 %v31311_v0, %s33560_s2 }
 0x80a   : > { %v31626_v1 = vpop.permute.xlu0 %18982  ;;  %v31628_v61 = vpop.permute.xlu1 %22614 }
 0x80b   : > { %33580 = vst [vmem:[#allocation35_spill] sm:$0xff] %v31628_v61 }
 0x80c   : > { %21631 = vrot.lane.b32.xlu0 %v31319_v43, %s33556_s1  ;;  %18379 = vrot.lane.b32.xlu1 %v31319_v43, %s33562_s6 }
 0x80e   : > { %v31634_v56 = vpop.permute.xlu0 %19310  ;;  %v31636_v22 = vpop.permute.xlu1 %23276 }
 0x80f   : > { %33581 = vst [vmem:[#allocation29_spill] sm:$0xff] %v31636_v22 }
 0x810   : > { %21635 = vrot.lane.b32.xlu0 %v31638_v55, %s33556_s1  ;;  %18986 = vrot.lane.b32.xlu1 %v31319_v43, %s33564_s24 }
 0x812   : > { %v31644_v35 = vpop.permute.xlu0 %19638  ;;  %v31646_v17 = vpop.permute.xlu1 %23938 }
 0x813   : > { %33582 = vst [vmem:[#allocation27_spill] sm:$0xff] %v31646_v17 }
 0x814   : > { %22293 = vrot.lane.b32.xlu0 %v31319_v43, %s33557_s30  ;;  %19314 = vrot.lane.b32.xlu1 %v31319_v43, %s33553_s15 }
 0x816   : > { %v31652_v20 = vpop.permute.xlu0 %19966  ;;  %v31654_v42 = vpop.permute.xlu1 %21623 }
 0x817   : > { %33583 = vst [vmem:[#allocation28_spill] sm:$0xff] %v31654_v42 }
 0x818   : > { %22297 = vrot.lane.b32.xlu0 %v31638_v55, %s33557_s30  ;;  %19642 = vrot.lane.b32.xlu1 %v31319_v43, %s33545_s18 }
 0x81a   : > { %v31660_v13 = vpop.permute.xlu0 %20294  ;;  %v31662_v32 = vpop.permute.xlu1 %22285 }
 0x81b   : > { %33584 = vst [vmem:[#allocation14_spill] sm:$0xff] %v31662_v32 }
 0x81c   : > { %22955 = vrot.lane.b32.xlu0 %v31319_v43, %s33558_s8  ;;  %19970 = vrot.lane.b32.xlu1 %v31319_v43, %s33546_s10 }
 0x81e   : > { %v31668_v51 = vpop.permute.xlu0 %20622  ;;  %v31670_v17 = vpop.permute.xlu1 %22947 }
 0x81f   : > { %33585 = vst [vmem:[#allocation36_spill] sm:$0xff] %v31670_v17 }
 0x820   : > { %22959 = vrot.lane.b32.xlu0 %v31638_v55, %s33558_s8  ;;  %20298 = vrot.lane.b32.xlu1 %v31319_v43, %s33547_s11 }
 0x822   : > { %v31676_v44 = vpop.permute.xlu0 %20950  ;;  %v31678_v8 = vpop.permute.xlu1 %23609 }
 0x823   : > { %33586 = vst [vmem:[#allocation41_spill] sm:$0xff] %v31678_v8 }
 0x824   : > { %23617 = vrot.lane.b32.xlu0 %v31319_v43, %s33560_s2  ;;  %20626 = vrot.lane.b32.xlu1 %v31319_v43, %s33548_s12 }
 0x826   : > { %v31684_v54 = vpop.permute.xlu0 %21296  ;;  %v18374_v21 = vpop.permute.xlu1 %18373 }
 0x827   : > { %33587 = vst [vmem:[#allocation32_spill] sm:$0xff] %v31684_v54  ;;  %v18386_v22 = vsel %vm326_vm0, %v18374_v21, %v31618_v60  ;;  %v18385_v37 = vsel %vm326_vm0, %v31497_v27, %v18374_v21 }
 0x828   : > { %23621 = vrot.lane.b32.xlu0 %v31638_v55, %s33560_s2  ;;  %20954 = vrot.lane.b32.xlu1 %v31319_v43, %s33549_s19 }
 0x829   : > { %18472 = vmatprep.subr.mxu1 %v18386_v22 }
 0x82a   : > { %18473 = vmatpush1.msra.mxu1 %v18385_v37  ;;  %v31694_v8 = vpop.permute.xlu0 %21625  ;;  %v31696_v26 = vpop.permute.xlu1 %18980 }
 0x82b   : > { %33588 = vst [vmem:[#allocation30_spill] sm:$0xff] %v31694_v8  ;;  %27720 = vmatmul.mubr.msk.f32.vlgmr.msra.gmra.mrb[8].mxu1 %vm342_vm1, %v31601_v49  ;;  %v31721_v8 = vld [vmem:[#allocation2 + $0x48] sm:$0xff] }
 0x82c   : > { %18381 = vrot.lane.b32.xlu0 %v31323_v31, %s33562_s6  ;;  %21300 = vrot.lane.b32.xlu1 %v31319_v43, %s33550_s9  ;;  %s33690_s6 = smov 34  }
 0x82d   : > { %18678 = vmatprep.mubr.f32.mxu1 %v29569_v7 }
 0x82e   : > { %v31705_v27 = vpop.permute.xlu0 %21958  ;;  %v31707_v21 = vpop.permute.xlu1 %19308 }
 0x82f   : > { %33589 = vst [vmem:[#allocation31_spill] sm:$0xff] %v31705_v27 }
 0x830   : > { %24291 = vrot.lane.b32.xlu0 %v31307_v57, %s33414_s26  ;;  %21304 = vrot.lane.b32.xlu1 %v31638_v55, %s33550_s9 }
 0x832   : > { %v31713_v37 = vpop.permute.xlu0 %22287  ;;  %v31715_v22 = vpop.permute.xlu1 %19636 }
 0x833   : > { %33590 = vst [vmem:[#allocation17_spill] sm:$0xff] %v31713_v37 }
 0x834   : > { %24285 = vrot.lane.b32.xlu0 %v31289_v59, %s33414_s26  ;;  %21962 = vrot.lane.b32.xlu1 %v31319_v43, %s33551_s22 }
 0x836   : > { %v31723_v6 = vpop.permute.xlu0 %22620  ;;  %v31725_v17 = vpop.permute.xlu1 %19964 }
 0x837   : > { %33591 = vst [vmem:[#allocation5_spill] sm:$0xff] %v31723_v6 }
 0x838   : > { %24301 = vrot.lane.b32.xlu0 %v31721_v8, %s33414_s26  ;;  %21966 = vrot.lane.b32.xlu1 %v31638_v55, %s33551_s22 }
 0x83a   : > { %v31731_v37 = vpop.permute.xlu0 %22949  ;;  %v31733_v3 = vpop.permute.xlu1 %20292 }
 0x83b   : > { %33592 = vst [vmem:[#allocation6_spill] sm:$0xff] %v31731_v37  ;;  %33593 = vst [vmem:[#allocation7_spill] sm:$0xff] %v31733_v3 }
 0x83c   : > { %18988 = vrot.lane.b32.xlu0 %v31323_v31, %s33564_s24  ;;  %22624 = vrot.lane.b32.xlu1 %v31319_v43, %s33552_s16 }
 0x83e   : > { %v31739_v61 = vpop.permute.xlu0 %23282  ;;  %v31741_v6 = vpop.permute.xlu1 %20620 }
 0x83f   : > { %33594 = vst [vmem:[#allocation8_spill] sm:$0xff] %v31739_v61  ;;  %33595 = vst [vmem:[#allocation9_spill] sm:$0xff] %v31741_v6 }
 0x840   : > { %24620 = vrot.lane.b32.xlu0 %v31297_v18, %s33415_s20  ;;  %22628 = vrot.lane.b32.xlu1 %v31638_v55, %s33552_s16 }
 0x842   : > { %v31747_v53 = vpop.permute.xlu0 %23611  ;;  %v31749_v37 = vpop.permute.xlu1 %20948 }
 0x843   : > { %33596 = vst [vmem:[#allocation10_spill] sm:$0xff] %v31747_v53  ;;  %33597 = vst [vmem:[#allocation11_spill] sm:$0xff] %v31749_v37 }
 0x844   : > { %19316 = vrot.lane.b32.xlu0 %v31323_v31, %s33553_s15  ;;  %23286 = vrot.lane.b32.xlu1 %v31319_v43, %s33554_s0 }
 0x846   : > { %v31755_v34 = vpop.permute.xlu0 %23944  ;;  %v31757_v61 = vpop.permute.xlu1 %21294 }
 0x847   : > { %33598 = vst [vmem:[#allocation12_spill] sm:$0xff] %v31755_v34  ;;  %33599 = vst [vmem:[#allocation42_spill] sm:$0xff] %v31757_v61 }
 0x848   : > { %24624 = vrot.lane.b32.xlu0 %v31311_v0, %s33415_s20  ;;  %23290 = vrot.lane.b32.xlu1 %v31638_v55, %s33554_s0 }
 0x84a   : > { %v18378_v41 = vpop.permute.xlu0 %18377  ;;  %v31763_v53 = vpop.permute.xlu1 %21627 }
 0x84b   : > { %33600 = vst [vmem:[#allocation43_spill] sm:$0xff] %v31763_v53 }
 0x84c   : > { %19644 = vrot.lane.b32.xlu0 %v31323_v31, %s33545_s18  ;;  %23948 = vrot.lane.b32.xlu1 %v31319_v43, %s33555_s28 }
 0x84e   : > { %v31769_v37 = vpop.permute.xlu0 %18984  ;;  %v31771_v34 = vpop.permute.xlu1 %21956 }
 0x84f   : > { %33601 = vst [vmem:[#allocation44_spill] sm:$0xff] %v31771_v34 }
 0x850   : > { %24626 = vrot.lane.b32.xlu0 %v31319_v43, %s33415_s20  ;;  %23952 = vrot.lane.b32.xlu1 %v31638_v55, %s33555_s28 }
 0x852   : > { %v31777_v61 = vpop.permute.xlu0 %19312  ;;  %v31779_v32 = vpop.permute.xlu1 %22289 }
 0x853   : > { %33602 = vst [vmem:[#allocation45_spill] sm:$0xff] %v31779_v32 }
 0x854   : > { %19972 = vrot.lane.b32.xlu0 %v31323_v31, %s33546_s10  ;;  %24293 = vrot.lane.b32.xlu1 %v31311_v0, %s33414_s26 }
 0x856   : > { %v31785_v27 = vpop.permute.xlu0 %19640  ;;  %v31787_v50 = vpop.permute.xlu1 %22618 }
 0x857   : > { %33603 = vst [vmem:[#allocation46_spill] sm:$0xff] %v31787_v50 }
 0x858   : > { %24630 = vrot.lane.b32.xlu0 %v31638_v55, %s33415_s20  ;;  %24295 = vrot.lane.b32.xlu1 %v31319_v43, %s33414_s26 }
 0x85a   : > { %v31793_v34 = vpop.permute.xlu0 %19968  ;;  %v31795_v6 = vpop.permute.xlu1 %22951 }
 0x85b   : > { %33604 = vst [vmem:[#allocation47_spill] sm:$0xff] %v31795_v6 }
 0x85c   : > { %20300 = vrot.lane.b32.xlu0 %v31323_v31, %s33547_s11  ;;  %24299 = vrot.lane.b32.xlu1 %v31638_v55, %s33414_s26 }
 0x85e   : > { %v31801_v32 = vpop.permute.xlu0 %20296  ;;  %v31803_v14 = vpop.permute.xlu1 %23280 }
 0x85f   : > { %33605 = vst [vmem:[#allocation48_spill] sm:$0xff] %v31803_v14 }
 0x860   : > { %24949 = vrot.lane.b32.xlu0 %v31293_v38, %s33416_s23  ;;  %24618 = vrot.lane.b32.xlu1 %v31293_v38, %s33415_s20 }
 0x862   : > { %v31809_v50 = vpop.permute.xlu0 %20624  ;;  %v31811_v29 = vpop.permute.xlu1 %23613 }
 0x863   : > { %33606 = vst [vmem:[#allocation49_spill] sm:$0xff] %v31811_v29 }
 0x864   : > { %20628 = vrot.lane.b32.xlu0 %v31323_v31, %s33548_s12  ;;  %24622 = vrot.lane.b32.xlu1 %v31307_v57, %s33415_s20 }
 0x866   : > { %v31817_v6 = vpop.permute.xlu0 %20952  ;;  %v31819_v53 = vpop.permute.xlu1 %23942 }
 0x867   : > { %33607 = vst [vmem:[#allocation50_spill] sm:$0xff] %v31819_v53 }
 0x868   : > { %24953 = vrot.lane.b32.xlu0 %v31307_v57, %s33416_s23  ;;  %24616 = vrot.lane.b32.xlu1 %v31289_v59, %s33415_s20 }
 0x86a   : > { %v31825_v14 = vpop.permute.xlu0 %21298  ;;  %v31827_v23 = vpop.permute.xlu1 %24289 }
 0x86b   : > { %33608 = vst [vmem:[#allocation51_spill] sm:$0xff] %v31827_v23 }
 0x86c   : > { %20956 = vrot.lane.b32.xlu0 %v31323_v31, %s33549_s19  ;;  %24632 = vrot.lane.b32.xlu1 %v31721_v8, %s33415_s20 }
 0x86e   : > { %v31833_v29 = vpop.permute.xlu0 %21960  ;;  %v31835_v3 = vpop.permute.xlu1 %21629 }
 0x86f   : > { %33609 = vst [vmem:[#allocation52_spill] sm:$0xff] %v31833_v29  ;;  %33610 = vst [vmem:[#allocation53_spill] sm:$0xff] %v31835_v3 }
 0x870   : > { %24947 = vrot.lane.b32.xlu0 %v31289_v59, %s33416_s23  ;;  %24951 = vrot.lane.b32.xlu1 %v31297_v18, %s33416_s23 }
 0x872   : > { %v31841_v53 = vpop.permute.xlu0 %22622  ;;  %v31843_v9 = vpop.permute.xlu1 %22291 }
 0x873   : > { %33611 = vst [vmem:[#allocation54_spill] sm:$0xff] %v31841_v53  ;;  %33612 = vst [vmem:[#allocation55_spill] sm:$0xff] %v31843_v9 }
 0x874   : > { %21302 = vrot.lane.b32.xlu0 %v31323_v31, %s33550_s9  ;;  %24955 = vrot.lane.b32.xlu1 %v31311_v0, %s33416_s23 }
 0x876   : > { %v31849_v23 = vpop.permute.xlu0 %23284  ;;  %v31851_v29 = vpop.permute.xlu1 %22953 }
 0x877   : > { %33613 = vst [vmem:[#allocation56_spill] sm:$0xff] %v31849_v23  ;;  %33614 = vst [vmem:[#allocation57_spill] sm:$0xff] %v31851_v29 }
 0x878   : > { %24963 = vrot.lane.b32.xlu0 %v31721_v8, %s33416_s23  ;;  %24957 = vrot.lane.b32.xlu1 %v31319_v43, %s33416_s23 }
 0x87a   : > { %v31857_v3 = vpop.permute.xlu0 %23946  ;;  %v31859_v53 = vpop.permute.xlu1 %23615 }
 0x87b   : > { %33615 = vst [vmem:[#allocation58_spill] sm:$0xff] %v31857_v3  ;;  %33616 = vst [vmem:[#allocation59_spill] sm:$0xff] %v31859_v53  ;;  %v18387_v3 = vsel %vm326_vm0, %v31618_v60, %v18378_v41 }
 0x87c   : > { %25282 = vrot.lane.b32.xlu0 %v31297_v18, %s33427_s21  ;;  %21633 = vrot.lane.b32.xlu1 %v31323_v31, %s33556_s1 }
 0x87e   : > { %v31865_v9 = vpop.permute.xlu0 %21631  ;;  %v31867_v23 = vpop.permute.xlu1 %18379 }
 0x87f   : > { %33617 = vst [vmem:[#allocation60_spill] sm:$0xff] %v31865_v9  ;;  %v18388_v29 = vsel %vm326_vm0, %v18378_v41, %v31867_v23 }
 0x880   : > { %25286 = vrot.lane.b32.xlu0 %v31311_v0, %s33427_s21  ;;  %24961 = vrot.lane.b32.xlu1 %v31638_v55, %s33416_s23 }
 0x881   : > { %18543 = vmatprep.subr.mxu0 %v18388_v29  ;;  %v31890_v29 = vld [vmem:[%s33205_s3] sm:$0xff] }
 0x882   : > { %18544 = vmatpush1.msra.mxu0 %v18387_v3  ;;  %v31877_v53 = vpop.permute.xlu0 %21635  ;;  %v31879_v42 = vpop.permute.xlu1 %18986 }
 0x883   : > { %33618 = vst [vmem:[#allocation61_spill] sm:$0xff] %v31877_v53  ;;  %27721 = vmatmul.mubr.msk.f32.vlgmr.msra.gmra.mrb[10].mxu0 %vm342_vm1, %v31601_v49  ;;  %18688 = vmatprep.subr.mxu0 %v31289_v59 }
 0x884   : > { %18689 = vmatpush1.msra.mxu0 %v31300_v58  ;;  %21964 = vrot.lane.b32.xlu0 %v31323_v31, %s33551_s22  ;;  %v18991_v58 = vsel %vm935_vm2, %v31548_v46, %v31505_v15  ;;  %s33826_s22 = sld [smem:[#allocation4_spill]] }
 0x885   : > { %25280 = vrot.lane.b32.xlu1 %v31293_v38, %s33427_s21  ;;  %18830 = vmatprep.subr.mxu0 %v31311_v0 }
 0x886   : > { %18752 = vmatprep.mubr.f32.mxu0 %v29569_v7  ;;  %v31896_v41 = vpop.permute.xlu0 %22293  ;;  %v31898_v3 = vpop.permute.xlu1 %19314 }
 0x887   : > { %33619 = vst [vmem:[#allocation62_spill] sm:$0xff] %v31896_v41  ;;  %27723 = vmatmul.mubr.msk.f32.vlgmr.msra.gmra.mrb[8].mxu0 %vm342_vm1, %v31890_v29  ;;  %v18990_v41 = vsel %vm935_vm2, %v31443_v48, %v31548_v46 }
 0x888   : > { %18831 = vmatpush1.msra.mxu0 %v31307_v57  ;;  %25288 = vrot.lane.b32.xlu0 %v31319_v43, %s33427_s21 }
 0x889   : > { %19008 = vmatprep.subr.mxu0 %v18991_v58  ;;  %25284 = vrot.lane.b32.xlu1 %v31307_v57, %s33427_s21  ;;  %v18995_v58 = vsel %vm935_vm2, %v31769_v37, %v31879_v42 }
 0x88a   : > { %18894 = vmatprep.mubr.f32.mxu0 %v29569_v7  ;;  %v31911_v60 = vpop.permute.xlu0 %22297  ;;  %v31913_v53 = vpop.permute.xlu1 %19642 }
 0x88b   : > { %33620 = vst [vmem:[#allocation63_spill] sm:$0xff] %v31911_v60  ;;  %27725 = vmatmul.mubr.msk.f32.vlgmr.msra.gmra.mrb[10].mxu0 %vm342_vm1, %v31890_v29  ;;  %v31928_v60 = vld [vmem:[%s33205_s3 + $0x10] sm:$0xff] }
 0x88c   : > { %19009 = vmatpush1.msra.mxu0 %v18990_v41  ;;  %25292 = vrot.lane.b32.xlu0 %v31638_v55, %s33427_s21  ;;  %v18994_v41 = vsel %vm935_vm2, %v31626_v1, %v31769_v37  ;;  %v19318_v37 = vsel %vm1264_vm3, %v31451_v25, %v31556_v40 }
 0x88d   : > { %19150 = vmatprep.subr.mxu0 %v18995_v58  ;;  %22295 = vrot.lane.b32.xlu1 %v31323_v31, %s33557_s30  ;;  %v19319_v58 = vsel %vm1264_vm3, %v31556_v40, %v31513_v24 }
 0x88e   : > { %19072 = vmatprep.mubr.f32.mxu0 %v29569_v7  ;;  %v31933_v48 = vpop.permute.xlu0 %22955  ;;  %v31935_v46 = vpop.permute.xlu1 %19970 }
 0x88f   : > { %33621 = vst [vmem:[#allocation64_spill] sm:$0xff] %v31933_v48  ;;  %27728 = vmatmul.mubr.msk.f32.vlgmr.msra.gmra.mrb[8].mxu0 %vm342_vm1, %v31928_v60 }
 0x890   : > { %19151 = vmatpush1.msra.mxu0 %v18994_v41  ;;  %25611 = vrot.lane.b32.xlu0 %v31293_v38, %s33440_s27  ;;  %v19323_v41 = vsel %vm1264_vm3, %v31777_v61, %v31898_v3 }
 0x891   : > { %19336 = vmatprep.subr.mxu0 %v19319_v58  ;;  %25278 = vrot.lane.b32.xlu1 %v31289_v59, %s33427_s21  ;;  %v31967_v58 = vld [vmem:[%s33205_s3 + $0x18] sm:$0xff] }
 0x892   : > { %19214 = vmatprep.mubr.f32.mxu0 %v29569_v7  ;;  %v31950_v48 = vpop.permute.xlu0 %22959  ;;  %v31952_v9 = vpop.permute.xlu1 %20298 }
 0x893   : > { %33622 = vst [vmem:[#allocation65_spill] sm:$0xff] %v31950_v48  ;;  %27730 = vmatmul.mubr.msk.f32.vlgmr.msra.gmra.mrb[10].mxu0 %vm342_vm1, %v31928_v60 }
 0x894   : > { %19337 = vmatpush1.msra.mxu0 %v19318_v37  ;;  %22626 = vrot.lane.b32.xlu0 %v31323_v31, %s33552_s16  ;;  %v19322_v37 = vsel %vm1264_vm3, %v31634_v56, %v31777_v61  ;;  %v19646_v61 = vsel %vm1593_vm4, %v31459_v33, %v31564_v2 }
 0x895   : > { %19478 = vmatprep.subr.mxu0 %v19323_v41  ;;  %25294 = vrot.lane.b32.xlu1 %v31721_v8, %s33427_s21  ;;  %v19647_v41 = vsel %vm1593_vm4, %v31564_v2, %v31521_v63 }
 0x896   : > { %19400 = vmatprep.mubr.f32.mxu0 %v29569_v7  ;;  %v31972_v25 = vpop.permute.xlu0 %23617  ;;  %v31974_v40 = vpop.permute.xlu1 %20626 }
 0x897   : > { %33623 = vst [vmem:[#allocation66_spill] sm:$0xff] %v31972_v25  ;;  %27733 = vmatmul.mubr.msk.f32.vlgmr.msra.gmra.mrb[8].mxu0 %vm342_vm1, %v31967_v58 }
 0x898   : > { %19479 = vmatpush1.msra.mxu0 %v19322_v37  ;;  %25615 = vrot.lane.b32.xlu0 %v31307_v57, %s33440_s27  ;;  %v19651_v37 = vsel %vm1593_vm4, %v31785_v27, %v31913_v53 }
 0x899   : > { %19664 = vmatprep.subr.mxu0 %v19647_v41  ;;  %25613 = vrot.lane.b32.xlu1 %v31297_v18, %s33440_s27  ;;  %v32006_v41 = vld [vmem:[%s33205_s3 + $0x20] sm:$0xff] }
 0x89a   : > { %19542 = vmatprep.mubr.f32.mxu0 %v29569_v7  ;;  %v31989_v48 = vpop.permute.xlu0 %23621  ;;  %v31991_v25 = vpop.permute.xlu1 %20954 }
 0x89b   : > { %33624 = vst [vmem:[#allocation67_spill] sm:$0xff] %v31989_v48  ;;  %27735 = vmatmul.mubr.msk.f32.vlgmr.msra.gmra.mrb[10].mxu0 %vm342_vm1, %v31967_v58 }
 0x89c   : > { %19665 = vmatpush1.msra.mxu0 %v19646_v61  ;;  %25609 = vrot.lane.b32.xlu0 %v31289_v59, %s33440_s27  ;;  %v19650_v61 = vsel %vm1593_vm4, %v31644_v35, %v31785_v27 }
 0x89d   : > { %19806 = vmatprep.subr.mxu0 %v19651_v37  ;;  %22957 = vrot.lane.b32.xlu1 %v31323_v31, %s33558_s8  ;;  %v19975_v37 = vsel %vm1922_vm5, %v31572_v47, %v31529_v11 }
 0x89e   : > { %19728 = vmatprep.mubr.f32.mxu0 %v29569_v7  ;;  %v18382_v33 = vpop.permute.xlu0 %18381  ;;  %v32011_v2 = vpop.permute.xlu1 %21300 }
 0x89f   : > { %27738 = vmatmul.mubr.msk.f32.vlgmr.msra.gmra.mrb[8].mxu0 %vm342_vm1, %v32006_v41  ;;  %18614 = vmatprep.subr.mxu1 %v18382_v33  ;;  %v18389_v48 = vsel %vm326_vm0, %v31867_v23, %v18382_v33  ;;  %v19974_v23 = vsel %vm1922_vm5, %v31467_v19, %v31572_v47  ;;  %v32052_v33 = vld [vmem:[%s33205_s3 + $0x28] sm:$0xff]  ;;  %v18993_v19 = vsel %vm935_vm2, %v31696_v26, %v31626_v1  ;;  %vm33636_vm0 = vcmask 211968  }
 0x8a0   : > { %19807 = vmatpush1.msra.mxu0 %v19650_v61  ;;  %25625 = vrot.lane.b32.xlu0 %v31721_v8, %s33440_s27  ;;  %v19978_v47 = vsel %vm1922_vm5, %v31652_v20, %v31793_v34  ;;  %vm33649_vm11 = vmmov %vm33636_vm0 }
 0x8a1   : > { %19992 = vmatprep.subr.mxu0 %v19975_v37  ;;  %25617 = vrot.lane.b32.xlu1 %v31311_v0, %s33440_s27  ;;  %v20303_v37 = vsel %vm2251_vm6, %v31580_v52, %v31537_v62 }
 0x8a2   : > { %18615 = vmatpush1.msra.mxu1 %v18389_v48  ;;  %19870 = vmatprep.mubr.f32.mxu0 %v29569_v7  ;;  %v32028_v27 = vpop.permute.xlu0 %24291  ;;  %v32030_v54 = vpop.permute.xlu1 %21304  ;;  %v19979_v48 = vsel %vm1922_vm5, %v31793_v34, %v31935_v46  ;;  %v18992_v34 = vsel %vm935_vm2, %v31505_v15, %v31696_v26  ;;  %v32104_v26 = vld [vmem:[%s33205_s3 + $0x30] sm:$0xff] }
 0x8a3   : > { %27722 = vmatmul.mubr.msk.f32.vlgmr.msra.gmra.mrb[10].mxu1 %vm342_vm1, %v31601_v49  ;;  %18759 = vmatprep.subr.mxu1 %v31297_v18 }
 0x8a4   : > { %18760 = vmatpush1.msra.mxu1 %v31293_v38  ;;  %27740 = vmatmul.mubr.msk.f32.vlgmr.msra.gmra.mrb[10].mxu0 %vm342_vm1, %v32006_v41 }
 0x8a5   : > { %19993 = vmatpush1.msra.mxu0 %v19974_v23  ;;  %18901 = vmatprep.subr.mxu1 %v31323_v31 }
 0x8a6   : > { %20134 = vmatprep.subr.mxu0 %v19979_v48  ;;  %23288 = vrot.lane.b32.xlu0 %v31323_v31, %s33554_s0  ;;  %v32047_v49 = vpop.permute.xlu0 %24285  ;;  %v32054_v61 = vpop.permute.xlu1 %21962  ;;  %s33828_s0 = sld [smem:[#allocation73_spill]] }
 0x8a7   : > { %25619 = vrot.lane.b32.xlu1 %v31319_v43, %s33440_s27  ;;  %18823 = vmatprep.mubr.f32.mxu1 %v29569_v7 }
 0x8a8   : > { %27724 = vmatmul.mubr.msk.f32.vlgmr.msra.gmra.mrb[8].mxu1 %vm342_vm1, %v31890_v29  ;;  %20056 = vmatprep.mubr.f32.mxu0 %v29569_v7 }
 0x8a9   : > { %18902 = vmatpush1.msra.mxu1 %v31319_v43  ;;  %27743 = vmatmul.mubr.msk.f32.vlgmr.msra.gmra.mrb[8].mxu0 %vm342_vm1, %v32052_v33 }
 0x8aa   : > { %19079 = vmatprep.subr.mxu1 %v18993_v19  ;;  %20135 = vmatpush1.msra.mxu0 %v19978_v47  ;;  %v32074_v23 = vpop.permute.xlu0 %24301  ;;  %v32076_v48 = vpop.permute.xlu1 %21966  ;;  %v20631_v47 = vsel %vm2580_vm7, %v31588_v45, %v31546_v10 }
 0x8ab   : > { %20320 = vmatprep.subr.mxu0 %v20303_v37  ;;  %25944 = vrot.lane.b32.xlu0 %v31297_v18, %s33453_s14  ;;  %v20302_v18 = vsel %vm2251_vm6, %v31475_v12, %v31580_v52 }
 0x8ac   : > { %25623 = vrot.lane.b32.xlu1 %v31638_v55, %s33440_s27  ;;  %18965 = vmatprep.mubr.f32.mxu1 %v29569_v7 }
 0x8ad   : > { %27726 = vmatmul.mubr.msk.f32.vlgmr.msra.gmra.mrb[10].mxu1 %vm342_vm1, %v31890_v29  ;;  %20198 = vmatprep.mubr.f32.mxu0 %v29569_v7  ;;  %v20307_v29 = vsel %vm2251_vm6, %v31801_v32, %v31952_v9 }
 0x8ae   : > { %19080 = vmatpush1.msra.mxu1 %v18992_v34  ;;  %27745 = vmatmul.mubr.msk.f32.vlgmr.msra.gmra.mrb[10].mxu0 %vm342_vm1, %v32052_v33  ;;  %v18989_v1 = vpop.permute.xlu0 %18988  ;;  %v32094_v19 = vpop.permute.xlu1 %22624 }
 0x8af   : > { %20321 = vmatpush1.msra.mxu0 %v20302_v18  ;;  %25948 = vrot.lane.b32.xlu0 %v31311_v0, %s33453_s14  ;;  %v20306_v0 = vsel %vm2251_vm6, %v31660_v13, %v31801_v32  ;;  %v18996_v12 = vsel %vm935_vm2, %v31879_v42, %v18989_v1  ;;  %v19321_v32 = vsel %vm1264_vm3, %v31707_v21, %v31634_v56  ;;  %vm33637_vm2 = vcmask 449536  }
 0x8b0   : > { %20462 = vmatprep.subr.mxu0 %v20307_v29  ;;  %23619 = vrot.lane.b32.xlu1 %v31323_v31, %s33560_s2  ;;  %v20635_v56 = vsel %vm2580_vm7, %v31809_v50, %v31974_v40  ;;  %v21307_v29 = vsel %vm3258_vm9, %v31612_v39, %v31562_v28 }
 0x8b1   : > { %19143 = vmatprep.mubr.f32.mxu1 %v29569_v7  ;;  %20384 = vmatprep.mubr.f32.mxu0 %v29569_v7 }
 0x8b2   : > { %27729 = vmatmul.mubr.msk.f32.vlgmr.msra.gmra.mrb[8].mxu1 %vm342_vm1, %v31928_v60  ;;  %27748 = vmatmul.mubr.msk.f32.vlgmr.msra.gmra.mrb[8].mxu0 %vm342_vm1, %v32104_v26  ;;  %v32119_v15 = vpop.permute.xlu0 %24620  ;;  %v32121_v52 = vpop.permute.xlu1 %22628 }
 0x8b3   : > { %20463 = vmatpush1.msra.mxu0 %v20306_v0  ;;  %19221 = vmatprep.subr.mxu1 %v18989_v1  ;;  %v32230_v0 = vld [vmem:[#allocation2 + $0x10] sm:$0xff] }
 0x8b4   : > { %20648 = vmatprep.subr.mxu0 %v20631_v47  ;;  %25950 = vrot.lane.b32.xlu0 %v31319_v43, %s33453_s14  ;;  %v20630_v43 = vsel %vm2580_vm7, %v31483_v4, %v31588_v45  ;;  %v20634_v45 = vsel %vm2580_vm7, %v31668_v51, %v31809_v50  ;;  %v19649_v50 = vsel %vm1593_vm4, %v31715_v22, %v31644_v35 }
 0x8b5   : > { %25942 = vrot.lane.b32.xlu1 %v31293_v38, %s33453_s14  ;;  %19222 = vmatpush1.msra.mxu1 %v18996_v12  ;;  %v19320_v38 = vsel %vm1264_vm3, %v31513_v24, %v31707_v21  ;;  %v32155_v24 = vld [vmem:[%s33205_s3 + $0x38] sm:$0xff] }
 0x8b6   : > { %19285 = vmatprep.mubr.f32.mxu1 %v29569_v7  ;;  %19407 = vmatprep.subr.mxu1 %v19321_v32  ;;  %v19317_v42 = vpop.permute.xlu0 %19316  ;;  %v32134_v37 = vpop.permute.xlu1 %23286  ;;  %v32234_v12 = vld [vmem:[#allocation2 + $0x18] sm:$0xff]  ;;  %v19976_v32 = vsel %vm1922_vm5, %v31529_v11, %v31725_v17  ;;  %v32267_v11 = vld [vmem:[%s33205_s3 + $0x48] sm:$0xff] }
 0x8b7   : > { %20526 = vmatprep.mubr.f32.mxu0 %v29569_v7  ;;  %27731 = vmatmul.mubr.msk.f32.vlgmr.msra.gmra.mrb[10].mxu1 %vm342_vm1, %v31928_v60  ;;  %v20959_v60 = vsel %vm2909_vm8, %v31596_v36, %v31554_v5 }
 0x8b8   : > { %19408 = vmatpush1.msra.mxu1 %v19320_v38  ;;  %27750 = vmatmul.mubr.msk.f32.vlgmr.msra.gmra.mrb[10].mxu0 %vm342_vm1, %v32104_v26  ;;  %v32260_v38 = vld [vmem:[#allocation2 + $0x20] sm:$0xff] }
 0x8b9   : > { %20649 = vmatpush1.msra.mxu0 %v20630_v43  ;;  %23950 = vrot.lane.b32.xlu0 %v31323_v31, %s33555_s28  ;;  %v33626_v43 = vld [vmem:[#allocation32_spill] sm:$0xff] }
 0x8ba   : > { %20790 = vmatprep.subr.mxu0 %v20635_v56  ;;  %25946 = vrot.lane.b32.xlu1 %v31307_v57, %s33453_s14  ;;  %v32159_v21 = vpop.permute.xlu0 %24624  ;;  %v32161_v4 = vpop.permute.xlu1 %23290  ;;  %v19324_v57 = vsel %vm1264_vm3, %v31898_v3, %v19317_v42  ;;  %v19648_v3 = vsel %vm1593_vm4, %v31521_v63, %v31715_v22  ;;  %v32210_v63 = vld [vmem:[%s33205_s3 + $0x40] sm:$0xff]  ;;  %v21310_v56 = vsel %vm3258_vm9, %v33626_v43, %v31825_v14  ;;  %vm33641_vm3 = vmmov %vm33636_vm0 }
 0x8bb   : > { %19471 = vmatprep.mubr.f32.mxu1 %v29569_v7  ;;  %20712 = vmatprep.mubr.f32.mxu0 %v29569_v7 }
 0x8bc   : > { %27734 = vmatmul.mubr.msk.f32.vlgmr.msra.gmra.mrb[8].mxu1 %vm342_vm1, %v31967_v58  ;;  %27753 = vmatmul.mubr.msk.f32.vlgmr.msra.gmra.mrb[8].mxu0 %vm342_vm1, %v32155_v24 }
 0x8bd   : > { %20791 = vmatpush1.msra.mxu0 %v20634_v45  ;;  %19549 = vmatprep.subr.mxu1 %v19317_v42  ;;  %v21311_v42 = vsel %vm3258_vm9, %v31825_v14, %v32011_v2  ;;  %v33627_v45 = vld [vmem:[#allocation28_spill] sm:$0xff]  ;;  %v33629_v14 = vld [vmem:[#allocation7_spill] sm:$0xff] }
 0x8be   : > { %20976 = vmatprep.subr.mxu0 %v20959_v60  ;;  %25954 = vrot.lane.b32.xlu0 %v31638_v55, %s33453_s14  ;;  %v19645_v34 = vpop.permute.xlu0 %19644  ;;  %v32179_v18 = vpop.permute.xlu1 %23948 }
 0x8bf   : > { %25940 = vrot.lane.b32.xlu1 %v31289_v59, %s33453_s14  ;;  %19550 = vmatpush1.msra.mxu1 %v19324_v57  ;;  %v20958_v59 = vsel %vm2909_vm8, %v31491_v16, %v31596_v36  ;;  %v19652_v16 = vsel %vm1593_vm4, %v31913_v53, %v19645_v34  ;;  %v33628_v57 = vld [vmem:[#allocation15_spill] sm:$0xff]  ;;  %vm33643_vm4 = vmmov %vm33636_vm0 }
 0x8c0   : > { %19613 = vmatprep.mubr.f32.mxu1 %v29569_v7  ;;  %19735 = vmatprep.subr.mxu1 %v19649_v50  ;;  %v21638_v60 = vsel %vm3590_vm10, %v33628_v57, %v33627_v45 }
 0x8c1   : > { %20854 = vmatprep.mubr.f32.mxu0 %v29569_v7  ;;  %27736 = vmatmul.mubr.msk.f32.vlgmr.msra.gmra.mrb[10].mxu1 %vm342_vm1, %v31967_v58  ;;  %v20963_v58 = vsel %vm2909_vm8, %v31817_v6, %v31991_v25 }
 0x8c2   : > { %19736 = vmatpush1.msra.mxu1 %v19648_v3  ;;  %27755 = vmatmul.mubr.msk.f32.vlgmr.msra.gmra.mrb[10].mxu0 %vm342_vm1, %v32155_v24  ;;  %v32198_v35 = vpop.permute.xlu0 %24626  ;;  %v32200_v1 = vpop.permute.xlu1 %23952  ;;  %v32297_v3 = vld [vmem:[#allocation2 + $0x28] sm:$0xff] }
 0x8c3   : > { %20977 = vmatpush1.msra.mxu0 %v20958_v59  ;;  %24297 = vrot.lane.b32.xlu0 %v31323_v31, %s33414_s26  ;;  %v20962_v31 = vsel %vm2909_vm8, %v31676_v44, %v31817_v6  ;;  %v19977_v6 = vsel %vm1922_vm5, %v31725_v17, %v31652_v20  ;;  %v21306_v20 = vsel %vm3258_vm9, %v31499_v30, %v31612_v39  ;;  %v32269_v17 = vld [vmem:[#allocation2 + $0x38] sm:$0xff] }
 0x8c4   : > { %21118 = vmatprep.subr.mxu0 %v20963_v58  ;;  %25956 = vrot.lane.b32.xlu1 %v31721_v8, %s33453_s14  ;;  %v20305_v59 = vsel %vm2251_vm6, %v33629_v14, %v31660_v13  ;;  %v20304_v58 = vsel %vm2251_vm6, %v31537_v62, %v33629_v14  ;;  %v32326_v62 = vld [vmem:[%s33205_s3 + $0x50] sm:$0xff]  ;;  %v33635_v14 = vld [vmem:[#allocation40_spill] sm:$0xff] }
 0x8c5   : > { %19799 = vmatprep.mubr.f32.mxu1 %v29569_v7  ;;  %21040 = vmatprep.mubr.f32.mxu0 %v29569_v7 }
 0x8c6   : > { %27739 = vmatmul.mubr.msk.f32.vlgmr.msra.gmra.mrb[8].mxu1 %vm342_vm1, %v32006_v41  ;;  %27758 = vmatmul.mubr.msk.f32.vlgmr.msra.gmra.mrb[8].mxu0 %vm342_vm1, %v32210_v63  ;;  %v19973_v36 = vpop.permute.xlu0 %19972  ;;  %v32225_v22 = vpop.permute.xlu1 %24293 }
 0x8c7   : > { %21119 = vmatpush1.msra.mxu0 %v20962_v31  ;;  %19877 = vmatprep.subr.mxu1 %v19645_v34  ;;  %v32289_v34 = vld [vmem:[#allocation2 + $0x8] sm:$0xff]  ;;  %v33630_v31 = vld [vmem:[#allocation37_spill] sm:$0xff] }
 0x8c8   : > { %21325 = vmatprep.subr.mxu0 %v21307_v29  ;;  %26273 = vrot.lane.b32.xlu0 %v32230_v0, %s33461_s13  ;;  %v21637_v13 = vsel %vm3590_vm10, %v33630_v31, %v33628_v57  ;;  %v33631_v29 = vld [vmem:[#allocation60_spill] sm:$0xff] }
 0x8c9   : > { %26275 = vrot.lane.b32.xlu1 %v32234_v12, %s33461_s13  ;;  %19878 = vmatpush1.msra.mxu1 %v19652_v16 }
 0x8ca   : > { %19941 = vmatprep.mubr.f32.mxu1 %v29569_v7  ;;  %20063 = vmatprep.subr.mxu1 %v19977_v6  ;;  %v32242_v53 = vpop.permute.xlu0 %24630  ;;  %v32244_v47 = vpop.permute.xlu1 %24295  ;;  %v33632_v6 = vld [vmem:[#allocation53_spill] sm:$0xff] }
 0x8cb   : > { %33625 = vst [vmem:[#allocation68_spill] sm:$0xff] %v32242_v53  ;;  %21182 = vmatprep.mubr.f32.mxu0 %v29569_v7  ;;  %27741 = vmatmul.mubr.msk.f32.vlgmr.msra.gmra.mrb[10].mxu1 %vm342_vm1, %v32006_v41  ;;  %v19980_v41 = vsel %vm1922_vm5, %v31935_v46, %v19973_v36  ;;  %vm33644_vm5 = vcmask 441344   ;;  %v33677_v53 = vld [vmem:[#allocation36_spill] sm:$0xff] }
 0x8cc   : > { %20064 = vmatpush1.msra.mxu1 %v19976_v32  ;;  %27760 = vmatmul.mubr.msk.f32.vlgmr.msra.gmra.mrb[10].mxu0 %vm342_vm1, %v32210_v63  ;;  %v32328_v32 = vld [vmem:[#allocation2 + $0x30] sm:$0xff]  ;;  %vm33647_vm14 = vmmov %vm33644_vm5 }
 0x8cd   : > { %21326 = vmatpush1.msra.mxu0 %v21306_v20  ;;  %26277 = vrot.lane.b32.xlu0 %v32260_v38, %s33461_s13 }
 0x8ce   : > { %21467 = vmatprep.subr.mxu0 %v21311_v42  ;;  %24628 = vrot.lane.b32.xlu1 %v32269_v17, %s33415_s20  ;;  %v20301_v30 = vpop.permute.xlu0 %20300  ;;  %v32273_v39 = vpop.permute.xlu1 %24299  ;;  %v33633_v42 = vld [vmem:[#allocation43_spill] sm:$0xff] }
 0x8cf   : > { %20127 = vmatprep.mubr.f32.mxu1 %v29569_v7  ;;  %21389 = vmatprep.mubr.f32.mxu0 %v29569_v7  ;;  %v20308_v20 = vsel %vm2251_vm6, %v31952_v9, %v20301_v30  ;;  %vm33645_vm6 = vmmov %vm33644_vm5 }
 0x8d0   : > { %27744 = vmatmul.mubr.msk.f32.vlgmr.msra.gmra.mrb[8].mxu1 %vm342_vm1, %v32052_v33  ;;  %27763 = vmatmul.mubr.msk.f32.vlgmr.msra.gmra.mrb[8].mxu0 %vm342_vm1, %v32267_v11 }
 0x8d1   : > { %21468 = vmatpush1.msra.mxu0 %v21310_v56  ;;  %20205 = vmatprep.subr.mxu1 %v19973_v36 }
 0x8d2   : > { %21656 = vmatprep.subr.mxu0 %v21638_v60  ;;  %26271 = vrot.lane.b32.xlu0 %v32289_v34, %s33461_s13  ;;  %v32293_v46 = vpop.permute.xlu0 %24949  ;;  %v32295_v50 = vpop.permute.xlu1 %24618  ;;  %v33634_v60 = vld [vmem:[#allocation39_spill] sm:$0xff] }
 0x8d3   : > { %26279 = vrot.lane.b32.xlu1 %v32297_v3, %s33461_s13  ;;  %20206 = vmatpush1.msra.mxu1 %v19980_v41  ;;  %v21641_v41 = vsel %vm3590_vm10, %v33633_v42, %v33632_v6 }
 0x8d4   : > { %20269 = vmatprep.mubr.f32.mxu1 %v29569_v7  ;;  %20391 = vmatprep.subr.mxu1 %v20305_v59  ;;  %v21969_v59 = vsel %vm33636_vm0, %v33635_v14, %v33634_v60  ;;  %vm33664_vm0 = vmmov %vm33658_vm12 }
 0x8d5   : > { %21531 = vmatprep.mubr.f32.mxu0 %v29569_v7  ;;  %27746 = vmatmul.mubr.msk.f32.vlgmr.msra.gmra.mrb[10].mxu1 %vm342_vm1, %v32052_v33  ;;  %v21642_v33 = vsel %vm3590_vm10, %v33632_v6, %v33631_v29 }
 0x8d6   : > { %20392 = vmatpush1.msra.mxu1 %v20304_v58  ;;  %27765 = vmatmul.mubr.msk.f32.vlgmr.msra.gmra.mrb[10].mxu0 %vm342_vm1, %v32267_v11  ;;  %v20629_v16 = vpop.permute.xlu0 %20628  ;;  %v32316_v36 = vpop.permute.xlu1 %24622  ;;  %v33638_v58 = vld [vmem:[#allocation9_spill] sm:$0xff] }
 0x8d7   : > { %21657 = vmatpush1.msra.mxu0 %v21637_v13  ;;  %24959 = vrot.lane.b32.xlu0 %v32269_v17, %s33416_s23  ;;  %v20632_v6 = vsel %vm2580_vm7, %v31546_v10, %v33638_v58  ;;  %v32379_v10 = vld [vmem:[%s33205_s3 + $0x58] sm:$0xff] }
 0x8d8   : > { %21798 = vmatprep.subr.mxu0 %v21642_v33  ;;  %26281 = vrot.lane.b32.xlu1 %v32328_v32, %s33461_s13 }
 0x8d9   : > { %20455 = vmatprep.mubr.f32.mxu1 %v29569_v7  ;;  %21720 = vmatprep.mubr.f32.mxu0 %v29569_v7 }
 0x8da   : > { %27749 = vmatmul.mubr.msk.f32.vlgmr.msra.gmra.mrb[8].mxu1 %vm342_vm1, %v32104_v26  ;;  %27768 = vmatmul.mubr.msk.f32.vlgmr.msra.gmra.mrb[8].mxu0 %vm342_vm1, %v32326_v62  ;;  %v24954_v56 = vpop.permute.xlu0 %24953  ;;  %v24617_v57 = vpop.permute.xlu1 %24616 }
 0x8db   : > { %21799 = vmatpush1.msra.mxu0 %v21641_v41  ;;  %20533 = vmatprep.subr.mxu1 %v20301_v30  ;;  %v32348_v9 = vsel %vm33637_vm2, %v24617_v57, %v32295_v50  ;;  %v20633_v30 = vsel %vm2580_vm7, %v33638_v58, %v31668_v51  ;;  %v33640_v51 = vld [vmem:[#allocation21_spill] sm:$0xff]  ;;  %vm33667_vm2 = vcmask 138240  }
 0x8dc   : > { %21987 = vmatprep.subr.mxu0 %v21969_v59  ;;  %25621 = vrot.lane.b32.xlu0 %v32269_v17, %s33440_s27  ;;  %v21968_v33 = vsel %vm33641_vm3, %v33640_v51, %v33635_v14  ;;  %vm33673_vm3 = vmmov %vm33667_vm2 }
 0x8dd   : > { %26285 = vrot.lane.b32.xlu1 %v31638_v55, %s33461_s13  ;;  %20534 = vmatpush1.msra.mxu1 %v20308_v20  ;;  %v33642_v20 = vld [vmem:[#allocation52_spill] sm:$0xff] }
 0x8de   : > { %20597 = vmatprep.mubr.f32.mxu1 %v29569_v7  ;;  %20719 = vmatprep.subr.mxu1 %v20633_v30  ;;  %v20957_v31 = vpop.permute.xlu0 %20956  ;;  %v32358_v13 = vpop.permute.xlu1 %24632  ;;  %v21973_v41 = vsel %vm33643_vm4, %v33642_v20, %v32054_v61  ;;  %v20636_v30 = vsel %vm2580_vm7, %v31974_v40, %v20629_v16  ;;  %vm33655_vm7 = vmmov %vm33644_vm5 }
 0x8df   : > { %33639 = vst [vmem:[#allocation32_spill] sm:$0xff] %v32358_v13  ;;  %21862 = vmatprep.mubr.f32.mxu0 %v29569_v7  ;;  %27751 = vmatmul.mubr.msk.f32.vlgmr.msra.gmra.mrb[10].mxu1 %vm342_vm1, %v32104_v26  ;;  %vm33675_vm4 = vmmov %vm33667_vm2  ;;  %v33678_v13 = vld [vmem:[#allocation33_spill] sm:$0xff] }
 0x8e0   : > { %20720 = vmatpush1.msra.mxu1 %v20632_v6  ;;  %27770 = vmatmul.mubr.msk.f32.vlgmr.msra.gmra.mrb[10].mxu0 %vm342_vm1, %v32326_v62  ;;  %v33648_v6 = vld [vmem:[#allocation31_spill] sm:$0xff] }
 0x8e1   : > { %21988 = vmatpush1.msra.mxu0 %v21968_v33  ;;  %26283 = vrot.lane.b32.xlu0 %v32269_v17, %s33461_s13  ;;  %v21972_v51 = vsel %vm33649_vm11, %v33648_v6, %v33642_v20  ;;  %v33650_v33 = vld [vmem:[#allocation14_spill] sm:$0xff]  ;;  %v33654_v20 = vld [vmem:[#allocation11_spill] sm:$0xff] }
 0x8e2   : > { %22129 = vmatprep.subr.mxu0 %v21973_v41  ;;  %25290 = vrot.lane.b32.xlu1 %v32269_v17, %s33427_s21  ;;  %v24948_v26 = vpop.permute.xlu0 %24947  ;;  %v24952_v57 = vpop.permute.xlu1 %24951  ;;  %v33651_v41 = vld [vmem:[#allocation38_spill] sm:$0xff] }
 0x8e3   : > { %20783 = vmatprep.mubr.f32.mxu1 %v29569_v7  ;;  %22051 = vmatprep.mubr.f32.mxu0 %v29569_v7  ;;  %v32387_v14 = vsel %vm33644_vm5, %v24948_v26, %v32293_v46  ;;  %v32390_v59 = vsel %vm33645_vm6, %v24952_v57, %v24954_v56  ;;  %v32394_v58 = vsel %vm33647_vm14, %v32293_v46, %v24952_v57  ;;  %vm33676_vm5 = vcmask 375808  }
 0x8e4   : > { %33646 = vst [vmem:[#allocation28_spill] sm:$0xff] %v32390_v59  ;;  %27754 = vmatmul.mubr.msk.f32.vlgmr.msra.gmra.mrb[8].mxu1 %vm342_vm1, %v32155_v24  ;;  %27773 = vmatmul.mubr.msk.f32.vlgmr.msra.gmra.mrb[8].mxu0 %vm342_vm1, %v32379_v10  ;;  %v22300_v46 = vsel %vm33652_vm13, %v33651_v41, %v33650_v33  ;;  %v33661_v59 = vld [vmem:[#allocation55_spill] sm:$0xff]  ;;  %vm33679_vm6 = vcmask 130048   ;;  %vm33683_vm14 = vmmov %vm33676_vm5 }
 0x8e5   : > { %22130 = vmatpush1.msra.mxu0 %v21972_v51  ;;  %20861 = vmatprep.subr.mxu1 %v20629_v16  ;;  %v20961_v16 = vsel %vm2909_vm8, %v33654_v20, %v31676_v44  ;;  %v33657_v44 = vld [vmem:[#allocation20_spill] sm:$0xff]  ;;  %vm33685_vm11 = vmmov %vm33679_vm6 }
 0x8e6   : > { %22318 = vmatprep.subr.mxu0 %v22300_v46  ;;  %26287 = vrot.lane.b32.xlu0 %v31721_v8, %s33461_s13  ;;  %v32410_v40 = vpop.permute.xlu0 %21302  ;;  %v32412_v26 = vpop.permute.xlu1 %24955  ;;  %vm33689_vm13 = vmmov %vm33679_vm6 }
 0x8e7   : > { %33653 = vst [vmem:[#allocation15_spill] sm:$0xff] %v32412_v26  ;;  %25952 = vrot.lane.b32.xlu1 %v32269_v17, %s33453_s14  ;;  %20862 = vmatpush1.msra.mxu1 %v20636_v30  ;;  %v32421_v57 = vsel %vm33655_vm7, %v24954_v56, %v32412_v26  ;;  %v20960_v30 = vsel %vm2909_vm8, %v31554_v5, %v33654_v20  ;;  %v32447_v5 = vld [vmem:[%s33205_s3 + $0x60] sm:$0xff]  ;;  %v33663_v20 = vld [vmem:[#allocation45_spill] sm:$0xff]  ;;  %vm33692_vm7 = vmmov %vm33679_vm6 }
 0x8e8   : > { %33656 = vst [vmem:[#allocation7_spill] sm:$0xff] %v32421_v57  ;;  %20925 = vmatprep.mubr.f32.mxu1 %v29569_v7  ;;  %21047 = vmatprep.subr.mxu1 %v20961_v16  ;;  %v22299_v56 = vsel %vm33658_vm12, %v33657_v44, %v33651_v41  ;;  %v33660_v16 = vld [vmem:[#allocation62_spill] sm:$0xff]  ;;  %v20964_v41 = vsel %vm2909_vm8, %v31991_v25, %v20957_v31  ;;  %vm33671_vm8 = vmmov %vm33667_vm2 }
 0x8e9   : > { %22193 = vmatprep.mubr.f32.mxu0 %v29569_v7  ;;  %27756 = vmatmul.mubr.msk.f32.vlgmr.msra.gmra.mrb[10].mxu1 %vm342_vm1, %v32155_v24  ;;  %v22304_v24 = vsel %vm33662_vm15, %v33661_v59, %v33660_v16  ;;  %v33668_v25 = vld [vmem:[#allocation42_spill] sm:$0xff]  ;;  %v22962_v26 = vsel %vm33679_vm6, %v33678_v13, %v33677_v53  ;;  %vm33696_vm12 = vmmov %vm33676_vm5  ;;  %vm33712_vm6 = vcmask 146432  }
 0x8ea   : > { %21048 = vmatpush1.msra.mxu1 %v20960_v30  ;;  %27775 = vmatmul.mubr.msk.f32.vlgmr.msra.gmra.mrb[10].mxu0 %vm342_vm1, %v32379_v10  ;;  %v32435_v51 = vpop.permute.xlu0 %24963  ;;  %v32437_v46 = vpop.permute.xlu1 %24957  ;;  %v22303_v30 = vsel %vm33664_vm0, %v33663_v20, %v33661_v59  ;;  %v21309_v59 = vsel %vm3258_vm9, %v33668_v25, %v33626_v43  ;;  %v33670_v43 = vld [vmem:[#allocation22_spill] sm:$0xff] }
 0x8eb   : > { %33659 = vst [vmem:[#allocation37_spill] sm:$0xff] %v32435_v51  ;;  %22319 = vmatpush1.msra.mxu0 %v22299_v56  ;;  %26606 = vrot.lane.b32.xlu0 %v32234_v12, %s33476_s17  ;;  %v33666_v51 = vld [vmem:[#allocation35_spill] sm:$0xff] }
 0x8ec   : > { %22460 = vmatprep.subr.mxu0 %v22304_v24  ;;  %26604 = vrot.lane.b32.xlu1 %v32230_v0, %s33476_s17  ;;  %v33665_v24 = vld [vmem:[#allocation26_spill] sm:$0xff] }
 0x8ed   : > { %21111 = vmatprep.mubr.f32.mxu1 %v29569_v7  ;;  %22382 = vmatprep.mubr.f32.mxu0 %v29569_v7  ;;  %v22631_v57 = vsel %vm33667_vm2, %v33666_v51, %v33665_v24  ;;  %vm33704_vm2 = vcmask 367616  }
 0x8ee   : > { %27759 = vmatmul.mubr.msk.f32.vlgmr.msra.gmra.mrb[8].mxu1 %vm342_vm1, %v32210_v63  ;;  %27778 = vmatmul.mubr.msk.f32.vlgmr.msra.gmra.mrb[8].mxu0 %vm342_vm1, %v32447_v5  ;;  %v25283_v44 = vpop.permute.xlu0 %25282  ;;  %v32462_v56 = vpop.permute.xlu1 %21633 }
 0x8ef   : > { %22461 = vmatpush1.msra.mxu0 %v22303_v30  ;;  %21189 = vmatprep.subr.mxu1 %v20957_v31 }
 0x8f0   : > { %22649 = vmatprep.subr.mxu0 %v22631_v57  ;;  %26610 = vrot.lane.b32.xlu0 %v32297_v3, %s33476_s17  ;;  %v21308_v57 = vsel %vm3258_vm9, %v31562_v28, %v33668_v25  ;;  %v32498_v28 = vld [vmem:[%s33205_s3 + $0x68] sm:$0xff]  ;;  %v33674_v25 = vld [vmem:[#allocation5_spill] sm:$0xff] }
 0x8f1   : > { %26608 = vrot.lane.b32.xlu1 %v32260_v38, %s33476_s17  ;;  %21190 = vmatpush1.msra.mxu1 %v20964_v41  ;;  %v22630_v41 = vsel %vm33671_vm8, %v33670_v43, %v33666_v51  ;;  %vm33705_vm8 = vmmov %vm33704_vm2 }
 0x8f2   : > { %21253 = vmatprep.mubr.f32.mxu1 %v29569_v7  ;;  %21396 = vmatprep.subr.mxu1 %v21309_v59  ;;  %v32475_v31 = vpop.permute.xlu0 %25286  ;;  %v32477_v30 = vpop.permute.xlu1 %24961  ;;  %v33672_v59 = vld [vmem:[#allocation54_spill] sm:$0xff] }
 0x8f3   : > { %33669 = vst [vmem:[#allocation60_spill] sm:$0xff] %v32477_v30  ;;  %22524 = vmatprep.mubr.f32.mxu0 %v29569_v7  ;;  %27761 = vmatmul.mubr.msk.f32.vlgmr.msra.gmra.mrb[10].mxu1 %vm342_vm1, %v32210_v63  ;;  %v22635_v30 = vsel %vm33673_vm3, %v33672_v59, %v32094_v19 }
 0x8f4   : > { %21397 = vmatpush1.msra.mxu1 %v21308_v57  ;;  %27780 = vmatmul.mubr.msk.f32.vlgmr.msra.gmra.mrb[10].mxu0 %vm342_vm1, %v32447_v5  ;;  %v21313_v57 = vsel %vm3258_vm9, %v32410_v40, %v32030_v54 }
 0x8f5   : > { %22650 = vmatpush1.msra.mxu0 %v22630_v41  ;;  %26612 = vrot.lane.b32.xlu0 %v32328_v32, %s33476_s17  ;;  %v21312_v41 = vsel %vm3258_vm9, %v32011_v2, %v32410_v40  ;;  %v33680_v2 = vld [vmem:[#allocation30_spill] sm:$0xff]  ;;  %vm33681_vm9 = vmmov %vm33676_vm5 }
 0x8f6   : > { %22791 = vmatprep.subr.mxu0 %v22635_v30  ;;  %26602 = vrot.lane.b32.xlu1 %v32289_v34, %s33476_s17  ;;  %v32502_v63 = vpop.permute.xlu0 %21964  ;;  %v22634_v30 = vsel %vm33675_vm4, %v33674_v25, %v33672_v59  ;;  %v21640_v40 = vsel %vm3590_vm10, %v33680_v2, %v33633_v42  ;;  %v33684_v42 = vld [vmem:[#allocation18_spill] sm:$0xff]  ;;  %vm33709_vm4 = vcmask 56320  }
 0x8f7   : > { %21460 = vmatprep.mubr.f32.mxu1 %v29569_v7  ;;  %22713 = vmatprep.mubr.f32.mxu0 %v29569_v7  ;;  %v25281_v51 = vpop.permute.xlu1 %25280 }
 0x8f8   : > { %27764 = vmatmul.mubr.msk.f32.vlgmr.msra.gmra.mrb[8].mxu1 %vm342_vm1, %v32267_v11  ;;  %27783 = vmatmul.mubr.msk.f32.vlgmr.msra.gmra.mrb[8].mxu0 %vm342_vm1, %v32498_v28  ;;  %v32517_v43 = vsel %vm33676_vm5, %v25281_v51, %v25283_v44  ;;  %vm33710_vm5 = vmmov %vm33704_vm2 }
 0x8f9   : > { %22792 = vmatpush1.msra.mxu0 %v22634_v30  ;;  %26616 = vrot.lane.b32.xlu0 %v31638_v55, %s33476_s17 }
 0x8fa   : > { %22980 = vmatprep.subr.mxu0 %v22962_v26  ;;  %26614 = vrot.lane.b32.xlu1 %v32269_v17, %s33476_s17  ;;  %v32529_v54 = vpop.permute.xlu0 %25288  ;;  %v21639_v26 = vsel %vm3590_vm10, %v33627_v45, %v33680_v2  ;;  %v32563_v45 = vld [vmem:[%s33205_s3 + $0x70] sm:$0xff] }
 0x8fb   : > { %21538 = vmatprep.subr.mxu1 %v21313_v57  ;;  %21602 = vmatprep.mubr.f32.mxu1 %v29569_v7  ;;  %v25285_v59 = vpop.permute.xlu1 %25284 }
 0x8fc   : > { %21539 = vmatpush1.msra.mxu1 %v21312_v41  ;;  %22855 = vmatprep.mubr.f32.mxu0 %v29569_v7  ;;  %v32537_v30 = vsel %vm33681_vm9, %v25283_v44, %v25285_v59  ;;  %v32541_v55 = vsel %vm33683_vm14, %v25285_v59, %v32475_v31  ;;  %v22961_v44 = vsel %vm33685_vm11, %v33684_v42, %v33678_v13  ;;  %v33687_v41 = vld [vmem:[#allocation64_spill] sm:$0xff]  ;;  %v33688_v59 = vld [vmem:[#allocation57_spill] sm:$0xff]  ;;  %vm33713_vm9 = vmmov %vm33712_vm6 }
 0x8fd   : > { %33682 = vst [vmem:[#allocation53_spill] sm:$0xff] %v32537_v30  ;;  %27766 = vmatmul.mubr.msk.f32.vlgmr.msra.gmra.mrb[10].mxu1 %vm342_vm1, %v32267_v11  ;;  %21727 = vmatprep.subr.mxu1 %v21640_v40  ;;  %v22966_v11 = vsel %vm33689_vm13, %v33688_v59, %v33687_v41  ;;  %v33693_v40 = vld [vmem:[#allocation61_spill] sm:$0xff]  ;;  %vm33715_vm14 = vmmov %vm33709_vm4 }
 0x8fe   : > { %27785 = vmatmul.mubr.msk.f32.vlgmr.msra.gmra.mrb[10].mxu0 %vm342_vm1, %v32498_v28  ;;  %21728 = vmatpush1.msra.mxu1 %v21639_v26  ;;  %v32553_v57 = vpop.permute.xlu0 %25292  ;;  %v21644_v26 = vsel %vm3590_vm10, %v32462_v56, %v33693_v40  ;;  %v33702_v40 = vld [vmem:[#allocation8_spill] sm:$0xff]  ;;  %vm33718_vm11 = vmmov %vm33709_vm4 }
 0x8ff   : > { %33686 = vst [vmem:[#allocation43_spill] sm:$0xff] %v32553_v57  ;;  %22981 = vmatpush1.msra.mxu0 %v22961_v44  ;;  %26935 = vrot.lane.b32.xlu0 %v32230_v0, %s33690_s6  ;;  %v32565_v2 = vpop.permute.xlu1 %22295  ;;  %v33691_v0 = vld [vmem:[#allocation47_spill] sm:$0xff]  ;;  %v33694_v44 = vld [vmem:[#allocation24_spill] sm:$0xff]  ;;  %vm33719_vm13 = vmmov %vm33704_vm2 }
 0x900   : > { %23122 = vmatprep.subr.mxu0 %v22966_v11  ;;  %26618 = vrot.lane.b32.xlu1 %v31721_v8, %s33476_s17  ;;  %v22965_v13 = vsel %vm33692_vm7, %v33691_v0, %v33688_v59  ;;  %v21643_v8 = vsel %vm3590_vm10, %v33631_v29, %v32462_v56  ;;  %v33695_v11 = vld [vmem:[#allocation29_spill] sm:$0xff]  ;;  %v33697_v29 = vld [vmem:[#allocation44_spill] sm:$0xff]  ;;  %vm33698_vm10 = vcmask 211968   ;;  %vm33721_vm7 = vmmov %vm33709_vm4 }
 0x901   : > { %21791 = vmatprep.mubr.f32.mxu1 %v29569_v7  ;;  %23044 = vmatprep.mubr.f32.mxu0 %v29569_v7  ;;  %v23293_v57 = vsel %vm342_vm1, %v33695_v11, %v33694_v44  ;;  %v21971_v56 = vsel %vm33698_vm10, %v33697_v29, %v33648_v6  ;;  %vm33699_vm15 = vmmov %vm33698_vm10  ;;  %v33701_v6 = vld [vmem:[#allocation56_spill] sm:$0xff] }
 0x902   : > { %27769 = vmatmul.mubr.msk.f32.vlgmr.msra.gmra.mrb[8].mxu1 %vm342_vm1, %v32326_v62  ;;  %27788 = vmatmul.mubr.msk.f32.vlgmr.msra.gmra.mrb[8].mxu0 %vm342_vm1, %v32563_v45  ;;  %v25612_v42 = vpop.permute.xlu0 %25611  ;;  %vm33703_vm0 = vmmov %vm33698_vm10 }
 0x903   : > { %23123 = vmatpush1.msra.mxu0 %v22965_v13  ;;  %26939 = vrot.lane.b32.xlu0 %v32260_v38, %s33690_s6  ;;  %v25279_v30 = vpop.permute.xlu1 %25278  ;;  %vm33706_vm3 = vmmov %vm33703_vm0 }
 0x904   : > { %23311 = vmatprep.subr.mxu0 %v23293_v57  ;;  %26937 = vrot.lane.b32.xlu1 %v32234_v12, %s33690_s6  ;;  %v32592_v59 = vsel %vm33696_vm12, %v25279_v30, %v25281_v51  ;;  %v21970_v12 = vsel %vm33699_vm15, %v33634_v60, %v33697_v29  ;;  %v33700_v51 = vld [vmem:[#allocation13_spill] sm:$0xff]  ;;  %v32621_v60 = vld [vmem:[%s33205_s3 + $0x78] sm:$0xff]  ;;  %v21974_v29 = vsel %vm33706_vm3, %v32054_v61, %v32502_v63  ;;  %vm33723_vm12 = vmmov %vm33712_vm6  ;;  %vm33727_vm15 = vcmask 48128  }
 0x905   : > { %21869 = vmatprep.subr.mxu1 %v21644_v26  ;;  %21933 = vmatprep.mubr.f32.mxu1 %v29569_v7  ;;  %v23292_v30 = vsel %vm342_vm1, %v33700_v51, %v33695_v11  ;;  %v23296_v26 = vsel %vm342_vm1, %v33702_v40, %v33701_v6  ;;  %vm33724_vm10 = vmmov %vm33712_vm6 }
 0x906   : > { %21870 = vmatpush1.msra.mxu1 %v21643_v8  ;;  %23186 = vmatprep.mubr.f32.mxu0 %v29569_v7  ;;  %v32599_v13 = vpop.permute.xlu0 %22626 }
 0x907   : > { %27771 = vmatmul.mubr.msk.f32.vlgmr.msra.gmra.mrb[10].mxu1 %vm342_vm1, %v32326_v62  ;;  %22058 = vmatprep.subr.mxu1 %v21971_v56  ;;  %v32606_v38 = vpop.permute.xlu1 %25294  ;;  %v23297_v62 = vsel %vm342_vm1, %v33701_v6, %v32134_v37  ;;  %v33707_v56 = vld [vmem:[#allocation41_spill] sm:$0xff] }
 0x908   : > { %27790 = vmatmul.mubr.msk.f32.vlgmr.msra.gmra.mrb[10].mxu0 %vm342_vm1, %v32563_v45  ;;  %22059 = vmatpush1.msra.mxu1 %v21970_v12  ;;  %v33708_v12 = vld [vmem:[#allocation23_spill] sm:$0xff] }
 0x909   : > { %23312 = vmatpush1.msra.mxu0 %v23292_v30  ;;  %26933 = vrot.lane.b32.xlu0 %v32289_v34, %s33690_s6  ;;  %v21975_v34 = vsel %vm33703_vm0, %v32502_v63, %v32076_v48  ;;  %v23624_v51 = vsel %vm33709_vm4, %v33708_v12, %v33707_v56  ;;  %v33711_v63 = vld [vmem:[#allocation17_spill] sm:$0xff]  ;;  %vm33729_vm0 = vcmask 138240  }
 0x90a   : > { %23453 = vmatprep.subr.mxu0 %v23297_v62  ;;  %26941 = vrot.lane.b32.xlu1 %v32297_v3, %s33690_s6  ;;  %v25616_v57 = vpop.permute.xlu0 %25615  ;;  %vm33733_vm3 = vmmov %vm33729_vm0 }
 0x90b   : > { %22122 = vmatprep.mubr.f32.mxu1 %v29569_v7  ;;  %23375 = vmatprep.mubr.f32.mxu0 %v29569_v7  ;;  %v25614_v8 = vpop.permute.xlu1 %25613 }
 0x90c   : > { %27774 = vmatmul.mubr.msk.f32.vlgmr.msra.gmra.mrb[8].mxu1 %vm342_vm1, %v32379_v10  ;;  %27793 = vmatmul.mubr.msk.f32.vlgmr.msra.gmra.mrb[8].mxu0 %vm342_vm1, %v32621_v60  ;;  %v32638_v3 = vsel %vm33704_vm2, %v25614_v8, %v25616_v57  ;;  %v32641_v11 = vsel %vm33705_vm8, %v25612_v42, %v25614_v8  ;;  %v28537_v8 = vld [vmem:[#allocation2 + $0x48] sm:$0xff]  ;;  %vm33730_vm2 = vmmov %vm33729_vm0 }
 0x90d   : > { %23454 = vmatpush1.msra.mxu0 %v23296_v26  ;;  %26945 = vrot.lane.b32.xlu0 %v32269_v17, %s33690_s6  ;;  %v22302_v17 = vsel %vm33712_vm6, %v33711_v63, %v33663_v20  ;;  %v33716_v20 = vld [vmem:[#allocation66_spill] sm:$0xff]  ;;  %v33717_v26 = vld [vmem:[#allocation59_spill] sm:$0xff]  ;;  %vm33732_vm8 = vmmov %vm33727_vm15 }
 0x90e   : > { %23642 = vmatprep.subr.mxu0 %v23624_v51  ;;  %26943 = vrot.lane.b32.xlu1 %v32328_v32, %s33690_s6  ;;  %v25610_v48 = vpop.permute.xlu0 %25609  ;;  %v22301_v32 = vsel %vm33713_vm9, %v33650_v33, %v33711_v63  ;;  %v32682_v33 = vld [vmem:[%s33205_s3 + $0x80] sm:$0xff]  ;;  %v33720_v63 = vld [vmem:[#allocation49_spill] sm:$0xff]  ;;  %vm33735_vm4 = vmmov %vm33732_vm8  ;;  %vm33741_vm9 = vcmask 457728  }
 0x90f   : > { %22200 = vmatprep.subr.mxu1 %v21975_v34  ;;  %22264 = vmatprep.mubr.f32.mxu1 %v29569_v7  ;;  %v32655_v30 = vsel %vm33710_vm5, %v25610_v48, %v25612_v42  ;;  %v32657_v61 = vpop.permute.xlu1 %22957  ;;  %v33714_v42 = vld [vmem:[#allocation19_spill] sm:$0xff]  ;;  %vm33736_vm5 = vmmov %vm33729_vm0 }
 0x910   : > { %22201 = vmatpush1.msra.mxu1 %v21974_v29  ;;  %23517 = vmatprep.mubr.f32.mxu0 %v29569_v7  ;;  %v23623_v6 = vsel %vm33715_vm14, %v33714_v42, %v33708_v12  ;;  %v28538_v29 = vld [vmem:[#allocation2 + $0x40] sm:$0xff]  ;;  %v27853_v12 = vld [vmem:[%s33207_s5 + $0x8] sm:$0xff]  ;;  %v22305_v42 = vsel %vm33724_vm10, %v33660_v16, %v32565_v2  ;;  %vm33738_vm6 = vmmov %vm33735_vm4  ;;  %vm33743_vm14 = vcmask 130048   ;;  %vm33751_vm10 = vcmask 56320  }
 0x911   : > { %27776 = vmatmul.mubr.msk.f32.vlgmr.msra.gmra.mrb[10].mxu1 %vm342_vm1, %v32379_v10  ;;  %22389 = vmatprep.subr.mxu1 %v22302_v17  ;;  %v23628_v10 = vsel %vm33718_vm11, %v33717_v26, %v33716_v20  ;;  %v27286_v48 = vld [vmem:[%s33207_s5] sm:$0xff]  ;;  %v23627_v17 = vsel %vm33721_vm7, %v33720_v63, %v33717_v26  ;;  %vm33744_vm11 = vmmov %vm33743_vm14 }
 0x912   : > { %27795 = vmatmul.mubr.msk.f32.vlgmr.msra.gmra.mrb[10].mxu0 %vm342_vm1, %v32621_v60  ;;  %22390 = vmatpush1.msra.mxu1 %v22301_v32  ;;  %v32673_v62 = vpop.permute.xlu0 %25625  ;;  %vm33747_vm7 = vmmov %vm33741_vm9 }
 0x913   : > { %23643 = vmatpush1.msra.mxu0 %v23623_v6  ;;  %26949 = vrot.lane.b32.xlu0 %v28537_v8, %s33690_s6  ;;  %v32684_v34 = vpop.permute.xlu1 %25617  ;;  %v33725_v6 = vld [vmem:[#allocation25_spill] sm:$0xff] }
 0x914   : > { %23784 = vmatprep.subr.mxu0 %v23628_v10  ;;  %26947 = vrot.lane.b32.xlu1 %v28538_v29, %s33690_s6  ;;  %v32692_v51 = vsel %vm33719_vm13, %v25616_v57, %v32684_v34  ;;  %v33722_v57 = vld [vmem:[#allocation63_spill] sm:$0xff]  ;;  %vm33746_vm13 = vmmov %vm33744_vm11 }
 0x915   : > { %22453 = vmatprep.mubr.f32.mxu1 %v29569_v7  ;;  %23706 = vmatprep.mubr.f32.mxu0 %v29569_v7  ;;  %v22306_v32 = vsel %vm33723_vm12, %v32565_v2, %v33722_v57  ;;  %v33726_v10 = vld [vmem:[#allocation27_spill] sm:$0xff]  ;;  %vm33748_vm12 = vmmov %vm33744_vm11 }
 0x916   : > { %27779 = vmatmul.mubr.msk.f32.vlgmr.msra.gmra.mrb[8].mxu1 %vm342_vm1, %v32447_v5  ;;  %27798 = vmatmul.mubr.msk.f32.vlgmr.msra.gmra.mrb[8].mxu0 %vm342_vm1, %v32682_v33  ;;  %v23955_v8 = vsel %vm33727_vm15, %v33726_v10, %v33725_v6  ;;  %vm33753_vm15 = vmmov %vm33751_vm10 }
 0x917   : > { %23785 = vmatpush1.msra.mxu0 %v23627_v17  ;;  %27305 = vperm.xlu0 %28519, %v27853_v12   ;;  %v33728_v17 = vld [vmem:[#allocation46_spill] sm:$0xff] }
 0x918   : > { %23973 = vmatprep.subr.mxu0 %v23955_v8  ;;  %27289 = vperm.xlu1 %28520, %v27286_v48   ;;  %v32715_v29 = vpop.permute.xlu0 %23288  ;;  %v22633_v16 = vsel %vm33729_vm0, %v33728_v17, %v33674_v25  ;;  %v22632_v2 = vsel %vm33730_vm2, %v33665_v24, %v33728_v17  ;;  %v33731_v12 = vld [vmem:[#allocation34_spill] sm:$0xff]  ;;  %v22637_v25 = vsel %vm33733_vm3, %v32599_v13, %v32121_v52  ;;  %v33740_v8 = vld [vmem:[#allocation16_spill] sm:$0xff]  ;;  %vm33754_vm0 = vmmov %vm33751_vm10 }
 0x919   : > { %22531 = vmatprep.subr.mxu1 %v22306_v32  ;;  %22595 = vmatprep.mubr.f32.mxu1 %v29569_v7  ;;  %v32718_v26 = vpop.permute.xlu1 %25619  ;;  %v23954_v48 = vsel %vm33732_vm8, %v33731_v12, %v33726_v10  ;;  %v22636_v24 = vsel %vm33736_vm5, %v32094_v19, %v32599_v13  ;;  %v32747_v32 = vld [vmem:[%s33205_s3 + $0x88] sm:$0xff]  ;;  %v33739_v10 = vld [vmem:[#allocation51_spill] sm:$0xff]  ;;  %vm33755_vm2 = vmmov %vm33754_vm0  ;;  %vm33759_vm5 = vcmask 449536  }
 0x91a   : > { %22532 = vmatpush1.msra.mxu1 %v22305_v42  ;;  %23848 = vmatprep.mubr.f32.mxu0 %v29569_v7  ;;  %v33737_v19 = vld [vmem:[#allocation12_spill] sm:$0xff]  ;;  %v24304_v17 = vsel %vm33741_vm9, %v33740_v8, %v33739_v10  ;;  %vm33756_vm8 = vmmov %vm33747_vm7 }
 0x91b   : > { %27781 = vmatmul.mubr.msk.f32.vlgmr.msra.gmra.mrb[10].mxu1 %vm342_vm1, %v32447_v5  ;;  %22720 = vmatprep.subr.mxu1 %v22633_v16  ;;  %v33734_v5 = vld [vmem:[#allocation58_spill] sm:$0xff]  ;;  %vm33757_vm3 = vmmov %vm33747_vm7 }
 0x91c   : > { %27800 = vmatmul.mubr.msk.f32.vlgmr.msra.gmra.mrb[10].mxu0 %vm342_vm1, %v32682_v33  ;;  %22721 = vmatpush1.msra.mxu1 %v22632_v2  ;;  %v23959_v57 = vsel %vm33735_vm4, %v33734_v5, %v32179_v18  ;;  %v23958_v13 = vsel %vm33738_vm6, %v33737_v19, %v33734_v5  ;;  %v33742_v2 = vld [vmem:[#allocation6_spill] sm:$0xff]  ;;  %v33745_v5 = vld [vmem:[#allocation65_spill] sm:$0xff]  ;;  %vm33760_vm6 = vmmov %vm33735_vm4 }
 0x91d   : > { %23974 = vmatpush1.msra.mxu0 %v23954_v48  ;;  %22784 = vmatprep.mubr.f32.mxu1 %v29569_v7  ;;  %v32749_v42 = vpop.permute.xlu0 %25944  ;;  %v22964_v12 = vsel %vm33743_vm14, %v33742_v2, %v33691_v0  ;;  %vm33761_vm9 = vmmov %vm33735_vm4 }
 0x91e   : > { %24115 = vmatprep.subr.mxu0 %v23959_v57  ;;  %24037 = vmatprep.mubr.f32.mxu0 %v29569_v7  ;;  %v32752_v52 = vpop.permute.xlu1 %25623  ;;  %v22968_v57 = vsel %vm33746_vm13, %v32657_v61, %v33745_v5  ;;  %v33752_v5 = vld [vmem:[#allocation67_spill] sm:$0xff]  ;;  %vm33762_vm14 = vmmov %vm33735_vm4 }
 0x91f   : > { %27784 = vmatmul.mubr.msk.f32.vlgmr.msra.gmra.mrb[8].mxu1 %vm342_vm1, %v32498_v28  ;;  %22862 = vmatprep.subr.mxu1 %v22637_v25  ;;  %v22963_v25 = vsel %vm33744_vm11, %v33677_v53, %v33742_v2  ;;  %v22967_v53 = vsel %vm33748_vm12, %v33687_v41, %v32657_v61  ;;  %v33749_v41 = vld [vmem:[#allocation48_spill] sm:$0xff]  ;;  %vm33763_vm11 = vmmov %vm33757_vm3 }
 0x920   : > { %27803 = vmatmul.mubr.msk.f32.vlgmr.msra.gmra.mrb[8].mxu0 %vm342_vm1, %v32747_v32  ;;  %22863 = vmatpush1.msra.mxu1 %v22636_v24  ;;  %v24303_v24 = vsel %vm33747_vm7, %v32047_v49, %v33740_v8  ;;  %v32797_v49 = vld [vmem:[%s33205_s3 + $0x90] sm:$0xff]  ;;  %v23295_v61 = vsel %vm342_vm1, %v33749_v41, %v33702_v40  ;;  %v23299_v8 = vsel %vm342_vm1, %v32715_v29, %v32161_v4  ;;  %v33750_v4 = vld [vmem:[#allocation10_spill] sm:$0xff]  ;;  %vm33764_vm13 = vmmov %vm33759_vm5 }
 0x921   : > { %24116 = vmatpush1.msra.mxu0 %v23958_v13  ;;  %22926 = vmatprep.mubr.f32.mxu1 %v29569_v7  ;;  %v32765_v16 = vpop.permute.xlu0 %25948  ;;  %vm33765_vm7 = vmmov %vm33759_vm5 }
 0x922   : > { %24322 = vmatprep.subr.mxu0 %v24304_v17  ;;  %24179 = vmatprep.mubr.f32.mxu0 %v29569_v7  ;;  %v23620_v48 = vpop.permute.xlu1 %23619  ;;  %v23294_v17 = vsel %vm342_vm1, %v33694_v44, %v33749_v41  ;;  %vm33766_vm12 = vmmov %vm33757_vm3 }
 0x923   : > { %27786 = vmatmul.mubr.msk.f32.vlgmr.msra.gmra.mrb[10].mxu1 %vm342_vm1, %v32498_v28  ;;  %23051 = vmatprep.subr.mxu1 %v22964_v12  ;;  %v27852_v28 = vld [vmem:[%s33206_s4 + $0x10] sm:$0xff]  ;;  %v23298_v12 = vsel %vm342_vm1, %v32134_v37, %v32715_v29  ;;  %v23625_v37 = vsel %vm33754_vm0, %v33707_v56, %v33750_v4  ;;  %v33758_v56 = vld [vmem:[#allocation50_spill] sm:$0xff]  ;;  %vm33769_vm0 = vmmov %vm33759_vm5 }
 0x924   : > { %27805 = vmatmul.mubr.msk.f32.vlgmr.msra.gmra.mrb[10].mxu0 %vm342_vm1, %v32747_v32  ;;  %23052 = vmatpush1.msra.mxu1 %v22963_v25 }
 0x925   : > { %24323 = vmatpush1.msra.mxu0 %v24303_v24  ;;  %23115 = vmatprep.mubr.f32.mxu1 %v29569_v7 }
 0x926   : > { %23193 = vmatprep.subr.mxu1 %v22968_v57  ;;  %v32791_v0 = vpop.permute.xlu0 %25950  ;;  %24386 = vmatprep.mubr.f32.mxu0 %v29569_v7  ;;  %v23630_v57 = vsel %vm33753_vm15, %v23620_v48, %v33752_v5  ;;  %vm33768_vm15 = vmmov %vm33757_vm3 }
 0x927   : > { %27789 = vmatmul.mubr.msk.f32.vlgmr.msra.gmra.mrb[8].mxu1 %vm342_vm1, %v32563_v45  ;;  %v32801_v13 = vpop.permute.xlu1 %25942  ;;  %27266 = vperm.xlu1 %28520, %v27852_v28  }
 0x928   : > { %23194 = vmatpush1.msra.mxu1 %v22967_v53  ;;  %23257 = vmatprep.mubr.f32.mxu1 %v29569_v7 }
 0x929   : > { %23382 = vmatprep.subr.mxu1 %v23295_v61  ;;  %27808 = vmatmul.mubr.msk.f32.vlgmr.msra.gmra.mrb[8].mxu0 %vm342_vm1, %v32797_v49  ;;  %v24638_v61 = vsel %vm33765_vm7, %v32159_v21, %v32198_v35  ;;  %vm33789_vm7 = vcmask 367616  }
 0x92a   : > { %24528 = vmatprep.mubr.f32.mxu0 %v29569_v7 }
 0x92b   : > { %27791 = vmatmul.mubr.msk.f32.vlgmr.msra.gmra.mrb[10].mxu1 %vm342_vm1, %v32563_v45  ;;  %v23951_v2 = vpop.permute.xlu0 %23950  ;;  %v23626_v45 = vsel %vm33751_vm10, %v33750_v4, %v33720_v63  ;;  %v23629_v63 = vsel %vm33755_vm2, %v33716_v20, %v23620_v48  ;;  %v23957_v20 = vsel %vm33735_vm4, %v33758_v56, %v33737_v19  ;;  %v24635_v48 = vsel %vm33759_vm5, %v32295_v50, %v32119_v15  ;;  %vm33767_vm10 = vmmov %vm33757_vm3  ;;  %v33775_v4 = vld [vmem:[#allocation68_spill] sm:$0xff] }
 0x92c   : > { %23383 = vmatpush1.msra.mxu1 %v23294_v17  ;;  %23446 = vmatprep.mubr.f32.mxu1 %v29569_v7  ;;  %v32819_v40 = vpop.permute.xlu1 %25946  ;;  %v23961_v53 = vsel %vm33760_vm6, %v23951_v2, %v32200_v1  ;;  %v32877_v1 = vld [vmem:[%s33205_s3 + $0x98] sm:$0xff]  ;;  %v23960_v50 = vsel %vm33762_vm14, %v32179_v18, %v23951_v2  ;;  %v24306_v18 = vsel %vm33763_vm11, %v32028_v27, %v32225_v22  ;;  %vm33770_vm2 = vcmask 441344   ;;  %vm33776_vm4 = vmmov %vm33769_vm0 }
 0x92d   : > { %23524 = vmatprep.subr.mxu1 %v23299_v8  ;;  %v24305_v8 = vsel %vm33766_vm12, %v33739_v10, %v32028_v27  ;;  %v27817_v27 = vld [vmem:[%s33205_s3 + $0xa0] sm:$0xff]  ;;  %vm33777_vm5 = vmmov %vm33769_vm0  ;;  %vm33784_vm14 = vcmask 375808  }
 0x92e   : > { %vm33782_vm6 = vmmov %vm33770_vm2 }
 0x92f   : > { %27794 = vmatmul.mubr.msk.f32.vlgmr.msra.gmra.mrb[8].mxu1 %vm342_vm1, %v32621_v60  ;;  %vm33785_vm11 = vmmov %vm33784_vm14 }
 0x930   : > { %23525 = vmatpush1.msra.mxu1 %v23298_v12  ;;  %23588 = vmatprep.mubr.f32.mxu1 %v29569_v7  ;;  %v32830_v44 = vpop.permute.xlu0 %25954  ;;  %v33774_v12 = vld [vmem:[#allocation32_spill] sm:$0xff]  ;;  %vm33790_vm12 = vmmov %vm33785_vm11 }
 0x931   : > { %23713 = vmatprep.subr.mxu1 %v23626_v45  ;;  %v32832_v25 = vpop.permute.xlu1 %25940  ;;  %v24641_v45 = vsel %vm33776_vm4, %v33775_v4, %v33774_v12 }
 0x933   : > { %27796 = vmatmul.mubr.msk.f32.vlgmr.msra.gmra.mrb[10].mxu1 %vm342_vm1, %v32621_v60  ;;  %v24307_v60 = vsel %vm33757_vm3, %v32225_v22, %v32244_v47  ;;  %v24310_v22 = vsel %vm33767_vm10, %v32273_v39, %v32074_v23  ;;  %v24637_v23 = vsel %vm33769_vm0, %v32316_v36, %v32159_v21  ;;  %v33772_v21 = vld [vmem:[#allocation15_spill] sm:$0xff]  ;;  %vm33773_vm3 = vmmov %vm33770_vm2 }
 0x934   : > { %23714 = vmatpush1.msra.mxu1 %v23625_v37  ;;  %23777 = vmatprep.mubr.f32.mxu1 %v29569_v7  ;;  %v24969_v2 = vsel %vm33773_vm3, %v33772_v21, %v32437_v46  ;;  %v33781_v37 = vld [vmem:[#allocation60_spill] sm:$0xff]  ;;  %vm33791_vm10 = vmmov %vm33789_vm7 }
 0x935   : > { %23855 = vmatprep.subr.mxu1 %v23630_v57  ;;  %v24298_v29 = vpop.permute.xlu0 %24297  ;;  %v33780_v57 = vld [vmem:[#allocation37_spill] sm:$0xff] }
 0x936   : > { %v32844_v24 = vpop.permute.xlu1 %25956  ;;  %v24308_v28 = vsel %vm33756_vm8, %v32244_v47, %v24298_v29  ;;  %v23956_v47 = vsel %vm33761_vm9, %v33725_v6, %v33758_v56  ;;  %vm33771_vm8 = vmmov %vm33769_vm0  ;;  %v25300_v56 = vsel %vm33785_vm11, %v32475_v31, %v32529_v54  ;;  %v27827_v31 = vld [vmem:[%s33205_s3 + $0xb0] sm:$0xff] }
 0x937   : > { %27799 = vmatmul.mubr.msk.f32.vlgmr.msra.gmra.mrb[8].mxu1 %vm342_vm1, %v32682_v33  ;;  %24464 = vmatprep.subr.mxu0 %v24308_v28  ;;  %vm33783_vm9 = vmmov %vm33770_vm2 }
 0x938   : > { %23856 = vmatpush1.msra.mxu1 %v23629_v63  ;;  %23919 = vmatprep.mubr.f32.mxu1 %v29569_v7  ;;  %v24972_v63 = vsel %vm33782_vm6, %v33781_v37, %v33780_v57  ;;  %vm33799_vm6 = vcmask 293888  }
 0x939   : > { %24044 = vmatprep.subr.mxu1 %v23957_v20  ;;  %24465 = vmatpush1.msra.mxu0 %v24307_v60 }
 0x93a   : > { %v32862_v41 = vpop.permute.xlu0 %26273  ;;  %27810 = vmatmul.mubr.msk.f32.vlgmr.msra.gmra.mrb[10].mxu0 %vm342_vm1, %v32797_v49  ;;  %24653 = vmatprep.subr.mxu0 %v24635_v48 }
 0x93b   : > { %27801 = vmatmul.mubr.msk.f32.vlgmr.msra.gmra.mrb[10].mxu1 %vm342_vm1, %v32682_v33  ;;  %v32871_v19 = vpop.permute.xlu1 %26275  ;;  %24654 = vmatpush1.msra.mxu0 %v32348_v9 }
 0x93c   : > { %24045 = vmatpush1.msra.mxu1 %v23956_v47  ;;  %24108 = vmatprep.mubr.f32.mxu1 %v29569_v7 }
 0x93d   : > { %24186 = vmatprep.subr.mxu1 %v23961_v53  ;;  %24717 = vmatprep.mubr.f32.mxu0 %v29569_v7 }
 0x93e   : > { %27813 = vmatmul.mubr.msk.f32.vlgmr.msra.gmra.mrb[8].mxu0 %vm342_vm1, %v32877_v1 }
 0x93f   : > { %27804 = vmatmul.mubr.msk.f32.vlgmr.msra.gmra.mrb[8].mxu1 %vm342_vm1, %v32747_v32  ;;  %v32887_v9 = vpop.permute.xlu0 %26277  ;;  %24859 = vmatprep.mubr.f32.mxu0 %v29569_v7 }
 0x940   : > { %24187 = vmatpush1.msra.mxu1 %v23960_v50  ;;  %24250 = vmatprep.mubr.f32.mxu1 %v29569_v7  ;;  %v24629_v33 = vpop.permute.xlu1 %24628 }
 0x941   : > { %24393 = vmatprep.subr.mxu1 %v24306_v18  ;;  %v24639_v6 = vsel %vm33764_vm13, %v32198_v35, %v24629_v33  ;;  %v24309_v35 = vsel %vm33768_vm15, %v24298_v29, %v32273_v39  ;;  %v24640_v5 = vsel %vm33777_vm5, %v24629_v33, %v33775_v4  ;;  %vm33788_vm13 = vmmov %vm33785_vm11  ;;  %vm33792_vm15 = vcmask 359424   ;;  %v27832_v33 = vld [vmem:[%s33205_s3 + $0xb8] sm:$0xff] }
 0x942   : > { %24795 = vmatprep.subr.mxu0 %v24639_v6  ;;  %v25959_v50 = vsel %vm33792_vm15, %v32801_v13, %v32749_v42  ;;  %vm33793_vm0 = vmmov %vm33792_vm15  ;;  %vm33807_vm15 = vcmask 285696  }
 0x943   : > { %27806 = vmatmul.mubr.msk.f32.vlgmr.msra.gmra.mrb[10].mxu1 %vm342_vm1, %v32747_v32  ;;  %24796 = vmatpush1.msra.mxu0 %v24638_v61  ;;  %v25958_v18 = vsel %vm33793_vm0, %v32832_v25, %v32801_v13  ;;  %vm33797_vm4 = vmmov %vm33793_vm0 }
 0x944   : > { %24394 = vmatpush1.msra.mxu1 %v24305_v8  ;;  %24457 = vmatprep.mubr.f32.mxu1 %v29569_v7  ;;  %v32908_v17 = vpop.permute.xlu0 %26271  ;;  %v25962_v13 = vsel %vm33797_vm4, %v32765_v16, %v32791_v0  ;;  %vm33798_vm5 = vmmov %vm33793_vm0 }
 0x945   : > { %24535 = vmatprep.subr.mxu1 %v24310_v22  ;;  %27815 = vmatmul.mubr.msk.f32.vlgmr.msra.gmra.mrb[10].mxu0 %vm342_vm1, %v32877_v1  ;;  %v32914_v32 = vpop.permute.xlu1 %26279  ;;  %v25961_v25 = vsel %vm33798_vm5, %v32819_v40, %v32765_v16  ;;  %vm33802_vm11 = vmmov %vm33793_vm0 }
 0x946   : > { %24984 = vmatprep.subr.mxu0 %v32394_v58  ;;  %25048 = vmatprep.mubr.f32.mxu0 %v29569_v7  ;;  %v25965_v22 = vsel %vm33802_vm11, %v32830_v44, %v32844_v24 }
 0x947   : > { %27809 = vmatmul.mubr.msk.f32.vlgmr.msra.gmra.mrb[8].mxu1 %vm342_vm1, %v32797_v49  ;;  %24985 = vmatpush1.msra.mxu0 %v32387_v14  ;;  %v24636_v14 = vsel %vm33771_vm8, %v32119_v15, %v32316_v36  ;;  %vm33795_vm8 = vmmov %vm33793_vm0 }
 0x948   : > { %24536 = vmatpush1.msra.mxu1 %v24309_v35  ;;  %24599 = vmatprep.mubr.f32.mxu1 %v29569_v7 }
 0x949   : > { %24724 = vmatprep.subr.mxu1 %v24637_v23  ;;  %v24960_v39 = vpop.permute.xlu0 %24959  ;;  %27818 = vmatmul.mubr.msk.f32.vlgmr.msra.gmra.mrb[8].mxu0 %vm342_vm1, %v27817_v27 }
 0x94a   : > { %v32929_v58 = vpop.permute.xlu1 %26281  ;;  %v24970_v10 = vsel %vm33770_vm2, %v32437_v46, %v24960_v39  ;;  %25190 = vmatprep.mubr.f32.mxu0 %v29569_v7  ;;  %v27822_v46 = vld [vmem:[%s33205_s3 + $0xa8] sm:$0xff]  ;;  %v24971_v28 = vsel %vm33783_vm9, %v24960_v39, %v33781_v37  ;;  %vm33794_vm2 = vmmov %vm33789_vm7 }
 0x94b   : > { %27811 = vmatmul.mubr.msk.f32.vlgmr.msra.gmra.mrb[10].mxu1 %vm342_vm1, %v32797_v49  ;;  %25126 = vmatprep.subr.mxu0 %v24970_v10  ;;  %v33778_v49 = vld [vmem:[#allocation7_spill] sm:$0xff]  ;;  %vm33796_vm3 = vmmov %vm33794_vm2  ;;  %v27842_v10 = vld [vmem:[%s33205_s3 + $0xc8] sm:$0xff] }
 0x94c   : > { %24725 = vmatpush1.msra.mxu1 %v24636_v14  ;;  %24788 = vmatprep.mubr.f32.mxu1 %v29569_v7  ;;  %vm33800_vm9 = vmmov %vm33793_vm0 }
 0x94d   : > { %24866 = vmatprep.subr.mxu1 %v24641_v45  ;;  %25127 = vmatpush1.msra.mxu0 %v24969_v2 }
 0x94e   : > { %v32948_v15 = vpop.permute.xlu0 %25621  ;;  %27820 = vmatmul.mubr.msk.f32.vlgmr.msra.gmra.mrb[10].mxu0 %vm342_vm1, %v27817_v27  ;;  %25315 = vmatprep.subr.mxu0 %v32517_v43 }
 0x94f   : > { %27814 = vmatmul.mubr.msk.f32.vlgmr.msra.gmra.mrb[8].mxu1 %vm342_vm1, %v32877_v1  ;;  %v32954_v36 = vpop.permute.xlu1 %26285  ;;  %25316 = vmatpush1.msra.mxu0 %v32592_v59  ;;  %v33779_v59 = vld [vmem:[#allocation28_spill] sm:$0xff] }
 0x950   : > { %24867 = vmatpush1.msra.mxu1 %v24640_v5  ;;  %24930 = vmatprep.mubr.f32.mxu1 %v29569_v7 }
 0x951   : > { %25055 = vmatprep.subr.mxu1 %v33778_v49  ;;  %25379 = vmatprep.mubr.f32.mxu0 %v29569_v7  ;;  %v27847_v49 = vld [vmem:[%s33205_s3 + $0xd0] sm:$0xff] }
 0x952   : > { %27823 = vmatmul.mubr.msk.f32.vlgmr.msra.gmra.mrb[8].mxu0 %vm342_vm1, %v27822_v46 }
 0x953   : > { %27816 = vmatmul.mubr.msk.f32.vlgmr.msra.gmra.mrb[10].mxu1 %vm342_vm1, %v32877_v1  ;;  %v32966_v43 = vpop.permute.xlu0 %26283  ;;  %25521 = vmatprep.mubr.f32.mxu0 %v29569_v7  ;;  %v25631_v1 = vsel %vm33791_vm10, %v32684_v34, %v32718_v26  ;;  %vm33806_vm10 = vmmov %vm33799_vm6 }
 0x954   : > { %25056 = vmatpush1.msra.mxu1 %v33779_v59  ;;  %25119 = vmatprep.mubr.f32.mxu1 %v29569_v7  ;;  %v25291_v29 = vpop.permute.xlu1 %25290 }
 0x955   : > { %25197 = vmatprep.subr.mxu1 %v24972_v63  ;;  %v25301_v60 = vsel %vm33784_vm14, %v32529_v54, %v25291_v29  ;;  %v33786_v54 = vld [vmem:[#allocation53_spill] sm:$0xff]  ;;  %vm33801_vm14 = vmmov %vm33799_vm6 }
 0x956   : > { %25457 = vmatprep.subr.mxu0 %v25301_v60  ;;  %v26289_v16 = vsel %vm33801_vm14, %v32908_v17, %v32862_v41  ;;  %v26292_v17 = vsel %vm33806_vm10, %v32887_v9, %v32914_v32 }
 0x957   : > { %27819 = vmatmul.mubr.msk.f32.vlgmr.msra.gmra.mrb[8].mxu1 %vm342_vm1, %v27817_v27  ;;  %25458 = vmatpush1.msra.mxu0 %v25300_v56 }
 0x958   : > { %25198 = vmatpush1.msra.mxu1 %v24971_v28  ;;  %25261 = vmatprep.mubr.f32.mxu1 %v29569_v7  ;;  %v32983_v20 = vpop.permute.xlu0 %26287 }
 0x959   : > { %25386 = vmatprep.subr.mxu1 %v32541_v55  ;;  %27825 = vmatmul.mubr.msk.f32.vlgmr.msra.gmra.mrb[10].mxu0 %vm342_vm1, %v27822_v46  ;;  %v32987_v48 = vpop.permute.xlu1 %25952  ;;  %v33787_v55 = vld [vmem:[#allocation43_spill] sm:$0xff] }
 0x95a   : > { %25646 = vmatprep.subr.mxu0 %v32641_v11  ;;  %25710 = vmatprep.mubr.f32.mxu0 %v29569_v7  ;;  %v25303_v53 = vsel %vm33788_vm13, %v33787_v55, %v32606_v38  ;;  %v25632_v11 = vsel %vm33789_vm7, %v32718_v26, %v32948_v15  ;;  %v25963_v6 = vsel %vm33795_vm8, %v32791_v0, %v32987_v48  ;;  %vm33803_vm13 = vmmov %vm33799_vm6 }
 0x95b   : > { %27821 = vmatmul.mubr.msk.f32.vlgmr.msra.gmra.mrb[10].mxu1 %vm342_vm1, %v27817_v27  ;;  %25647 = vmatpush1.msra.mxu0 %v32655_v30  ;;  %v25302_v30 = vsel %vm33790_vm12, %v25291_v29, %v33787_v55  ;;  %v25960_v0 = vsel %vm33800_vm9, %v32749_v42, %v32819_v40  ;;  %v27837_v42 = vld [vmem:[%s33205_s3 + $0xc0] sm:$0xff]  ;;  %v26294_v40 = vsel %vm33803_vm13, %v32929_v58, %v32966_v43  ;;  %vm33804_vm7 = vmmov %vm33793_vm0  ;;  %vm33815_vm9 = vcmask 277504   ;;  %v27280_v55 = vld [vmem:[%s28630_s29 + $0x18] sm:$0xff] }
 0x95c   : > { %25387 = vmatpush1.msra.mxu1 %v33786_v54  ;;  %25450 = vmatprep.mubr.f32.mxu1 %v29569_v7  ;;  %v25964_v24 = vsel %vm33804_vm7, %v32987_v48, %v32830_v44  ;;  %vm33805_vm12 = vmmov %vm33799_vm6  ;;  %v27277_v54 = vld [vmem:[%s28630_s29] sm:$0xff] }
 0x95d   : > { %25528 = vmatprep.subr.mxu1 %v25303_v53  ;;  %25788 = vmatprep.subr.mxu0 %v25632_v11  ;;  %v33006_v47 = vpop.permute.xlu0 %26606  ;;  %vm33808_vm0 = vmmov %vm33799_vm6  ;;  %v27279_v53 = vld [vmem:[%s28630_s29 + $0x10] sm:$0xff] }
 0x95e   : > { %27828 = vmatmul.mubr.msk.f32.vlgmr.msra.gmra.mrb[8].mxu0 %vm342_vm1, %v27827_v31  ;;  %v33012_v38 = vpop.permute.xlu1 %26604  ;;  %v26291_v39 = vsel %vm33808_vm0, %v32871_v19, %v32887_v9  ;;  %vm33810_vm8 = vmmov %vm33808_vm0 }
 0x95f   : > { %27824 = vmatmul.mubr.msk.f32.vlgmr.msra.gmra.mrb[8].mxu1 %vm342_vm1, %v27822_v46  ;;  %25789 = vmatpush1.msra.mxu0 %v25631_v1  ;;  %v26621_v44 = vsel %vm33807_vm15, %v33012_v38, %v33006_v47  ;;  %vm33812_vm4 = vmmov %vm33808_vm0 }
 0x960   : > { %25529 = vmatpush1.msra.mxu1 %v25302_v30  ;;  %25592 = vmatprep.mubr.f32.mxu1 %v29569_v7  ;;  %v26295_v21 = vsel %vm33812_vm4, %v32966_v43, %v32954_v36  ;;  %vm33818_vm13 = vmmov %vm33815_vm9 }
 0x961   : > { %25717 = vmatprep.subr.mxu1 %v32692_v51  ;;  %25977 = vmatprep.subr.mxu0 %v25959_v50  ;;  %v25634_v51 = vsel %vm33794_vm2, %v32752_v52, %v32673_v62  ;;  %vm33809_vm2 = vmmov %vm33807_vm15  ;;  %v27282_v50 = vld [vmem:[%s28630_s29 + $0x28] sm:$0xff] }
 0x962   : > { %25852 = vmatprep.mubr.f32.mxu0 %v29569_v7  ;;  %v33021_v34 = vpop.permute.xlu0 %26610  ;;  %vm33813_vm5 = vmmov %vm33809_vm2 }
 0x963   : > { %27826 = vmatmul.mubr.msk.f32.vlgmr.msra.gmra.mrb[10].mxu1 %vm342_vm1, %v27822_v46  ;;  %27830 = vmatmul.mubr.msk.f32.vlgmr.msra.gmra.mrb[10].mxu0 %vm342_vm1, %v27827_v31  ;;  %v33025_v26 = vpop.permute.xlu1 %26608  ;;  %vm33816_vm14 = vmmov %vm33809_vm2 }
 0x964   : > { %25718 = vmatpush1.msra.mxu1 %v32638_v3  ;;  %25781 = vmatprep.mubr.f32.mxu1 %v29569_v7  ;;  %v25633_v3 = vsel %vm33796_vm3, %v32948_v15, %v32752_v52  ;;  %v26290_v52 = vsel %vm33799_vm6, %v32862_v41, %v32871_v19  ;;  %v26293_v41 = vsel %vm33805_vm12, %v32914_v32, %v32929_v58  ;;  %vm33811_vm3 = vmmov %vm33809_vm2 }
 0x965   : > { %25859 = vmatprep.subr.mxu1 %v25634_v51  ;;  %25978 = vmatpush1.msra.mxu0 %v25958_v18  ;;  %v26296_v58 = vsel %vm33810_vm8, %v32954_v36, %v32983_v20  ;;  %vm33814_vm6 = vmmov %vm33809_vm2  ;;  %v26622_v45 = vsel %vm33816_vm14, %v33006_v47, %v33025_v26 }
 0x966   : > { %26119 = vmatprep.subr.mxu0 %v25963_v6  ;;  %26041 = vmatprep.mubr.f32.mxu0 %v29569_v7  ;;  %v26623_v12 = vsel %vm33814_vm6, %v33025_v26, %v33021_v34  ;;  %vm33817_vm11 = vmmov %vm33809_vm2 }
 0x967   : > { %27829 = vmatmul.mubr.msk.f32.vlgmr.msra.gmra.mrb[8].mxu1 %vm342_vm1, %v27827_v31  ;;  %v26613_v62 = vpop.permute.xlu0 %26612  ;;  %27833 = vmatmul.mubr.msk.f32.vlgmr.msra.gmra.mrb[8].mxu0 %vm342_vm1, %v27832_v33  ;;  %vm33819_vm7 = vmmov %vm33815_vm9 }
 0x968   : > { %25860 = vmatpush1.msra.mxu1 %v25633_v3  ;;  %25923 = vmatprep.mubr.f32.mxu1 %v29569_v7  ;;  %v26603_v61 = vpop.permute.xlu1 %26602  ;;  %v26624_v2 = vsel %vm33813_vm5, %v33021_v34, %v26613_v62  ;;  %vm33820_vm12 = vmmov %vm33809_vm2  ;;  %v27281_v34 = vld [vmem:[%s28630_s29 + $0x20] sm:$0xff] }
 0x969   : > { %26048 = vmatprep.subr.mxu1 %v25961_v25  ;;  %26120 = vmatpush1.msra.mxu0 %v25962_v13  ;;  %v26620_v32 = vsel %vm33809_vm2, %v26603_v61, %v33012_v38  ;;  %vm33821_vm10 = vmmov %vm33819_vm7  ;;  %v27284_v25 = vld [vmem:[%s28630_s29 + $0x38] sm:$0xff]  ;;  %v27283_v61 = vld [vmem:[%s28630_s29 + $0x30] sm:$0xff] }
 0x96a   : > { %26308 = vmatprep.subr.mxu0 %v26290_v52  ;;  %26183 = vmatprep.mubr.f32.mxu0 %v29569_v7  ;;  %vm33822_vm15 = vmmov %vm33819_vm7 }
 0x96b   : > { %27831 = vmatmul.mubr.msk.f32.vlgmr.msra.gmra.mrb[10].mxu1 %vm342_vm1, %v27827_v31  ;;  %v33062_v8 = vpop.permute.xlu0 %26616  ;;  %27835 = vmatmul.mubr.msk.f32.vlgmr.msra.gmra.mrb[10].mxu0 %vm342_vm1, %v27832_v33  ;;  %vm33823_vm0 = vmmov %vm33819_vm7  ;;  %v27278_v31 = vld [vmem:[%s28630_s29 + $0x8] sm:$0xff] }
 0x96c   : > { %26049 = vmatpush1.msra.mxu1 %v25960_v0  ;;  %26112 = vmatprep.mubr.f32.mxu1 %v29569_v7  ;;  %v33072_v35 = vpop.permute.xlu1 %26614  ;;  %vm33824_vm2 = vmmov %vm33823_vm0 }
 0x96d   : > { %26190 = vmatprep.subr.mxu1 %v25965_v22  ;;  %26309 = vmatpush1.msra.mxu0 %v26289_v16  ;;  %v26625_v9 = vsel %vm33811_vm3, %v26613_v62, %v33072_v35  ;;  %v26626_v59 = vsel %vm33820_vm12, %v33072_v35, %v33062_v8  ;;  %vm33825_vm8 = vmmov %vm33823_vm0 }
 0x96e   : > { %26450 = vmatprep.subr.mxu0 %v26294_v40  ;;  %26372 = vmatprep.mubr.f32.mxu0 %v29569_v7 }
 0x96f   : > { %27834 = vmatmul.mubr.msk.f32.vlgmr.msra.gmra.mrb[8].mxu1 %vm342_vm1, %v27832_v33  ;;  %27838 = vmatmul.mubr.msk.f32.vlgmr.msra.gmra.mrb[8].mxu0 %vm342_vm1, %v27837_v42 }
 0x970   : > { %26191 = vmatpush1.msra.mxu1 %v25964_v24  ;;  %26254 = vmatprep.mubr.f32.mxu1 %v29569_v7 }
 0x971   : > { %26379 = vmatprep.subr.mxu1 %v26292_v17  ;;  %v26936_v27 = vpop.permute.xlu0 %26935  ;;  %26451 = vmatpush1.msra.mxu0 %v26293_v41 }
 0x972   : > { %v26619_v23 = vpop.permute.xlu1 %26618  ;;  %26639 = vmatprep.subr.mxu0 %v26621_v44  ;;  %26514 = vmatprep.mubr.f32.mxu0 %v29569_v7 }
 0x973   : > { %27836 = vmatmul.mubr.msk.f32.vlgmr.msra.gmra.mrb[10].mxu1 %vm342_vm1, %v27832_v33  ;;  %27840 = vmatmul.mubr.msk.f32.vlgmr.msra.gmra.mrb[10].mxu0 %vm342_vm1, %v27837_v42  ;;  %v26627_v15 = vsel %vm33817_vm11, %v33062_v8, %v26619_v23 }
 0x974   : > { %26380 = vmatpush1.msra.mxu1 %v26291_v39  ;;  %26443 = vmatprep.mubr.f32.mxu1 %v29569_v7 }
 0x975   : > { %26521 = vmatprep.subr.mxu1 %v26296_v58  ;;  %v26940_v19 = vpop.permute.xlu0 %26939  ;;  %26640 = vmatpush1.msra.mxu0 %v26620_v32 }
 0x976   : > { %v26938_v14 = vpop.permute.xlu1 %26937  ;;  %26781 = vmatprep.subr.mxu0 %v26625_v9  ;;  %26703 = vmatprep.mubr.f32.mxu0 %v29569_v7 }
 0x977   : > { %27839 = vmatmul.mubr.msk.f32.vlgmr.msra.gmra.mrb[8].mxu1 %vm342_vm1, %v27837_v42  ;;  %27843 = vmatmul.mubr.msk.f32.vlgmr.msra.gmra.mrb[8].mxu0 %vm342_vm1, %v27842_v10  ;;  %v26952_v4 = vsel %vm33815_vm9, %v26936_v27, %v26938_v14  ;;  %v26953_v28 = vsel %vm33823_vm0, %v26938_v14, %v26940_v19 }
 0x978   : > { %26522 = vmatpush1.msra.mxu1 %v26295_v21  ;;  %26585 = vmatprep.mubr.f32.mxu1 %v29569_v7 }
 0x979   : > { %26710 = vmatprep.subr.mxu1 %v26623_v12  ;;  %26782 = vmatpush1.msra.mxu0 %v26624_v2 }
 0x97a   : > { %26970 = vmatprep.subr.mxu0 %v26952_v4  ;;  %26845 = vmatprep.mubr.f32.mxu0 %v29569_v7 }
 0x97b   : > { %27841 = vmatmul.mubr.msk.f32.vlgmr.msra.gmra.mrb[10].mxu1 %vm342_vm1, %v27837_v42  ;;  %v26934_v5 = vpop.permute.xlu0 %26933  ;;  %27845 = vmatmul.mubr.msk.f32.vlgmr.msra.gmra.mrb[10].mxu0 %vm342_vm1, %v27842_v10  ;;  %v27285_v42 = vld [vmem:[%s28630_s29 + $0x40] sm:$0xff]  ;;  %s27856_s29 = sshll.u32 %s33826_s22, 6 }
 0x97c   : > { %26711 = vmatpush1.msra.mxu1 %v26622_v45  ;;  %26774 = vmatprep.mubr.f32.mxu1 %v29569_v7  ;;  %v26951_v36 = vsel %vm33818_vm13, %v26934_v5, %v26936_v27  ;;  %v26942_v46 = vpop.permute.xlu1 %26941  ;;  %s33182_s19 = scalar_lea.vmem %s33828_s0, %s27856_s29  ;;  %vm27384_vm13 = vcmask 850944  }
 0x97d   : > { %26852 = vmatprep.subr.mxu1 %v26627_v15  ;;  %26971 = vmatpush1.msra.mxu0 %v26951_v36  ;;  %v26954_v43 = vsel %vm33819_vm7, %v26940_v19, %v26942_v46 }
 0x97e   : > { %27034 = vmatprep.mubr.f32.mxu0 %v29569_v7 }
 0x97f   : > { %27844 = vmatmul.mubr.msk.f32.vlgmr.msra.gmra.mrb[8].mxu1 %vm342_vm1, %v27842_v10  ;;  %v26946_v57 = vpop.permute.xlu0 %26945  ;;  %27848 = vmatmul.mubr.msk.f32.vlgmr.msra.gmra.mrb[8].mxu0 %vm342_vm1, %v27847_v49 }
 0x980   : > { %26853 = vmatpush1.msra.mxu1 %v26626_v59  ;;  %26916 = vmatprep.mubr.f32.mxu1 %v29569_v7  ;;  %v26944_v37 = vpop.permute.xlu1 %26943 }
 0x981   : > { %27041 = vmatprep.subr.mxu1 %v26954_v43  ;;  %v26956_v63 = vsel %vm33821_vm10, %v26944_v37, %v26946_v57  ;;  %27176 = vmatprep.mubr.f32.mxu0 %v29569_v7  ;;  %v26955_v29 = vsel %vm33822_vm15, %v26942_v46, %v26944_v37 }
 0x982   : > { %27112 = vmatprep.subr.mxu0 %v26956_v63 }
 0x983   : > { %27846 = vmatmul.mubr.msk.f32.vlgmr.msra.gmra.mrb[10].mxu1 %vm342_vm1, %v27842_v10  ;;  %27113 = vmatpush1.msra.mxu0 %v26955_v29 }
 0x984   : > { %27042 = vmatpush1.msra.mxu1 %v26953_v28  ;;  %27105 = vmatprep.mubr.f32.mxu1 %v29569_v7 }
 0x985   : > { %v26950_v60 = vpop.permute.xlu0 %26949  ;;  %27850 = vmatmul.mubr.msk.f32.vlgmr.msra.gmra.mrb[10].mxu0 %vm342_vm1, %v27847_v49 }
 0x986   : > { %v26948_v56 = vpop.permute.xlu1 %26947 }
 0x987   : > { %27849 = vmatmul.mubr.msk.f32.vlgmr.msra.gmra.mrb[8].mxu1 %vm342_vm1, %v27847_v49  ;;  %v26957_v20 = vsel %vm33824_vm2, %v26946_v57, %v26948_v56  ;;  %v26958_v48 = vsel %vm33825_vm8, %v26948_v56, %v26950_v60 }
 0x988   : > { %27183 = vmatprep.subr.mxu1 %v26958_v48  ;;  %27247 = vmatprep.mubr.f32.mxu1 %v29569_v7 }
 0x989   : > { %27184 = vmatpush1.msra.mxu1 %v26957_v20 }
 0x98b   : > { %27851 = vmatmul.mubr.msk.f32.vlgmr.msra.gmra.mrb[10].mxu1 %vm342_vm1, %v27847_v49  ;;  %vm33827_vm1 = vcmask 138240  }
 0x98c   : > { %vm33829_vm3 = vmmov %vm33827_vm1 }
 0x98d   : > { %vm33830_vm4 = vmmov %vm33827_vm1 }
 0x98e   : > { %vm33831_vm5 = vmmov %vm33827_vm1 }
 0x98f   : > { %vm33832_vm6 = vmmov %vm33827_vm1 }
 0x990   : > { %vm33833_vm9 = vmmov %vm33827_vm1 }
 0x991   : > { %vm33834_vm14 = vmmov %vm33827_vm1 }
 0x992   : > { %vm33835_vm11 = vmmov %vm33827_vm1 }
 0x996   : > { %v27306_v26 = vpop.permute.xlu0 %27305 }
 0x997   : > { %v27290_v11 = vpop.permute.xlu1 %27289 }
 0x998   : > { %v27293_v30 = vmul.f32 %v27290_v11, %v27278_v31  ;;  %v27292_v47 = vmul.f32 %v27290_v11, %v27277_v54  ;;  %v27295_v1 = vmul.f32 %v27290_v11, %v27280_v55  ;;  %v27294_v38 = vmul.f32 %v27290_v11, %v27279_v53 }
 0x999   : > { %v27297_v7 = vmul.f32 %v27290_v11, %v27282_v50  ;;  %v27296_v33 = vmul.f32 %v27290_v11, %v27281_v34  ;;  %v27299_v52 = vmul.f32 %v27290_v11, %v27284_v25  ;;  %v27298_v0 = vmul.f32 %v27290_v11, %v27283_v61 }
 0x99a   : > { %v27309_v18 = vadd.f32 %v27306_v26, %v27293_v30  ;;  %v27308_v51 = vadd.f32 %v27306_v26, %v27292_v47  ;;  %v27311_v62 = vadd.f32 %v27306_v26, %v27295_v1  ;;  %v27310_v13 = vadd.f32 %v27306_v26, %v27294_v38 }
 0x99b   : > { %v27313_v22 = vadd.f32 %v27306_v26, %v27297_v7  ;;  %v27312_v35 = vadd.f32 %v27306_v26, %v27296_v33  ;;  %v27315_v40 = vadd.f32 %v27306_v26, %v27299_v52  ;;  %v27314_v17 = vadd.f32 %v27306_v26, %v27298_v0 }
 0x99c   : > { %v27318_v6 = vmax.f32 %v27309_v18, 0.0  ;;  %v27317_v3 = vmax.f32 %v27308_v51, 0.0  ;;  %v27320_v8 = vmax.f32 %v27311_v62, 0.0  ;;  %v27319_v16 = vmax.f32 %v27310_v13, 0.0 }
 0x99d   : > { %v27322_v24 = vmax.f32 %v27313_v22, 0.0  ;;  %v27321_v41 = vmax.f32 %v27312_v35, 0.0  ;;  %v27300_v27 = vmul.f32 %v27290_v11, %v27285_v42  ;;  %v27324_v44 = vmax.f32 %v27315_v40, 0.0 }
 0x99e   : > { %27337 = vrot.lane.b32.xlu1 %v27318_v6, %s33552_s16  ;;  %27335 = vrot.lane.b32.xlu0 %v27317_v3, %s33552_s16  ;;  %v27323_v23 = vmax.f32 %v27314_v17, 0.0 }
 0x99f   : > { %v27316_v39 = vadd.f32 %v27306_v26, %v27300_v27 }
 0x9a1   : > { %v27325_v32 = vmax.f32 %v27316_v39, 0.0 }
 0x9a2   : > { %27341 = vrot.lane.b32.xlu1 %v27320_v8, %s33552_s16  ;;  %27339 = vrot.lane.b32.xlu0 %v27319_v16, %s33552_s16 }
 0x9a6   : > { %27345 = vrot.lane.b32.xlu1 %v27322_v24, %s33552_s16  ;;  %27343 = vrot.lane.b32.xlu0 %v27321_v41, %s33552_s16  ;;  %v27267_v10 = vpop.permute.xlu1 %27266 }
 0x9aa   : > { %27349 = vrot.lane.b32.xlu1 %v27324_v44, %s33552_s16  ;;  %27347 = vrot.lane.b32.xlu0 %v27323_v23, %s33552_s16 }
 0x9ae   : > { %27351 = vrot.lane.b32.xlu0 %v27325_v32, %s33552_s16 }
 0xa10   : > { %v27336_v58 = vpop.permute.xlu0 %27335  ;;  %v27338_v19 = vpop.permute.xlu1 %27337 }
 0xa11   : > { %v27353_v45 = vsel %vm33827_vm1, %v27336_v58, %v27338_v19 }
 0xa14   : > { %v27340_v9 = vpop.permute.xlu0 %27339  ;;  %v27342_v14 = vpop.permute.xlu1 %27341 }
 0xa15   : > { %v27354_v15 = vsel %vm33829_vm3, %v27338_v19, %v27340_v9  ;;  %v27355_v31 = vsel %vm33832_vm6, %v27340_v9, %v27342_v14 }
 0xa18   : > { %v27344_v21 = vpop.permute.xlu0 %27343  ;;  %v27346_v49 = vpop.permute.xlu1 %27345 }
 0xa19   : > { %v27357_v63 = vsel %vm33830_vm4, %v27344_v21, %v27346_v49  ;;  %v27356_v53 = vsel %vm33833_vm9, %v27342_v14, %v27344_v21 }
 0xa1c   : > { %v27348_v43 = vpop.permute.xlu0 %27347  ;;  %v27350_v11 = vpop.permute.xlu1 %27349 }
 0xa1d   : > { %v27358_v60 = vsel %vm33831_vm5, %v27346_v49, %v27348_v43  ;;  %v27359_v26 = vsel %vm33834_vm14, %v27348_v43, %v27350_v11 }
 0xa20   : > { %v27352_v47 = vpop.permute.xlu0 %27351 }
 0xa21   : > { %v27360_v51 = vsel %vm33835_vm11, %v27350_v11, %v27352_v47 }
 0xa52   : > { %v27036_v2 = vpop.f32.mrb[8].mxu0 }
 0xa53   : > { %v27269_v12 = vadd.f32 %v27267_v10, %v27036_v2  ;;  %v27038_v4 = vpop.f32.mrb[9].mxu0 }
 0xa54   : > { %v27270_v5 = vadd.f32 %v27267_v10, %v27038_v4 }
 0xa55   : > { %v27369_v36 = vadd.f32 %v27353_v45, %v27269_v12 }
 0xa56   : > { %v27370_v46 = vadd.f32 %v27354_v15, %v27270_v5 }
 0xa57   : > { %27377 = vst [vmem:[%s33182_s19] sm:$0xff] %v27369_v36 }
 0xa58   : > { %27378 = vst [vmem:[%s33182_s19 + $0x8] sm:$0xff] %v27370_v46  ;;  %v27178_v59 = vpop.f32.mrb[10].mxu0 }
 0xa59   : > { %v27273_v57 = vadd.f32 %v27267_v10, %v27178_v59  ;;  %v27180_v37 = vpop.f32.mrb[11].mxu0 }
 0xa5a   : > { %v27107_v29 = vpop.f32.mrb[8].mxu1  ;;  %v27274_v28 = vadd.f32 %v27267_v10, %v27180_v37 }
 0xa5b   : > { %v27271_v56 = vadd.f32 %v27267_v10, %v27107_v29  ;;  %v27109_v20 = vpop.f32.mrb[9].mxu1  ;;  %v27373_v48 = vadd.f32 %v27357_v63, %v27273_v57 }
 0xa5c   : > { %v27272_v54 = vadd.f32 %v27267_v10, %v27109_v20  ;;  %v27374_v55 = vadd.f32 %v27358_v60, %v27274_v28 }
 0xa5d   : > { %v27371_v30 = vadd.f32 %v27355_v31, %v27271_v56  ;;  %27381 = vst [vmem:[%s33182_s19 + $0x20] sm:$0xff] %v27373_v48 }
 0xa5e   : > { %v27372_v1 = vadd.f32 %v27356_v53, %v27272_v54  ;;  %v27249_v38 = vpop.f32.mrb[10].mxu1  ;;  %27382 = vst [vmem:[%s33182_s19 + $0x28] sm:$0xff] %v27374_v55 }
 0xa5f   : > { %27379 = vst [vmem:[%s33182_s19 + $0x10] sm:$0xff] %v27371_v30  ;;  %v27275_v50 = vadd.f32 %v27267_v10, %v27249_v38  ;;  %v27251_v34 = vpop.f32.mrb[11].mxu1 }
 0xa60   : > { %27380 = vst [vmem:[%s33182_s19 + $0x18] sm:$0xff] %v27372_v1  ;;  %v27276_v18 = vadd.f32 %v27267_v10, %v27251_v34 }
 0xa61   : > { %v27375_v7 = vadd.f32 %v27359_v26, %v27275_v50 }
 0xa62   : > { %v27376_v33 = vadd.f32 %v27360_v51, %v27276_v18 }
 0xa63   : > { %27383 = vst [vmem:[%s33182_s19 + $0x30] sm:$0xff] %v27375_v7 }
 0xa64   : > { %27385 = vst.msk [vmem:[%s33182_s19 + $0x38] sm:$0xff] %vm27384_vm13, %v27376_v33 }
 0xa65 PF: > { %s33836_s16 = sld [smem:[#allocation3_spill]] }
 0xa6b   : > { %s17_s24 = sadd.s32 1, %s33836_s16  }
 0xa6c   : > { %p14_p4 = scmp.ge.s32.totalorder %s17_s24, 4  }
 0xa6e   :  { %16 = sbr.rel (!%p14_p4) target bundleno = 6 (0x6), region = 159 }

</bundles_post_ra>
